<compile_context>
chip_gen: v6e
topology: v6e:2x2x1
jax: 0.10.0
libtpu: 0.0.40
codegen_flags: <defaults>
</compile_context>

<pallas_src>
import functools
from math import ceil

import jax
import jax.numpy as jnp
from jax.experimental import pallas as pl
from jax.experimental.pallas import tpu as pltpu

BN_EPS = 1e-3
_MAX_TILE_ROWS = 1024                   # cap on per-tile M (= bho * Wo) of the matmul
_VMEM_LIMIT_BYTES = 48 * 1024 * 1024    # stay under v7x's 64 MiB physical VMEM


# --------------------------------------------------------------------------
# Padding helper (identical to the PyTorch reference)
# --------------------------------------------------------------------------
def calc_padding(in_size, kernel_size, stride):
    if in_size[0] % stride[0] == 0:
        pad_along_height = max(kernel_size[0] - stride[0], 0)
    else:
        pad_along_height = max(kernel_size[0] - in_size[0] % stride[0], 0)
    if in_size[1] % stride[1] == 0:
        pad_along_width = max(kernel_size[1] - stride[1], 0)
    else:
        pad_along_width = max(kernel_size[1] - in_size[1] % stride[1], 0)
    pad_top = pad_along_height // 2
    pad_bottom = pad_along_height - pad_top
    pad_left = pad_along_width // 2
    pad_right = pad_along_width - pad_left
    return [pad_left, pad_right, pad_top, pad_bottom]


def rep_pad(x, left, right, top, bottom):
    # nn.ReplicationPad2d((left, right, top, bottom)) on NHWC.
    return jnp.pad(x, ((0, 0), (top, bottom), (left, right), (0, 0)), mode="edge")


# --------------------------------------------------------------------------
# Fused conv (+ folded-BN shift) (+ ReLU) Pallas kernel.  NHWC, in-kernel taps.
# --------------------------------------------------------------------------
def _conv_bn_relu_kernel(x_ref, w_ref, shift_ref, o_ref, *,
                         kh, kw, sh, sw, bho, wo, cin, apply_relu):
    # x_ref     : (1, Hp, Wp, Cin)    replication-padded image, VMEM-resident
    # w_ref     : (kh*kw, Cin, Cout)  bf16, BN scale already folded in
    # shift_ref : (1, Cout)           f32 BN shift
    # o_ref     : (1, bho*wo, Cout)   f32 output tile (bho output rows)
    t = pl.program_id(1)
    row0 = t * (bho * sh)               # first input row touched by this tile
    m = bho * wo
    cout = o_ref.shape[-1]
    acc = jnp.zeros((m, cout), jnp.float32)
    for i in range(kh):                 # small static tap loop (unrolled)
        for j in range(kw):
            row_ix = pl.ds(row0 + i, bho) if sh == 1 else pl.ds(row0 + i, bho, sh)
            col_ix = pl.ds(j, wo) if sw == 1 else pl.ds(j, wo, sw)
            v = x_ref[0, row_ix, col_ix, :]                      # (bho, wo, cin)
            xt = v.reshape(m, cin).astype(jnp.bfloat16)
            acc = acc + jnp.dot(xt, w_ref[i * kw + j],
                                preferred_element_type=jnp.float32)
    y = acc + shift_ref[...]            # folded-BN shift (f32 epilogue)
    if apply_relu:
        y = jnp.maximum(y, 0.0)
    o_ref[...] = y.reshape(1, m, cout).astype(o_ref.dtype)


def _pick_row_tile(ho, wo):
    # Largest divisor of ho whose tile (bho*wo rows of M) stays under the cap
    # and keeps the second-minor block dim 8-aligned; falls back to the full
    # height (always a legal block).
    if ho * wo <= _MAX_TILE_ROWS:
        return ho
    for d in range(ho - 1, 0, -1):
        if ho % d == 0 and d * wo <= _MAX_TILE_ROWS and (d * wo) % 8 == 0:
            return d
    return ho


def conv_bn_relu(x, p, stride=(1, 1), apply_relu=True):
    """x: NHWC float32, already replication-padded.  Returns NHWC float32."""
    w, shift = p["w"], p["shift"]
    kh, kw = p["k"]
    sh, sw = stride
    n, hp, wp, cin = x.shape
    cout = w.shape[-1]
    ho = (hp - kh) // sh + 1
    wo = (wp - kw) // sw + 1
    bho = _pick_row_tile(ho, wo)
    grid = (n, ho // bho)
    kernel = functools.partial(_conv_bn_relu_kernel, kh=kh, kw=kw, sh=sh, sw=sw,
                               bho=bho, wo=wo, cin=cin, apply_relu=apply_relu)
    # TODO(synk): for very large feature maps the whole padded image is kept
    # VMEM-resident per batch element; an H-tiled variant with manual halo DMA
    # would be needed beyond that scale.
    out = pl.pallas_call(
        kernel,
        out_shape=jax.ShapeDtypeStruct((n, ho * wo, cout), jnp.float32),
        grid=grid,
        in_specs=[
            pl.BlockSpec((1, hp, wp, cin), lambda b, t: (b, 0, 0, 0)),
            pl.BlockSpec((kh * kw, cin, cout), lambda b, t: (0, 0, 0)),
            pl.BlockSpec((1, cout), lambda b, t: (0, 0)),
        ],
        out_specs=pl.BlockSpec((1, bho * wo, cout), lambda b, t: (b, t, 0)),
        compiler_params=pltpu.CompilerParams(
            dimension_semantics=("parallel", "parallel"),
            vmem_limit_bytes=_VMEM_LIMIT_BYTES),
    )(x, w, shift)
    return out.reshape(n, ho, wo, cout)


# --------------------------------------------------------------------------
# BasicConv2d (= Conv2d(bias=False) + BN(eps=1e-3, eval) + ReLU), folded params
# --------------------------------------------------------------------------
def init_basic_conv(key, cin, cout, kh, kw, avg_pool_k=None):
    k1, k2, k3, k4, k5 = jax.random.split(key, 5)
    w = 0.1 * jax.random.normal(k1, (cout, cin, kh, kw), jnp.float32)
    gamma = 1.0 + 0.1 * jax.random.normal(k2, (cout,), jnp.float32)
    beta = 0.1 * jax.random.normal(k3, (cout,), jnp.float32)
    running_mean = 0.1 * jax.random.normal(k4, (cout,), jnp.float32)
    running_var = 1.0 + 0.1 * jnp.abs(jax.random.normal(k5, (cout,), jnp.float32))
    scale = gamma / jnp.sqrt(running_var + BN_EPS)
    shift = beta - running_mean * scale
    # Fold the BN scale into the conv weights:  y = P @ (W * s) + shift.
    w = w * scale[:, None, None, None]
    # (Cout, Cin, kh, kw) -> (kh*kw, Cin, Cout) tap-major layout used in-kernel.
    wk = jnp.transpose(w, (2, 3, 1, 0)).reshape(kh * kw, cin, cout)
    if avg_pool_k is not None:
        # Fold a preceding avg_pool2d(kernel=avg_pool_k) into this 1x1 conv:
        # conv1x1(avgpool(x)) == conv_{p_k}(x) with tiled weights / (ph*pw).
        ph, pw = avg_pool_k
        wk = jnp.tile(wk, (ph * pw, 1, 1)) / float(ph * pw)
        k = (ph, pw)
    else:
        k = (kh, kw)
    return {"w": wk.astype(jnp.bfloat16),
            "shift": shift.reshape(1, cout).astype(jnp.float32),
            "k": k}


def _fused_1x1_stem(x, params):
    """Run several 1x1 stride-1 BasicConv2d's sharing the same input as a single
    lane-denser matmul (weights concatenated along Cout); split afterwards."""
    if len(params) == 1:
        return [conv_bn_relu(x, params[0], (1, 1), True)]
    fused = {"w": jnp.concatenate([p["w"] for p in params], axis=-1),
             "shift": jnp.concatenate([p["shift"] for p in params], axis=-1),
             "k": (1, 1)}
    y = conv_bn_relu(x, fused, (1, 1), True)
    outs, off = [], 0
    for p in params:
        c = p["shift"].shape[-1]
        outs.append(y[..., off:off + c])
        off += c
    return outs


# --------------------------------------------------------------------------
# Inception branch variants
# --------------------------------------------------------------------------
def init_fact1(key, cin, cout, kernel_size, stride, in_size):
    ks = (ceil(kernel_size[0] / 2), ceil(kernel_size[1] / 2))
    pad1 = [ks[1] // 2 - 1 + ks[1] % 2, ks[1] // 2,
            ks[0] // 2 - 1 + ks[0] % 2, ks[0] // 2]
    pad2 = calc_padding([in_size[1], in_size[2]], ks, stride)
    k1, k2, k3 = jax.random.split(key, 3)
    return {
        "branch_1": init_basic_conv(k1, cin, cout, 1, 1),
        "branch_2": init_basic_conv(k2, cout, cout, ks[0], ks[1]),
        "branch_3": init_basic_conv(k3, cout, cout, ks[0], ks[1]),
        "pad1": pad1, "pad2": pad2, "stride": tuple(stride),
    }


def fwd_fact1(x, p, b1_out=None):
    x = b1_out if b1_out is not None else conv_bn_relu(x, p["branch_1"], (1, 1), True)
    x = rep_pad(x, *p["pad1"])
    x = conv_bn_relu(x, p["branch_2"], (1, 1), True)
    x = rep_pad(x, *p["pad2"])
    return conv_bn_relu(x, p["branch_3"], p["stride"], True)


def init_fact1_split(key, cin, cout, kernel_size, stride, in_size):
    ks2 = (ceil(kernel_size[0] / 2), ceil(kernel_size[1] / 2))
    pad1 = [ks2[1] // 2 - 1 + ks2[1] % 2, ks2[1] // 2,
            ks2[0] // 2 - 1 + ks2[0] % 2, ks2[0] // 2]
    ks3a = (1, ceil(kernel_size[1] / 2))
    pad2 = calc_padding([in_size[1], in_size[2]], ks3a, stride)
    ks3b = (ceil(kernel_size[0] / 2), 1)
    pad3 = calc_padding([in_size[1], in_size[2]], ks3b, stride)
    k1, k2, k3, k4 = jax.random.split(key, 4)
    return {
        "branch_1": init_basic_conv(k1, cin, cout, 1, 1),
        "branch_2": init_basic_conv(k2, cout, cout, ks2[0], ks2[1]),
        "branch_3a": init_basic_conv(k3, cout, cout, ks3a[0], ks3a[1]),
        "branch_3b": init_basic_conv(k4, cout, cout, ks3b[0], ks3b[1]),
        "pad1": pad1, "pad2": pad2, "pad3": pad3, "stride": tuple(stride),
    }


def fwd_fact1_split(x, p, b1_out=None):
    x = b1_out if b1_out is not None else conv_bn_relu(x, p["branch_1"], (1, 1), True)
    x = rep_pad(x, *p["pad1"])
    x = conv_bn_relu(x, p["branch_2"], (1, 1), True)
    # branch_3a / branch_3b share x but use different kernels/paddings;
    # they are kept as two (small) kernel launches.
    xa = rep_pad(x, *p["pad2"])
    xa = conv_bn_relu(xa, p["branch_3a"], p["stride"], True)
    xb = rep_pad(x, *p["pad3"])
    xb = conv_bn_relu(xb, p["branch_3b"], p["stride"], True)
    return jnp.concatenate([xa, xb], axis=-1)


def init_asynch(key, cin, cout, kernel_size, stride, in_size):
    ks2 = (1, kernel_size[1])
    s2 = (1, stride[1])
    pad1 = calc_padding([in_size[1], in_size[2]], ks2, s2)
    ks3 = (kernel_size[0], 1)
    s3 = (stride[0], 1)
    pad2 = calc_padding([in_size[1], in_size[2]], ks3, s3)
    k1, k2, k3 = jax.random.split(key, 3)
    return {
        "branch_1": init_basic_conv(k1, cin, cout, 1, 1),
        "branch_2": init_basic_conv(k2, cout, cout, ks2[0], ks2[1]),
        "branch_3": init_basic_conv(k3, cout, cout, ks3[0], ks3[1]),
        "pad1": pad1, "pad2": pad2, "s2": s2, "s3": s3,
    }


def fwd_asynch(x, p, b1_out=None):
    x = b1_out if b1_out is not None else conv_bn_relu(x, p["branch_1"], (1, 1), True)
    x = rep_pad(x, *p["pad1"])
    x = conv_bn_relu(x, p["branch_2"], p["s2"], True)
    x = rep_pad(x, *p["pad2"])
    return conv_bn_relu(x, p["branch_3"], p["s3"], True)


FACT_INIT = [init_fact1, init_fact1_split, init_asynch]
FACT_FWD = [fwd_fact1, fwd_fact1_split, fwd_asynch]


# --------------------------------------------------------------------------
# Inception module
# --------------------------------------------------------------------------
def init_inception(key, in_channels, is_pooling, p_k, p_out_channels,
                   is_b1, b1_out_channels, is_b2, b2_k, b2_out_channels,
                   b2_factorization_mode, is_b3, b3_k, b3_out_channels,
                   b3_factorization_mode, stride, in_size):
    keys = jax.random.split(key, 4)
    params = {
        "stride": tuple(stride),
        "is_b1": is_b1, "is_b2": is_b2, "is_b3": is_b3, "is_pooling": is_pooling,
        "pad_b1": calc_padding([in_size[1], in_size[2]], [1, 1], stride),
        "pad_b4": calc_padding([in_size[1], in_size[2]], p_k, stride),
        "b2_mode": b2_factorization_mode, "b3_mode": b3_factorization_mode,
    }
    if is_b1:
        params["branch1_1x1"] = init_basic_conv(keys[0], in_channels, b1_out_channels, 1, 1)
    if is_b2 == 1:
        params["branch2"] = FACT_INIT[b2_factorization_mode](
            keys[1], in_channels, b2_out_channels, b2_k, stride, in_size)
    if is_b3 == 1:
        params["branch3"] = FACT_INIT[b3_factorization_mode](
            keys[2], in_channels, b3_out_channels, b3_k, stride, in_size)
    if is_pooling:
        # avg_pool2d(p_k, stride) followed by a 1x1 conv, folded into one conv.
        params["branch4"] = init_basic_conv(keys[3], in_channels, p_out_channels,
                                            1, 1, avg_pool_k=tuple(p_k))
    return params


def inception_forward(x_nchw, p):
    # Module boundary is NCHW (matches PyTorch); everything inside runs
    # channels-last so C sits on the 128-lane axis.
    x = jnp.transpose(x_nchw, (0, 2, 3, 1))
    stride = p["stride"]

    # Batch the 1x1 stride-1 convs that all consume the module input into one
    # matmul (branch1_1x1 joins only when it is stride-1; its padding is
    # always zero for a 1x1 kernel).
    stem_keys, stem_params = [], []
    if p["is_b1"] == 1 and stride == (1, 1):
        stem_keys.append("b1"); stem_params.append(p["branch1_1x1"])
    if p["is_b2"] == 1:
        stem_keys.append("b2"); stem_params.append(p["branch2"]["branch_1"])
    if p["is_b3"] == 1:
        stem_keys.append("b3"); stem_params.append(p["branch3"]["branch_1"])
    stem_out = dict(zip(stem_keys, _fused_1x1_stem(x, stem_params))) if stem_params else {}

    outputs = []
    if p["is_b1"] == 1:
        if "b1" in stem_out:
            b1 = stem_out["b1"]
        else:
            b1 = conv_bn_relu(rep_pad(x, *p["pad_b1"]), p["branch1_1x1"], stride, True)
        outputs.append(b1)
    if p["is_b2"] == 1:
        outputs.append(FACT_FWD[p["b2_mode"]](x, p["branch2"], stem_out.get("b2")))
    if p["is_b3"] == 1:
        outputs.append(FACT_FWD[p["b3_mode"]](x, p["branch3"], stem_out.get("b3")))
    if p["is_pooling"] == 1:
        b4 = conv_bn_relu(rep_pad(x, *p["pad_b4"]), p["branch4"], stride, True)
        outputs.append(b4)
    y = jnp.concatenate(outputs, axis=-1)
    return jnp.transpose(y, (0, 3, 1, 2))


# --------------------------------------------------------------------------
if __name__ == "__main__":
    key = jax.random.PRNGKey(0)
    kx, kp = jax.random.split(key)

    # x in NCHW, small shapes: batch=2, channels=4, spatial=16x16
    x = jax.random.normal(kx, (2, 4, 16, 16), jnp.float32)

    params = init_inception(
        kp,
        in_channels=4,
        is_pooling=1, p_k=(3, 3), p_out_channels=4,
        is_b1=1, b1_out_channels=4,
        is_b2=1, b2_k=(3, 3), b2_out_channels=4, b2_factorization_mode=1,
        is_b3=1, b3_k=(3, 3), b3_out_channels=4, b3_factorization_mode=2,
        stride=(1, 1), in_size=(4, 16, 16),
    )

    fwd = jax.jit(lambda inp: inception_forward(inp, params))
    out = jax.block_until_ready(fwd(x))

    # channels: b1(4) + b2 split(4+4) + b3 asynch(4) + pool(4) = 20
    assert out.shape == (2, 20, 16, 16), out.shape
    assert out.dtype == jnp.float32
    print("KERNEL_OK")
</pallas_src>

<mosaic_0001>
module attributes {stable_mosaic.version = 11 : i64} {
  func.func @_conv_bn_relu_kernel(%arg0: i32, %arg1: i32, %arg2: memref<1x16x16x4xf32, #tpu.memory_space<vmem>>, %arg3: memref<1x4x12xbf16, #tpu.memory_space<vmem>>, %arg4: memref<1x12xf32, #tpu.memory_space<vmem>>, %arg5: memref<1x256x12xf32, #tpu.memory_space<vmem>>) attributes {dimension_semantics = [#tpu.dimension_semantics<parallel>, #tpu.dimension_semantics<parallel>], iteration_bounds = array<i64: 2, 1>, scalar_prefetch = 0 : i64, scratch_operands = 0 : i64, tpu.core_type = #tpu.core_type<tc>, window_params = [{transform_indices = @transform_0, window_bounds = array<i64: 1, 16, 16, 4>}, {pipeline_mode = #tpu.pipeline_mode<synchronous>, transform_indices = @transform_1, window_bounds = array<i64: 1, 4, 12>}, {pipeline_mode = #tpu.pipeline_mode<synchronous>, transform_indices = @transform_2, window_bounds = array<i64: 1, 12>}, {transform_indices = @transform_3, window_bounds = array<i64: 1, 256, 12>}]} {
    %c16_i32 = arith.constant 16 : i32
    %0 = arith.muli %arg1, %c16_i32 : i32
    %cst = arith.constant 0.000000e+00 : f32
    %1 = vector.broadcast %cst : f32 to vector<256x12xf32>
    %c0_i32 = arith.constant 0 : i32
    %2 = arith.addi %0, %c0_i32 : i32
    %c0 = arith.constant 0 : index
    %3 = arith.index_cast %2 : i32 to index
    %c0_0 = arith.constant 0 : index
    %c0_1 = arith.constant 0 : index
    %4 = vector.load %arg2[%c0, %3, %c0_0, %c0_1] : memref<1x16x16x4xf32, #tpu.memory_space<vmem>>, vector<1x16x16x4xf32>
    %5 = vector.shape_cast %4 : vector<1x16x16x4xf32> to vector<16x16x4xf32>
    %6 = vector.shape_cast %5 : vector<16x16x4xf32> to vector<256x4xf32>
    %7 = arith.truncf %6 : vector<256x4xf32> to vector<256x4xbf16>
    %c0_2 = arith.constant 0 : index
    %c0_3 = arith.constant 0 : index
    %c0_4 = arith.constant 0 : index
    %8 = vector.load %arg3[%c0_2, %c0_3, %c0_4] : memref<1x4x12xbf16, #tpu.memory_space<vmem>>, vector<1x4x12xbf16>
    %9 = vector.shape_cast %8 : vector<1x4x12xbf16> to vector<4x12xbf16>
    %cst_5 = arith.constant dense<0.000000e+00> : vector<256x12xf32>
    %10 = tpu.matmul %7, %9, %cst_5 {dimension_numbers = #tpu.dot_dimension_numbers<[1], [0], [0], [1], [0, 0, 1, 1], [], []>} : vector<256x4xbf16>, vector<4x12xbf16>, vector<256x12xf32> -> vector<256x12xf32>
    %11 = arith.addf %1, %10 : vector<256x12xf32>
    %c0_6 = arith.constant 0 : index
    %c0_7 = arith.constant 0 : index
    %12 = vector.load %arg4[%c0_6, %c0_7] : memref<1x12xf32, #tpu.memory_space<vmem>>, vector<1x12xf32>
    %13 = vector.broadcast %12 : vector<1x12xf32> to vector<256x12xf32>
    %14 = arith.addf %11, %13 : vector<256x12xf32>
    %cst_8 = arith.constant 0.000000e+00 : f32
    %15 = vector.broadcast %cst_8 : f32 to vector<256x12xf32>
    %16 = arith.maximumf %14, %15 : vector<256x12xf32>
    %17 = vector.shape_cast %16 : vector<256x12xf32> to vector<1x256x12xf32>
    %c0_9 = arith.constant 0 : index
    %c0_10 = arith.constant 0 : index
    %c0_11 = arith.constant 0 : index
    %18 = vector.load %arg5[%c0_9, %c0_10, %c0_11] : memref<1x256x12xf32, #tpu.memory_space<vmem>>, vector<1x256x12xf32>
    tpu.vector_store %arg5[%c0_9, %c0_10, %c0_11], %17 {strides = array<i32>} : memref<1x256x12xf32, #tpu.memory_space<vmem>>, vector<1x256x12xf32>,
    return
  }
  func.func @transform_0(%arg0: i32, %arg1: i32) -> (i32, i32, i32, i32) {
    %c0_i32 = arith.constant 0 : i32
    %c0_i32_0 = arith.constant 0 : i32
    %c0_i32_1 = arith.constant 0 : i32
    %c0_i32_2 = arith.constant 0 : i32
    return %arg0, %c0_i32, %c0_i32_0, %c0_i32_1 : i32, i32, i32, i32
  }
  func.func @transform_1(%arg0: i32, %arg1: i32) -> (i32, i32, i32) {
    %c0_i32 = arith.constant 0 : i32
    %c0_i32_0 = arith.constant 0 : i32
    %c0_i32_1 = arith.constant 0 : i32
    %c0_i32_2 = arith.constant 0 : i32
    return %c0_i32, %c0_i32_0, %c0_i32_1 : i32, i32, i32
  }
  func.func @transform_2(%arg0: i32, %arg1: i32) -> (i32, i32) {
    %c0_i32 = arith.constant 0 : i32
    %c0_i32_0 = arith.constant 0 : i32
    %c0_i32_1 = arith.constant 0 : i32
    return %c0_i32, %c0_i32_0 : i32, i32
  }
  func.func @transform_3(%arg0: i32, %arg1: i32) -> (i32, i32, i32) {
    %c0_i32 = arith.constant 0 : i32
    %c0_i32_0 = arith.constant 0 : i32
    return %arg0, %arg1, %c0_i32 : i32, i32, i32
  }
}

module attributes {stable_mosaic.version = 11 : i64} {
  func.func @_conv_bn_relu_kernel(%arg0: i32, %arg1: i32, %arg2: memref<1x18x18x4xf32, #tpu.memory_space<vmem>>, %arg3: memref<9x4x4xbf16, #tpu.memory_space<vmem>>, %arg4: memref<1x4xf32, #tpu.memory_space<vmem>>, %arg5: memref<1x256x4xf32, #tpu.memory_space<vmem>>) attributes {dimension_semantics = [#tpu.dimension_semantics<parallel>, #tpu.dimension_semantics<parallel>], iteration_bounds = array<i64: 2, 1>, scalar_prefetch = 0 : i64, scratch_operands = 0 : i64, tpu.core_type = #tpu.core_type<tc>, window_params = [{transform_indices = @transform_0, window_bounds = array<i64: 1, 18, 18, 4>}, {pipeline_mode = #tpu.pipeline_mode<synchronous>, transform_indices = @transform_1, window_bounds = array<i64: 9, 4, 4>}, {pipeline_mode = #tpu.pipeline_mode<synchronous>, transform_indices = @transform_2, window_bounds = array<i64: 1, 4>}, {transform_indices = @transform_3, window_bounds = array<i64: 1, 256, 4>}]} {
    %c16_i32 = arith.constant 16 : i32
    %0 = arith.muli %arg1, %c16_i32 : i32
    %cst = arith.constant 0.000000e+00 : f32
    %1 = vector.broadcast %cst : f32 to vector<256x4xf32>
    %c0_i32 = arith.constant 0 : i32
    %2 = arith.addi %0, %c0_i32 : i32
    %c0 = arith.constant 0 : index
    %3 = arith.index_cast %2 : i32 to index
    %c0_0 = arith.constant 0 : index
    %c0_1 = arith.constant 0 : index
    %4 = vector.load %arg2[%c0, %3, %c0_0, %c0_1] : memref<1x18x18x4xf32, #tpu.memory_space<vmem>>, vector<1x16x16x4xf32>
    %5 = vector.shape_cast %4 : vector<1x16x16x4xf32> to vector<16x16x4xf32>
    %6 = vector.shape_cast %5 : vector<16x16x4xf32> to vector<256x4xf32>
    %7 = arith.truncf %6 : vector<256x4xf32> to vector<256x4xbf16>
    %c0_2 = arith.constant 0 : index
    %c0_3 = arith.constant 0 : index
    %c0_4 = arith.constant 0 : index
    %8 = vector.load %arg3[%c0_2, %c0_3, %c0_4] : memref<9x4x4xbf16, #tpu.memory_space<vmem>>, vector<1x4x4xbf16>
    %9 = vector.shape_cast %8 : vector<1x4x4xbf16> to vector<4x4xbf16>
    %cst_5 = arith.constant dense<0.000000e+00> : vector<256x4xf32>
    %10 = tpu.matmul %7, %9, %cst_5 {dimension_numbers = #tpu.dot_dimension_numbers<[1], [0], [0], [1], [0, 0, 1, 1], [], []>} : vector<256x4xbf16>, vector<4x4xbf16>, vector<256x4xf32> -> vector<256x4xf32>
    %11 = arith.addf %1, %10 : vector<256x4xf32>
    %c0_i32_6 = arith.constant 0 : i32
    %12 = arith.addi %0, %c0_i32_6 : i32
    %c0_7 = arith.constant 0 : index
    %13 = arith.index_cast %12 : i32 to index
    %c1 = arith.constant 1 : index
    %c0_8 = arith.constant 0 : index
    %14 = vector.load %arg2[%c0_7, %13, %c1, %c0_8] : memref<1x18x18x4xf32, #tpu.memory_space<vmem>>, vector<1x16x16x4xf32>
    %15 = vector.shape_cast %14 : vector<1x16x16x4xf32> to vector<16x16x4xf32>
    %16 = vector.shape_cast %15 : vector<16x16x4xf32> to vector<256x4xf32>
    %17 = arith.truncf %16 : vector<256x4xf32> to vector<256x4xbf16>
    %c1_9 = arith.constant 1 : index
    %c0_10 = arith.constant 0 : index
    %c0_11 = arith.constant 0 : index
    %18 = vector.load %arg3[%c1_9, %c0_10, %c0_11] : memref<9x4x4xbf16, #tpu.memory_space<vmem>>, vector<1x4x4xbf16>
    %19 = vector.shape_cast %18 : vector<1x4x4xbf16> to vector<4x4xbf16>
    %cst_12 = arith.constant dense<0.000000e+00> : vector<256x4xf32>
    %20 = tpu.matmul %17, %19, %cst_12 {dimension_numbers = #tpu.dot_dimension_numbers<[1], [0], [0], [1], [0, 0, 1, 1], [], []>} : vector<256x4xbf16>, vector<4x4xbf16>, vector<256x4xf32> -> vector<256x4xf32>
    %21 = arith.addf %11, %20 : vector<256x4xf32>
    %c0_i32_13 = arith.constant 0 : i32
    %22 = arith.addi %0, %c0_i32_13 : i32
    %c0_14 = arith.constant 0 : index
    %23 = arith.index_cast %22 : i32 to index
    %c2 = arith.constant 2 : index
    %c0_15 = arith.constant 0 : index
    %24 = vector.load %arg2[%c0_14, %23, %c2, %c0_15] : memref<1x18x18x4xf32, #tpu.memory_space<vmem>>, vector<1x16x16x4xf32>
    %25 = vector.shape_cast %24 : vector<1x16x16x4xf32> to vector<16x16x4xf32>
    %26 = vector.shape_cast %25 : vector<16x16x4xf32> to vector<256x4xf32>
    %27 = arith.truncf %26 : vector<256x4xf32> to vector<256x4xbf16>
    %c2_16 = arith.constant 2 : index
    %c0_17 = arith.constant 0 : index
    %c0_18 = arith.constant 0 : index
    %28 = vector.load %arg3[%c2_16, %c0_17, %c0_18] : memref<9x4x4xbf16, #tpu.memory_space<vmem>>, vector<1x4x4xbf16>
    %29 = vector.shape_cast %28 : vector<1x4x4xbf16> to vector<4x4xbf16>
    %cst_19 = arith.constant dense<0.000000e+00> : vector<256x4xf32>
    %30 = tpu.matmul %27, %29, %cst_19 {dimension_numbers = #tpu.dot_dimension_numbers<[1], [0], [0], [1], [0, 0, 1, 1], [], []>} : vector<256x4xbf16>, vector<4x4xbf16>, vector<256x4xf32> -> vector<256x4xf32>
    %31 = arith.addf %21, %30 : vector<256x4xf32>
    %c1_i32 = arith.constant 1 : i32
    %32 = arith.addi %0, %c1_i32 : i32
    %c0_20 = arith.constant 0 : index
    %33 = arith.index_cast %32 : i32 to index
    %c0_21 = arith.constant 0 : index
    %c0_22 = arith.constant 0 : index
    %34 = vector.load %arg2[%c0_20, %33, %c0_21, %c0_22] : memref<1x18x18x4xf32, #tpu.memory_space<vmem>>, vector<1x16x16x4xf32>
    %35 = vector.shape_cast %34 : vector<1x16x16x4xf32> to vector<16x16x4xf32>
    %36 = vector.shape_cast %35 : vector<16x16x4xf32> to vector<256x4xf32>
    %37 = arith.truncf %36 : vector<256x4xf32> to vector<256x4xbf16>
    %c3 = arith.constant 3 : index
    %c0_23 = arith.constant 0 : index
    %c0_24 = arith.constant 0 : index
    %38 = vector.load %arg3[%c3, %c0_23, %c0_24] : memref<9x4x4xbf16, #tpu.memory_space<vmem>>, vector<1x4x4xbf16>
    %39 = vector.shape_cast %38 : vector<1x4x4xbf16> to vector<4x4xbf16>
    %cst_25 = arith.constant dense<0.000000e+00> : vector<256x4xf32>
    %40 = tpu.matmul %37, %39, %cst_25 {dimension_numbers = #tpu.dot_dimension_numbers<[1], [0], [0], [1], [0, 0, 1, 1], [], []>} : vector<256x4xbf16>, vector<4x4xbf16>, vector<256x4xf32> -> vector<256x4xf32>
    %41 = arith.addf %31, %40 : vector<256x4xf32>
    %c1_i32_26 = arith.constant 1 : i32
    %42 = arith.addi %0, %c1_i32_26 : i32
    %c0_27 = arith.constant 0 : index
    %43 = arith.index_cast %42 : i32 to index
    %c1_28 = arith.constant 1 : index
    %c0_29 = arith.constant 0 : index
    %44 = vector.load %arg2[%c0_27, %43, %c1_28, %c0_29] : memref<1x18x18x4xf32, #tpu.memory_space<vmem>>, vector<1x16x16x4xf32>
    %45 = vector.shape_cast %44 : vector<1x16x16x4xf32> to vector<16x16x4xf32>
    %46 = vector.shape_cast %45 : vector<16x16x4xf32> to vector<256x4xf32>
    %47 = arith.truncf %46 : vector<256x4xf32> to vector<256x4xbf16>
    %c4 = arith.constant 4 : index
    %c0_30 = arith.constant 0 : index
    %c0_31 = arith.constant 0 : index
    %48 = vector.load %arg3[%c4, %c0_30, %c0_31] : memref<9x4x4xbf16, #tpu.memory_space<vmem>>, vector<1x4x4xbf16>
    %49 = vector.shape_cast %48 : vector<1x4x4xbf16> to vector<4x4xbf16>
    %cst_32 = arith.constant dense<0.000000e+00> : vector<256x4xf32>
    %50 = tpu.matmul %47, %49, %cst_32 {dimension_numbers = #tpu.dot_dimension_numbers<[1], [0], [0], [1], [0, 0, 1, 1], [], []>} : vector<256x4xbf16>, vector<4x4xbf16>, vector<256x4xf32> -> vector<256x4xf32>
    %51 = arith.addf %41, %50 : vector<256x4xf32>
    %c1_i32_33 = arith.constant 1 : i32
    %52 = arith.addi %0, %c1_i32_33 : i32
    %c0_34 = arith.constant 0 : index
    %53 = arith.index_cast %52 : i32 to index
    %c2_35 = arith.constant 2 : index
    %c0_36 = arith.constant 0 : index
    %54 = vector.load %arg2[%c0_34, %53, %c2_35, %c0_36] : memref<1x18x18x4xf32, #tpu.memory_space<vmem>>, vector<1x16x16x4xf32>
    %55 = vector.shape_cast %54 : vector<1x16x16x4xf32> to vector<16x16x4xf32>
    %56 = vector.shape_cast %55 : vector<16x16x4xf32> to vector<256x4xf32>
    %57 = arith.truncf %56 : vector<256x4xf32> to vector<256x4xbf16>
    %c5 = arith.constant 5 : index
    %c0_37 = arith.constant 0 : index
    %c0_38 = arith.constant 0 : index
    %58 = vector.load %arg3[%c5, %c0_37, %c0_38] : memref<9x4x4xbf16, #tpu.memory_space<vmem>>, vector<1x4x4xbf16>
    %59 = vector.shape_cast %58 : vector<1x4x4xbf16> to vector<4x4xbf16>
    %cst_39 = arith.constant dense<0.000000e+00> : vector<256x4xf32>
    %60 = tpu.matmul %57, %59, %cst_39 {dimension_numbers = #tpu.dot_dimension_numbers<[1], [0], [0], [1], [0, 0, 1, 1], [], []>} : vector<256x4xbf16>, vector<4x4xbf16>, vector<256x4xf32> -> vector<256x4xf32>
    %61 = arith.addf %51, %60 : vector<256x4xf32>
    %c2_i32 = arith.constant 2 : i32
    %62 = arith.addi %0, %c2_i32 : i32
    %c0_40 = arith.constant 0 : index
    %63 = arith.index_cast %62 : i32 to index
    %c0_41 = arith.constant 0 : index
    %c0_42 = arith.constant 0 : index
    %64 = vector.load %arg2[%c0_40, %63, %c0_41, %c0_42] : memref<1x18x18x4xf32, #tpu.memory_space<vmem>>, vector<1x16x16x4xf32>
    %65 = vector.shape_cast %64 : vector<1x16x16x4xf32> to vector<16x16x4xf32>
    %66 = vector.shape_cast %65 : vector<16x16x4xf32> to vector<256x4xf32>
    %67 = arith.truncf %66 : vector<256x4xf32> to vector<256x4xbf16>
    %c6 = arith.constant 6 : index
    %c0_43 = arith.constant 0 : index
    %c0_44 = arith.constant 0 : index
    %68 = vector.load %arg3[%c6, %c0_43, %c0_44] : memref<9x4x4xbf16, #tpu.memory_space<vmem>>, vector<1x4x4xbf16>
    %69 = vector.shape_cast %68 : vector<1x4x4xbf16> to vector<4x4xbf16>
    %cst_45 = arith.constant dense<0.000000e+00> : vector<256x4xf32>
    %70 = tpu.matmul %67, %69, %cst_45 {dimension_numbers = #tpu.dot_dimension_numbers<[1], [0], [0], [1], [0, 0, 1, 1], [], []>} : vector<256x4xbf16>, vector<4x4xbf16>, vector<256x4xf32> -> vector<256x4xf32>
    %71 = arith.addf %61, %70 : vector<256x4xf32>
    %c2_i32_46 = arith.constant 2 : i32
    %72 = arith.addi %0, %c2_i32_46 : i32
    %c0_47 = arith.constant 0 : index
    %73 = arith.index_cast %72 : i32 to index
    %c1_48 = arith.constant 1 : index
    %c0_49 = arith.constant 0 : index
    %74 = vector.load %arg2[%c0_47, %73, %c1_48, %c0_49] : memref<1x18x18x4xf32, #tpu.memory_space<vmem>>, vector<1x16x16x4xf32>
    %75 = vector.shape_cast %74 : vector<1x16x16x4xf32> to vector<16x16x4xf32>
    %76 = vector.shape_cast %75 : vector<16x16x4xf32> to vector<256x4xf32>
    %77 = arith.truncf %76 : vector<256x4xf32> to vector<256x4xbf16>
    %c7 = arith.constant 7 : index
    %c0_50 = arith.constant 0 : index
    %c0_51 = arith.constant 0 : index
    %78 = vector.load %arg3[%c7, %c0_50, %c0_51] : memref<9x4x4xbf16, #tpu.memory_space<vmem>>, vector<1x4x4xbf16>
    %79 = vector.shape_cast %78 : vector<1x4x4xbf16> to vector<4x4xbf16>
    %cst_52 = arith.constant dense<0.000000e+00> : vector<256x4xf32>
    %80 = tpu.matmul %77, %79, %cst_52 {dimension_numbers = #tpu.dot_dimension_numbers<[1], [0], [0], [1], [0, 0, 1, 1], [], []>} : vector<256x4xbf16>, vector<4x4xbf16>, vector<256x4xf32> -> vector<256x4xf32>
    %81 = arith.addf %71, %80 : vector<256x4xf32>
    %c2_i32_53 = arith.constant 2 : i32
    %82 = arith.addi %0, %c2_i32_53 : i32
    %c0_54 = arith.constant 0 : index
    %83 = arith.index_cast %82 : i32 to index
    %c2_55 = arith.constant 2 : index
    %c0_56 = arith.constant 0 : index
    %84 = vector.load %arg2[%c0_54, %83, %c2_55, %c0_56] : memref<1x18x18x4xf32, #tpu.memory_space<vmem>>, vector<1x16x16x4xf32>
    %85 = vector.shape_cast %84 : vector<1x16x16x4xf32> to vector<16x16x4xf32>
    %86 = vector.shape_cast %85 : vector<16x16x4xf32> to vector<256x4xf32>
    %87 = arith.truncf %86 : vector<256x4xf32> to vector<256x4xbf16>
    %c8 = arith.constant 8 : index
    %c0_57 = arith.constant 0 : index
    %c0_58 = arith.constant 0 : index
    %88 = vector.load %arg3[%c8, %c0_57, %c0_58] : memref<9x4x4xbf16, #tpu.memory_space<vmem>>, vector<1x4x4xbf16>
    %89 = vector.shape_cast %88 : vector<1x4x4xbf16> to vector<4x4xbf16>
    %cst_59 = arith.constant dense<0.000000e+00> : vector<256x4xf32>
    %90 = tpu.matmul %87, %89, %cst_59 {dimension_numbers = #tpu.dot_dimension_numbers<[1], [0], [0], [1], [0, 0, 1, 1], [], []>} : vector<256x4xbf16>, vector<4x4xbf16>, vector<256x4xf32> -> vector<256x4xf32>
    %91 = arith.addf %81, %90 : vector<256x4xf32>
    %c0_60 = arith.constant 0 : index
    %c0_61 = arith.constant 0 : index
    %92 = vector.load %arg4[%c0_60, %c0_61] : memref<1x4xf32, #tpu.memory_space<vmem>>, vector<1x4xf32>
    %93 = vector.broadcast %92 : vector<1x4xf32> to vector<256x4xf32>
    %94 = arith.addf %91, %93 : vector<256x4xf32>
    %cst_62 = arith.constant 0.000000e+00 : f32
    %95 = vector.broadcast %cst_62 : f32 to vector<256x4xf32>
    %96 = arith.maximumf %94, %95 : vector<256x4xf32>
    %97 = vector.shape_cast %96 : vector<256x4xf32> to vector<1x256x4xf32>
    %c0_63 = arith.constant 0 : index
    %c0_64 = arith.constant 0 : index
    %c0_65 = arith.constant 0 : index
    %98 = vector.load %arg5[%c0_63, %c0_64, %c0_65] : memref<1x256x4xf32, #tpu.memory_space<vmem>>, vector<1x256x4xf32>
    tpu.vector_store %arg5[%c0_63, %c0_64, %c0_65], %97 {strides = array<i32>} : memref<1x256x4xf32, #tpu.memory_space<vmem>>, vector<1x256x4xf32>,
    return
  }
  func.func @transform_0(%arg0: i32, %arg1: i32) -> (i32, i32, i32, i32) {
    %c0_i32 = arith.constant 0 : i32
    %c0_i32_0 = arith.constant 0 : i32
    %c0_i32_1 = arith.constant 0 : i32
    %c0_i32_2 = arith.constant 0 : i32
    return %arg0, %c0_i32, %c0_i32_0, %c0_i32_1 : i32, i32, i32, i32
  }
  func.func @transform_1(%arg0: i32, %arg1: i32) -> (i32, i32, i32) {
    %c0_i32 = arith.constant 0 : i32
    %c0_i32_0 = arith.constant 0 : i32
    %c0_i32_1 = arith.constant 0 : i32
    %c0_i32_2 = arith.constant 0 : i32
    return %c0_i32, %c0_i32_0, %c0_i32_1 : i32, i32, i32
  }
  func.func @transform_2(%arg0: i32, %arg1: i32) -> (i32, i32) {
    %c0_i32 = arith.constant 0 : i32
    %c0_i32_0 = arith.constant 0 : i32
    %c0_i32_1 = arith.constant 0 : i32
    return %c0_i32, %c0_i32_0 : i32, i32
  }
  func.func @transform_3(%arg0: i32, %arg1: i32) -> (i32, i32, i32) {
    %c0_i32 = arith.constant 0 : i32
    %c0_i32_0 = arith.constant 0 : i32
    return %arg0, %arg1, %c0_i32 : i32, i32, i32
  }
}

module attributes {stable_mosaic.version = 11 : i64} {
  func.func @_conv_bn_relu_kernel(%arg0: i32, %arg1: i32, %arg2: memref<1x17x17x4xf32, #tpu.memory_space<vmem>>, %arg3: memref<4x4x4xbf16, #tpu.memory_space<vmem>>, %arg4: memref<1x4xf32, #tpu.memory_space<vmem>>, %arg5: memref<1x256x4xf32, #tpu.memory_space<vmem>>) attributes {dimension_semantics = [#tpu.dimension_semantics<parallel>, #tpu.dimension_semantics<parallel>], iteration_bounds = array<i64: 2, 1>, scalar_prefetch = 0 : i64, scratch_operands = 0 : i64, tpu.core_type = #tpu.core_type<tc>, window_params = [{transform_indices = @transform_0, window_bounds = array<i64: 1, 17, 17, 4>}, {pipeline_mode = #tpu.pipeline_mode<synchronous>, transform_indices = @transform_1, window_bounds = array<i64: 4, 4, 4>}, {pipeline_mode = #tpu.pipeline_mode<synchronous>, transform_indices = @transform_2, window_bounds = array<i64: 1, 4>}, {transform_indices = @transform_3, window_bounds = array<i64: 1, 256, 4>}]} {
    %c16_i32 = arith.constant 16 : i32
    %0 = arith.muli %arg1, %c16_i32 : i32
    %cst = arith.constant 0.000000e+00 : f32
    %1 = vector.broadcast %cst : f32 to vector<256x4xf32>
    %c0_i32 = arith.constant 0 : i32
    %2 = arith.addi %0, %c0_i32 : i32
    %c0 = arith.constant 0 : index
    %3 = arith.index_cast %2 : i32 to index
    %c0_0 = arith.constant 0 : index
    %c0_1 = arith.constant 0 : index
    %4 = vector.load %arg2[%c0, %3, %c0_0, %c0_1] : memref<1x17x17x4xf32, #tpu.memory_space<vmem>>, vector<1x16x16x4xf32>
    %5 = vector.shape_cast %4 : vector<1x16x16x4xf32> to vector<16x16x4xf32>
    %6 = vector.shape_cast %5 : vector<16x16x4xf32> to vector<256x4xf32>
    %7 = arith.truncf %6 : vector<256x4xf32> to vector<256x4xbf16>
    %c0_2 = arith.constant 0 : index
    %c0_3 = arith.constant 0 : index
    %c0_4 = arith.constant 0 : index
    %8 = vector.load %arg3[%c0_2, %c0_3, %c0_4] : memref<4x4x4xbf16, #tpu.memory_space<vmem>>, vector<1x4x4xbf16>
    %9 = vector.shape_cast %8 : vector<1x4x4xbf16> to vector<4x4xbf16>
    %cst_5 = arith.constant dense<0.000000e+00> : vector<256x4xf32>
    %10 = tpu.matmul %7, %9, %cst_5 {dimension_numbers = #tpu.dot_dimension_numbers<[1], [0], [0], [1], [0, 0, 1, 1], [], []>} : vector<256x4xbf16>, vector<4x4xbf16>, vector<256x4xf32> -> vector<256x4xf32>
    %11 = arith.addf %1, %10 : vector<256x4xf32>
    %c0_i32_6 = arith.constant 0 : i32
    %12 = arith.addi %0, %c0_i32_6 : i32
    %c0_7 = arith.constant 0 : index
    %13 = arith.index_cast %12 : i32 to index
    %c1 = arith.constant 1 : index
    %c0_8 = arith.constant 0 : index
    %14 = vector.load %arg2[%c0_7, %13, %c1, %c0_8] : memref<1x17x17x4xf32, #tpu.memory_space<vmem>>, vector<1x16x16x4xf32>
    %15 = vector.shape_cast %14 : vector<1x16x16x4xf32> to vector<16x16x4xf32>
    %16 = vector.shape_cast %15 : vector<16x16x4xf32> to vector<256x4xf32>
    %17 = arith.truncf %16 : vector<256x4xf32> to vector<256x4xbf16>
    %c1_9 = arith.constant 1 : index
    %c0_10 = arith.constant 0 : index
    %c0_11 = arith.constant 0 : index
    %18 = vector.load %arg3[%c1_9, %c0_10, %c0_11] : memref<4x4x4xbf16, #tpu.memory_space<vmem>>, vector<1x4x4xbf16>
    %19 = vector.shape_cast %18 : vector<1x4x4xbf16> to vector<4x4xbf16>
    %cst_12 = arith.constant dense<0.000000e+00> : vector<256x4xf32>
    %20 = tpu.matmul %17, %19, %cst_12 {dimension_numbers = #tpu.dot_dimension_numbers<[1], [0], [0], [1], [0, 0, 1, 1], [], []>} : vector<256x4xbf16>, vector<4x4xbf16>, vector<256x4xf32> -> vector<256x4xf32>
    %21 = arith.addf %11, %20 : vector<256x4xf32>
    %c1_i32 = arith.constant 1 : i32
    %22 = arith.addi %0, %c1_i32 : i32
    %c0_13 = arith.constant 0 : index
    %23 = arith.index_cast %22 : i32 to index
    %c0_14 = arith.constant 0 : index
    %c0_15 = arith.constant 0 : index
    %24 = vector.load %arg2[%c0_13, %23, %c0_14, %c0_15] : memref<1x17x17x4xf32, #tpu.memory_space<vmem>>, vector<1x16x16x4xf32>
    %25 = vector.shape_cast %24 : vector<1x16x16x4xf32> to vector<16x16x4xf32>
    %26 = vector.shape_cast %25 : vector<16x16x4xf32> to vector<256x4xf32>
    %27 = arith.truncf %26 : vector<256x4xf32> to vector<256x4xbf16>
    %c2 = arith.constant 2 : index
    %c0_16 = arith.constant 0 : index
    %c0_17 = arith.constant 0 : index
    %28 = vector.load %arg3[%c2, %c0_16, %c0_17] : memref<4x4x4xbf16, #tpu.memory_space<vmem>>, vector<1x4x4xbf16>
    %29 = vector.shape_cast %28 : vector<1x4x4xbf16> to vector<4x4xbf16>
    %cst_18 = arith.constant dense<0.000000e+00> : vector<256x4xf32>
    %30 = tpu.matmul %27, %29, %cst_18 {dimension_numbers = #tpu.dot_dimension_numbers<[1], [0], [0], [1], [0, 0, 1, 1], [], []>} : vector<256x4xbf16>, vector<4x4xbf16>, vector<256x4xf32> -> vector<256x4xf32>
    %31 = arith.addf %21, %30 : vector<256x4xf32>
    %c1_i32_19 = arith.constant 1 : i32
    %32 = arith.addi %0, %c1_i32_19 : i32
    %c0_20 = arith.constant 0 : index
    %33 = arith.index_cast %32 : i32 to index
    %c1_21 = arith.constant 1 : index
    %c0_22 = arith.constant 0 : index
    %34 = vector.load %arg2[%c0_20, %33, %c1_21, %c0_22] : memref<1x17x17x4xf32, #tpu.memory_space<vmem>>, vector<1x16x16x4xf32>
    %35 = vector.shape_cast %34 : vector<1x16x16x4xf32> to vector<16x16x4xf32>
    %36 = vector.shape_cast %35 : vector<16x16x4xf32> to vector<256x4xf32>
    %37 = arith.truncf %36 : vector<256x4xf32> to vector<256x4xbf16>
    %c3 = arith.constant 3 : index
    %c0_23 = arith.constant 0 : index
    %c0_24 = arith.constant 0 : index
    %38 = vector.load %arg3[%c3, %c0_23, %c0_24] : memref<4x4x4xbf16, #tpu.memory_space<vmem>>, vector<1x4x4xbf16>
    %39 = vector.shape_cast %38 : vector<1x4x4xbf16> to vector<4x4xbf16>
    %cst_25 = arith.constant dense<0.000000e+00> : vector<256x4xf32>
    %40 = tpu.matmul %37, %39, %cst_25 {dimension_numbers = #tpu.dot_dimension_numbers<[1], [0], [0], [1], [0, 0, 1, 1], [], []>} : vector<256x4xbf16>, vector<4x4xbf16>, vector<256x4xf32> -> vector<256x4xf32>
    %41 = arith.addf %31, %40 : vector<256x4xf32>
    %c0_26 = arith.constant 0 : index
    %c0_27 = arith.constant 0 : index
    %42 = vector.load %arg4[%c0_26, %c0_27] : memref<1x4xf32, #tpu.memory_space<vmem>>, vector<1x4xf32>
    %43 = vector.broadcast %42 : vector<1x4xf32> to vector<256x4xf32>
    %44 = arith.addf %41, %43 : vector<256x4xf32>
    %cst_28 = arith.constant 0.000000e+00 : f32
    %45 = vector.broadcast %cst_28 : f32 to vector<256x4xf32>
    %46 = arith.maximumf %44, %45 : vector<256x4xf32>
    %47 = vector.shape_cast %46 : vector<256x4xf32> to vector<1x256x4xf32>
    %c0_29 = arith.constant 0 : index
    %c0_30 = arith.constant 0 : index
    %c0_31 = arith.constant 0 : index
    %48 = vector.load %arg5[%c0_29, %c0_30, %c0_31] : memref<1x256x4xf32, #tpu.memory_space<vmem>>, vector<1x256x4xf32>
    tpu.vector_store %arg5[%c0_29, %c0_30, %c0_31], %47 {strides = array<i32>} : memref<1x256x4xf32, #tpu.memory_space<vmem>>, vector<1x256x4xf32>,
    return
  }
  func.func @transform_0(%arg0: i32, %arg1: i32) -> (i32, i32, i32, i32) {
    %c0_i32 = arith.constant 0 : i32
    %c0_i32_0 = arith.constant 0 : i32
    %c0_i32_1 = arith.constant 0 : i32
    %c0_i32_2 = arith.constant 0 : i32
    return %arg0, %c0_i32, %c0_i32_0, %c0_i32_1 : i32, i32, i32, i32
  }
  func.func @transform_1(%arg0: i32, %arg1: i32) -> (i32, i32, i32) {
    %c0_i32 = arith.constant 0 : i32
    %c0_i32_0 = arith.constant 0 : i32
    %c0_i32_1 = arith.constant 0 : i32
    %c0_i32_2 = arith.constant 0 : i32
    return %c0_i32, %c0_i32_0, %c0_i32_1 : i32, i32, i32
  }
  func.func @transform_2(%arg0: i32, %arg1: i32) -> (i32, i32) {
    %c0_i32 = arith.constant 0 : i32
    %c0_i32_0 = arith.constant 0 : i32
    %c0_i32_1 = arith.constant 0 : i32
    return %c0_i32, %c0_i32_0 : i32, i32
  }
  func.func @transform_3(%arg0: i32, %arg1: i32) -> (i32, i32, i32) {
    %c0_i32 = arith.constant 0 : i32
    %c0_i32_0 = arith.constant 0 : i32
    return %arg0, %arg1, %c0_i32 : i32, i32, i32
  }
}

module attributes {stable_mosaic.version = 11 : i64} {
  func.func @_conv_bn_relu_kernel(%arg0: i32, %arg1: i32, %arg2: memref<1x17x16x4xf32, #tpu.memory_space<vmem>>, %arg3: memref<2x4x4xbf16, #tpu.memory_space<vmem>>, %arg4: memref<1x4xf32, #tpu.memory_space<vmem>>, %arg5: memref<1x256x4xf32, #tpu.memory_space<vmem>>) attributes {dimension_semantics = [#tpu.dimension_semantics<parallel>, #tpu.dimension_semantics<parallel>], iteration_bounds = array<i64: 2, 1>, scalar_prefetch = 0 : i64, scratch_operands = 0 : i64, tpu.core_type = #tpu.core_type<tc>, window_params = [{transform_indices = @transform_0, window_bounds = array<i64: 1, 17, 16, 4>}, {pipeline_mode = #tpu.pipeline_mode<synchronous>, transform_indices = @transform_1, window_bounds = array<i64: 2, 4, 4>}, {pipeline_mode = #tpu.pipeline_mode<synchronous>, transform_indices = @transform_2, window_bounds = array<i64: 1, 4>}, {transform_indices = @transform_3, window_bounds = array<i64: 1, 256, 4>}]} {
    %c16_i32 = arith.constant 16 : i32
    %0 = arith.muli %arg1, %c16_i32 : i32
    %cst = arith.constant 0.000000e+00 : f32
    %1 = vector.broadcast %cst : f32 to vector<256x4xf32>
    %c0_i32 = arith.constant 0 : i32
    %2 = arith.addi %0, %c0_i32 : i32
    %c0 = arith.constant 0 : index
    %3 = arith.index_cast %2 : i32 to index
    %c0_0 = arith.constant 0 : index
    %c0_1 = arith.constant 0 : index
    %4 = vector.load %arg2[%c0, %3, %c0_0, %c0_1] : memref<1x17x16x4xf32, #tpu.memory_space<vmem>>, vector<1x16x16x4xf32>
    %5 = vector.shape_cast %4 : vector<1x16x16x4xf32> to vector<16x16x4xf32>
    %6 = vector.shape_cast %5 : vector<16x16x4xf32> to vector<256x4xf32>
    %7 = arith.truncf %6 : vector<256x4xf32> to vector<256x4xbf16>
    %c0_2 = arith.constant 0 : index
    %c0_3 = arith.constant 0 : index
    %c0_4 = arith.constant 0 : index
    %8 = vector.load %arg3[%c0_2, %c0_3, %c0_4] : memref<2x4x4xbf16, #tpu.memory_space<vmem>>, vector<1x4x4xbf16>
    %9 = vector.shape_cast %8 : vector<1x4x4xbf16> to vector<4x4xbf16>
    %cst_5 = arith.constant dense<0.000000e+00> : vector<256x4xf32>
    %10 = tpu.matmul %7, %9, %cst_5 {dimension_numbers = #tpu.dot_dimension_numbers<[1], [0], [0], [1], [0, 0, 1, 1], [], []>} : vector<256x4xbf16>, vector<4x4xbf16>, vector<256x4xf32> -> vector<256x4xf32>
    %11 = arith.addf %1, %10 : vector<256x4xf32>
    %c1_i32 = arith.constant 1 : i32
    %12 = arith.addi %0, %c1_i32 : i32
    %c0_6 = arith.constant 0 : index
    %13 = arith.index_cast %12 : i32 to index
    %c0_7 = arith.constant 0 : index
    %c0_8 = arith.constant 0 : index
    %14 = vector.load %arg2[%c0_6, %13, %c0_7, %c0_8] : memref<1x17x16x4xf32, #tpu.memory_space<vmem>>, vector<1x16x16x4xf32>
    %15 = vector.shape_cast %14 : vector<1x16x16x4xf32> to vector<16x16x4xf32>
    %16 = vector.shape_cast %15 : vector<16x16x4xf32> to vector<256x4xf32>
    %17 = arith.truncf %16 : vector<256x4xf32> to vector<256x4xbf16>
    %c1 = arith.constant 1 : index
    %c0_9 = arith.constant 0 : index
    %c0_10 = arith.constant 0 : index
    %18 = vector.load %arg3[%c1, %c0_9, %c0_10] : memref<2x4x4xbf16, #tpu.memory_space<vmem>>, vector<1x4x4xbf16>
    %19 = vector.shape_cast %18 : vector<1x4x4xbf16> to vector<4x4xbf16>
    %cst_11 = arith.constant dense<0.000000e+00> : vector<256x4xf32>
    %20 = tpu.matmul %17, %19, %cst_11 {dimension_numbers = #tpu.dot_dimension_numbers<[1], [0], [0], [1], [0, 0, 1, 1], [], []>} : vector<256x4xbf16>, vector<4x4xbf16>, vector<256x4xf32> -> vector<256x4xf32>
    %21 = arith.addf %11, %20 : vector<256x4xf32>
    %c0_12 = arith.constant 0 : index
    %c0_13 = arith.constant 0 : index
    %22 = vector.load %arg4[%c0_12, %c0_13] : memref<1x4xf32, #tpu.memory_space<vmem>>, vector<1x4xf32>
    %23 = vector.broadcast %22 : vector<1x4xf32> to vector<256x4xf32>
    %24 = arith.addf %21, %23 : vector<256x4xf32>
    %cst_14 = arith.constant 0.000000e+00 : f32
    %25 = vector.broadcast %cst_14 : f32 to vector<256x4xf32>
    %26 = arith.maximumf %24, %25 : vector<256x4xf32>
    %27 = vector.shape_cast %26 : vector<256x4xf32> to vector<1x256x4xf32>
    %c0_15 = arith.constant 0 : index
    %c0_16 = arith.constant 0 : index
    %c0_17 = arith.constant 0 : index
    %28 = vector.load %arg5[%c0_15, %c0_16, %c0_17] : memref<1x256x4xf32, #tpu.memory_space<vmem>>, vector<1x256x4xf32>
    tpu.vector_store %arg5[%c0_15, %c0_16, %c0_17], %27 {strides = array<i32>} : memref<1x256x4xf32, #tpu.memory_space<vmem>>, vector<1x256x4xf32>,
    return
  }
  func.func @transform_0(%arg0: i32, %arg1: i32) -> (i32, i32, i32, i32) {
    %c0_i32 = arith.constant 0 : i32
    %c0_i32_0 = arith.constant 0 : i32
    %c0_i32_1 = arith.constant 0 : i32
    %c0_i32_2 = arith.constant 0 : i32
    return %arg0, %c0_i32, %c0_i32_0, %c0_i32_1 : i32, i32, i32, i32
  }
  func.func @transform_1(%arg0: i32, %arg1: i32) -> (i32, i32, i32) {
    %c0_i32 = arith.constant 0 : i32
    %c0_i32_0 = arith.constant 0 : i32
    %c0_i32_1 = arith.constant 0 : i32
    %c0_i32_2 = arith.constant 0 : i32
    return %c0_i32, %c0_i32_0, %c0_i32_1 : i32, i32, i32
  }
  func.func @transform_2(%arg0: i32, %arg1: i32) -> (i32, i32) {
    %c0_i32 = arith.constant 0 : i32
    %c0_i32_0 = arith.constant 0 : i32
    %c0_i32_1 = arith.constant 0 : i32
    return %c0_i32, %c0_i32_0 : i32, i32
  }
  func.func @transform_3(%arg0: i32, %arg1: i32) -> (i32, i32, i32) {
    %c0_i32 = arith.constant 0 : i32
    %c0_i32_0 = arith.constant 0 : i32
    return %arg0, %arg1, %c0_i32 : i32, i32, i32
  }
}

module attributes {stable_mosaic.version = 11 : i64} {
  func.func @_conv_bn_relu_kernel(%arg0: i32, %arg1: i32, %arg2: memref<1x16x17x4xf32, #tpu.memory_space<vmem>>, %arg3: memref<2x4x4xbf16, #tpu.memory_space<vmem>>, %arg4: memref<1x4xf32, #tpu.memory_space<vmem>>, %arg5: memref<1x256x4xf32, #tpu.memory_space<vmem>>) attributes {dimension_semantics = [#tpu.dimension_semantics<parallel>, #tpu.dimension_semantics<parallel>], iteration_bounds = array<i64: 2, 1>, scalar_prefetch = 0 : i64, scratch_operands = 0 : i64, tpu.core_type = #tpu.core_type<tc>, window_params = [{transform_indices = @transform_0, window_bounds = array<i64: 1, 16, 17, 4>}, {pipeline_mode = #tpu.pipeline_mode<synchronous>, transform_indices = @transform_1, window_bounds = array<i64: 2, 4, 4>}, {pipeline_mode = #tpu.pipeline_mode<synchronous>, transform_indices = @transform_2, window_bounds = array<i64: 1, 4>}, {transform_indices = @transform_3, window_bounds = array<i64: 1, 256, 4>}]} {
    %c16_i32 = arith.constant 16 : i32
    %0 = arith.muli %arg1, %c16_i32 : i32
    %cst = arith.constant 0.000000e+00 : f32
    %1 = vector.broadcast %cst : f32 to vector<256x4xf32>
    %c0_i32 = arith.constant 0 : i32
    %2 = arith.addi %0, %c0_i32 : i32
    %c0 = arith.constant 0 : index
    %3 = arith.index_cast %2 : i32 to index
    %c0_0 = arith.constant 0 : index
    %c0_1 = arith.constant 0 : index
    %4 = vector.load %arg2[%c0, %3, %c0_0, %c0_1] : memref<1x16x17x4xf32, #tpu.memory_space<vmem>>, vector<1x16x16x4xf32>
    %5 = vector.shape_cast %4 : vector<1x16x16x4xf32> to vector<16x16x4xf32>
    %6 = vector.shape_cast %5 : vector<16x16x4xf32> to vector<256x4xf32>
    %7 = arith.truncf %6 : vector<256x4xf32> to vector<256x4xbf16>
    %c0_2 = arith.constant 0 : index
    %c0_3 = arith.constant 0 : index
    %c0_4 = arith.constant 0 : index
    %8 = vector.load %arg3[%c0_2, %c0_3, %c0_4] : memref<2x4x4xbf16, #tpu.memory_space<vmem>>, vector<1x4x4xbf16>
    %9 = vector.shape_cast %8 : vector<1x4x4xbf16> to vector<4x4xbf16>
    %cst_5 = arith.constant dense<0.000000e+00> : vector<256x4xf32>
    %10 = tpu.matmul %7, %9, %cst_5 {dimension_numbers = #tpu.dot_dimension_numbers<[1], [0], [0], [1], [0, 0, 1, 1], [], []>} : vector<256x4xbf16>, vector<4x4xbf16>, vector<256x4xf32> -> vector<256x4xf32>
    %11 = arith.addf %1, %10 : vector<256x4xf32>
    %c0_i32_6 = arith.constant 0 : i32
    %12 = arith.addi %0, %c0_i32_6 : i32
    %c0_7 = arith.constant 0 : index
    %13 = arith.index_cast %12 : i32 to index
    %c1 = arith.constant 1 : index
    %c0_8 = arith.constant 0 : index
    %14 = vector.load %arg2[%c0_7, %13, %c1, %c0_8] : memref<1x16x17x4xf32, #tpu.memory_space<vmem>>, vector<1x16x16x4xf32>
    %15 = vector.shape_cast %14 : vector<1x16x16x4xf32> to vector<16x16x4xf32>
    %16 = vector.shape_cast %15 : vector<16x16x4xf32> to vector<256x4xf32>
    %17 = arith.truncf %16 : vector<256x4xf32> to vector<256x4xbf16>
    %c1_9 = arith.constant 1 : index
    %c0_10 = arith.constant 0 : index
    %c0_11 = arith.constant 0 : index
    %18 = vector.load %arg3[%c1_9, %c0_10, %c0_11] : memref<2x4x4xbf16, #tpu.memory_space<vmem>>, vector<1x4x4xbf16>
    %19 = vector.shape_cast %18 : vector<1x4x4xbf16> to vector<4x4xbf16>
    %cst_12 = arith.constant dense<0.000000e+00> : vector<256x4xf32>
    %20 = tpu.matmul %17, %19, %cst_12 {dimension_numbers = #tpu.dot_dimension_numbers<[1], [0], [0], [1], [0, 0, 1, 1], [], []>} : vector<256x4xbf16>, vector<4x4xbf16>, vector<256x4xf32> -> vector<256x4xf32>
    %21 = arith.addf %11, %20 : vector<256x4xf32>
    %c0_13 = arith.constant 0 : index
    %c0_14 = arith.constant 0 : index
    %22 = vector.load %arg4[%c0_13, %c0_14] : memref<1x4xf32, #tpu.memory_space<vmem>>, vector<1x4xf32>
    %23 = vector.broadcast %22 : vector<1x4xf32> to vector<256x4xf32>
    %24 = arith.addf %21, %23 : vector<256x4xf32>
    %cst_15 = arith.constant 0.000000e+00 : f32
    %25 = vector.broadcast %cst_15 : f32 to vector<256x4xf32>
    %26 = arith.maximumf %24, %25 : vector<256x4xf32>
    %27 = vector.shape_cast %26 : vector<256x4xf32> to vector<1x256x4xf32>
    %c0_16 = arith.constant 0 : index
    %c0_17 = arith.constant 0 : index
    %c0_18 = arith.constant 0 : index
    %28 = vector.load %arg5[%c0_16, %c0_17, %c0_18] : memref<1x256x4xf32, #tpu.memory_space<vmem>>, vector<1x256x4xf32>
    tpu.vector_store %arg5[%c0_16, %c0_17, %c0_18], %27 {strides = array<i32>} : memref<1x256x4xf32, #tpu.memory_space<vmem>>, vector<1x256x4xf32>,
    return
  }
  func.func @transform_0(%arg0: i32, %arg1: i32) -> (i32, i32, i32, i32) {
    %c0_i32 = arith.constant 0 : i32
    %c0_i32_0 = arith.constant 0 : i32
    %c0_i32_1 = arith.constant 0 : i32
    %c0_i32_2 = arith.constant 0 : i32
    return %arg0, %c0_i32, %c0_i32_0, %c0_i32_1 : i32, i32, i32, i32
  }
  func.func @transform_1(%arg0: i32, %arg1: i32) -> (i32, i32, i32) {
    %c0_i32 = arith.constant 0 : i32
    %c0_i32_0 = arith.constant 0 : i32
    %c0_i32_1 = arith.constant 0 : i32
    %c0_i32_2 = arith.constant 0 : i32
    return %c0_i32, %c0_i32_0, %c0_i32_1 : i32, i32, i32
  }
  func.func @transform_2(%arg0: i32, %arg1: i32) -> (i32, i32) {
    %c0_i32 = arith.constant 0 : i32
    %c0_i32_0 = arith.constant 0 : i32
    %c0_i32_1 = arith.constant 0 : i32
    return %c0_i32, %c0_i32_0 : i32, i32
  }
  func.func @transform_3(%arg0: i32, %arg1: i32) -> (i32, i32, i32) {
    %c0_i32 = arith.constant 0 : i32
    %c0_i32_0 = arith.constant 0 : i32
    return %arg0, %arg1, %c0_i32 : i32, i32, i32
  }
}

module attributes {stable_mosaic.version = 11 : i64} {
  func.func @_conv_bn_relu_kernel(%arg0: i32, %arg1: i32, %arg2: memref<1x16x18x4xf32, #tpu.memory_space<vmem>>, %arg3: memref<3x4x4xbf16, #tpu.memory_space<vmem>>, %arg4: memref<1x4xf32, #tpu.memory_space<vmem>>, %arg5: memref<1x256x4xf32, #tpu.memory_space<vmem>>) attributes {dimension_semantics = [#tpu.dimension_semantics<parallel>, #tpu.dimension_semantics<parallel>], iteration_bounds = array<i64: 2, 1>, scalar_prefetch = 0 : i64, scratch_operands = 0 : i64, tpu.core_type = #tpu.core_type<tc>, window_params = [{transform_indices = @transform_0, window_bounds = array<i64: 1, 16, 18, 4>}, {pipeline_mode = #tpu.pipeline_mode<synchronous>, transform_indices = @transform_1, window_bounds = array<i64: 3, 4, 4>}, {pipeline_mode = #tpu.pipeline_mode<synchronous>, transform_indices = @transform_2, window_bounds = array<i64: 1, 4>}, {transform_indices = @transform_3, window_bounds = array<i64: 1, 256, 4>}]} {
    %c16_i32 = arith.constant 16 : i32
    %0 = arith.muli %arg1, %c16_i32 : i32
    %cst = arith.constant 0.000000e+00 : f32
    %1 = vector.broadcast %cst : f32 to vector<256x4xf32>
    %c0_i32 = arith.constant 0 : i32
    %2 = arith.addi %0, %c0_i32 : i32
    %c0 = arith.constant 0 : index
    %3 = arith.index_cast %2 : i32 to index
    %c0_0 = arith.constant 0 : index
    %c0_1 = arith.constant 0 : index
    %4 = vector.load %arg2[%c0, %3, %c0_0, %c0_1] : memref<1x16x18x4xf32, #tpu.memory_space<vmem>>, vector<1x16x16x4xf32>
    %5 = vector.shape_cast %4 : vector<1x16x16x4xf32> to vector<16x16x4xf32>
    %6 = vector.shape_cast %5 : vector<16x16x4xf32> to vector<256x4xf32>
    %7 = arith.truncf %6 : vector<256x4xf32> to vector<256x4xbf16>
    %c0_2 = arith.constant 0 : index
    %c0_3 = arith.constant 0 : index
    %c0_4 = arith.constant 0 : index
    %8 = vector.load %arg3[%c0_2, %c0_3, %c0_4] : memref<3x4x4xbf16, #tpu.memory_space<vmem>>, vector<1x4x4xbf16>
    %9 = vector.shape_cast %8 : vector<1x4x4xbf16> to vector<4x4xbf16>
    %cst_5 = arith.constant dense<0.000000e+00> : vector<256x4xf32>
    %10 = tpu.matmul %7, %9, %cst_5 {dimension_numbers = #tpu.dot_dimension_numbers<[1], [0], [0], [1], [0, 0, 1, 1], [], []>} : vector<256x4xbf16>, vector<4x4xbf16>, vector<256x4xf32> -> vector<256x4xf32>
    %11 = arith.addf %1, %10 : vector<256x4xf32>
    %c0_i32_6 = arith.constant 0 : i32
    %12 = arith.addi %0, %c0_i32_6 : i32
    %c0_7 = arith.constant 0 : index
    %13 = arith.index_cast %12 : i32 to index
    %c1 = arith.constant 1 : index
    %c0_8 = arith.constant 0 : index
    %14 = vector.load %arg2[%c0_7, %13, %c1, %c0_8] : memref<1x16x18x4xf32, #tpu.memory_space<vmem>>, vector<1x16x16x4xf32>
    %15 = vector.shape_cast %14 : vector<1x16x16x4xf32> to vector<16x16x4xf32>
    %16 = vector.shape_cast %15 : vector<16x16x4xf32> to vector<256x4xf32>
    %17 = arith.truncf %16 : vector<256x4xf32> to vector<256x4xbf16>
    %c1_9 = arith.constant 1 : index
    %c0_10 = arith.constant 0 : index
    %c0_11 = arith.constant 0 : index
    %18 = vector.load %arg3[%c1_9, %c0_10, %c0_11] : memref<3x4x4xbf16, #tpu.memory_space<vmem>>, vector<1x4x4xbf16>
    %19 = vector.shape_cast %18 : vector<1x4x4xbf16> to vector<4x4xbf16>
    %cst_12 = arith.constant dense<0.000000e+00> : vector<256x4xf32>
    %20 = tpu.matmul %17, %19, %cst_12 {dimension_numbers = #tpu.dot_dimension_numbers<[1], [0], [0], [1], [0, 0, 1, 1], [], []>} : vector<256x4xbf16>, vector<4x4xbf16>, vector<256x4xf32> -> vector<256x4xf32>
    %21 = arith.addf %11, %20 : vector<256x4xf32>
    %c0_i32_13 = arith.constant 0 : i32
    %22 = arith.addi %0, %c0_i32_13 : i32
    %c0_14 = arith.constant 0 : index
    %23 = arith.index_cast %22 : i32 to index
    %c2 = arith.constant 2 : index
    %c0_15 = arith.constant 0 : index
    %24 = vector.load %arg2[%c0_14, %23, %c2, %c0_15] : memref<1x16x18x4xf32, #tpu.memory_space<vmem>>, vector<1x16x16x4xf32>
    %25 = vector.shape_cast %24 : vector<1x16x16x4xf32> to vector<16x16x4xf32>
    %26 = vector.shape_cast %25 : vector<16x16x4xf32> to vector<256x4xf32>
    %27 = arith.truncf %26 : vector<256x4xf32> to vector<256x4xbf16>
    %c2_16 = arith.constant 2 : index
    %c0_17 = arith.constant 0 : index
    %c0_18 = arith.constant 0 : index
    %28 = vector.load %arg3[%c2_16, %c0_17, %c0_18] : memref<3x4x4xbf16, #tpu.memory_space<vmem>>, vector<1x4x4xbf16>
    %29 = vector.shape_cast %28 : vector<1x4x4xbf16> to vector<4x4xbf16>
    %cst_19 = arith.constant dense<0.000000e+00> : vector<256x4xf32>
    %30 = tpu.matmul %27, %29, %cst_19 {dimension_numbers = #tpu.dot_dimension_numbers<[1], [0], [0], [1], [0, 0, 1, 1], [], []>} : vector<256x4xbf16>, vector<4x4xbf16>, vector<256x4xf32> -> vector<256x4xf32>
    %31 = arith.addf %21, %30 : vector<256x4xf32>
    %c0_20 = arith.constant 0 : index
    %c0_21 = arith.constant 0 : index
    %32 = vector.load %arg4[%c0_20, %c0_21] : memref<1x4xf32, #tpu.memory_space<vmem>>, vector<1x4xf32>
    %33 = vector.broadcast %32 : vector<1x4xf32> to vector<256x4xf32>
    %34 = arith.addf %31, %33 : vector<256x4xf32>
    %cst_22 = arith.constant 0.000000e+00 : f32
    %35 = vector.broadcast %cst_22 : f32 to vector<256x4xf32>
    %36 = arith.maximumf %34, %35 : vector<256x4xf32>
    %37 = vector.shape_cast %36 : vector<256x4xf32> to vector<1x256x4xf32>
    %c0_23 = arith.constant 0 : index
    %c0_24 = arith.constant 0 : index
    %c0_25 = arith.constant 0 : index
    %38 = vector.load %arg5[%c0_23, %c0_24, %c0_25] : memref<1x256x4xf32, #tpu.memory_space<vmem>>, vector<1x256x4xf32>
    tpu.vector_store %arg5[%c0_23, %c0_24, %c0_25], %37 {strides = array<i32>} : memref<1x256x4xf32, #tpu.memory_space<vmem>>, vector<1x256x4xf32>,
    return
  }
  func.func @transform_0(%arg0: i32, %arg1: i32) -> (i32, i32, i32, i32) {
    %c0_i32 = arith.constant 0 : i32
    %c0_i32_0 = arith.constant 0 : i32
    %c0_i32_1 = arith.constant 0 : i32
    %c0_i32_2 = arith.constant 0 : i32
    return %arg0, %c0_i32, %c0_i32_0, %c0_i32_1 : i32, i32, i32, i32
  }
  func.func @transform_1(%arg0: i32, %arg1: i32) -> (i32, i32, i32) {
    %c0_i32 = arith.constant 0 : i32
    %c0_i32_0 = arith.constant 0 : i32
    %c0_i32_1 = arith.constant 0 : i32
    %c0_i32_2 = arith.constant 0 : i32
    return %c0_i32, %c0_i32_0, %c0_i32_1 : i32, i32, i32
  }
  func.func @transform_2(%arg0: i32, %arg1: i32) -> (i32, i32) {
    %c0_i32 = arith.constant 0 : i32
    %c0_i32_0 = arith.constant 0 : i32
    %c0_i32_1 = arith.constant 0 : i32
    return %c0_i32, %c0_i32_0 : i32, i32
  }
  func.func @transform_3(%arg0: i32, %arg1: i32) -> (i32, i32, i32) {
    %c0_i32 = arith.constant 0 : i32
    %c0_i32_0 = arith.constant 0 : i32
    return %arg0, %arg1, %c0_i32 : i32, i32, i32
  }
}

module attributes {stable_mosaic.version = 11 : i64} {
  func.func @_conv_bn_relu_kernel(%arg0: i32, %arg1: i32, %arg2: memref<1x18x16x4xf32, #tpu.memory_space<vmem>>, %arg3: memref<3x4x4xbf16, #tpu.memory_space<vmem>>, %arg4: memref<1x4xf32, #tpu.memory_space<vmem>>, %arg5: memref<1x256x4xf32, #tpu.memory_space<vmem>>) attributes {dimension_semantics = [#tpu.dimension_semantics<parallel>, #tpu.dimension_semantics<parallel>], iteration_bounds = array<i64: 2, 1>, scalar_prefetch = 0 : i64, scratch_operands = 0 : i64, tpu.core_type = #tpu.core_type<tc>, window_params = [{transform_indices = @transform_0, window_bounds = array<i64: 1, 18, 16, 4>}, {pipeline_mode = #tpu.pipeline_mode<synchronous>, transform_indices = @transform_1, window_bounds = array<i64: 3, 4, 4>}, {pipeline_mode = #tpu.pipeline_mode<synchronous>, transform_indices = @transform_2, window_bounds = array<i64: 1, 4>}, {transform_indices = @transform_3, window_bounds = array<i64: 1, 256, 4>}]} {
    %c16_i32 = arith.constant 16 : i32
    %0 = arith.muli %arg1, %c16_i32 : i32
    %cst = arith.constant 0.000000e+00 : f32
    %1 = vector.broadcast %cst : f32 to vector<256x4xf32>
    %c0_i32 = arith.constant 0 : i32
    %2 = arith.addi %0, %c0_i32 : i32
    %c0 = arith.constant 0 : index
    %3 = arith.index_cast %2 : i32 to index
    %c0_0 = arith.constant 0 : index
    %c0_1 = arith.constant 0 : index
    %4 = vector.load %arg2[%c0, %3, %c0_0, %c0_1] : memref<1x18x16x4xf32, #tpu.memory_space<vmem>>, vector<1x16x16x4xf32>
    %5 = vector.shape_cast %4 : vector<1x16x16x4xf32> to vector<16x16x4xf32>
    %6 = vector.shape_cast %5 : vector<16x16x4xf32> to vector<256x4xf32>
    %7 = arith.truncf %6 : vector<256x4xf32> to vector<256x4xbf16>
    %c0_2 = arith.constant 0 : index
    %c0_3 = arith.constant 0 : index
    %c0_4 = arith.constant 0 : index
    %8 = vector.load %arg3[%c0_2, %c0_3, %c0_4] : memref<3x4x4xbf16, #tpu.memory_space<vmem>>, vector<1x4x4xbf16>
    %9 = vector.shape_cast %8 : vector<1x4x4xbf16> to vector<4x4xbf16>
    %cst_5 = arith.constant dense<0.000000e+00> : vector<256x4xf32>
    %10 = tpu.matmul %7, %9, %cst_5 {dimension_numbers = #tpu.dot_dimension_numbers<[1], [0], [0], [1], [0, 0, 1, 1], [], []>} : vector<256x4xbf16>, vector<4x4xbf16>, vector<256x4xf32> -> vector<256x4xf32>
    %11 = arith.addf %1, %10 : vector<256x4xf32>
    %c1_i32 = arith.constant 1 : i32
    %12 = arith.addi %0, %c1_i32 : i32
    %c0_6 = arith.constant 0 : index
    %13 = arith.index_cast %12 : i32 to index
    %c0_7 = arith.constant 0 : index
    %c0_8 = arith.constant 0 : index
    %14 = vector.load %arg2[%c0_6, %13, %c0_7, %c0_8] : memref<1x18x16x4xf32, #tpu.memory_space<vmem>>, vector<1x16x16x4xf32>
    %15 = vector.shape_cast %14 : vector<1x16x16x4xf32> to vector<16x16x4xf32>
    %16 = vector.shape_cast %15 : vector<16x16x4xf32> to vector<256x4xf32>
    %17 = arith.truncf %16 : vector<256x4xf32> to vector<256x4xbf16>
    %c1 = arith.constant 1 : index
    %c0_9 = arith.constant 0 : index
    %c0_10 = arith.constant 0 : index
    %18 = vector.load %arg3[%c1, %c0_9, %c0_10] : memref<3x4x4xbf16, #tpu.memory_space<vmem>>, vector<1x4x4xbf16>
    %19 = vector.shape_cast %18 : vector<1x4x4xbf16> to vector<4x4xbf16>
    %cst_11 = arith.constant dense<0.000000e+00> : vector<256x4xf32>
    %20 = tpu.matmul %17, %19, %cst_11 {dimension_numbers = #tpu.dot_dimension_numbers<[1], [0], [0], [1], [0, 0, 1, 1], [], []>} : vector<256x4xbf16>, vector<4x4xbf16>, vector<256x4xf32> -> vector<256x4xf32>
    %21 = arith.addf %11, %20 : vector<256x4xf32>
    %c2_i32 = arith.constant 2 : i32
    %22 = arith.addi %0, %c2_i32 : i32
    %c0_12 = arith.constant 0 : index
    %23 = arith.index_cast %22 : i32 to index
    %c0_13 = arith.constant 0 : index
    %c0_14 = arith.constant 0 : index
    %24 = vector.load %arg2[%c0_12, %23, %c0_13, %c0_14] : memref<1x18x16x4xf32, #tpu.memory_space<vmem>>, vector<1x16x16x4xf32>
    %25 = vector.shape_cast %24 : vector<1x16x16x4xf32> to vector<16x16x4xf32>
    %26 = vector.shape_cast %25 : vector<16x16x4xf32> to vector<256x4xf32>
    %27 = arith.truncf %26 : vector<256x4xf32> to vector<256x4xbf16>
    %c2 = arith.constant 2 : index
    %c0_15 = arith.constant 0 : index
    %c0_16 = arith.constant 0 : index
    %28 = vector.load %arg3[%c2, %c0_15, %c0_16] : memref<3x4x4xbf16, #tpu.memory_space<vmem>>, vector<1x4x4xbf16>
    %29 = vector.shape_cast %28 : vector<1x4x4xbf16> to vector<4x4xbf16>
    %cst_17 = arith.constant dense<0.000000e+00> : vector<256x4xf32>
    %30 = tpu.matmul %27, %29, %cst_17 {dimension_numbers = #tpu.dot_dimension_numbers<[1], [0], [0], [1], [0, 0, 1, 1], [], []>} : vector<256x4xbf16>, vector<4x4xbf16>, vector<256x4xf32> -> vector<256x4xf32>
    %31 = arith.addf %21, %30 : vector<256x4xf32>
    %c0_18 = arith.constant 0 : index
    %c0_19 = arith.constant 0 : index
    %32 = vector.load %arg4[%c0_18, %c0_19] : memref<1x4xf32, #tpu.memory_space<vmem>>, vector<1x4xf32>
    %33 = vector.broadcast %32 : vector<1x4xf32> to vector<256x4xf32>
    %34 = arith.addf %31, %33 : vector<256x4xf32>
    %cst_20 = arith.constant 0.000000e+00 : f32
    %35 = vector.broadcast %cst_20 : f32 to vector<256x4xf32>
    %36 = arith.maximumf %34, %35 : vector<256x4xf32>
    %37 = vector.shape_cast %36 : vector<256x4xf32> to vector<1x256x4xf32>
    %c0_21 = arith.constant 0 : index
    %c0_22 = arith.constant 0 : index
    %c0_23 = arith.constant 0 : index
    %38 = vector.load %arg5[%c0_21, %c0_22, %c0_23] : memref<1x256x4xf32, #tpu.memory_space<vmem>>, vector<1x256x4xf32>
    tpu.vector_store %arg5[%c0_21, %c0_22, %c0_23], %37 {strides = array<i32>} : memref<1x256x4xf32, #tpu.memory_space<vmem>>, vector<1x256x4xf32>,
    return
  }
  func.func @transform_0(%arg0: i32, %arg1: i32) -> (i32, i32, i32, i32) {
    %c0_i32 = arith.constant 0 : i32
    %c0_i32_0 = arith.constant 0 : i32
    %c0_i32_1 = arith.constant 0 : i32
    %c0_i32_2 = arith.constant 0 : i32
    return %arg0, %c0_i32, %c0_i32_0, %c0_i32_1 : i32, i32, i32, i32
  }
  func.func @transform_1(%arg0: i32, %arg1: i32) -> (i32, i32, i32) {
    %c0_i32 = arith.constant 0 : i32
    %c0_i32_0 = arith.constant 0 : i32
    %c0_i32_1 = arith.constant 0 : i32
    %c0_i32_2 = arith.constant 0 : i32
    return %c0_i32, %c0_i32_0, %c0_i32_1 : i32, i32, i32
  }
  func.func @transform_2(%arg0: i32, %arg1: i32) -> (i32, i32) {
    %c0_i32 = arith.constant 0 : i32
    %c0_i32_0 = arith.constant 0 : i32
    %c0_i32_1 = arith.constant 0 : i32
    return %c0_i32, %c0_i32_0 : i32, i32
  }
  func.func @transform_3(%arg0: i32, %arg1: i32) -> (i32, i32, i32) {
    %c0_i32 = arith.constant 0 : i32
    %c0_i32_0 = arith.constant 0 : i32
    return %arg0, %arg1, %c0_i32 : i32, i32, i32
  }
}

</mosaic_0001>

<bundles_post_ra>
// kernel: _lambda_.7
= control target key start
LH: loop header
LB: loop body
LE: loop exit
PB: predicated region body
PF: predicated region fallthrough
CT: control target
= control target key end

     0   :  { %s769_s12 = smov 0   ;;  %s771_s13 = smov 0   ;;  %s965_s0 = inlined_call_operand.vmem [shape: f32[2,16,16,4], index: 0, kind: input, shape index: {}]   ;;  %s966_s1 = inlined_call_operand.vmem [shape: bf16[1,4,12], index: 1, kind: input, shape index: {}]   ;;  %s967_s2 = inlined_call_operand.vmem [shape: f32[1,12], index: 2, kind: input, shape index: {}]   ;;  %s968_s3 = inlined_call_operand.vmem [shape: f32[2,256,12], index: 3, kind: output, shape index: {}]  }
   0x1   :  { %s773_s14 = smov 0  }
   0x2 LB: > { %s25_s15 = sadd.s32 1, %s743_s13  ;;  %p620_p0 = scmp.ge.s32.totalorder %s747_s14, 1  ;;  %s747_s14 = sphi %s773_s14, %s13_s14   ;;  %s743_s13 = sphi %s771_s13, %s970_s13   ;;  %s739_s12 = sphi %s769_s12, %s969_s12  }
   0x3   : > { %p27_p1 = scmp.ge.s32.totalorder %s25_s15, 2  ;;  %p151_p2 = scmp.lt.s32.totalorder %s747_s14, 3 }
   0x5   : > { %s972_s15 = smov (%p27_p1, %s25_s15), 0  ;;  %p152_p3 = pnand %p620_p0, %p151_p2 }
   0x6   : > { %p179_p4 = scmp.lt.s32.totalorder (!%p152_p3), %s739_s12, 1 }
   0x7   : > { %155 = sbr.rel (%p152_p3) target bundleno = 248 (0xf8), region = 32 }
   0xc   : > { %v246_v0 = vld [vmem:[%s966_s1] sm:$0x3]  ;;  %vm303_vm0 = vcmask 1041408   ;;  %s974_s12 = smov (!%p179_p4, %s739_s12), 1  ;;  %vm254_vm1 = vcmask 31744   ;;  %vm500_vm2 = vcmask 97280  }
   0xd   : > { %699 = vmatprep.subr.msk.bf16.mxu0 %vm303_vm0, %v246_v0  ;;  %700 = vmatprep.subr.msk.bf16.mxu1 %vm303_vm0, %v246_v0  ;;  %v305_v1 = vsel %vm303_vm0, %v246_v0, 0  ;;  %s644_s18 = sshll.u32 %s974_s12, 8  ;;  %v851_v50 = vld [vmem:[%s967_s2] ss:$0 sm:$0xff] }
   0xe   : > { %664 = vmatpush3.bf16.msra.mxu0 %v305_v1  ;;  %698 = vmatpush3.bf16.msra.mxu1 %v305_v1  ;;  %s798_s21 = scalar_lea.vmem %s965_s0, %s644_s18  ;;  %s859_s26 = scalar_lea.vmem %s968_s3, %s644_s18 }
   0xf   : > { %v198_v2 = vld [vmem:[%s798_s21] sm:$0xff]  ;;  %v199_v3 = vld [vmem:[%s798_s21 + $0x8] sm:$0xff]  ;;  %v200_v7 = vld [vmem:[%s798_s21 + $0x10] sm:$0xff] }
  0x10   : > { %v214_v4 = vld [vmem:[%s798_s21 + $0x80] sm:$0xff]  ;;  %v230_v5 = vpack.c.bf16 %v199_v3, %v198_v2  ;;  %v215_v6 = vld [vmem:[%s798_s21 + $0x88] sm:$0xff]  ;;  %v201_v8 = vld [vmem:[%s798_s21 + $0x18] sm:$0xff] }
  0x11   : > { %v238_v9 = vpack.c.bf16 %v215_v6, %v214_v4  ;;  %v231_v10 = vpack.c.bf16 %v201_v8, %v200_v7  ;;  %v216_v11 = vld [vmem:[%s798_s21 + $0x90] sm:$0xff]  ;;  %v217_v12 = vld [vmem:[%s798_s21 + $0x98] sm:$0xff]  ;;  %v202_v13 = vld [vmem:[%s798_s21 + $0x20] sm:$0xff] }
  0x12   : > { %665 = vmatprep.mubr.msk.bf16.mxu0 %vm254_vm1, %v230_v5  ;;  %v239_v14 = vpack.c.bf16 %v217_v12, %v216_v11  ;;  %v203_v15 = vld [vmem:[%s798_s21 + $0x28] sm:$0xff]  ;;  %v218_v16 = vld [vmem:[%s798_s21 + $0xa0] sm:$0xff]  ;;  %v204_v20 = vld [vmem:[%s798_s21 + $0x30] sm:$0xff] }
  0x13   : > { %v219_v17 = vld [vmem:[%s798_s21 + $0xa8] sm:$0xff]  ;;  %681 = vmatprep.mubr.msk.bf16.mxu1 %vm254_vm1, %v238_v9  ;;  %666 = vmatmul.mubr.msk.bf16.vlgmr.msra.gmra.mxu0 %vm254_vm1, %v231_v10  ;;  %v232_v18 = vpack.c.bf16 %v203_v15, %v202_v13  ;;  %v205_v21 = vld [vmem:[%s798_s21 + $0x38] sm:$0xff]  ;;  %v220_v22 = vld [vmem:[%s798_s21 + $0xb0] sm:$0xff] }
  0x14   : > { %v240_v19 = vpack.c.bf16 %v219_v17, %v218_v16  ;;  %682 = vmatmul.mubr.msk.bf16.vlgmr.msra.gmra.mxu1 %vm254_vm1, %v239_v14  ;;  %v221_v23 = vld [vmem:[%s798_s21 + $0xb8] sm:$0xff]  ;;  %v206_v24 = vld [vmem:[%s798_s21 + $0x40] sm:$0xff]  ;;  %v207_v25 = vld [vmem:[%s798_s21 + $0x48] sm:$0xff]  ;;  %v233_v28 = vpack.c.bf16 %v205_v21, %v204_v20 }
  0x15   : > { %669 = vmatprep.mubr.msk.bf16.mxu0 %vm254_vm1, %v232_v18  ;;  %v222_v26 = vld [vmem:[%s798_s21 + $0xc0] sm:$0xff]  ;;  %v223_v27 = vld [vmem:[%s798_s21 + $0xc8] sm:$0xff]  ;;  %v241_v29 = vpack.c.bf16 %v221_v23, %v220_v22  ;;  %v234_v30 = vpack.c.bf16 %v207_v25, %v206_v24  ;;  %v208_v32 = vld [vmem:[%s798_s21 + $0x50] sm:$0xff] }
  0x16   : > { %685 = vmatprep.mubr.msk.bf16.mxu1 %vm254_vm1, %v240_v19  ;;  %v242_v31 = vpack.c.bf16 %v223_v27, %v222_v26  ;;  %v209_v33 = vld [vmem:[%s798_s21 + $0x58] sm:$0xff]  ;;  %v224_v34 = vld [vmem:[%s798_s21 + $0xd0] sm:$0xff]  ;;  %v210_v36 = vld [vmem:[%s798_s21 + $0x60] sm:$0xff] }
  0x17   : > { %v225_v35 = vld [vmem:[%s798_s21 + $0xd8] sm:$0xff]  ;;  %v211_v37 = vld [vmem:[%s798_s21 + $0x68] sm:$0xff]  ;;  %v226_v38 = vld [vmem:[%s798_s21 + $0xe0] sm:$0xff]  ;;  %v235_v40 = vpack.c.bf16 %v209_v33, %v208_v32 }
  0x18   : > { %v227_v39 = vld [vmem:[%s798_s21 + $0xe8] sm:$0xff]  ;;  %v243_v41 = vpack.c.bf16 %v225_v35, %v224_v34  ;;  %v236_v42 = vpack.c.bf16 %v211_v37, %v210_v36  ;;  %v212_v44 = vld [vmem:[%s798_s21 + $0x70] sm:$0xff]  ;;  %v213_v45 = vld [vmem:[%s798_s21 + $0x78] sm:$0xff] }
  0x19   : > { %v244_v43 = vpack.c.bf16 %v227_v39, %v226_v38  ;;  %v228_v46 = vld [vmem:[%s798_s21 + $0xf0] sm:$0xff]  ;;  %v229_v47 = vld [vmem:[%s798_s21 + $0xf8] sm:$0xff]  ;;  %v237_v48 = vpack.c.bf16 %v213_v45, %v212_v44 }
  0x1a   : > { %v245_v49 = vpack.c.bf16 %v229_v47, %v228_v46 }
  0x1b   : > { %670 = vmatmul.mubr.msk.bf16.gmra.mxu0 %vm254_vm1, %v233_v28 }
  0x1c   : > { %686 = vmatmul.mubr.msk.bf16.gmra.mxu1 %vm254_vm1, %v241_v29  ;;  %673 = vmatprep.mubr.msk.bf16.mxu0 %vm254_vm1, %v234_v30 }
  0x1d   : > { %689 = vmatprep.mubr.msk.bf16.mxu1 %vm254_vm1, %v242_v31 }
  0x23   : > { %674 = vmatmul.mubr.msk.bf16.gmra.mxu0 %vm254_vm1, %v235_v40 }
  0x24   : > { %690 = vmatmul.mubr.msk.bf16.gmra.mxu1 %vm254_vm1, %v243_v41  ;;  %677 = vmatprep.mubr.msk.bf16.mxu0 %vm254_vm1, %v236_v42 }
  0x25   : > { %693 = vmatprep.mubr.msk.bf16.mxu1 %vm254_vm1, %v244_v43 }
  0x2b   : > { %678 = vmatmul.mubr.msk.bf16.gmra.mxu0 %vm254_vm1, %v237_v48 }
  0x2c   : > { %694 = vmatmul.mubr.msk.bf16.gmra.mxu1 %vm254_vm1, %v245_v49 }
  0xd3   : > { %v667_v51 = vpop.f32.mrf.mxu0 }
  0xd4   : > { %v350_v52 = vadd.f32 %v667_v51, %v851_v50  ;;  %v683_v53 = vpop.f32.mrf.mxu1 }
  0xd5   : > { %v414_v54 = vadd.f32 %v683_v53, %v851_v50  ;;  %v341_v55 = vpop.f32.mrf.mxu0 }
  0xd6   : > { %v470_v56 = vmax.f32 %v350_v52, 0.0  ;;  %v342_v57 = vadd.f32 %v851_v50, %v341_v55  ;;  %v405_v58 = vpop.f32.mrf.mxu1 }
  0xd7   : > { %v486_v59 = vmax.f32 %v414_v54, 0.0  ;;  %v406_v60 = vadd.f32 %v851_v50, %v405_v58  ;;  %v668_v61 = vpop.f32.mrf.mxu0 }
  0xd8   : > { %503 = vst.msk [vmem:[%s859_s26 + $0x10] sm:$0xff] %vm500_vm2, %v470_v56  ;;  %v468_v62 = vmax.f32 %v342_v57, 0.0  ;;  %v353_v63 = vadd.f32 %v668_v61, %v851_v50  ;;  %v684_v0 = vpop.f32.mrf.mxu1 }
  0xd9   : > { %519 = vst.msk [vmem:[%s859_s26 + $0x90] sm:$0xff] %vm500_vm2, %v486_v59  ;;  %v484_v1 = vmax.f32 %v406_v60, 0.0  ;;  %v417_v2 = vadd.f32 %v684_v0, %v851_v50  ;;  %v344_v3 = vpop.f32.mrf.mxu0 }
  0xda   : > { %501 = vst.msk [vmem:[%s859_s26] sm:$0xff] %vm500_vm2, %v468_v62  ;;  %v471_v4 = vmax.f32 %v353_v63, 0.0  ;;  %v345_v5 = vadd.f32 %v851_v50, %v344_v3  ;;  %v408_v6 = vpop.f32.mrf.mxu1 }
  0xdb   : > { %517 = vst.msk [vmem:[%s859_s26 + $0x80] sm:$0xff] %vm500_vm2, %v484_v1  ;;  %v487_v7 = vmax.f32 %v417_v2, 0.0  ;;  %v409_v8 = vadd.f32 %v851_v50, %v408_v6  ;;  %v671_v9 = vpop.f32.mrf.mxu0 }
  0xdc   : > { %504 = vst.msk [vmem:[%s859_s26 + $0x18] sm:$0xff] %vm500_vm2, %v471_v4  ;;  %v469_v10 = vmax.f32 %v345_v5, 0.0  ;;  %v366_v11 = vadd.f32 %v671_v9, %v851_v50  ;;  %v687_v12 = vpop.f32.mrf.mxu1 }
  0xdd   : > { %520 = vst.msk [vmem:[%s859_s26 + $0x98] sm:$0xff] %vm500_vm2, %v487_v7  ;;  %v485_v13 = vmax.f32 %v409_v8, 0.0  ;;  %v430_v14 = vadd.f32 %v687_v12, %v851_v50  ;;  %v357_v15 = vpop.f32.mrf.mxu0 }
  0xde   : > { %502 = vst.msk [vmem:[%s859_s26 + $0x8] sm:$0xff] %vm500_vm2, %v469_v10  ;;  %v474_v16 = vmax.f32 %v366_v11, 0.0  ;;  %v358_v17 = vadd.f32 %v851_v50, %v357_v15  ;;  %v421_v18 = vpop.f32.mrf.mxu1 }
  0xdf   : > { %518 = vst.msk [vmem:[%s859_s26 + $0x88] sm:$0xff] %vm500_vm2, %v485_v13  ;;  %v490_v19 = vmax.f32 %v430_v14, 0.0  ;;  %v422_v20 = vadd.f32 %v851_v50, %v421_v18  ;;  %v672_v21 = vpop.f32.mrf.mxu0 }
  0xe0   : > { %507 = vst.msk [vmem:[%s859_s26 + $0x30] sm:$0xff] %vm500_vm2, %v474_v16  ;;  %v472_v22 = vmax.f32 %v358_v17, 0.0  ;;  %v369_v23 = vadd.f32 %v672_v21, %v851_v50  ;;  %v688_v24 = vpop.f32.mrf.mxu1 }
  0xe1   : > { %523 = vst.msk [vmem:[%s859_s26 + $0xb0] sm:$0xff] %vm500_vm2, %v490_v19  ;;  %v488_v25 = vmax.f32 %v422_v20, 0.0  ;;  %v433_v26 = vadd.f32 %v688_v24, %v851_v50  ;;  %v360_v27 = vpop.f32.mrf.mxu0 }
  0xe2   : > { %505 = vst.msk [vmem:[%s859_s26 + $0x20] sm:$0xff] %vm500_vm2, %v472_v22  ;;  %v475_v28 = vmax.f32 %v369_v23, 0.0  ;;  %v361_v29 = vadd.f32 %v851_v50, %v360_v27  ;;  %v424_v30 = vpop.f32.mrf.mxu1 }
  0xe3   : > { %521 = vst.msk [vmem:[%s859_s26 + $0xa0] sm:$0xff] %vm500_vm2, %v488_v25  ;;  %v491_v31 = vmax.f32 %v433_v26, 0.0  ;;  %v425_v32 = vadd.f32 %v851_v50, %v424_v30  ;;  %v675_v33 = vpop.f32.mrf.mxu0 }
  0xe4   : > { %508 = vst.msk [vmem:[%s859_s26 + $0x38] sm:$0xff] %vm500_vm2, %v475_v28  ;;  %v473_v34 = vmax.f32 %v361_v29, 0.0  ;;  %v382_v35 = vadd.f32 %v675_v33, %v851_v50  ;;  %v691_v36 = vpop.f32.mrf.mxu1 }
  0xe5   : > { %524 = vst.msk [vmem:[%s859_s26 + $0xb8] sm:$0xff] %vm500_vm2, %v491_v31  ;;  %v489_v37 = vmax.f32 %v425_v32, 0.0  ;;  %v446_v38 = vadd.f32 %v691_v36, %v851_v50  ;;  %v373_v39 = vpop.f32.mrf.mxu0 }
  0xe6   : > { %506 = vst.msk [vmem:[%s859_s26 + $0x28] sm:$0xff] %vm500_vm2, %v473_v34  ;;  %v478_v40 = vmax.f32 %v382_v35, 0.0  ;;  %v374_v41 = vadd.f32 %v851_v50, %v373_v39  ;;  %v437_v42 = vpop.f32.mrf.mxu1 }
  0xe7   : > { %522 = vst.msk [vmem:[%s859_s26 + $0xa8] sm:$0xff] %vm500_vm2, %v489_v37  ;;  %v494_v43 = vmax.f32 %v446_v38, 0.0  ;;  %v438_v44 = vadd.f32 %v851_v50, %v437_v42  ;;  %v676_v45 = vpop.f32.mrf.mxu0 }
  0xe8   : > { %511 = vst.msk [vmem:[%s859_s26 + $0x50] sm:$0xff] %vm500_vm2, %v478_v40  ;;  %v476_v46 = vmax.f32 %v374_v41, 0.0  ;;  %v385_v47 = vadd.f32 %v676_v45, %v851_v50  ;;  %v692_v48 = vpop.f32.mrf.mxu1 }
  0xe9   : > { %527 = vst.msk [vmem:[%s859_s26 + $0xd0] sm:$0xff] %vm500_vm2, %v494_v43  ;;  %v492_v49 = vmax.f32 %v438_v44, 0.0  ;;  %v449_v51 = vadd.f32 %v692_v48, %v851_v50  ;;  %v376_v52 = vpop.f32.mrf.mxu0 }
  0xea   : > { %509 = vst.msk [vmem:[%s859_s26 + $0x40] sm:$0xff] %vm500_vm2, %v476_v46  ;;  %v479_v53 = vmax.f32 %v385_v47, 0.0  ;;  %v377_v54 = vadd.f32 %v851_v50, %v376_v52  ;;  %v440_v55 = vpop.f32.mrf.mxu1 }
  0xeb   : > { %525 = vst.msk [vmem:[%s859_s26 + $0xc0] sm:$0xff] %vm500_vm2, %v492_v49  ;;  %v495_v56 = vmax.f32 %v449_v51, 0.0  ;;  %v441_v57 = vadd.f32 %v851_v50, %v440_v55  ;;  %v679_v58 = vpop.f32.mrf.mxu0 }
  0xec   : > { %512 = vst.msk [vmem:[%s859_s26 + $0x58] sm:$0xff] %vm500_vm2, %v479_v53  ;;  %v477_v59 = vmax.f32 %v377_v54, 0.0  ;;  %v398_v60 = vadd.f32 %v679_v58, %v851_v50  ;;  %v695_v61 = vpop.f32.mrf.mxu1 }
  0xed   : > { %528 = vst.msk [vmem:[%s859_s26 + $0xd8] sm:$0xff] %vm500_vm2, %v495_v56  ;;  %v493_v62 = vmax.f32 %v441_v57, 0.0  ;;  %v462_v63 = vadd.f32 %v695_v61, %v851_v50  ;;  %v389_v0 = vpop.f32.mrf.mxu0 }
  0xee   : > { %510 = vst.msk [vmem:[%s859_s26 + $0x48] sm:$0xff] %vm500_vm2, %v477_v59  ;;  %v482_v1 = vmax.f32 %v398_v60, 0.0  ;;  %v390_v2 = vadd.f32 %v851_v50, %v389_v0  ;;  %v453_v3 = vpop.f32.mrf.mxu1 }
  0xef   : > { %526 = vst.msk [vmem:[%s859_s26 + $0xc8] sm:$0xff] %vm500_vm2, %v493_v62  ;;  %v498_v4 = vmax.f32 %v462_v63, 0.0  ;;  %v454_v5 = vadd.f32 %v851_v50, %v453_v3  ;;  %v680_v6 = vpop.f32.mrf.mxu0 }
  0xf0   : > { %515 = vst.msk [vmem:[%s859_s26 + $0x70] sm:$0xff] %vm500_vm2, %v482_v1  ;;  %v480_v7 = vmax.f32 %v390_v2, 0.0  ;;  %v401_v8 = vadd.f32 %v680_v6, %v851_v50  ;;  %v696_v9 = vpop.f32.mrf.mxu1 }
  0xf1   : > { %531 = vst.msk [vmem:[%s859_s26 + $0xf0] sm:$0xff] %vm500_vm2, %v498_v4  ;;  %v496_v10 = vmax.f32 %v454_v5, 0.0  ;;  %v465_v11 = vadd.f32 %v696_v9, %v851_v50  ;;  %v392_v12 = vpop.f32.mrf.mxu0 }
  0xf2   : > { %513 = vst.msk [vmem:[%s859_s26 + $0x60] sm:$0xff] %vm500_vm2, %v480_v7  ;;  %v483_v13 = vmax.f32 %v401_v8, 0.0  ;;  %v393_v14 = vadd.f32 %v851_v50, %v392_v12  ;;  %v456_v15 = vpop.f32.mrf.mxu1 }
  0xf3   : > { %529 = vst.msk [vmem:[%s859_s26 + $0xe0] sm:$0xff] %vm500_vm2, %v496_v10  ;;  %v499_v16 = vmax.f32 %v465_v11, 0.0  ;;  %v457_v17 = vadd.f32 %v851_v50, %v456_v15 }
  0xf4   : > { %516 = vst.msk [vmem:[%s859_s26 + $0x78] sm:$0xff] %vm500_vm2, %v483_v13  ;;  %v481_v18 = vmax.f32 %v393_v14, 0.0 }
  0xf5   : > { %532 = vst.msk [vmem:[%s859_s26 + $0xf8] sm:$0xff] %vm500_vm2, %v499_v16  ;;  %v497_v19 = vmax.f32 %v457_v17, 0.0 }
  0xf6   : > { %514 = vst.msk [vmem:[%s859_s26 + $0x68] sm:$0xff] %vm500_vm2, %v481_v18 }
  0xf7   : > { %530 = vst.msk [vmem:[%s859_s26 + $0xe8] sm:$0xff] %vm500_vm2, %v497_v19 }
  0xf8 PF: > { %s13_s14 = sadd.s32 1, %s747_s14   ;;  %s969_s12 = smov %s743_s13 }
  0xf9   : > { %p10_p5 = scmp.ge.s32.totalorder %s13_s14, 4   ;;  %s970_s13 = smov %s972_s15 }
  0xfb   :  { %12 = sbr.rel (!%p10_p5) target bundleno = 2 (0x2), region = 63 }

// kernel: _lambda_.13
= control target key start
LH: loop header
LB: loop body
LE: loop exit
PB: predicated region body
PF: predicated region fallthrough
CT: control target
= control target key end

     0   :  { %s3877_s12 = smov 0   ;;  %s3879_s13 = smov 0   ;;  %s5036_s0 = inlined_call_operand.vmem [shape: f32[2,18,18,4], index: 0, kind: input, shape index: {}]   ;;  %s5037_s1 = inlined_call_operand.vmem [shape: bf16[9,4,4], index: 1, kind: input, shape index: {}]   ;;  %s5038_s2 = inlined_call_operand.vmem [shape: f32[1,4], index: 2, kind: input, shape index: {}]   ;;  %s5039_s3 = inlined_call_operand.vmem [shape: f32[2,256,4], index: 3, kind: output, shape index: {}]  }
   0x1   :  { %s3881_s14 = smov 0  }
   0x2 LB: > { %s25_s15 = sadd.s32 1, %s3851_s13  ;;  %p2985_p0 = scmp.ge.s32.totalorder %s3855_s14, 1  ;;  %s3855_s14 = sphi %s3881_s14, %s13_s14   ;;  %s3851_s13 = sphi %s3879_s13, %s5123_s13   ;;  %s3847_s12 = sphi %s3877_s12, %s5122_s12  }
   0x3   : > { %p27_p1 = scmp.ge.s32.totalorder %s25_s15, 2  ;;  %p151_p2 = scmp.lt.s32.totalorder %s3855_s14, 3 }
   0x5   : > { %s5125_s15 = smov (%p27_p1, %s25_s15), 0  ;;  %p152_p3 = pnand %p2985_p0, %p151_p2 }
   0x7   : > { %155 = sbr.rel (%p152_p3) target bundleno = 512 (0x200), region = 32 }
   0xc   : > { %v2989_v0 = vld [vmem:[%s5037_s1 + $0x2] sm:$0x3]  ;;  %vm346_vm0 = vcmask 1041408   ;;  %p179_p4 = scmp.lt.s32.totalorder %s3847_s12, 1  ;;  %v246_v2 = vld [vmem:[%s5037_s1] sm:$0x3] }
   0xd   : > { %3799 = vmatprep.subr.msk.bf16.mxu1 %vm346_vm0, %v2989_v0  ;;  %3798 = vmatprep.subr.msk.bf16.mxu0 %vm346_vm0, %v2989_v0  ;;  %v348_v1 = vsel %vm346_vm0, %v2989_v0, 0  ;;  %v3022_v3 = vld [vmem:[%s5037_s1 + $0x4] sm:$0x3]  ;;  %vm297_vm1 = vcmask 31744   ;;  %v560_v18 = vsel %vm346_vm0, %v246_v2, 0 }
   0xe   : > { %3797 = vmatpush3.bf16.msra.mxu1 %v348_v1  ;;  %3491 = vmatpush3.bf16.msra.mxu0 %v348_v1  ;;  %s5127_s12 = smov (!%p179_p4, %s3847_s12), 1  ;;  %v822_v15 = vsel %vm346_vm0, %v3022_v3, 0  ;;  %v3949_v24 = vld [vmem:[%s5037_s1 + $0x6] sm:$0x3]  ;;  %v3954_v25 = vld [vmem:[%s5037_s1 + $0x8] sm:$0x3] }
   0xf   : > { %3800 = vmatprep.subr.msk.bf16.mxu1 %vm346_vm0, %v246_v2  ;;  %3801 = vmatprep.subr.msk.bf16.mxu0 %vm346_vm0, %v3022_v3  ;;  %s3808_s22 = smul.u32 432, %s5127_s12  ;;  %s3336_s17 = sshll.u32 %s5127_s12, 8 }
  0x10   : > { %s4853_s19 = scalar_lea.vmem %s5039_s3, %s3336_s17 }
  0x11   : > { %s3915_s25 = scalar_lea.vmem %s5036_s0, %s3808_s22 }
  0x12   : > { %v247_v4 = vld [vmem:[%s3915_s25 + $0x1] sm:$0xff]  ;;  %v248_v5 = vld [vmem:[%s3915_s25 + $0x9] sm:$0xff]  ;;  %v249_v9 = vld [vmem:[%s3915_s25 + $0x19] sm:$0xff] }
  0x13   : > { %v263_v6 = vld [vmem:[%s3915_s25 + $0xc1] sm:$0xff]  ;;  %v279_v7 = vpack.c.bf16 %v248_v5, %v247_v4  ;;  %v264_v8 = vld [vmem:[%s3915_s25 + $0xc9] sm:$0xff]  ;;  %v265_v13 = vld [vmem:[%s3915_s25 + $0xd9] sm:$0xff] }
  0x14   : > { %v250_v10 = vld [vmem:[%s3915_s25 + $0x21] sm:$0xff]  ;;  %v3923_v11 = vpack.c.bf16 %v264_v8, %v263_v6  ;;  %v251_v16 = vld [vmem:[%s3915_s25 + $0x31] sm:$0xff]  ;;  %v252_v19 = vld [vmem:[%s3915_s25 + $0x39] sm:$0xff]  ;;  %v1413_v8 = vsel %vm346_vm0, %v3954_v25, 0 }
  0x15   : > { %v3925_v12 = vpack.c.bf16 %v250_v10, %v249_v9  ;;  %v266_v14 = vld [vmem:[%s3915_s25 + $0xe1] sm:$0xff]  ;;  %3492 = vmatprep.mubr.msk.bf16.mxu0 %vm297_vm1, %v279_v7  ;;  %v267_v20 = vld [vmem:[%s3915_s25 + $0xf1] sm:$0xff]  ;;  %v268_v21 = vld [vmem:[%s3915_s25 + $0xf9] sm:$0xff]  ;;  %v3942_v22 = vpack.c.bf16 %v252_v19, %v251_v16  ;;  %v1119_v10 = vsel %vm346_vm0, %v3949_v24, 0 }
  0x16   : > { %v3932_v17 = vpack.c.bf16 %v266_v14, %v265_v13  ;;  %3508 = vmatprep.mubr.msk.bf16.mxu1 %vm297_vm1, %v3923_v11  ;;  %v3944_v23 = vpack.c.bf16 %v268_v21, %v267_v20  ;;  %v253_v26 = vld [vmem:[%s3915_s25 + $0x49] sm:$0xff]  ;;  %v254_v27 = vld [vmem:[%s3915_s25 + $0x51] sm:$0xff]  ;;  %v255_v30 = vld [vmem:[%s3915_s25 + $0x61] sm:$0xff] }
  0x17   : > { %3493 = vmatmul.mubr.msk.bf16.vlgmr.msra.gmra.mxu0 %vm297_vm1, %v3925_v12  ;;  %v269_v28 = vld [vmem:[%s3915_s25 + $0x109] sm:$0xff]  ;;  %v270_v29 = vld [vmem:[%s3915_s25 + $0x111] sm:$0xff]  ;;  %v271_v32 = vld [vmem:[%s3915_s25 + $0x121] sm:$0xff]  ;;  %v3972_v34 = vpack.c.bf16 %v254_v27, %v253_v26 }
  0x18   : > { %3509 = vmatmul.mubr.msk.bf16.vlgmr.msra.gmra.mxu1 %vm297_vm1, %v3932_v17  ;;  %3559 = vmatpush3.bf16.msra.mxu0 %v822_v15  ;;  %v256_v31 = vld [vmem:[%s3915_s25 + $0x69] sm:$0xff]  ;;  %v3976_v35 = vpack.c.bf16 %v270_v29, %v269_v28  ;;  %v257_v38 = vld [vmem:[%s3915_s25 + $0x79] sm:$0xff]  ;;  %v258_v39 = vld [vmem:[%s3915_s25 + $0x81] sm:$0xff] }
  0x19   : > { %3525 = vmatpush3.bf16.msra.mxu1 %v560_v18  ;;  %3496 = vmatprep.mubr.msk.bf16.mxu0 %vm297_vm1, %v3942_v22  ;;  %v272_v33 = vld [vmem:[%s3915_s25 + $0x129] sm:$0xff]  ;;  %v3978_v36 = vpack.c.bf16 %v256_v31, %v255_v30  ;;  %v273_v40 = vld [vmem:[%s3915_s25 + $0x139] sm:$0xff]  ;;  %v274_v41 = vld [vmem:[%s3915_s25 + $0x141] sm:$0xff]  ;;  %v3998_v46 = vpack.c.bf16 %v258_v39, %v257_v38 }
  0x1a   : > { %3512 = vmatprep.mubr.msk.bf16.mxu1 %vm297_vm1, %v3944_v23  ;;  %3802 = vmatprep.subr.msk.bf16.mxu1 %vm346_vm0, %v3949_v24  ;;  %v3980_v37 = vpack.c.bf16 %v272_v33, %v271_v32  ;;  %v259_v42 = vld [vmem:[%s3915_s25 + $0x91] sm:$0xff]  ;;  %v260_v43 = vld [vmem:[%s3915_s25 + $0x99] sm:$0xff]  ;;  %v4000_v47 = vpack.c.bf16 %v274_v41, %v273_v40  ;;  %v261_v50 = vld [vmem:[%s3915_s25 + $0xa9] sm:$0xff] }
  0x1b   : > { %3803 = vmatprep.subr.msk.bf16.mxu0 %vm346_vm0, %v3954_v25  ;;  %v275_v44 = vld [vmem:[%s3915_s25 + $0x151] sm:$0xff]  ;;  %v276_v45 = vld [vmem:[%s3915_s25 + $0x159] sm:$0xff]  ;;  %v4002_v48 = vpack.c.bf16 %v260_v43, %v259_v42  ;;  %v277_v52 = vld [vmem:[%s3915_s25 + $0x169] sm:$0xff] }
  0x1c   : > { %v4004_v49 = vpack.c.bf16 %v276_v45, %v275_v44  ;;  %v262_v51 = vld [vmem:[%s3915_s25 + $0xb1] sm:$0xff]  ;;  %v723_v54 = vld [vmem:[%s3915_s25 + $0x2] sm:$0xff]  ;;  %v725_v62 = vld [vmem:[%s3915_s25 + $0x1a] sm:$0xff] }
  0x1d   : > { %v278_v53 = vld [vmem:[%s3915_s25 + $0x171] sm:$0xff]  ;;  %v198_v56 = vld [vmem:[%s3915_s25] sm:$0xff]  ;;  %v199_v57 = vld [vmem:[%s3915_s25 + $0x8] sm:$0xff]  ;;  %v4022_v58 = vpack.c.bf16 %v262_v51, %v261_v50 }
  0x1e   : > { %v724_v55 = vld [vmem:[%s3915_s25 + $0xa] sm:$0xff]  ;;  %v4024_v59 = vpack.c.bf16 %v278_v53, %v277_v52  ;;  %v230_v61 = vpack.c.bf16 %v199_v57, %v198_v56  ;;  %v726_v63 = vld [vmem:[%s3915_s25 + $0x22] sm:$0xff]  ;;  %v200_v0 = vld [vmem:[%s3915_s25 + $0x18] sm:$0xff] }
  0x1f   : > { %3497 = vmatmul.mubr.msk.bf16.gmra.mxu0 %vm297_vm1, %v3972_v34  ;;  %v755_v60 = vpack.c.bf16 %v724_v55, %v723_v54  ;;  %v201_v1 = vld [vmem:[%s3915_s25 + $0x20] sm:$0xff]  ;;  %v202_v2 = vld [vmem:[%s3915_s25 + $0x30] sm:$0xff]  ;;  %v203_v3 = vld [vmem:[%s3915_s25 + $0x38] sm:$0xff]  ;;  %v4038_v4 = vpack.c.bf16 %v726_v63, %v725_v62 }
  0x20   : > { %3513 = vmatmul.mubr.msk.bf16.gmra.mxu1 %vm297_vm1, %v3976_v35  ;;  %3500 = vmatprep.mubr.msk.bf16.mxu0 %vm297_vm1, %v3978_v36  ;;  %v727_v5 = vld [vmem:[%s3915_s25 + $0x32] sm:$0xff]  ;;  %v728_v6 = vld [vmem:[%s3915_s25 + $0x3a] sm:$0xff]  ;;  %v4042_v7 = vpack.c.bf16 %v201_v1, %v200_v0  ;;  %v4046_v9 = vpack.c.bf16 %v203_v3, %v202_v2  ;;  %v4057_v14 = vld [vmem:[%s5037_s1 + $0xa] sm:$0x3] }
  0x21   : > { %3516 = vmatprep.mubr.msk.bf16.mxu1 %vm297_vm1, %v3980_v37  ;;  %v4050_v13 = vpack.c.bf16 %v728_v6, %v727_v5  ;;  %v4062_v15 = vld [vmem:[%s5037_s1 + $0xc] sm:$0x3]  ;;  %v730_v19 = vld [vmem:[%s3915_s25 + $0x52] sm:$0xff]  ;;  %v731_v21 = vld [vmem:[%s3915_s25 + $0x62] sm:$0xff] }
  0x22   : > { %v204_v16 = vld [vmem:[%s3915_s25 + $0x48] sm:$0xff]  ;;  %v205_v20 = vld [vmem:[%s3915_s25 + $0x50] sm:$0xff]  ;;  %v206_v25 = vld [vmem:[%s3915_s25 + $0x60] sm:$0xff] }
  0x23   : > { %v729_v18 = vld [vmem:[%s3915_s25 + $0x4a] sm:$0xff]  ;;  %v4084_v28 = vpack.c.bf16 %v205_v20, %v204_v16  ;;  %v208_v31 = vld [vmem:[%s3915_s25 + $0x78] sm:$0xff]  ;;  %v734_v33 = vld [vmem:[%s3915_s25 + $0x82] sm:$0xff] }
  0x24   : > { %v732_v24 = vld [vmem:[%s3915_s25 + $0x6a] sm:$0xff]  ;;  %v4080_v27 = vpack.c.bf16 %v730_v19, %v729_v18  ;;  %v733_v32 = vld [vmem:[%s3915_s25 + $0x7a] sm:$0xff]  ;;  %v735_v39 = vld [vmem:[%s3915_s25 + $0x92] sm:$0xff] }
  0x25   : > { %v207_v26 = vld [vmem:[%s3915_s25 + $0x68] sm:$0xff]  ;;  %v4086_v29 = vpack.c.bf16 %v732_v24, %v731_v21  ;;  %v209_v38 = vld [vmem:[%s3915_s25 + $0x80] sm:$0xff]  ;;  %v210_v41 = vld [vmem:[%s3915_s25 + $0x90] sm:$0xff]  ;;  %v4106_v43 = vpack.c.bf16 %v734_v33, %v733_v32 }
  0x26   : > { %v4088_v30 = vpack.c.bf16 %v207_v26, %v206_v25  ;;  %v736_v40 = vld [vmem:[%s3915_s25 + $0x9a] sm:$0xff]  ;;  %v4108_v44 = vpack.c.bf16 %v209_v38, %v208_v31  ;;  %v212_v51 = vld [vmem:[%s3915_s25 + $0xa8] sm:$0xff]  ;;  %v738_v53 = vld [vmem:[%s3915_s25 + $0xb2] sm:$0xff] }
  0x27   : > { %3501 = vmatmul.mubr.msk.bf16.gmra.mxu0 %vm297_vm1, %v3998_v46  ;;  %v211_v42 = vld [vmem:[%s3915_s25 + $0x98] sm:$0xff]  ;;  %v4110_v45 = vpack.c.bf16 %v736_v40, %v735_v39  ;;  %v737_v52 = vld [vmem:[%s3915_s25 + $0xaa] sm:$0xff]  ;;  %v739_v55 = vld [vmem:[%s3915_s25 + $0xc2] sm:$0xff] }
  0x28   : > { %3517 = vmatmul.mubr.msk.bf16.gmra.mxu1 %vm297_vm1, %v4000_v47  ;;  %3504 = vmatprep.mubr.msk.bf16.mxu0 %vm297_vm1, %v4002_v48  ;;  %v4112_v50 = vpack.c.bf16 %v211_v42, %v210_v41  ;;  %v213_v54 = vld [vmem:[%s3915_s25 + $0xb0] sm:$0xff]  ;;  %v214_v57 = vld [vmem:[%s3915_s25 + $0xc0] sm:$0xff]  ;;  %v216_v1 = vld [vmem:[%s3915_s25 + $0xd8] sm:$0xff] }
  0x29   : > { %3520 = vmatprep.mubr.msk.bf16.mxu1 %vm297_vm1, %v4004_v49  ;;  %v740_v56 = vld [vmem:[%s3915_s25 + $0xca] sm:$0xff]  ;;  %v4132_v62 = vpack.c.bf16 %v213_v54, %v212_v51  ;;  %v741_v2 = vld [vmem:[%s3915_s25 + $0xda] sm:$0xff]  ;;  %v742_v3 = vld [vmem:[%s3915_s25 + $0xe2] sm:$0xff] }
  0x2a   : > { %v4134_v63 = vpack.c.bf16 %v740_v56, %v739_v55  ;;  %v217_v5 = vld [vmem:[%s3915_s25 + $0xe0] sm:$0xff]  ;;  %v743_v6 = vld [vmem:[%s3915_s25 + $0xf2] sm:$0xff]  ;;  %v4154_v18 = vpack.c.bf16 %v742_v3, %v741_v2  ;;  %v220_v24 = vld [vmem:[%s3915_s25 + $0x108] sm:$0xff] }
  0x2b   : > { %v219_v16 = vld [vmem:[%s3915_s25 + $0xf8] sm:$0xff]  ;;  %v4156_v19 = vpack.c.bf16 %v217_v5, %v216_v1  ;;  %v745_v25 = vld [vmem:[%s3915_s25 + $0x10a] sm:$0xff]  ;;  %v747_v32 = vld [vmem:[%s3915_s25 + $0x122] sm:$0xff] }
  0x2c   : > { %v746_v26 = vld [vmem:[%s3915_s25 + $0x112] sm:$0xff]  ;;  %v748_v33 = vld [vmem:[%s3915_s25 + $0x12a] sm:$0xff]  ;;  %v222_v38 = vld [vmem:[%s3915_s25 + $0x120] sm:$0xff] }
  0x2d   : > { %v221_v31 = vld [vmem:[%s3915_s25 + $0x110] sm:$0xff]  ;;  %v223_v39 = vld [vmem:[%s3915_s25 + $0x128] sm:$0xff]  ;;  %v4178_v40 = vpack.c.bf16 %v746_v26, %v745_v25  ;;  %v4182_v42 = vpack.c.bf16 %v748_v33, %v747_v32  ;;  %v225_v55 = vld [vmem:[%s3915_s25 + $0x140] sm:$0xff]  ;;  %v1707_v32 = vsel %vm346_vm0, %v4057_v14, 0 }
  0x2e   : > { %v4180_v41 = vpack.c.bf16 %v221_v31, %v220_v24  ;;  %v4184_v51 = vpack.c.bf16 %v223_v39, %v222_v38  ;;  %v750_v54 = vld [vmem:[%s3915_s25 + $0x142] sm:$0xff]  ;;  %v751_v56 = vld [vmem:[%s3915_s25 + $0x152] sm:$0xff]  ;;  %v2004_v31 = vsel %vm346_vm0, %v4062_v15, 0  ;;  %v3267_v33 = vld [vmem:[%s5037_s1 + $0xe] sm:$0x3] }
  0x2f   : > { %3505 = vmatmul.mubr.msk.bf16.gmra.mxu0 %vm297_vm1, %v4022_v58  ;;  %v227_v1 = vld [vmem:[%s3915_s25 + $0x158] sm:$0xff]  ;;  %v229_v24 = vld [vmem:[%s3915_s25 + $0x170] sm:$0xff] }
  0x30   : > { %3521 = vmatmul.mubr.msk.bf16.gmra.mxu1 %vm297_vm1, %v4024_v59  ;;  %3560 = vmatprep.mubr.msk.bf16.mxu0 %vm297_vm1, %v755_v60  ;;  %v215_v60 = vld [vmem:[%s3915_s25 + $0xc8] sm:$0xff] }
  0x31   : > { %3526 = vmatprep.mubr.msk.bf16.mxu1 %vm297_vm1, %v230_v61  ;;  %v4130_v61 = vpack.c.bf16 %v738_v53, %v737_v52  ;;  %v4136_v0 = vpack.c.bf16 %v215_v60, %v214_v57  ;;  %v224_v52 = vld [vmem:[%s3915_s25 + $0x138] sm:$0xff]  ;;  %v226_v60 = vld [vmem:[%s3915_s25 + $0x150] sm:$0xff] }
  0x32   : > { %v749_v53 = vld [vmem:[%s3915_s25 + $0x13a] sm:$0xff]  ;;  %v4204_v3 = vpack.c.bf16 %v225_v55, %v224_v52  ;;  %v3168_v55 = vld [vmem:[%s3915_s25 + $0x18a] sm:$0xff] }
  0x33   : > { %v752_v57 = vld [vmem:[%s3915_s25 + $0x15a] sm:$0xff]  ;;  %v4202_v2 = vpack.c.bf16 %v750_v54, %v749_v53  ;;  %v3167_v54 = vld [vmem:[%s3915_s25 + $0x182] sm:$0xff] }
  0x34   : > { %v4206_v5 = vpack.c.bf16 %v752_v57, %v751_v56  ;;  %v3217_v52 = vld [vmem:[%s3915_s25 + $0x1a0] sm:$0xff] }
  0x37   : > { %3561 = vmatmul.mubr.msk.bf16.vlgmr.msra.gmra.mxu0 %vm297_vm1, %v4038_v4 }
  0x38   : > { %3527 = vmatmul.mubr.msk.bf16.vlgmr.msra.gmra.mxu1 %vm297_vm1, %v4042_v7  ;;  %3627 = vmatpush3.bf16.msra.mxu0 %v1413_v8  ;;  %v744_v8 = vld [vmem:[%s3915_s25 + $0xfa] sm:$0xff] }
  0x39   : > { %3593 = vmatpush3.bf16.msra.mxu1 %v1119_v10  ;;  %3530 = vmatprep.mubr.msk.bf16.mxu1 %vm297_vm1, %v4046_v9  ;;  %v218_v10 = vld [vmem:[%s3915_s25 + $0xf0] sm:$0xff]  ;;  %v4158_v20 = vpack.c.bf16 %v744_v8, %v743_v6  ;;  %v4208_v6 = vpack.c.bf16 %v227_v1, %v226_v60 }
  0x3a   : > { %3564 = vmatprep.mubr.msk.bf16.mxu0 %vm297_vm1, %v4050_v13  ;;  %3804 = vmatprep.subr.msk.bf16.mxu1 %vm346_vm0, %v4057_v14  ;;  %v4160_v21 = vpack.c.bf16 %v219_v16, %v218_v10  ;;  %v753_v8 = vld [vmem:[%s3915_s25 + $0x16a] sm:$0xff]  ;;  %v754_v10 = vld [vmem:[%s3915_s25 + $0x172] sm:$0xff] }
  0x3b   : > { %3805 = vmatprep.subr.msk.bf16.mxu0 %vm346_vm0, %v4062_v15  ;;  %v228_v16 = vld [vmem:[%s3915_s25 + $0x168] sm:$0xff]  ;;  %v4222_v25 = vpack.c.bf16 %v754_v10, %v753_v8 }
  0x3c   : > { %v4224_v26 = vpack.c.bf16 %v229_v24, %v228_v16 }
  0x3f   : > { %3565 = vmatmul.mubr.msk.bf16.gmra.mxu0 %vm297_vm1, %v4080_v27 }
  0x40   : > { %3531 = vmatmul.mubr.msk.bf16.gmra.mxu1 %vm297_vm1, %v4084_v28  ;;  %3568 = vmatprep.mubr.msk.bf16.mxu0 %vm297_vm1, %v4086_v29 }
  0x41   : > { %3534 = vmatprep.mubr.msk.bf16.mxu1 %vm297_vm1, %v4088_v30 }
  0x47   : > { %3569 = vmatmul.mubr.msk.bf16.gmra.mxu0 %vm297_vm1, %v4106_v43 }
  0x48   : > { %3535 = vmatmul.mubr.msk.bf16.gmra.mxu1 %vm297_vm1, %v4108_v44  ;;  %3572 = vmatprep.mubr.msk.bf16.mxu0 %vm297_vm1, %v4110_v45 }
  0x49   : > { %3538 = vmatprep.mubr.msk.bf16.mxu1 %vm297_vm1, %v4112_v50 }
  0x4f   : > { %3573 = vmatmul.mubr.msk.bf16.gmra.mxu0 %vm297_vm1, %v4130_v61 }
  0x50   : > { %3539 = vmatmul.mubr.msk.bf16.gmra.mxu1 %vm297_vm1, %v4132_v62  ;;  %3576 = vmatprep.mubr.msk.bf16.mxu0 %vm297_vm1, %v4134_v63 }
  0x51   : > { %3542 = vmatprep.mubr.msk.bf16.mxu1 %vm297_vm1, %v4136_v0 }
  0x57   : > { %3577 = vmatmul.mubr.msk.bf16.gmra.mxu0 %vm297_vm1, %v4154_v18 }
  0x58   : > { %3543 = vmatmul.mubr.msk.bf16.gmra.mxu1 %vm297_vm1, %v4156_v19  ;;  %3580 = vmatprep.mubr.msk.bf16.mxu0 %vm297_vm1, %v4158_v20 }
  0x59   : > { %3546 = vmatprep.mubr.msk.bf16.mxu1 %vm297_vm1, %v4160_v21 }
  0x5f   : > { %3581 = vmatmul.mubr.msk.bf16.gmra.mxu0 %vm297_vm1, %v4178_v40 }
  0x60   : > { %3547 = vmatmul.mubr.msk.bf16.gmra.mxu1 %vm297_vm1, %v4180_v41  ;;  %3584 = vmatprep.mubr.msk.bf16.mxu0 %vm297_vm1, %v4182_v42 }
  0x61   : > { %3550 = vmatprep.mubr.msk.bf16.mxu1 %vm297_vm1, %v4184_v51 }
  0x67   : > { %3585 = vmatmul.mubr.msk.bf16.gmra.mxu0 %vm297_vm1, %v4202_v2 }
  0x68   : > { %3551 = vmatmul.mubr.msk.bf16.gmra.mxu1 %vm297_vm1, %v4204_v3  ;;  %3588 = vmatprep.mubr.msk.bf16.mxu0 %vm297_vm1, %v4206_v5 }
  0x69   : > { %3554 = vmatprep.mubr.msk.bf16.mxu1 %vm297_vm1, %v4208_v6 }
  0x6f   : > { %3589 = vmatmul.mubr.msk.bf16.gmra.mxu0 %vm297_vm1, %v4222_v25 }
  0x70   : > { %3555 = vmatmul.mubr.msk.bf16.gmra.mxu1 %vm297_vm1, %v4224_v26  ;;  %3628 = vmatprep.mubr.msk.bf16.mxu0 %vm297_vm1, %v3925_v12  ;;  %v3316_v12 = vld [vmem:[%s5037_s1 + $0x10] sm:$0x3] }
  0x71   : > { %3594 = vmatprep.mubr.msk.bf16.mxu1 %vm297_vm1, %v4042_v7 }
  0x77   : > { %3629 = vmatmul.mubr.msk.bf16.vlgmr.msra.gmra.mxu0 %vm297_vm1, %v3942_v22 }
  0x78   : > { %3595 = vmatmul.mubr.msk.bf16.vlgmr.msra.gmra.mxu1 %vm297_vm1, %v4046_v9  ;;  %3695 = vmatpush3.bf16.msra.mxu0 %v2004_v31 }
  0x79   : > { %3661 = vmatpush3.bf16.msra.mxu1 %v1707_v32  ;;  %3598 = vmatprep.mubr.msk.bf16.mxu1 %vm297_vm1, %v4084_v28 }
  0x7a   : > { %3632 = vmatprep.mubr.msk.bf16.mxu0 %vm297_vm1, %v3972_v34  ;;  %3806 = vmatprep.subr.msk.bf16.mxu1 %vm346_vm0, %v3267_v33 }
  0x7b   : > { %3807 = vmatprep.subr.msk.bf16.mxu0 %vm346_vm0, %v3316_v12 }
  0x7f   : > { %3633 = vmatmul.mubr.msk.bf16.gmra.mxu0 %vm297_vm1, %v3978_v36 }
  0x80   : > { %3599 = vmatmul.mubr.msk.bf16.gmra.mxu1 %vm297_vm1, %v4088_v30  ;;  %3636 = vmatprep.mubr.msk.bf16.mxu0 %vm297_vm1, %v3998_v46 }
  0x81   : > { %3602 = vmatprep.mubr.msk.bf16.mxu1 %vm297_vm1, %v4108_v44 }
  0x87   : > { %3637 = vmatmul.mubr.msk.bf16.gmra.mxu0 %vm297_vm1, %v4002_v48  ;;  %v2592_v48 = vsel %vm346_vm0, %v3316_v12, 0 }
  0x88   : > { %3603 = vmatmul.mubr.msk.bf16.gmra.mxu1 %vm297_vm1, %v4112_v50  ;;  %3640 = vmatprep.mubr.msk.bf16.mxu0 %vm297_vm1, %v4022_v58 }
  0x89   : > { %3606 = vmatprep.mubr.msk.bf16.mxu1 %vm297_vm1, %v4132_v62 }
  0x8f   : > { %3641 = vmatmul.mubr.msk.bf16.gmra.mxu0 %vm297_vm1, %v3923_v11  ;;  %v3118_v11 = vld [vmem:[%s3915_s25 + $0x181] sm:$0xff] }
  0x90   : > { %3607 = vmatmul.mubr.msk.bf16.gmra.mxu1 %vm297_vm1, %v4136_v0  ;;  %3644 = vmatprep.mubr.msk.bf16.mxu0 %vm297_vm1, %v3932_v17  ;;  %v3119_v17 = vld [vmem:[%s3915_s25 + $0x189] sm:$0xff] }
  0x91   : > { %3610 = vmatprep.mubr.msk.bf16.mxu1 %vm297_vm1, %v4156_v19 }
  0x97   : > { %3645 = vmatmul.mubr.msk.bf16.gmra.mxu0 %vm297_vm1, %v3944_v23  ;;  %v3069_v23 = vld [vmem:[%s3915_s25 + $0x180] sm:$0xff] }
  0x98   : > { %3611 = vmatmul.mubr.msk.bf16.gmra.mxu1 %vm297_vm1, %v4160_v21  ;;  %3648 = vmatprep.mubr.msk.bf16.mxu0 %vm297_vm1, %v3976_v35  ;;  %v3070_v35 = vld [vmem:[%s3915_s25 + $0x188] sm:$0xff] }
  0x99   : > { %3614 = vmatprep.mubr.msk.bf16.mxu1 %vm297_vm1, %v4180_v41 }
  0x9f   : > { %3649 = vmatmul.mubr.msk.bf16.gmra.mxu0 %vm297_vm1, %v3980_v37  ;;  %v4306_v37 = vpack.c.bf16 %v3119_v17, %v3118_v11 }
  0xa0   : > { %3615 = vmatmul.mubr.msk.bf16.gmra.mxu1 %vm297_vm1, %v4184_v51  ;;  %3652 = vmatprep.mubr.msk.bf16.mxu0 %vm297_vm1, %v4000_v47  ;;  %v1067_v47 = vpack.c.bf16 %v3070_v35, %v3069_v23  ;;  %v3243_v23 = vld [vmem:[%s3915_s25 + $0x91] sm:$0xff]  ;;  %v3244_v35 = vld [vmem:[%s3915_s25 + $0x99] sm:$0xff] }
  0xa1   : > { %3618 = vmatprep.mubr.msk.bf16.mxu1 %vm297_vm1, %v4204_v3 }
  0xa7   : > { %3653 = vmatmul.mubr.msk.bf16.gmra.mxu0 %vm297_vm1, %v4004_v49  ;;  %v2298_v49 = vsel %vm346_vm0, %v3267_v33, 0 }
  0xa8   : > { %3619 = vmatmul.mubr.msk.bf16.gmra.mxu1 %vm297_vm1, %v4208_v6  ;;  %3656 = vmatprep.mubr.msk.bf16.mxu0 %vm297_vm1, %v4024_v59 }
  0xa9   : > { %3622 = vmatprep.mubr.msk.bf16.mxu1 %vm297_vm1, %v4224_v26 }
  0xaf   : > { %3657 = vmatmul.mubr.msk.bf16.gmra.mxu0 %vm297_vm1, %v4306_v37 }
  0xb0   : > { %3623 = vmatmul.mubr.msk.bf16.gmra.mxu1 %vm297_vm1, %v1067_v47  ;;  %3696 = vmatprep.mubr.msk.bf16.mxu0 %vm297_vm1, %v4046_v9 }
  0xb1   : > { %3662 = vmatprep.mubr.msk.bf16.mxu1 %vm297_vm1, %v4038_v4 }
  0xb7   : > { %3697 = vmatmul.mubr.msk.bf16.vlgmr.msra.gmra.mxu0 %vm297_vm1, %v4084_v28 }
  0xb8   : > { %3663 = vmatmul.mubr.msk.bf16.vlgmr.msra.gmra.mxu1 %vm297_vm1, %v4050_v13  ;;  %3763 = vmatpush3.bf16.msra.mxu0 %v2592_v48 }
  0xb9   : > { %3729 = vmatpush3.bf16.msra.mxu1 %v2298_v49  ;;  %3666 = vmatprep.mubr.msk.bf16.mxu1 %vm297_vm1, %v4080_v27 }
  0xba   : > { %3700 = vmatprep.mubr.msk.bf16.mxu0 %vm297_vm1, %v4088_v30 }
  0xbf   : > { %3701 = vmatmul.mubr.msk.bf16.gmra.mxu0 %vm297_vm1, %v4108_v44 }
  0xc0   : > { %3667 = vmatmul.mubr.msk.bf16.gmra.mxu1 %vm297_vm1, %v4086_v29  ;;  %3704 = vmatprep.mubr.msk.bf16.mxu0 %vm297_vm1, %v4112_v50 }
  0xc1   : > { %3670 = vmatprep.mubr.msk.bf16.mxu1 %vm297_vm1, %v4106_v43 }
  0xc7   : > { %3705 = vmatmul.mubr.msk.bf16.gmra.mxu0 %vm297_vm1, %v4132_v62 }
  0xc8   : > { %3671 = vmatmul.mubr.msk.bf16.gmra.mxu1 %vm297_vm1, %v4110_v45  ;;  %3708 = vmatprep.mubr.msk.bf16.mxu0 %vm297_vm1, %v4136_v0 }
  0xc9   : > { %3674 = vmatprep.mubr.msk.bf16.mxu1 %vm297_vm1, %v4130_v61 }
  0xcf   : > { %3709 = vmatmul.mubr.msk.bf16.gmra.mxu0 %vm297_vm1, %v4156_v19 }
  0xd0   : > { %3675 = vmatmul.mubr.msk.bf16.gmra.mxu1 %vm297_vm1, %v4134_v63  ;;  %3712 = vmatprep.mubr.msk.bf16.mxu0 %vm297_vm1, %v4160_v21 }
  0xd1   : > { %3678 = vmatprep.mubr.msk.bf16.mxu1 %vm297_vm1, %v4154_v18 }
  0xd7   : > { %v3494_v58 = vpop.f32.mrf.mxu0  ;;  %3713 = vmatmul.mubr.msk.bf16.gmra.mxu0 %vm297_vm1, %v4180_v41 }
  0xd8   : > { %v4351_v59 = vpop.f32.mrf.mxu1  ;;  %3679 = vmatmul.mubr.msk.bf16.gmra.mxu1 %vm297_vm1, %v4158_v20  ;;  %3716 = vmatprep.mubr.msk.bf16.mxu0 %vm297_vm1, %v4184_v51  ;;  %v3216_v51 = vld [vmem:[%s3915_s25 + $0x198] sm:$0xff] }
  0xd9   : > { %v384_v4 = vpop.f32.mrf.mxu0  ;;  %3682 = vmatprep.mubr.msk.bf16.mxu1 %vm297_vm1, %v4178_v40  ;;  %v1952_v60 = vpack.c.bf16 %v3217_v52, %v3216_v51 }
  0xda   : > { %v4359_v7 = vpop.f32.mrf.mxu1 }
  0xdb   : > { %v3495_v9 = vpop.f32.mrf.mxu0 }
  0xdc   : > { %v4361_v14 = vpop.f32.mrf.mxu1 }
  0xdd   : > { %v4363_v15 = vpop.f32.mrf.mxu0 }
  0xde   : > { %v4365_v28 = vpop.f32.mrf.mxu1 }
  0xdf   : > { %v4367_v30 = vpop.f32.mrf.mxu0  ;;  %3717 = vmatmul.mubr.msk.bf16.gmra.mxu0 %vm297_vm1, %v4204_v3  ;;  %v4414_v3 = vpack.c.bf16 %v3168_v55, %v3167_v54 }
  0xe0   : > { %v4371_v44 = vpop.f32.mrf.mxu1  ;;  %3683 = vmatmul.mubr.msk.bf16.gmra.mxu1 %vm297_vm1, %v4182_v42  ;;  %3720 = vmatprep.mubr.msk.bf16.mxu0 %vm297_vm1, %v4208_v6 }
  0xe1   : > { %v4377_v50 = vpop.f32.mrf.mxu0  ;;  %3686 = vmatprep.mubr.msk.bf16.mxu1 %vm297_vm1, %v4202_v2 }
  0xe2   : > { %v4381_v62 = vpop.f32.mrf.mxu1 }
  0xe3   : > { %v4383_v0 = vpop.f32.mrf.mxu0 }
  0xe4   : > { %v4385_v19 = vpop.f32.mrf.mxu1 }
  0xe5   : > { %v4387_v21 = vpop.f32.mrf.mxu0 }
  0xe6   : > { %v4389_v38 = vpop.f32.mrf.mxu1 }
  0xe7   : > { %v4391_v39 = vpop.f32.mrf.mxu0  ;;  %3721 = vmatmul.mubr.msk.bf16.gmra.mxu0 %vm297_vm1, %v4224_v26 }
  0xe8   : > { %v4395_v41 = vpop.f32.mrf.mxu1  ;;  %3687 = vmatmul.mubr.msk.bf16.gmra.mxu1 %vm297_vm1, %v4206_v5  ;;  %3724 = vmatprep.mubr.msk.bf16.mxu0 %vm297_vm1, %v1067_v47 }
  0xe9   : > { %v4402_v53 = vpop.f32.mrf.mxu0  ;;  %3690 = vmatprep.mubr.msk.bf16.mxu1 %vm297_vm1, %v4222_v25 }
  0xea   : > { %v4408_v56 = vpop.f32.mrf.mxu1 }
  0xeb   : > { %v4410_v57 = vpop.f32.mrf.mxu0 }
  0xec   : > { %v4412_v1 = vpop.f32.mrf.mxu1 }
  0xed   : > { %v4416_v6 = vpop.f32.mrf.mxu0 }
  0xee   : > { %v4418_v8 = vpop.f32.mrf.mxu1 }
  0xef   : > { %v4420_v10 = vpop.f32.mrf.mxu0  ;;  %3725 = vmatmul.mubr.msk.bf16.gmra.mxu0 %vm297_vm1, %v1952_v60 }
  0xf0   : > { %v4423_v16 = vpop.f32.mrf.mxu1  ;;  %3691 = vmatmul.mubr.msk.bf16.gmra.mxu1 %vm297_vm1, %v4414_v3  ;;  %3764 = vmatprep.mubr.msk.bf16.mxu0 %vm297_vm1, %v4050_v13 }
  0xf1   : > { %v4429_v24 = vpop.f32.mrf.mxu0  ;;  %3730 = vmatprep.mubr.msk.bf16.mxu1 %vm297_vm1, %v3942_v22 }
  0xf2   : > { %v4433_v25 = vpop.f32.mrf.mxu1 }
  0xf3   : > { %v4435_v26 = vpop.f32.mrf.mxu0 }
  0xf4   : > { %v4437_v31 = vpop.f32.mrf.mxu1 }
  0xf5   : > { %v4439_v32 = vpop.f32.mrf.mxu0 }
  0xf6   : > { %v4441_v33 = vpop.f32.mrf.mxu1 }
  0xf7   : > { %v3562_v12 = vpop.f32.mrf.mxu0  ;;  %3765 = vmatmul.mubr.msk.bf16.vlgmr.msra.gmra.mxu0 %vm297_vm1, %v4080_v27 }
  0xf8   : > { %v3528_v13 = vpop.f32.mrf.mxu1  ;;  %3731 = vmatmul.mubr.msk.bf16.vlgmr.msra.gmra.mxu1 %vm297_vm1, %v3972_v34  ;;  %3768 = vmatprep.mubr.msk.bf16.mxu0 %vm297_vm1, %v4086_v29  ;;  %v2235_v29 = vpack.c.bf16 %v3244_v35, %v3243_v23 }
  0xf9   : > { %v605_v22 = vadd.f32 %v3528_v13, %v3494_v58  ;;  %v858_v11 = vpop.f32.mrf.mxu0  ;;  %3734 = vmatprep.mubr.msk.bf16.mxu1 %vm297_vm1, %v3978_v36  ;;  %v3245_v13 = vld [vmem:[%s3915_s25 + $0xa9] sm:$0xff] }
  0xfa   : > { %v596_v17 = vpop.f32.mrf.mxu1 }
  0xfb   : > { %v4453_v47 = vadd.f32 %v3562_v12, %v605_v22  ;;  %v597_v48 = vadd.f32 %v596_v17, %v384_v4  ;;  %v3563_v49 = vpop.f32.mrf.mxu0  ;;  %v3248_v17 = vld [vmem:[%s3915_s25 + $0xc9] sm:$0xff] }
  0xfc   : > { %v3529_v27 = vpop.f32.mrf.mxu1 }
  0xfd   : > { %v4455_v51 = vadd.f32 %v858_v11, %v597_v48  ;;  %v608_v34 = vadd.f32 %v3529_v27, %v3495_v9  ;;  %v861_v52 = vpop.f32.mrf.mxu0  ;;  %v3247_v11 = vld [vmem:[%s3915_s25 + $0xc1] sm:$0xff] }
  0xfe   : > { %v599_v58 = vpop.f32.mrf.mxu1  ;;  %v2237_v27 = vpack.c.bf16 %v3248_v17, %v3247_v11 }
  0xff   : > { %v4457_v54 = vadd.f32 %v3563_v49, %v608_v34  ;;  %v600_v36 = vadd.f32 %v599_v58, %v4363_v15  ;;  %v3566_v55 = vpop.f32.mrf.mxu0  ;;  %3769 = vmatmul.mubr.msk.bf16.gmra.mxu0 %vm297_vm1, %v4106_v43  ;;  %v3246_v15 = vld [vmem:[%s3915_s25 + $0xb1] sm:$0xff] }
 0x100   : > { %v3532_v4 = vpop.f32.mrf.mxu1  ;;  %3735 = vmatmul.mubr.msk.bf16.gmra.mxu1 %vm297_vm1, %v3998_v46  ;;  %3772 = vmatprep.mubr.msk.bf16.mxu0 %vm297_vm1, %v4110_v45  ;;  %v2236_v48 = vpack.c.bf16 %v3246_v15, %v3245_v13  ;;  %v3252_v13 = vld [vmem:[%s3915_s25 + $0xf9] sm:$0xff] }
 0x101   : > { %v4466_v9 = vadd.f32 %v861_v52, %v600_v36  ;;  %v621_v60 = vadd.f32 %v3532_v4, %v4367_v30  ;;  %v874_v12 = vpop.f32.mrf.mxu0  ;;  %3738 = vmatprep.mubr.msk.bf16.mxu1 %vm297_vm1, %v2235_v29  ;;  %v3249_v4 = vld [vmem:[%s3915_s25 + $0xd9] sm:$0xff] }
 0x102   : > { %v612_v22 = vpop.f32.mrf.mxu1 }
 0x103   : > { %v4474_v43 = vadd.f32 %v3566_v55, %v621_v60  ;;  %v613_v23 = vadd.f32 %v612_v22, %v4377_v50  ;;  %v3567_v46 = vpop.f32.mrf.mxu0  ;;  %v3250_v60 = vld [vmem:[%s3915_s25 + $0xe1] sm:$0xff] }
 0x104   : > { %v3533_v35 = vpop.f32.mrf.mxu1  ;;  %v2238_v17 = vpack.c.bf16 %v3250_v60, %v3249_v4 }
 0x105   : > { %v4477_v45 = vadd.f32 %v874_v12, %v613_v23  ;;  %v624_v30 = vadd.f32 %v3533_v35, %v4383_v0  ;;  %v877_v49 = vpop.f32.mrf.mxu0  ;;  %v3251_v12 = vld [vmem:[%s3915_s25 + $0xf1] sm:$0xff] }
 0x106   : > { %v615_v34 = vpop.f32.mrf.mxu1 }
 0x107   : > { %v4480_v52 = vadd.f32 %v3567_v46, %v624_v30  ;;  %v616_v29 = vadd.f32 %v615_v34, %v4387_v21  ;;  %v3570_v58 = vpop.f32.mrf.mxu0  ;;  %3773 = vmatmul.mubr.msk.bf16.gmra.mxu0 %vm297_vm1, %v4130_v61  ;;  %v2239_v46 = vpack.c.bf16 %v3252_v13, %v3251_v12 }
 0x108   : > { %v3536_v50 = vpop.f32.mrf.mxu1  ;;  %3739 = vmatmul.mubr.msk.bf16.gmra.mxu1 %vm297_vm1, %v2236_v48  ;;  %3776 = vmatprep.mubr.msk.bf16.mxu0 %vm297_vm1, %v4134_v63 }
 0x109   : > { %v4488_v0 = vadd.f32 %v877_v49, %v616_v29  ;;  %v637_v36 = vadd.f32 %v3536_v50, %v4391_v39  ;;  %v890_v55 = vpop.f32.mrf.mxu0  ;;  %3742 = vmatprep.mubr.msk.bf16.mxu1 %vm297_vm1, %v2237_v27  ;;  %v3253_v29 = vld [vmem:[%s3915_s25 + $0x109] sm:$0xff]  ;;  %v3255_v50 = vld [vmem:[%s3915_s25 + $0x121] sm:$0xff] }
 0x10a   : > { %v628_v21 = vpop.f32.mrf.mxu1 }
 0x10b   : > { %v4496_v15 = vadd.f32 %v3570_v58, %v637_v36  ;;  %v629_v61 = vadd.f32 %v628_v21, %v4402_v53  ;;  %v3571_v22 = vpop.f32.mrf.mxu0  ;;  %v3254_v58 = vld [vmem:[%s3915_s25 + $0x111] sm:$0xff]  ;;  %v3256_v36 = vld [vmem:[%s3915_s25 + $0x129] sm:$0xff] }
 0x10c   : > { %v3537_v11 = vpop.f32.mrf.mxu1  ;;  %v2240_v21 = vpack.c.bf16 %v3254_v58, %v3253_v29  ;;  %v2241_v13 = vpack.c.bf16 %v3256_v36, %v3255_v50 }
 0x10d   : > { %v4499_v63 = vadd.f32 %v890_v55, %v629_v61  ;;  %v640_v39 = vadd.f32 %v3537_v11, %v4410_v57  ;;  %v893_v23 = vpop.f32.mrf.mxu0 }
 0x10e   : > { %v631_v35 = vpop.f32.mrf.mxu1 }
 0x10f   : > { %v4502_v48 = vadd.f32 %v3571_v22, %v640_v39  ;;  %v632_v30 = vadd.f32 %v631_v35, %v4416_v6  ;;  %v3574_v49 = vpop.f32.mrf.mxu0  ;;  %3777 = vmatmul.mubr.msk.bf16.gmra.mxu0 %vm297_vm1, %v4154_v18  ;;  %v3258_v35 = vld [vmem:[%s3915_s25 + $0x141] sm:$0xff] }
 0x110   : > { %v3540_v53 = vpop.f32.mrf.mxu1  ;;  %3743 = vmatmul.mubr.msk.bf16.gmra.mxu1 %vm297_vm1, %v2238_v17  ;;  %3780 = vmatprep.mubr.msk.bf16.mxu0 %vm297_vm1, %v4158_v20 }
 0x111   : > { %v4510_v57 = vadd.f32 %v893_v23, %v632_v30  ;;  %v653_v27 = vadd.f32 %v3540_v53, %v4420_v10  ;;  %v906_v34 = vpop.f32.mrf.mxu0  ;;  %3746 = vmatprep.mubr.msk.bf16.mxu1 %vm297_vm1, %v2239_v46  ;;  %v3257_v46 = vld [vmem:[%s3915_s25 + $0x139] sm:$0xff]  ;;  %v3259_v30 = vld [vmem:[%s3915_s25 + $0x151] sm:$0xff] }
 0x112   : > { %v644_v6 = vpop.f32.mrf.mxu1 }
 0x113   : > { %v4518_v55 = vadd.f32 %v3574_v49, %v653_v27  ;;  %v645_v18 = vadd.f32 %v644_v6, %v4429_v24  ;;  %v3575_v4 = vpop.f32.mrf.mxu0  ;;  %v3260_v49 = vld [vmem:[%s3915_s25 + $0x159] sm:$0xff] }
 0x114   : > { %v3541_v60 = vpop.f32.mrf.mxu1  ;;  %v2243_v6 = vpack.c.bf16 %v3260_v49, %v3259_v30 }
 0x115   : > { %v4521_v20 = vadd.f32 %v906_v34, %v645_v18  ;;  %v656_v10 = vadd.f32 %v3541_v60, %v4435_v26  ;;  %v909_v12 = vpop.f32.mrf.mxu0  ;;  %v2242_v34 = vpack.c.bf16 %v3258_v35, %v3257_v46  ;;  %v3311_v60 = vld [vmem:[%s3915_s25 + $0x172] sm:$0xff] }
 0x116   : > { %v647_v61 = vpop.f32.mrf.mxu1 }
 0x117   : > { %v4524_v22 = vadd.f32 %v3575_v4, %v656_v10  ;;  %v648_v11 = vadd.f32 %v647_v61, %v4439_v32  ;;  %v3578_v17 = vpop.f32.mrf.mxu0  ;;  %3781 = vmatmul.mubr.msk.bf16.gmra.mxu0 %vm297_vm1, %v4178_v40 }
 0x118   : > { %v3544_v24 = vpop.f32.mrf.mxu1  ;;  %3747 = vmatmul.mubr.msk.bf16.gmra.mxu1 %vm297_vm1, %v2240_v21  ;;  %3784 = vmatprep.mubr.msk.bf16.mxu0 %vm297_vm1, %v4182_v42 }
 0x119   : > { %v4532_v26 = vadd.f32 %v909_v12, %v648_v11  ;;  %v669_v39 = vadd.f32 %v3544_v24, %v4351_v59  ;;  %v922_v23 = vpop.f32.mrf.mxu0  ;;  %3750 = vmatprep.mubr.msk.bf16.mxu1 %vm297_vm1, %v2241_v13  ;;  %v3262_v13 = vld [vmem:[%s3915_s25 + $0x171] sm:$0xff] }
 0x11a   : > { %v660_v32 = vpop.f32.mrf.mxu1 }
 0x11b   : > { %v4540_v53 = vadd.f32 %v3578_v17, %v669_v39  ;;  %v661_v40 = vadd.f32 %v660_v32, %v4359_v7  ;;  %v3579_v27 = vpop.f32.mrf.mxu0 }
 0x11c   : > { %v3545_v42 = vpop.f32.mrf.mxu1 }
 0x11d   : > { %v4543_v29 = vadd.f32 %v922_v23, %v661_v40  ;;  %v672_v59 = vadd.f32 %v3545_v42, %v4361_v14  ;;  %v925_v58 = vpop.f32.mrf.mxu0  ;;  %v3310_v14 = vld [vmem:[%s3915_s25 + $0x16a] sm:$0xff]  ;;  %v3314_v40 = vld [vmem:[%s3915_s25 + $0x19a] sm:$0xff] }
 0x11e   : > { %v663_v50 = vpop.f32.mrf.mxu1 }
 0x11f   : > { %v4546_v36 = vadd.f32 %v3579_v27, %v672_v59  ;;  %v664_v18 = vadd.f32 %v663_v50, %v4365_v28  ;;  %v3582_v4 = vpop.f32.mrf.mxu0  ;;  %3785 = vmatmul.mubr.msk.bf16.gmra.mxu0 %vm297_vm1, %v4202_v2  ;;  %v3261_v28 = vld [vmem:[%s3915_s25 + $0x169] sm:$0xff]  ;;  %v3266_v59 = vld [vmem:[%s3915_s25 + $0x1a1] sm:$0xff] }
 0x120   : > { %v3548_v7 = vpop.f32.mrf.mxu1  ;;  %3751 = vmatmul.mubr.msk.bf16.gmra.mxu1 %vm297_vm1, %v2242_v34  ;;  %3788 = vmatprep.mubr.msk.bf16.mxu0 %vm297_vm1, %v4206_v5  ;;  %v2538_v5 = vpack.c.bf16 %v3311_v60, %v3310_v14  ;;  %v2244_v39 = vpack.c.bf16 %v3262_v13, %v3261_v28  ;;  %v3315_v27 = vld [vmem:[%s3915_s25 + $0x1a2] sm:$0xff] }
 0x121   : > { %v4556_v21 = vadd.f32 %v925_v58, %v664_v18  ;;  %v685_v10 = vadd.f32 %v3548_v7, %v4371_v44  ;;  %v938_v12 = vpop.f32.mrf.mxu0  ;;  %3754 = vmatprep.mubr.msk.bf16.mxu1 %vm297_vm1, %v2243_v6 }
 0x122   : > { %v676_v61 = vpop.f32.mrf.mxu1 }
 0x123   : > { %v4562_v11 = vadd.f32 %v3582_v4, %v685_v10  ;;  %v677_v2 = vadd.f32 %v676_v61, %v4381_v62  ;;  %v3583_v17 = vpop.f32.mrf.mxu0  ;;  %v2540_v4 = vpack.c.bf16 %v3315_v27, %v3314_v40 }
 0x124   : > { %v3549_v24 = vpop.f32.mrf.mxu1 }
 0x125   : > { %v4565_v23 = vadd.f32 %v938_v12, %v677_v2  ;;  %v688_v44 = vadd.f32 %v3549_v24, %v4385_v19  ;;  %v941_v46 = vpop.f32.mrf.mxu0 }
 0x126   : > { %v679_v35 = vpop.f32.mrf.mxu1 }
 0x127   : > { %v4568_v32 = vadd.f32 %v3583_v17, %v688_v44  ;;  %v680_v30 = vadd.f32 %v679_v35, %v4389_v38  ;;  %v3586_v49 = vpop.f32.mrf.mxu0  ;;  %3789 = vmatmul.mubr.msk.bf16.gmra.mxu0 %vm297_vm1, %v2538_v5  ;;  %v3265_v38 = vld [vmem:[%s3915_s25 + $0x199] sm:$0xff] }
 0x128   : > { %v3552_v62 = vpop.f32.mrf.mxu1  ;;  %3755 = vmatmul.mubr.msk.bf16.gmra.mxu1 %vm297_vm1, %v2244_v39  ;;  %3792 = vmatprep.mubr.msk.bf16.mxu0 %vm297_vm1, %v4414_v3  ;;  %v2246_v7 = vpack.c.bf16 %v3266_v59, %v3265_v38 }
 0x129   : > { %v4577_v19 = vadd.f32 %v941_v46, %v680_v30  ;;  %v701_v42 = vadd.f32 %v3552_v62, %v4395_v41  ;;  %v954_v34 = vpop.f32.mrf.mxu0  ;;  %3758 = vmatprep.mubr.msk.bf16.mxu1 %vm297_vm1, %v4306_v37 }
 0x12a   : > { %v692_v58 = vpop.f32.mrf.mxu1 }
 0x12b   : > { %v4584_v6 = vadd.f32 %v3586_v49, %v701_v42  ;;  %v693_v50 = vadd.f32 %v692_v58, %v4408_v56  ;;  %v3587_v18 = vpop.f32.mrf.mxu0 }
 0x12c   : > { %v3553_v3 = vpop.f32.mrf.mxu1 }
 0x12d   : > { %v4587_v14 = vadd.f32 %v954_v34, %v693_v50  ;;  %v704_v60 = vadd.f32 %v3553_v3, %v4412_v1  ;;  %v957_v41 = vpop.f32.mrf.mxu0 }
 0x12e   : > { %v695_v10 = vpop.f32.mrf.mxu1 }
 0x12f   : > { %v4590_v12 = vadd.f32 %v3587_v18, %v704_v60  ;;  %v696_v37 = vadd.f32 %v695_v10, %v4418_v8  ;;  %v3590_v28 = vpop.f32.mrf.mxu0  ;;  %3793 = vmatmul.mubr.msk.bf16.gmra.mxu0 %vm297_vm1, %v2540_v4 }
 0x130   : > { %v3556_v13 = vpop.f32.mrf.mxu1  ;;  %3759 = vmatmul.mubr.msk.bf16.gmra.mxu1 %vm297_vm1, %v2246_v7 }
 0x131   : > { %v4595_v56 = vadd.f32 %v957_v41, %v696_v37  ;;  %v717_v61 = vadd.f32 %v3556_v13, %v4423_v16  ;;  %v970_v2 = vpop.f32.mrf.mxu0 }
 0x132   : > { %v708_v17 = vpop.f32.mrf.mxu1 }
 0x133   : > { %v4598_v5 = vadd.f32 %v3590_v28, %v717_v61  ;;  %v709_v1 = vadd.f32 %v708_v17, %v4433_v25  ;;  %v3591_v24 = vpop.f32.mrf.mxu0 }
 0x134   : > { %v3557_v39 = vpop.f32.mrf.mxu1 }
 0x135   : > { %v4601_v44 = vadd.f32 %v970_v2, %v709_v1  ;;  %v720_v8 = vadd.f32 %v3557_v39, %v4437_v31  ;;  %v973_v46 = vpop.f32.mrf.mxu0 }
 0x136   : > { %v711_v35 = vpop.f32.mrf.mxu1 }
 0x137   : > { %v4604_v30 = vadd.f32 %v3591_v24, %v720_v8  ;;  %v712_v49 = vadd.f32 %v711_v35, %v4441_v33  ;;  %v3630_v62 = vpop.f32.mrf.mxu0 }
 0x138   : > { %v3596_v16 = vpop.f32.mrf.mxu1 }
 0x139   : > { %v4607_v40 = vadd.f32 %v973_v46, %v712_v49  ;;  %v1284_v27 = vadd.f32 %v3596_v16, %v4453_v47  ;;  %v1449_v42 = vpop.f32.mrf.mxu0 }
 0x13a   : > { %v1155_v25 = vpop.f32.mrf.mxu1 }
 0x13b   : > { %v4610_v34 = vadd.f32 %v3630_v62, %v1284_v27  ;;  %v1282_v38 = vadd.f32 %v1155_v25, %v4455_v51  ;;  %v3631_v59 = vpop.f32.mrf.mxu0 }
 0x13c   : > { %v3597_v31 = vpop.f32.mrf.mxu1 }
 0x13d   : > { %v4613_v58 = vadd.f32 %v1449_v42, %v1282_v38  ;;  %v1285_v50 = vadd.f32 %v3597_v31, %v4457_v54  ;;  %v1452_v18 = vpop.f32.mrf.mxu0 }
 0x13e   : > { %v1158_v33 = vpop.f32.mrf.mxu1 }
 0x13f   : > { %v4616_v4 = vadd.f32 %v3631_v59, %v1285_v50  ;;  %v1283_v3 = vadd.f32 %v1158_v33, %v4466_v9  ;;  %v3634_v7 = vpop.f32.mrf.mxu0 }
 0x140   : > { %v3600_v47 = vpop.f32.mrf.mxu1 }
 0x141   : > { %v4619_v60 = vadd.f32 %v1452_v18, %v1283_v3  ;;  %v1288_v41 = vadd.f32 %v3600_v47, %v4474_v43  ;;  %v1465_v10 = vpop.f32.mrf.mxu0 }
 0x142   : > { %v1171_v51 = vpop.f32.mrf.mxu1 }
 0x143   : > { %v4622_v37 = vadd.f32 %v3634_v7, %v1288_v41  ;;  %v1286_v28 = vadd.f32 %v1171_v51, %v4477_v45  ;;  %v3635_v13 = vpop.f32.mrf.mxu0 }
 0x144   : > { %v3601_v54 = vpop.f32.mrf.mxu1 }
 0x145   : > { %v4625_v61 = vadd.f32 %v1465_v10, %v1286_v28  ;;  %v1289_v2 = vadd.f32 %v3601_v54, %v4480_v52  ;;  %v1468_v17 = vpop.f32.mrf.mxu0 }
 0x146   : > { %v1174_v9 = vpop.f32.mrf.mxu1 }
 0x147   : > { %v4628_v1 = vadd.f32 %v3635_v13, %v1289_v2  ;;  %v1287_v24 = vadd.f32 %v1174_v9, %v4488_v0  ;;  %v3638_v39 = vpop.f32.mrf.mxu0 }
 0x148   : > { %v3604_v43 = vpop.f32.mrf.mxu1 }
 0x149   : > { %v4631_v8 = vadd.f32 %v1468_v17, %v1287_v24  ;;  %v1292_v46 = vadd.f32 %v3604_v43, %v4496_v15  ;;  %v1481_v35 = vpop.f32.mrf.mxu0 }
 0x14a   : > { %v1187_v45 = vpop.f32.mrf.mxu1 }
 0x14b   : > { %v4634_v49 = vadd.f32 %v3638_v39, %v1292_v46  ;;  %v1290_v62 = vadd.f32 %v1187_v45, %v4499_v63  ;;  %v3639_v16 = vpop.f32.mrf.mxu0 }
 0x14c   : > { %v3605_v52 = vpop.f32.mrf.mxu1 }
 0x14d   : > { %v4637_v27 = vadd.f32 %v1481_v35, %v1290_v62  ;;  %v1293_v42 = vadd.f32 %v3605_v52, %v4502_v48  ;;  %v1484_v25 = vpop.f32.mrf.mxu0 }
 0x14e   : > { %v1190_v0 = vpop.f32.mrf.mxu1 }
 0x14f   : > { %v4640_v38 = vadd.f32 %v3639_v16, %v1293_v42  ;;  %v1291_v59 = vadd.f32 %v1190_v0, %v4510_v57  ;;  %v3642_v31 = vpop.f32.mrf.mxu0 }
 0x150   : > { %v3608_v15 = vpop.f32.mrf.mxu1 }
 0x151   : > { %v4643_v50 = vadd.f32 %v1484_v25, %v1291_v59  ;;  %v1296_v18 = vadd.f32 %v3608_v15, %v4518_v55  ;;  %v1497_v33 = vpop.f32.mrf.mxu0 }
 0x152   : > { %v1203_v63 = vpop.f32.mrf.mxu1 }
 0x153   : > { %v4646_v3 = vadd.f32 %v3642_v31, %v1296_v18  ;;  %v1294_v7 = vadd.f32 %v1203_v63, %v4521_v20  ;;  %v3643_v47 = vpop.f32.mrf.mxu0 }
 0x154   : > { %v3609_v48 = vpop.f32.mrf.mxu1 }
 0x155   : > { %v4649_v41 = vadd.f32 %v1497_v33, %v1294_v7  ;;  %v1297_v10 = vadd.f32 %v3609_v48, %v4524_v22  ;;  %v1500_v51 = vpop.f32.mrf.mxu0 }
 0x156   : > { %v1206_v57 = vpop.f32.mrf.mxu1 }
 0x157   : > { %v4652_v28 = vadd.f32 %v3643_v47, %v1297_v10  ;;  %v1295_v13 = vadd.f32 %v1206_v57, %v4532_v26  ;;  %v3646_v54 = vpop.f32.mrf.mxu0 }
 0x158   : > { %v3612_v55 = vpop.f32.mrf.mxu1 }
 0x159   : > { %v4655_v2 = vadd.f32 %v1500_v51, %v1295_v13  ;;  %v1300_v17 = vadd.f32 %v3612_v55, %v4540_v53  ;;  %v1513_v9 = vpop.f32.mrf.mxu0 }
 0x15a   : > { %v1219_v20 = vpop.f32.mrf.mxu1 }
 0x15b   : > { %v4658_v24 = vadd.f32 %v3646_v54, %v1300_v17  ;;  %v1298_v39 = vadd.f32 %v1219_v20, %v4543_v29  ;;  %v3647_v43 = vpop.f32.mrf.mxu0 }
 0x15c   : > { %v3613_v22 = vpop.f32.mrf.mxu1 }
 0x15d   : > { %v4661_v46 = vadd.f32 %v1513_v9, %v1298_v39  ;;  %v1301_v35 = vadd.f32 %v3613_v22, %v4546_v36  ;;  %v1516_v45 = vpop.f32.mrf.mxu0 }
 0x15e   : > { %v1222_v26 = vpop.f32.mrf.mxu1 }
 0x15f   : > { %v4664_v62 = vadd.f32 %v3647_v43, %v1301_v35  ;;  %v1299_v16 = vadd.f32 %v1222_v26, %v4556_v21  ;;  %v3650_v52 = vpop.f32.mrf.mxu0 }
 0x160   : > { %v3616_v53 = vpop.f32.mrf.mxu1 }
 0x161   : > { %5040 = vst [vmem:[#allocation2_spill] sm:$0xff] %v4664_v62  ;;  %v4667_v42 = vadd.f32 %v1516_v45, %v1299_v16  ;;  %v1304_v25 = vadd.f32 %v3616_v53, %v4562_v11  ;;  %v1529_v0 = vpop.f32.mrf.mxu0 }
 0x162   : > { %v1235_v29 = vpop.f32.mrf.mxu1 }
 0x163   : > { %5041 = vst [vmem:[#allocation3_spill] sm:$0xff] %v4667_v42  ;;  %v4670_v59 = vadd.f32 %v3650_v52, %v1304_v25  ;;  %v1302_v31 = vadd.f32 %v1235_v29, %v4565_v23  ;;  %v3651_v15 = vpop.f32.mrf.mxu0 }
 0x164   : > { %v3617_v36 = vpop.f32.mrf.mxu1 }
 0x165   : > { %5042 = vst [vmem:[#allocation4_spill] sm:$0xff] %v4670_v59  ;;  %v4673_v18 = vadd.f32 %v1529_v0, %v1302_v31  ;;  %v1305_v33 = vadd.f32 %v3617_v36, %v4568_v32  ;;  %v1532_v63 = vpop.f32.mrf.mxu0 }
 0x166   : > { %v1238_v21 = vpop.f32.mrf.mxu1 }
 0x167   : > { %5043 = vst [vmem:[#allocation5_spill] sm:$0xff] %v4673_v18  ;;  %v4676_v7 = vadd.f32 %v3651_v15, %v1305_v33  ;;  %v1303_v47 = vadd.f32 %v1238_v21, %v4577_v19  ;;  %v3654_v48 = vpop.f32.mrf.mxu0 }
 0x168   : > { %v3620_v11 = vpop.f32.mrf.mxu1 }
 0x169   : > { %5044 = vst [vmem:[#allocation6_spill] sm:$0xff] %v4676_v7  ;;  %v4679_v10 = vadd.f32 %v1532_v63, %v1303_v47  ;;  %v1308_v51 = vadd.f32 %v3620_v11, %v4584_v6  ;;  %v1545_v57 = vpop.f32.mrf.mxu0 }
 0x16a   : > { %v1251_v23 = vpop.f32.mrf.mxu1 }
 0x16b   : > { %5045 = vst [vmem:[#allocation7_spill] sm:$0xff] %v4679_v10  ;;  %v4682_v13 = vadd.f32 %v3654_v48, %v1308_v51  ;;  %v1306_v54 = vadd.f32 %v1251_v23, %v4587_v14  ;;  %v3655_v55 = vpop.f32.mrf.mxu0 }
 0x16c   : > { %v3621_v32 = vpop.f32.mrf.mxu1 }
 0x16d   : > { %5046 = vst [vmem:[#allocation8_spill] sm:$0xff] %v4682_v13  ;;  %v4685_v17 = vadd.f32 %v1545_v57, %v1306_v54  ;;  %v1309_v9 = vadd.f32 %v3621_v32, %v4590_v12  ;;  %v1548_v20 = vpop.f32.mrf.mxu0 }
 0x16e   : > { %v1254_v19 = vpop.f32.mrf.mxu1 }
 0x16f   : > { %5047 = vst [vmem:[#allocation9_spill] sm:$0xff] %v4685_v17  ;;  %v4688_v39 = vadd.f32 %v3655_v55, %v1309_v9  ;;  %v1307_v43 = vadd.f32 %v1254_v19, %v4595_v56  ;;  %v3658_v22 = vpop.f32.mrf.mxu0 }
 0x170   : > { %v3624_v6 = vpop.f32.mrf.mxu1 }
 0x171   : > { %5048 = vst [vmem:[#allocation10_spill] sm:$0xff] %v4688_v39  ;;  %v4691_v35 = vadd.f32 %v1548_v20, %v1307_v43  ;;  %v1312_v45 = vadd.f32 %v3624_v6, %v4598_v5  ;;  %v1561_v26 = vpop.f32.mrf.mxu0 }
 0x172   : > { %v1267_v14 = vpop.f32.mrf.mxu1 }
 0x173   : > { %5049 = vst [vmem:[#allocation11_spill] sm:$0xff] %v4691_v35  ;;  %v4694_v16 = vadd.f32 %v3658_v22, %v1312_v45  ;;  %v1310_v52 = vadd.f32 %v1267_v14, %v4601_v44  ;;  %v3659_v53 = vpop.f32.mrf.mxu0 }
 0x174   : > { %v3625_v12 = vpop.f32.mrf.mxu1 }
 0x175   : > { %5050 = vst [vmem:[#allocation12_spill] sm:$0xff] %v4694_v16  ;;  %v4697_v25 = vadd.f32 %v1561_v26, %v1310_v52  ;;  %v1313_v0 = vadd.f32 %v3625_v12, %v4604_v30  ;;  %v1564_v29 = vpop.f32.mrf.mxu0 }
 0x176   : > { %v1270_v56 = vpop.f32.mrf.mxu1 }
 0x177   : > { %5051 = vst [vmem:[#allocation13_spill] sm:$0xff] %v4697_v25  ;;  %v4700_v31 = vadd.f32 %v3659_v53, %v1313_v0  ;;  %v1311_v15 = vadd.f32 %v1270_v56, %v4607_v40  ;;  %v4703_v36 = vpop.f32.mrf.mxu0 }
 0x178   : > { %v3664_v5 = vpop.f32.mrf.mxu1 }
 0x179   : > { %5052 = vst [vmem:[#allocation14_spill] sm:$0xff] %v4700_v31  ;;  %v4705_v33 = vadd.f32 %v1564_v29, %v1311_v15  ;;  %v4707_v63 = vpop.f32.mrf.mxu0 }
 0x17a   : > { %v1743_v44 = vpop.f32.mrf.mxu1 }
 0x17b   : > { %5053 = vst [vmem:[#allocation15_spill] sm:$0xff] %v4705_v33  ;;  %v4709_v21 = vpop.f32.mrf.mxu0 }
 0x17c   : > { %v3665_v47 = vpop.f32.mrf.mxu1 }
 0x17d   : > { %v4711_v48 = vpop.f32.mrf.mxu0 }
 0x17e   : > { %v4713_v30 = vpop.f32.mrf.mxu1 }
 0x17f   : > { %v4715_v11 = vpop.f32.mrf.mxu0 }
 0x180   : > { %v4717_v51 = vpop.f32.mrf.mxu1 }
 0x181   : > { %v4719_v40 = vpop.f32.mrf.mxu0 }
 0x182   : > { %v4721_v57 = vpop.f32.mrf.mxu1 }
 0x183   : > { %v4723_v23 = vpop.f32.mrf.mxu0 }
 0x184   : > { %v4725_v54 = vpop.f32.mrf.mxu1 }
 0x185   : > { %v4727_v55 = vpop.f32.mrf.mxu0 }
 0x186   : > { %v4729_v32 = vpop.f32.mrf.mxu1 }
 0x187   : > { %v4731_v9 = vpop.f32.mrf.mxu0 }
 0x188   : > { %v4733_v20 = vpop.f32.mrf.mxu1 }
 0x189   : > { %v4735_v19 = vpop.f32.mrf.mxu0 }
 0x18a   : > { %v4737_v43 = vpop.f32.mrf.mxu1 }
 0x18b   : > { %v4739_v22 = vpop.f32.mrf.mxu0 }
 0x18c   : > { %v4741_v6 = vpop.f32.mrf.mxu1 }
 0x18d   : > { %v4743_v45 = vpop.f32.mrf.mxu0 }
 0x18e   : > { %v4745_v26 = vpop.f32.mrf.mxu1 }
 0x18f   : > { %v4747_v14 = vpop.f32.mrf.mxu0 }
 0x190   : > { %v4749_v52 = vpop.f32.mrf.mxu1 }
 0x191   : > { %v4751_v53 = vpop.f32.mrf.mxu0 }
 0x192   : > { %v4753_v12 = vpop.f32.mrf.mxu1 }
 0x193   : > { %v4755_v0 = vpop.f32.mrf.mxu0 }
 0x194   : > { %v4757_v29 = vpop.f32.mrf.mxu1 }
 0x195   : > { %v4759_v56 = vpop.f32.mrf.mxu0 }
 0x196   : > { %v4761_v15 = vpop.f32.mrf.mxu1 }
 0x197   : > { %v4763_v33 = vpop.f32.mrf.mxu0 }
 0x198   : > { %v4765_v31 = vpop.f32.mrf.mxu1 }
 0x199   : > { %v4767_v25 = vpop.f32.mrf.mxu0 }
 0x19a   : > { %5054 = vst [vmem:[#allocation16_spill] sm:$0xff] %v4767_v25  ;;  %v4769_v16 = vpop.f32.mrf.mxu1 }
 0x19b   : > { %v4771_v35 = vpop.f32.mrf.mxu0 }
 0x19c   : > { %5055 = vst [vmem:[#allocation17_spill] sm:$0xff] %v4771_v35  ;;  %v4773_v39 = vpop.f32.mrf.mxu1 }
 0x19d   : > { %5056 = vst [vmem:[#allocation18_spill] sm:$0xff] %v4773_v39  ;;  %v4775_v17 = vpop.f32.mrf.mxu0 }
 0x19e   : > { %5057 = vst [vmem:[#allocation19_spill] sm:$0xff] %v4775_v17  ;;  %v4777_v13 = vpop.f32.mrf.mxu1 }
 0x19f   : > { %5058 = vst [vmem:[#allocation20_spill] sm:$0xff] %v4777_v13  ;;  %v4779_v10 = vpop.f32.mrf.mxu0 }
 0x1a0   : > { %5059 = vst [vmem:[#allocation21_spill] sm:$0xff] %v4779_v10  ;;  %v4781_v7 = vpop.f32.mrf.mxu1 }
 0x1a1   : > { %5060 = vst [vmem:[#allocation22_spill] sm:$0xff] %v4781_v7  ;;  %v4783_v18 = vpop.f32.mrf.mxu0 }
 0x1a2   : > { %5061 = vst [vmem:[#allocation23_spill] sm:$0xff] %v4783_v18  ;;  %v4785_v59 = vpop.f32.mrf.mxu1 }
 0x1a3   : > { %5062 = vst [vmem:[#allocation24_spill] sm:$0xff] %v4785_v59  ;;  %v4787_v42 = vpop.f32.mrf.mxu0 }
 0x1a4   : > { %5063 = vst [vmem:[#allocation25_spill] sm:$0xff] %v4787_v42  ;;  %v4789_v25 = vpop.f32.mrf.mxu1 }
 0x1a5   : > { %5064 = vst [vmem:[#allocation26_spill] sm:$0xff] %v4789_v25  ;;  %v4791_v62 = vpop.f32.mrf.mxu0 }
 0x1a6   : > { %5065 = vst [vmem:[#allocation27_spill] sm:$0xff] %v4791_v62  ;;  %v4793_v35 = vpop.f32.mrf.mxu1 }
 0x1a7   : > { %5066 = vst [vmem:[#allocation28_spill] sm:$0xff] %v4793_v35  ;;  %v4795_v39 = vpop.f32.mrf.mxu0 }
 0x1a8   : > { %5067 = vst [vmem:[#allocation29_spill] sm:$0xff] %v4795_v39  ;;  %v4797_v17 = vpop.f32.mrf.mxu1 }
 0x1a9   : > { %5068 = vst [vmem:[#allocation30_spill] sm:$0xff] %v4797_v17  ;;  %v4799_v13 = vpop.f32.mrf.mxu0 }
 0x1aa   : > { %5069 = vst [vmem:[#allocation31_spill] sm:$0xff] %v4799_v13  ;;  %v4801_v10 = vpop.f32.mrf.mxu1  ;;  %v1872_v13 = vadd.f32 %v3664_v5, %v4610_v34  ;;  %v1871_v34 = vadd.f32 %v4713_v30, %v4619_v60  ;;  %v1874_v60 = vadd.f32 %v4721_v57, %v4625_v61 }
 0x1ab   : > { %5070 = vst [vmem:[#allocation32_spill] sm:$0xff] %v4801_v10  ;;  %v4803_v7 = vpop.f32.mrf.mxu0 }
 0x1ac   : > { %5071 = vst [vmem:[#allocation33_spill] sm:$0xff] %v4803_v7  ;;  %v4805_v18 = vpop.f32.mrf.mxu1  ;;  %v1870_v7 = vadd.f32 %v1743_v44, %v4613_v58  ;;  %v1876_v58 = vadd.f32 %v4717_v51, %v4622_v37  ;;  %v4839_v44 = vld [vmem:[%s5038_s2] ss:$0 sm:$0xff]  ;;  %v2171_v57 = vadd.f32 %v4719_v40, %v1874_v60 }
 0x1ad   : > { %5072 = vst [vmem:[#allocation34_spill] sm:$0xff] %v4805_v18  ;;  %v4807_v59 = vpop.f32.mrf.mxu0 }
 0x1ae   : > { %5073 = vst [vmem:[#allocation35_spill] sm:$0xff] %v4807_v59  ;;  %v4809_v42 = vpop.f32.mrf.mxu1 }
 0x1af   : > { %5074 = vst [vmem:[#allocation36_spill] sm:$0xff] %v4809_v42  ;;  %v4811_v25 = vpop.f32.mrf.mxu0 }
 0x1b0   : > { %5075 = vst [vmem:[#allocation37_spill] sm:$0xff] %v4811_v25  ;;  %v4813_v62 = vpop.f32.mrf.mxu1  ;;  %v2169_v25 = vadd.f32 %v4703_v36, %v1872_v13 }
 0x1b1   : > { %5076 = vst [vmem:[#allocation38_spill] sm:$0xff] %v4813_v62  ;;  %v4815_v35 = vpop.f32.mrf.mxu0  ;;  %v1873_v62 = vadd.f32 %v3665_v47, %v4616_v4 }
 0x1b2   : > { %5077 = vst [vmem:[#allocation39_spill] sm:$0xff] %v4815_v35  ;;  %v4817_v39 = vpop.f32.mrf.mxu1 }
 0x1b3   : > { %5078 = vst [vmem:[#allocation40_spill] sm:$0xff] %v4817_v39  ;;  %v4820_v17 = vpop.f32.mrf.mxu0  ;;  %v2167_v39 = vadd.f32 %v4707_v63, %v1870_v7  ;;  %v2170_v4 = vadd.f32 %v4709_v21, %v1873_v62  ;;  %v1877_v62 = vadd.f32 %v4725_v54, %v4628_v1 }
 0x1b4   : > { %5079 = vst [vmem:[#allocation41_spill] sm:$0xff] %v4820_v17  ;;  %v4822_v10 = vpop.f32.mrf.mxu1 }
 0x1b5   : > { %v4825_v59 = vpop.f32.mrf.mxu0 }
 0x1b6   : > { %5080 = vst [vmem:[#allocation42_spill] sm:$0xff] %v4825_v59  ;;  %v4827_v42 = vpop.f32.mrf.mxu1  ;;  %v2173_v59 = vadd.f32 %v4715_v11, %v1876_v58  ;;  %v1875_v11 = vadd.f32 %v4729_v32, %v4631_v8 }
 0x1b7   : > { %v3766_v35 = vpop.f32.mrf.mxu0 }
 0x1b8   : > { %v3732_v18 = vpop.f32.mrf.mxu1 }
 0x1b9   : > { %v2463_v5 = vadd.f32 %v3732_v18, %v2169_v25  ;;  %v2628_v17 = vpop.f32.mrf.mxu0  ;;  %v2168_v25 = vadd.f32 %v4711_v48, %v1871_v34 }
 0x1ba   : > { %v2334_v13 = vpop.f32.mrf.mxu1 }
 0x1bb   : > { %v2757_v36 = vadd.f32 %v3766_v35, %v2463_v5  ;;  %v2461_v47 = vadd.f32 %v2334_v13, %v2167_v39  ;;  %v3767_v7 = vpop.f32.mrf.mxu0 }
 0x1bc   : > { %v3733_v18 = vpop.f32.mrf.mxu1 }
 0x1bd   : > { %v2796_v37 = vadd.f32 %v4839_v44, %v2757_v36  ;;  %v2755_v63 = vadd.f32 %v2628_v17, %v2461_v47  ;;  %v2464_v30 = vadd.f32 %v3733_v18, %v2170_v4  ;;  %v2631_v51 = vpop.f32.mrf.mxu0  ;;  %v2174_v4 = vadd.f32 %v4723_v23, %v1877_v62 }
 0x1be   : > { %v2337_v61 = vpop.f32.mrf.mxu1  ;;  %v1880_v36 = vadd.f32 %v4733_v20, %v4634_v49  ;;  %v2172_v18 = vadd.f32 %v4727_v55, %v1875_v11 }
 0x1bf   : > { %v2828_v39 = vmax.f32 %v2796_v37, 0.0  ;;  %v2794_v35 = vadd.f32 %v4839_v44, %v2755_v63  ;;  %v2758_v21 = vadd.f32 %v3767_v7, %v2464_v30  ;;  %v2462_v17 = vadd.f32 %v2337_v61, %v2168_v25  ;;  %v3770_v48 = vpop.f32.mrf.mxu0 }
 0x1c0   : > { %v3736_v1 = vpop.f32.mrf.mxu1  ;;  %v2177_v30 = vadd.f32 %v4731_v9, %v1880_v36 }
 0x1c1   : > { %2860 = vst.msk [vmem:[%s4853_s19 + $0x10] sm:$0xff] %vm297_vm1, %v2828_v39  ;;  %v2826_v54 = vmax.f32 %v2794_v35, 0.0  ;;  %v2797_v34 = vadd.f32 %v4839_v44, %v2758_v21  ;;  %v2756_v5 = vadd.f32 %v2631_v51, %v2462_v17  ;;  %v2467_v58 = vadd.f32 %v3736_v1, %v2173_v59  ;;  %v2644_v13 = vpop.f32.mrf.mxu0 }
 0x1c2   : > { %v2350_v47 = vpop.f32.mrf.mxu1  ;;  %v1878_v59 = vadd.f32 %v4737_v43, %v4637_v27  ;;  %v1881_v51 = vadd.f32 %v4741_v6, %v4640_v38  ;;  %v1879_v21 = vadd.f32 %v4745_v26, %v4643_v50  ;;  %v1884_v1 = vadd.f32 %v4749_v52, %v4646_v3 }
 0x1c3   : > { %2858 = vst.msk [vmem:[%s4853_s19] sm:$0xff] %vm297_vm1, %v2826_v54  ;;  %v2829_v40 = vmax.f32 %v2797_v34, 0.0  ;;  %v2795_v8 = vadd.f32 %v4839_v44, %v2756_v5  ;;  %v2761_v32 = vadd.f32 %v3770_v48, %v2467_v58  ;;  %v2465_v7 = vadd.f32 %v2350_v47, %v2171_v57  ;;  %v3771_v60 = vpop.f32.mrf.mxu0 }
 0x1c4   : > { %v3737_v25 = vpop.f32.mrf.mxu1  ;;  %v2175_v35 = vadd.f32 %v4735_v19, %v1878_v59  ;;  %v2178_v11 = vadd.f32 %v4739_v22, %v1881_v51  ;;  %v2176_v58 = vadd.f32 %v4743_v45, %v1879_v21  ;;  %v1883_v59 = vadd.f32 %v4761_v15, %v4655_v2  ;;  %v5082_v21 = vld [vmem:[#allocation18_spill] sm:$0xff] }
 0x1c5   : > { %2861 = vst.msk [vmem:[%s4853_s19 + $0x18] sm:$0xff] %vm297_vm1, %v2829_v40  ;;  %v2827_v23 = vmax.f32 %v2795_v8, 0.0  ;;  %v2800_v49 = vadd.f32 %v4839_v44, %v2761_v32  ;;  %v2759_v20 = vadd.f32 %v2644_v13, %v2465_v7  ;;  %v2468_v37 = vadd.f32 %v3737_v25, %v2174_v4  ;;  %v2647_v63 = vpop.f32.mrf.mxu0 }
 0x1c6   : > { %v2353_v62 = vpop.f32.mrf.mxu1  ;;  %v1882_v13 = vadd.f32 %v4753_v12, %v4649_v41  ;;  %v2181_v40 = vadd.f32 %v4747_v14, %v1884_v1  ;;  %v1885_v8 = vadd.f32 %v4757_v29, %v4652_v28  ;;  %v5085_v1 = vld [vmem:[#allocation20_spill] sm:$0xff] }
 0x1c7   : > { %2859 = vst.msk [vmem:[%s4853_s19 + $0x8] sm:$0xff] %vm297_vm1, %v2827_v23  ;;  %v2832_v55 = vmax.f32 %v2800_v49, 0.0  ;;  %v2798_v27 = vadd.f32 %v4839_v44, %v2759_v20  ;;  %v2762_v43 = vadd.f32 %v3771_v60, %v2468_v37  ;;  %v2466_v61 = vadd.f32 %v2353_v62, %v2172_v18  ;;  %v3774_v39 = vpop.f32.mrf.mxu0 }
 0x1c8   : > { %v3740_v17 = vpop.f32.mrf.mxu1  ;;  %v2179_v18 = vadd.f32 %v4751_v53, %v1882_v13  ;;  %v2182_v20 = vadd.f32 %v4755_v0, %v1885_v8  ;;  %v1888_v37 = vadd.f32 %v4765_v31, %v4658_v24  ;;  %v2180_v62 = vadd.f32 %v4759_v56, %v1883_v59 }
 0x1c9   : > { %2864 = vst.msk [vmem:[%s4853_s19 + $0x30] sm:$0xff] %vm297_vm1, %v2832_v55  ;;  %v2830_v9 = vmax.f32 %v2798_v27, 0.0  ;;  %v2801_v38 = vadd.f32 %v4839_v44, %v2762_v43  ;;  %v2760_v6 = vadd.f32 %v2647_v63, %v2466_v61  ;;  %v2471_v48 = vadd.f32 %v3740_v17, %v2177_v30  ;;  %v2660_v57 = vpop.f32.mrf.mxu0 }
 0x1ca   : > { %v2366_v54 = vpop.f32.mrf.mxu1  ;;  %v1886_v55 = vadd.f32 %v4769_v16, %v4661_v46 }
 0x1cb   : > { %2862 = vst.msk [vmem:[%s4853_s19 + $0x20] sm:$0xff] %vm297_vm1, %v2830_v9  ;;  %v2833_v19 = vmax.f32 %v2801_v38, 0.0  ;;  %v2799_v50 = vadd.f32 %v4839_v44, %v2760_v6  ;;  %v2765_v26 = vadd.f32 %v3774_v39, %v2471_v48  ;;  %v2469_v34 = vadd.f32 %v2366_v54, %v2175_v35  ;;  %v3775_v5 = vpop.f32.mrf.mxu0  ;;  %v5081_v35 = vld [vmem:[#allocation2_spill] sm:$0xff]  ;;  %v5083_v48 = vld [vmem:[#allocation16_spill] sm:$0xff] }
 0x1cc   : > { %v3741_v4 = vpop.f32.mrf.mxu1  ;;  %v2185_v39 = vadd.f32 %v4763_v33, %v1888_v37  ;;  %v1889_v17 = vadd.f32 %v5082_v21, %v5081_v35  ;;  %v5094_v37 = vld [vmem:[#allocation26_spill] sm:$0xff] }
 0x1cd   : > { %2865 = vst.msk [vmem:[%s4853_s19 + $0x38] sm:$0xff] %vm297_vm1, %v2833_v19  ;;  %v2831_v22 = vmax.f32 %v2799_v50, 0.0  ;;  %v2804_v3 = vadd.f32 %v4839_v44, %v2765_v26  ;;  %v2763_v52 = vadd.f32 %v2660_v57, %v2469_v34  ;;  %v2472_v36 = vadd.f32 %v3741_v4, %v2178_v11  ;;  %v2663_v47 = vpop.f32.mrf.mxu0  ;;  %v5084_v11 = vld [vmem:[#allocation3_spill] sm:$0xff]  ;;  %v5087_v4 = vld [vmem:[#allocation4_spill] sm:$0xff] }
 0x1ce   : > { %v2369_v32 = vpop.f32.mrf.mxu1  ;;  %v2183_v57 = vadd.f32 %v5083_v48, %v1886_v55  ;;  %v1887_v54 = vadd.f32 %v5085_v1, %v5084_v11  ;;  %v5095_v55 = vld [vmem:[#allocation23_spill] sm:$0xff] }
 0x1cf   : > { %2863 = vst.msk [vmem:[%s4853_s19 + $0x28] sm:$0xff] %vm297_vm1, %v2831_v22  ;;  %v2836_v45 = vmax.f32 %v2804_v3, 0.0  ;;  %v2802_v41 = vadd.f32 %v4839_v44, %v2763_v52  ;;  %v2766_v12 = vadd.f32 %v3775_v5, %v2472_v36  ;;  %v2470_v7 = vadd.f32 %v2369_v32, %v2176_v58  ;;  %v3778_v60 = vpop.f32.mrf.mxu0  ;;  %v5086_v58 = vld [vmem:[#allocation17_spill] sm:$0xff]  ;;  %v5088_v22 = vld [vmem:[#allocation22_spill] sm:$0xff] }
 0x1d0   : > { %v3744_v25 = vpop.f32.mrf.mxu1  ;;  %v2186_v13 = vadd.f32 %v5086_v58, %v1889_v17  ;;  %v1892_v3 = vadd.f32 %v5088_v22, %v5087_v4 }
 0x1d1   : > { %2868 = vst.msk [vmem:[%s4853_s19 + $0x50] sm:$0xff] %vm297_vm1, %v2836_v45  ;;  %v2834_v14 = vmax.f32 %v2802_v41, 0.0  ;;  %v2805_v28 = vadd.f32 %v4839_v44, %v2766_v12  ;;  %v2764_v29 = vadd.f32 %v2663_v47, %v2470_v7  ;;  %v2475_v23 = vadd.f32 %v3744_v25, %v2181_v40  ;;  %v2676_v49 = vpop.f32.mrf.mxu0  ;;  %v5089_v45 = vld [vmem:[#allocation19_spill] sm:$0xff]  ;;  %v5090_v12 = vld [vmem:[#allocation5_spill] sm:$0xff]  ;;  %v5091_v7 = vld [vmem:[#allocation24_spill] sm:$0xff] }
 0x1d2   : > { %v2382_v63 = vpop.f32.mrf.mxu1  ;;  %v2184_v41 = vadd.f32 %v5089_v45, %v1887_v54 }
 0x1d3   : > { %2866 = vst.msk [vmem:[%s4853_s19 + $0x40] sm:$0xff] %vm297_vm1, %v2834_v14  ;;  %v2837_v53 = vmax.f32 %v2805_v28, 0.0  ;;  %v2803_v2 = vadd.f32 %v4839_v44, %v2764_v29  ;;  %v2769_v15 = vadd.f32 %v3778_v60, %v2475_v23  ;;  %v2473_v30 = vadd.f32 %v2382_v63, %v2179_v18  ;;  %v3779_v51 = vpop.f32.mrf.mxu0  ;;  %v5092_v23 = vld [vmem:[#allocation21_spill] sm:$0xff] }
 0x1d4   : > { %v3745_v27 = vpop.f32.mrf.mxu1  ;;  %v1890_v60 = vadd.f32 %v5091_v7, %v5090_v12 }
 0x1d5   : > { %2869 = vst.msk [vmem:[%s4853_s19 + $0x58] sm:$0xff] %vm297_vm1, %v2837_v53  ;;  %v2835_v0 = vmax.f32 %v2803_v2, 0.0  ;;  %v2808_v24 = vadd.f32 %v4839_v44, %v2769_v15  ;;  %v2767_v31 = vadd.f32 %v2676_v49, %v2473_v30  ;;  %v2476_v43 = vadd.f32 %v3745_v27, %v2182_v20  ;;  %v2679_v61 = vpop.f32.mrf.mxu0  ;;  %v5093_v20 = vld [vmem:[#allocation6_spill] sm:$0xff] }
 0x1d6   : > { %v2385_v9 = vpop.f32.mrf.mxu1  ;;  %v2189_v49 = vadd.f32 %v5092_v23, %v1892_v3  ;;  %v1893_v63 = vadd.f32 %v5094_v37, %v5093_v20  ;;  %v2187_v27 = vadd.f32 %v5095_v55, %v1890_v60 }
 0x1d7   : > { %2867 = vst.msk [vmem:[%s4853_s19 + $0x48] sm:$0xff] %vm297_vm1, %v2835_v0  ;;  %v2840_v56 = vmax.f32 %v2808_v24, 0.0  ;;  %v2806_v46 = vadd.f32 %v4839_v44, %v2767_v31  ;;  %v2770_v16 = vadd.f32 %v3779_v51, %v2476_v43  ;;  %v2474_v38 = vadd.f32 %v2385_v9, %v2180_v62  ;;  %v3782_v6 = vpop.f32.mrf.mxu0  ;;  %v5096_v0 = vld [vmem:[#allocation7_spill] sm:$0xff]  ;;  %v5097_v24 = vld [vmem:[#allocation28_spill] sm:$0xff]  ;;  %v5098_v9 = vld [vmem:[#allocation25_spill] sm:$0xff] }
 0x1d8   : > { %v3748_v19 = vpop.f32.mrf.mxu1  ;;  %v1891_v31 = vadd.f32 %v5097_v24, %v5096_v0 }
 0x1d9   : > { %2872 = vst.msk [vmem:[%s4853_s19 + $0x70] sm:$0xff] %vm297_vm1, %v2840_v56  ;;  %v2838_v33 = vmax.f32 %v2806_v46, 0.0  ;;  %v2809_v50 = vadd.f32 %v4839_v44, %v2770_v16  ;;  %v2768_v26 = vadd.f32 %v2679_v61, %v2474_v38  ;;  %v2479_v34 = vadd.f32 %v3748_v19, %v2185_v39  ;;  %v2692_v5 = vpop.f32.mrf.mxu0  ;;  %v5099_v46 = vld [vmem:[#allocation8_spill] sm:$0xff]  ;;  %v5100_v16 = vld [vmem:[#allocation30_spill] sm:$0xff]  ;;  %v5101_v19 = vld [vmem:[#allocation27_spill] sm:$0xff] }
 0x1da   : > { %v2398_v52 = vpop.f32.mrf.mxu1  ;;  %v2190_v56 = vadd.f32 %v5098_v9, %v1893_v63  ;;  %v1896_v38 = vadd.f32 %v5100_v16, %v5099_v46 }
 0x1db   : > { %2870 = vst.msk [vmem:[%s4853_s19 + $0x60] sm:$0xff] %vm297_vm1, %v2838_v33  ;;  %v2841_v36 = vmax.f32 %v2809_v50, 0.0  ;;  %v2807_v47 = vadd.f32 %v4839_v44, %v2768_v26  ;;  %v2773_v40 = vadd.f32 %v3782_v6, %v2479_v34  ;;  %v2477_v8 = vadd.f32 %v2398_v52, %v2183_v57  ;;  %v3783_v32 = vpop.f32.mrf.mxu0  ;;  %v5102_v50 = vld [vmem:[#allocation9_spill] sm:$0xff]  ;;  %v5103_v26 = vld [vmem:[#allocation32_spill] sm:$0xff] }
 0x1dc   : > { %v3749_v18 = vpop.f32.mrf.mxu1  ;;  %v2188_v33 = vadd.f32 %v5101_v19, %v1891_v31  ;;  %v1894_v34 = vadd.f32 %v5103_v26, %v5102_v50  ;;  %v5104_v52 = vld [vmem:[#allocation29_spill] sm:$0xff] }
 0x1dd   : > { %2873 = vst.msk [vmem:[%s4853_s19 + $0x78] sm:$0xff] %vm297_vm1, %v2841_v36  ;;  %v2839_v59 = vmax.f32 %v2807_v47, 0.0  ;;  %v2812_v25 = vadd.f32 %v4839_v44, %v2773_v40  ;;  %v2771_v14 = vadd.f32 %v2692_v5, %v2477_v8  ;;  %v2480_v28 = vadd.f32 %v3749_v18, %v2186_v13  ;;  %v2695_v29 = vpop.f32.mrf.mxu0  ;;  %v5105_v47 = vld [vmem:[#allocation10_spill] sm:$0xff]  ;;  %v5107_v18 = vld [vmem:[#allocation31_spill] sm:$0xff] }
 0x1de   : > { %v2401_v53 = vpop.f32.mrf.mxu1  ;;  %v2193_v36 = vadd.f32 %v5104_v52, %v1896_v38  ;;  %v5106_v40 = vld [vmem:[#allocation34_spill] sm:$0xff] }
 0x1df   : > { %2871 = vst.msk [vmem:[%s4853_s19 + $0x68] sm:$0xff] %vm297_vm1, %v2839_v59  ;;  %v2844_v2 = vmax.f32 %v2812_v25, 0.0  ;;  %v2810_v15 = vadd.f32 %v4839_v44, %v2771_v14  ;;  %v2774_v30 = vadd.f32 %v3783_v32, %v2480_v28  ;;  %v2478_v51 = vadd.f32 %v2401_v53, %v2184_v41  ;;  %v3786_v62 = vpop.f32.mrf.mxu0  ;;  %v5108_v25 = vld [vmem:[#allocation11_spill] sm:$0xff]  ;;  %v5109_v14 = vld [vmem:[#allocation36_spill] sm:$0xff]  ;;  %v5110_v53 = vld [vmem:[#allocation33_spill] sm:$0xff] }
 0x1e0   : > { %v3752_v43 = vpop.f32.mrf.mxu1  ;;  %v1897_v8 = vadd.f32 %v5106_v40, %v5105_v47  ;;  %v2191_v59 = vadd.f32 %v5107_v18, %v1894_v34  ;;  %v1895_v28 = vadd.f32 %v5109_v14, %v5108_v25  ;;  %v5118_v34 = vld [vmem:[#allocation39_spill] sm:$0xff]  ;;  %v5120_v47 = vld [vmem:[#allocation41_spill] sm:$0xff] }
 0x1e1   : > { %2876 = vst.msk [vmem:[%s4853_s19 + $0x90] sm:$0xff] %vm297_vm1, %v2844_v2  ;;  %v2842_v61 = vmax.f32 %v2810_v15, 0.0  ;;  %v2813_v39 = vadd.f32 %v4839_v44, %v2774_v30  ;;  %v2772_v35 = vadd.f32 %v2695_v29, %v2478_v51  ;;  %v2483_v21 = vadd.f32 %v3752_v43, %v2189_v49  ;;  %v2708_v17 = vpop.f32.mrf.mxu0  ;;  %v5111_v15 = vld [vmem:[#allocation12_spill] sm:$0xff]  ;;  %v5112_v30 = vld [vmem:[#allocation38_spill] sm:$0xff]  ;;  %v5113_v43 = vld [vmem:[#allocation35_spill] sm:$0xff] }
 0x1e2   : > { %v2414_v6 = vpop.f32.mrf.mxu1  ;;  %v2194_v2 = vadd.f32 %v5110_v53, %v1897_v8  ;;  %v1900_v51 = vadd.f32 %v5112_v30, %v5111_v15 }
 0x1e3   : > { %2874 = vst.msk [vmem:[%s4853_s19 + $0x80] sm:$0xff] %vm297_vm1, %v2842_v61  ;;  %v2845_v48 = vmax.f32 %v2813_v39, 0.0  ;;  %v2811_v57 = vadd.f32 %v4839_v44, %v2772_v35  ;;  %v2777_v11 = vadd.f32 %v3786_v62, %v2483_v21  ;;  %v2481_v1 = vadd.f32 %v2414_v6, %v2187_v27  ;;  %v3787_v54 = vpop.f32.mrf.mxu0  ;;  %v5114_v39 = vld [vmem:[#allocation13_spill] sm:$0xff]  ;;  %v5115_v35 = vld [vmem:[#allocation40_spill] sm:$0xff] }
 0x1e4   : > { %v3753_v5 = vpop.f32.mrf.mxu1  ;;  %v2192_v61 = vadd.f32 %v5113_v43, %v1895_v28  ;;  %v1898_v21 = vadd.f32 %v5115_v35, %v5114_v39  ;;  %v5116_v6 = vld [vmem:[#allocation37_spill] sm:$0xff] }
 0x1e5   : > { %2877 = vst.msk [vmem:[%s4853_s19 + $0x98] sm:$0xff] %vm297_vm1, %v2845_v48  ;;  %v2843_v58 = vmax.f32 %v2811_v57, 0.0  ;;  %v2816_v13 = vadd.f32 %v4839_v44, %v2777_v11  ;;  %v2775_v4 = vadd.f32 %v2708_v17, %v2481_v1  ;;  %v2484_v22 = vadd.f32 %v3753_v5, %v2190_v56  ;;  %v2711_v3 = vpop.f32.mrf.mxu0  ;;  %v5117_v57 = vld [vmem:[#allocation14_spill] sm:$0xff] }
 0x1e6   : > { %v2417_v32 = vpop.f32.mrf.mxu1  ;;  %v2197_v48 = vadd.f32 %v5116_v6, %v1900_v51  ;;  %v1901_v11 = vadd.f32 %v4822_v10, %v5117_v57  ;;  %v2195_v5 = vadd.f32 %v5118_v34, %v1898_v21 }
 0x1e7   : > { %2875 = vst.msk [vmem:[%s4853_s19 + $0x88] sm:$0xff] %vm297_vm1, %v2843_v58  ;;  %v2848_v45 = vmax.f32 %v2816_v13, 0.0  ;;  %v2814_v41 = vadd.f32 %v4839_v44, %v2775_v4  ;;  %v2778_v12 = vadd.f32 %v3787_v54, %v2484_v22  ;;  %v2482_v7 = vadd.f32 %v2417_v32, %v2188_v33  ;;  %v3790_v60 = vpop.f32.mrf.mxu0  ;;  %v5119_v58 = vld [vmem:[#allocation15_spill] sm:$0xff] }
 0x1e8   : > { %v3756_v29 = vpop.f32.mrf.mxu1  ;;  %v1899_v13 = vadd.f32 %v4827_v42, %v5119_v58  ;;  %v2198_v40 = vadd.f32 %v5120_v47, %v1901_v11 }
 0x1e9   : > { %2880 = vst.msk [vmem:[%s4853_s19 + $0xb0] sm:$0xff] %vm297_vm1, %v2848_v45  ;;  %v2846_v23 = vmax.f32 %v2814_v41, 0.0  ;;  %v2817_v49 = vadd.f32 %v4839_v44, %v2778_v12  ;;  %v2776_v20 = vadd.f32 %v2711_v3, %v2482_v7  ;;  %v2487_v37 = vadd.f32 %v3756_v29, %v2193_v36  ;;  %v2724_v63 = vpop.f32.mrf.mxu0  ;;  %v5121_v12 = vld [vmem:[#allocation42_spill] sm:$0xff] }
 0x1ea   : > { %v2430_v62 = vpop.f32.mrf.mxu1  ;;  %v2196_v7 = vadd.f32 %v5121_v12, %v1899_v13 }
 0x1eb   : > { %2878 = vst.msk [vmem:[%s4853_s19 + $0xa0] sm:$0xff] %vm297_vm1, %v2846_v23  ;;  %v2849_v55 = vmax.f32 %v2817_v49, 0.0  ;;  %v2815_v27 = vadd.f32 %v4839_v44, %v2776_v20  ;;  %v2781_v0 = vadd.f32 %v3790_v60, %v2487_v37  ;;  %v2485_v24 = vadd.f32 %v2430_v62, %v2191_v59  ;;  %v3791_v31 = vpop.f32.mrf.mxu0 }
 0x1ec   : > { %v3757_v17 = vpop.f32.mrf.mxu1 }
 0x1ed   : > { %2881 = vst.msk [vmem:[%s4853_s19 + $0xb8] sm:$0xff] %vm297_vm1, %v2849_v55  ;;  %v2847_v9 = vmax.f32 %v2815_v27, 0.0  ;;  %v2820_v56 = vadd.f32 %v4839_v44, %v2781_v0  ;;  %v2779_v46 = vadd.f32 %v2724_v63, %v2485_v24  ;;  %v2488_v16 = vadd.f32 %v3757_v17, %v2194_v2  ;;  %v2727_v38 = vpop.f32.mrf.mxu0 }
 0x1ee   : > { %v2433_v1 = vpop.f32.mrf.mxu1 }
 0x1ef   : > { %2879 = vst.msk [vmem:[%s4853_s19 + $0xa8] sm:$0xff] %vm297_vm1, %v2847_v9  ;;  %v2852_v54 = vmax.f32 %v2820_v56, 0.0  ;;  %v2818_v19 = vadd.f32 %v4839_v44, %v2779_v46  ;;  %v2782_v33 = vadd.f32 %v3791_v31, %v2488_v16  ;;  %v2486_v50 = vadd.f32 %v2433_v1, %v2192_v61  ;;  %v3794_v26 = vpop.f32.mrf.mxu0 }
 0x1f0   : > { %v3760_v4 = vpop.f32.mrf.mxu1 }
 0x1f1   : > { %2884 = vst.msk [vmem:[%s4853_s19 + $0xd0] sm:$0xff] %vm297_vm1, %v2852_v54  ;;  %v2850_v10 = vmax.f32 %v2818_v19, 0.0  ;;  %v2821_v22 = vadd.f32 %v4839_v44, %v2782_v33  ;;  %v2780_v3 = vadd.f32 %v2727_v38, %v2486_v50  ;;  %v2491_v52 = vadd.f32 %v3760_v4, %v2197_v48  ;;  %v2740_v36 = vpop.f32.mrf.mxu0 }
 0x1f2   : > { %v2446_v8 = vpop.f32.mrf.mxu1 }
 0x1f3   : > { %2882 = vst.msk [vmem:[%s4853_s19 + $0xc0] sm:$0xff] %vm297_vm1, %v2850_v10  ;;  %v2853_v32 = vmax.f32 %v2821_v22, 0.0  ;;  %v2819_v45 = vadd.f32 %v4839_v44, %v2780_v3  ;;  %v2785_v42 = vadd.f32 %v3794_v26, %v2491_v52  ;;  %v2489_v41 = vadd.f32 %v2446_v8, %v2195_v5  ;;  %v3795_v18 = vpop.f32.mrf.mxu0 }
 0x1f4   : > { %v3761_v60 = vpop.f32.mrf.mxu1 }
 0x1f5   : > { %2885 = vst.msk [vmem:[%s4853_s19 + $0xd8] sm:$0xff] %vm297_vm1, %v2853_v32  ;;  %v2851_v59 = vmax.f32 %v2819_v45, 0.0  ;;  %v2824_v25 = vadd.f32 %v4839_v44, %v2785_v42  ;;  %v2783_v14 = vadd.f32 %v2740_v36, %v2489_v41  ;;  %v2492_v28 = vadd.f32 %v3761_v60, %v2198_v40  ;;  %v2743_v63 = vpop.f32.mrf.mxu0 }
 0x1f6   : > { %v2449_v29 = vpop.f32.mrf.mxu1 }
 0x1f7   : > { %2883 = vst.msk [vmem:[%s4853_s19 + $0xc8] sm:$0xff] %vm297_vm1, %v2851_v59  ;;  %v2856_v23 = vmax.f32 %v2824_v25, 0.0  ;;  %v2822_v49 = vadd.f32 %v4839_v44, %v2783_v14  ;;  %v2786_v20 = vadd.f32 %v3795_v18, %v2492_v28  ;;  %v2490_v37 = vadd.f32 %v2449_v29, %v2196_v7 }
 0x1f9   : > { %2888 = vst.msk [vmem:[%s4853_s19 + $0xf0] sm:$0xff] %vm297_vm1, %v2856_v23  ;;  %v2854_v53 = vmax.f32 %v2822_v49, 0.0  ;;  %v2825_v2 = vadd.f32 %v4839_v44, %v2786_v20  ;;  %v2784_v15 = vadd.f32 %v2743_v63, %v2490_v37 }
 0x1fb   : > { %2886 = vst.msk [vmem:[%s4853_s19 + $0xe0] sm:$0xff] %vm297_vm1, %v2854_v53  ;;  %v2857_v30 = vmax.f32 %v2825_v2, 0.0  ;;  %v2823_v51 = vadd.f32 %v4839_v44, %v2784_v15 }
 0x1fd   : > { %2889 = vst.msk [vmem:[%s4853_s19 + $0xf8] sm:$0xff] %vm297_vm1, %v2857_v30  ;;  %v2855_v62 = vmax.f32 %v2823_v51, 0.0 }
 0x1ff   : > { %2887 = vst.msk [vmem:[%s4853_s19 + $0xe8] sm:$0xff] %vm297_vm1, %v2855_v62 }
 0x200 PF: > { %s13_s14 = sadd.s32 1, %s3855_s14   ;;  %s5122_s12 = smov %s3851_s13 }
 0x201   : > { %p10_p5 = scmp.ge.s32.totalorder %s13_s14, 4   ;;  %s5123_s13 = smov %s5125_s15 }
 0x203   :  { %12 = sbr.rel (!%p10_p5) target bundleno = 2 (0x2), region = 73 }

// kernel: _lambda_.10
= control target key start
LH: loop header
LB: loop body
LE: loop exit
PB: predicated region body
PF: predicated region fallthrough
CT: control target
= control target key end

     0   :  { %s1166_s12 = smov 0   ;;  %s1168_s13 = smov 0   ;;  %s1380_s0 = inlined_call_operand.vmem [shape: f32[2,17,16,4], index: 0, kind: input, shape index: {}]   ;;  %s1381_s1 = inlined_call_operand.vmem [shape: bf16[2,4,4], index: 1, kind: input, shape index: {}]   ;;  %s1382_s2 = inlined_call_operand.vmem [shape: f32[1,4], index: 2, kind: input, shape index: {}]   ;;  %s1383_s3 = inlined_call_operand.vmem [shape: f32[2,256,4], index: 3, kind: output, shape index: {}]  }
   0x1   :  { %s1170_s14 = smov 0  }
   0x2 LB: > { %s25_s15 = sadd.s32 1, %s1140_s13  ;;  %p920_p0 = scmp.ge.s32.totalorder %s1144_s14, 1  ;;  %s1144_s14 = sphi %s1170_s14, %s13_s14   ;;  %s1140_s13 = sphi %s1168_s13, %s1385_s13   ;;  %s1136_s12 = sphi %s1166_s12, %s1384_s12  }
   0x3   : > { %p27_p1 = scmp.ge.s32.totalorder %s25_s15, 2  ;;  %p151_p2 = scmp.lt.s32.totalorder %s1144_s14, 3 }
   0x5   : > { %s1387_s15 = smov (%p27_p1, %s25_s15), 0  ;;  %p152_p3 = pnand %p920_p0, %p151_p2 }
   0x6   : > { %p179_p4 = scmp.lt.s32.totalorder (!%p152_p3), %s1136_s12, 1 }
   0x7   : > { %155 = sbr.rel (%p152_p3) target bundleno = 283 (0x11b), region = 32 }
   0xc   : > { %v956_v0 = vld [vmem:[%s1381_s1 + $0x2] sm:$0x3]  ;;  %vm349_vm0 = vcmask 1041408   ;;  %v246_v1 = vld [vmem:[%s1381_s1] sm:$0x3]  ;;  %s1389_s12 = smov (!%p179_p4, %s1136_s12), 1 }
   0xd   : > { %1095 = vmatprep.subr.msk.bf16.mxu0 %vm349_vm0, %v956_v0  ;;  %1096 = vmatprep.subr.msk.bf16.mxu1 %vm349_vm0, %v246_v1  ;;  %v351_v2 = vsel %vm349_vm0, %v956_v0, 0  ;;  %v563_v3 = vsel %vm349_vm0, %v246_v1, 0  ;;  %s1097_s20 = smul.u32 272, %s1389_s12  ;;  %vm300_vm1 = vcmask 31744   ;;  %v1267_v57 = vld [vmem:[%s1382_s2] ss:$0 sm:$0xff] }
   0xe   : > { %1028 = vmatpush3.bf16.msra.mxu0 %v351_v2  ;;  %1062 = vmatpush3.bf16.msra.mxu1 %v563_v3  ;;  %s992_s26 = sshll.u32 %s1389_s12, 8 }
   0xf   : > { %s1196_s23 = scalar_lea.vmem %s1380_s0, %s1097_s20  ;;  %s1274_s29 = scalar_lea.vmem %s1383_s3, %s992_s26 }
  0x10   : > { %v924_v4 = vld [vmem:[%s1196_s23 + $0x10] sm:$0xff]  ;;  %v925_v5 = vld [vmem:[%s1196_s23 + $0x18] sm:$0xff]  ;;  %v198_v6 = vld [vmem:[%s1196_s23] sm:$0xff] }
  0x11   : > { %v282_v7 = vpack.c.bf16 %v925_v5, %v924_v4  ;;  %v199_v8 = vld [vmem:[%s1196_s23 + $0x8] sm:$0xff]  ;;  %v926_v9 = vld [vmem:[%s1196_s23 + $0x20] sm:$0xff]  ;;  %v928_v13 = vld [vmem:[%s1196_s23 + $0x30] sm:$0xff] }
  0x12   : > { %v927_v10 = vld [vmem:[%s1196_s23 + $0x28] sm:$0xff]  ;;  %v230_v11 = vpack.c.bf16 %v199_v8, %v198_v6  ;;  %v929_v14 = vld [vmem:[%s1196_s23 + $0x38] sm:$0xff]  ;;  %v930_v16 = vld [vmem:[%s1196_s23 + $0x40] sm:$0xff] }
  0x13   : > { %v283_v12 = vpack.c.bf16 %v927_v10, %v926_v9  ;;  %1029 = vmatprep.mubr.msk.bf16.mxu0 %vm300_vm1, %v282_v7  ;;  %v284_v15 = vpack.c.bf16 %v929_v14, %v928_v13  ;;  %v931_v17 = vld [vmem:[%s1196_s23 + $0x48] sm:$0xff]  ;;  %v932_v18 = vld [vmem:[%s1196_s23 + $0x50] sm:$0xff]  ;;  %v933_v19 = vld [vmem:[%s1196_s23 + $0x58] sm:$0xff] }
  0x14   : > { %1063 = vmatprep.mubr.msk.bf16.mxu1 %vm300_vm1, %v230_v11  ;;  %v285_v20 = vpack.c.bf16 %v931_v17, %v930_v16  ;;  %v286_v21 = vpack.c.bf16 %v933_v19, %v932_v18  ;;  %v934_v22 = vld [vmem:[%s1196_s23 + $0x60] sm:$0xff]  ;;  %v935_v23 = vld [vmem:[%s1196_s23 + $0x68] sm:$0xff]  ;;  %v936_v24 = vld [vmem:[%s1196_s23 + $0x70] sm:$0xff] }
  0x15   : > { %1030 = vmatmul.mubr.msk.bf16.vlgmr.msra.gmra.mxu0 %vm300_vm1, %v283_v12  ;;  %1064 = vmatmul.mubr.msk.bf16.vlgmr.msra.gmra.mxu1 %vm300_vm1, %v282_v7  ;;  %v937_v25 = vld [vmem:[%s1196_s23 + $0x78] sm:$0xff]  ;;  %v287_v26 = vpack.c.bf16 %v935_v23, %v934_v22  ;;  %v938_v28 = vld [vmem:[%s1196_s23 + $0x80] sm:$0xff]  ;;  %v939_v29 = vld [vmem:[%s1196_s23 + $0x88] sm:$0xff] }
  0x16   : > { %1033 = vmatprep.mubr.msk.bf16.mxu0 %vm300_vm1, %v284_v15  ;;  %1067 = vmatprep.mubr.msk.bf16.mxu1 %vm300_vm1, %v283_v12  ;;  %v288_v27 = vpack.c.bf16 %v937_v25, %v936_v24  ;;  %v940_v30 = vld [vmem:[%s1196_s23 + $0x90] sm:$0xff]  ;;  %v941_v31 = vld [vmem:[%s1196_s23 + $0x98] sm:$0xff]  ;;  %v289_v32 = vpack.c.bf16 %v939_v29, %v938_v28  ;;  %v942_v34 = vld [vmem:[%s1196_s23 + $0xa0] sm:$0xff] }
  0x17   : > { %v290_v33 = vpack.c.bf16 %v941_v31, %v940_v30  ;;  %v943_v35 = vld [vmem:[%s1196_s23 + $0xa8] sm:$0xff]  ;;  %v944_v36 = vld [vmem:[%s1196_s23 + $0xb0] sm:$0xff]  ;;  %v945_v37 = vld [vmem:[%s1196_s23 + $0xb8] sm:$0xff] }
  0x18   : > { %v291_v38 = vpack.c.bf16 %v943_v35, %v942_v34  ;;  %v292_v39 = vpack.c.bf16 %v945_v37, %v944_v36  ;;  %v946_v40 = vld [vmem:[%s1196_s23 + $0xc0] sm:$0xff]  ;;  %v947_v41 = vld [vmem:[%s1196_s23 + $0xc8] sm:$0xff]  ;;  %v948_v42 = vld [vmem:[%s1196_s23 + $0xd0] sm:$0xff] }
  0x19   : > { %v949_v43 = vld [vmem:[%s1196_s23 + $0xd8] sm:$0xff]  ;;  %v293_v44 = vpack.c.bf16 %v947_v41, %v946_v40  ;;  %v950_v46 = vld [vmem:[%s1196_s23 + $0xe0] sm:$0xff]  ;;  %v951_v47 = vld [vmem:[%s1196_s23 + $0xe8] sm:$0xff] }
  0x1a   : > { %v294_v45 = vpack.c.bf16 %v949_v43, %v948_v42  ;;  %v952_v48 = vld [vmem:[%s1196_s23 + $0xf0] sm:$0xff]  ;;  %v953_v49 = vld [vmem:[%s1196_s23 + $0xf8] sm:$0xff]  ;;  %v295_v50 = vpack.c.bf16 %v951_v47, %v950_v46  ;;  %v954_v52 = vld [vmem:[%s1196_s23 + $0x100] sm:$0xff] }
  0x1b   : > { %v296_v51 = vpack.c.bf16 %v953_v49, %v952_v48  ;;  %v955_v53 = vld [vmem:[%s1196_s23 + $0x108] sm:$0xff] }
  0x1c   : > { %v297_v54 = vpack.c.bf16 %v955_v53, %v954_v52 }
  0x1d   : > { %1034 = vmatmul.mubr.msk.bf16.gmra.mxu0 %vm300_vm1, %v285_v20  ;;  %1068 = vmatmul.mubr.msk.bf16.gmra.mxu1 %vm300_vm1, %v284_v15 }
  0x1e   : > { %1037 = vmatprep.mubr.msk.bf16.mxu0 %vm300_vm1, %v286_v21  ;;  %1071 = vmatprep.mubr.msk.bf16.mxu1 %vm300_vm1, %v285_v20 }
  0x25   : > { %1038 = vmatmul.mubr.msk.bf16.gmra.mxu0 %vm300_vm1, %v287_v26  ;;  %1072 = vmatmul.mubr.msk.bf16.gmra.mxu1 %vm300_vm1, %v286_v21 }
  0x26   : > { %1041 = vmatprep.mubr.msk.bf16.mxu0 %vm300_vm1, %v288_v27  ;;  %1075 = vmatprep.mubr.msk.bf16.mxu1 %vm300_vm1, %v287_v26 }
  0x2d   : > { %1042 = vmatmul.mubr.msk.bf16.gmra.mxu0 %vm300_vm1, %v289_v32  ;;  %1076 = vmatmul.mubr.msk.bf16.gmra.mxu1 %vm300_vm1, %v288_v27 }
  0x2e   : > { %1045 = vmatprep.mubr.msk.bf16.mxu0 %vm300_vm1, %v290_v33  ;;  %1079 = vmatprep.mubr.msk.bf16.mxu1 %vm300_vm1, %v289_v32 }
  0x35   : > { %1046 = vmatmul.mubr.msk.bf16.gmra.mxu0 %vm300_vm1, %v291_v38  ;;  %1080 = vmatmul.mubr.msk.bf16.gmra.mxu1 %vm300_vm1, %v290_v33 }
  0x36   : > { %1049 = vmatprep.mubr.msk.bf16.mxu0 %vm300_vm1, %v292_v39  ;;  %1083 = vmatprep.mubr.msk.bf16.mxu1 %vm300_vm1, %v291_v38 }
  0x3d   : > { %1050 = vmatmul.mubr.msk.bf16.gmra.mxu0 %vm300_vm1, %v293_v44  ;;  %1084 = vmatmul.mubr.msk.bf16.gmra.mxu1 %vm300_vm1, %v292_v39 }
  0x3e   : > { %1053 = vmatprep.mubr.msk.bf16.mxu0 %vm300_vm1, %v294_v45  ;;  %1087 = vmatprep.mubr.msk.bf16.mxu1 %vm300_vm1, %v293_v44 }
  0x45   : > { %1054 = vmatmul.mubr.msk.bf16.gmra.mxu0 %vm300_vm1, %v295_v50  ;;  %1088 = vmatmul.mubr.msk.bf16.gmra.mxu1 %vm300_vm1, %v294_v45 }
  0x46   : > { %1057 = vmatprep.mubr.msk.bf16.mxu0 %vm300_vm1, %v296_v51  ;;  %1091 = vmatprep.mubr.msk.bf16.mxu1 %vm300_vm1, %v295_v50 }
  0x4d   : > { %1058 = vmatmul.mubr.msk.bf16.gmra.mxu0 %vm300_vm1, %v297_v54  ;;  %1092 = vmatmul.mubr.msk.bf16.gmra.mxu1 %vm300_vm1, %v296_v51 }
  0xd5   : > { %v1031_v55 = vpop.f32.mrf.mxu0  ;;  %v1065_v56 = vpop.f32.mrf.mxu1 }
  0xd6   : > { %v608_v58 = vadd.f32 %v1065_v56, %v1031_v55 }
  0xd7   : > { %v387_v59 = vpop.f32.mrf.mxu0  ;;  %v599_v60 = vpop.f32.mrf.mxu1 }
  0xd8   : > { %v735_v61 = vadd.f32 %v1267_v57, %v608_v58  ;;  %v600_v62 = vadd.f32 %v599_v60, %v387_v59 }
  0xd9   : > { %v1032_v63 = vpop.f32.mrf.mxu0  ;;  %v1066_v0 = vpop.f32.mrf.mxu1 }
  0xda   : > { %v767_v1 = vmax.f32 %v735_v61, 0.0  ;;  %v733_v2 = vadd.f32 %v1267_v57, %v600_v62  ;;  %v611_v3 = vadd.f32 %v1066_v0, %v1032_v63 }
  0xdb   : > { %v390_v4 = vpop.f32.mrf.mxu0  ;;  %v602_v5 = vpop.f32.mrf.mxu1 }
  0xdc   : > { %799 = vst.msk [vmem:[%s1274_s29 + $0x10] sm:$0xff] %vm300_vm1, %v767_v1  ;;  %v765_v6 = vmax.f32 %v733_v2, 0.0  ;;  %v736_v7 = vadd.f32 %v1267_v57, %v611_v3  ;;  %v603_v8 = vadd.f32 %v602_v5, %v390_v4 }
  0xdd   : > { %v1035_v9 = vpop.f32.mrf.mxu0  ;;  %v1069_v10 = vpop.f32.mrf.mxu1 }
  0xde   : > { %797 = vst.msk [vmem:[%s1274_s29] sm:$0xff] %vm300_vm1, %v765_v6  ;;  %v768_v11 = vmax.f32 %v736_v7, 0.0  ;;  %v734_v12 = vadd.f32 %v1267_v57, %v603_v8  ;;  %v624_v13 = vadd.f32 %v1069_v10, %v1035_v9 }
  0xdf   : > { %v403_v14 = vpop.f32.mrf.mxu0  ;;  %v615_v15 = vpop.f32.mrf.mxu1 }
  0xe0   : > { %800 = vst.msk [vmem:[%s1274_s29 + $0x18] sm:$0xff] %vm300_vm1, %v768_v11  ;;  %v766_v16 = vmax.f32 %v734_v12, 0.0  ;;  %v739_v17 = vadd.f32 %v1267_v57, %v624_v13  ;;  %v616_v18 = vadd.f32 %v615_v15, %v403_v14 }
  0xe1   : > { %v1036_v19 = vpop.f32.mrf.mxu0  ;;  %v1070_v20 = vpop.f32.mrf.mxu1 }
  0xe2   : > { %798 = vst.msk [vmem:[%s1274_s29 + $0x8] sm:$0xff] %vm300_vm1, %v766_v16  ;;  %v771_v21 = vmax.f32 %v739_v17, 0.0  ;;  %v737_v22 = vadd.f32 %v1267_v57, %v616_v18  ;;  %v627_v23 = vadd.f32 %v1070_v20, %v1036_v19 }
  0xe3   : > { %v406_v24 = vpop.f32.mrf.mxu0  ;;  %v618_v25 = vpop.f32.mrf.mxu1 }
  0xe4   : > { %803 = vst.msk [vmem:[%s1274_s29 + $0x30] sm:$0xff] %vm300_vm1, %v771_v21  ;;  %v769_v26 = vmax.f32 %v737_v22, 0.0  ;;  %v740_v27 = vadd.f32 %v1267_v57, %v627_v23  ;;  %v619_v28 = vadd.f32 %v618_v25, %v406_v24 }
  0xe5   : > { %v1039_v29 = vpop.f32.mrf.mxu0  ;;  %v1073_v30 = vpop.f32.mrf.mxu1 }
  0xe6   : > { %801 = vst.msk [vmem:[%s1274_s29 + $0x20] sm:$0xff] %vm300_vm1, %v769_v26  ;;  %v772_v31 = vmax.f32 %v740_v27, 0.0  ;;  %v738_v32 = vadd.f32 %v1267_v57, %v619_v28  ;;  %v640_v33 = vadd.f32 %v1073_v30, %v1039_v29 }
  0xe7   : > { %v419_v34 = vpop.f32.mrf.mxu0  ;;  %v631_v35 = vpop.f32.mrf.mxu1 }
  0xe8   : > { %804 = vst.msk [vmem:[%s1274_s29 + $0x38] sm:$0xff] %vm300_vm1, %v772_v31  ;;  %v770_v36 = vmax.f32 %v738_v32, 0.0  ;;  %v743_v37 = vadd.f32 %v1267_v57, %v640_v33  ;;  %v632_v38 = vadd.f32 %v631_v35, %v419_v34 }
  0xe9   : > { %v1040_v39 = vpop.f32.mrf.mxu0  ;;  %v1074_v40 = vpop.f32.mrf.mxu1 }
  0xea   : > { %802 = vst.msk [vmem:[%s1274_s29 + $0x28] sm:$0xff] %vm300_vm1, %v770_v36  ;;  %v775_v41 = vmax.f32 %v743_v37, 0.0  ;;  %v741_v42 = vadd.f32 %v1267_v57, %v632_v38  ;;  %v643_v43 = vadd.f32 %v1074_v40, %v1040_v39 }
  0xeb   : > { %v422_v44 = vpop.f32.mrf.mxu0  ;;  %v634_v45 = vpop.f32.mrf.mxu1 }
  0xec   : > { %807 = vst.msk [vmem:[%s1274_s29 + $0x50] sm:$0xff] %vm300_vm1, %v775_v41  ;;  %v773_v46 = vmax.f32 %v741_v42, 0.0  ;;  %v744_v47 = vadd.f32 %v1267_v57, %v643_v43  ;;  %v635_v48 = vadd.f32 %v634_v45, %v422_v44 }
  0xed   : > { %v1043_v49 = vpop.f32.mrf.mxu0  ;;  %v1077_v50 = vpop.f32.mrf.mxu1 }
  0xee   : > { %805 = vst.msk [vmem:[%s1274_s29 + $0x40] sm:$0xff] %vm300_vm1, %v773_v46  ;;  %v776_v51 = vmax.f32 %v744_v47, 0.0  ;;  %v742_v52 = vadd.f32 %v1267_v57, %v635_v48  ;;  %v656_v53 = vadd.f32 %v1077_v50, %v1043_v49 }
  0xef   : > { %v435_v54 = vpop.f32.mrf.mxu0  ;;  %v647_v55 = vpop.f32.mrf.mxu1 }
  0xf0   : > { %808 = vst.msk [vmem:[%s1274_s29 + $0x58] sm:$0xff] %vm300_vm1, %v776_v51  ;;  %v774_v56 = vmax.f32 %v742_v52, 0.0  ;;  %v747_v58 = vadd.f32 %v1267_v57, %v656_v53  ;;  %v648_v59 = vadd.f32 %v647_v55, %v435_v54 }
  0xf1   : > { %v1044_v60 = vpop.f32.mrf.mxu0  ;;  %v1078_v61 = vpop.f32.mrf.mxu1 }
  0xf2   : > { %806 = vst.msk [vmem:[%s1274_s29 + $0x48] sm:$0xff] %vm300_vm1, %v774_v56  ;;  %v779_v62 = vmax.f32 %v747_v58, 0.0  ;;  %v745_v63 = vadd.f32 %v1267_v57, %v648_v59  ;;  %v659_v0 = vadd.f32 %v1078_v61, %v1044_v60 }
  0xf3   : > { %v438_v1 = vpop.f32.mrf.mxu0  ;;  %v650_v2 = vpop.f32.mrf.mxu1 }
  0xf4   : > { %811 = vst.msk [vmem:[%s1274_s29 + $0x70] sm:$0xff] %vm300_vm1, %v779_v62  ;;  %v777_v3 = vmax.f32 %v745_v63, 0.0  ;;  %v748_v4 = vadd.f32 %v1267_v57, %v659_v0  ;;  %v651_v5 = vadd.f32 %v650_v2, %v438_v1 }
  0xf5   : > { %v1047_v6 = vpop.f32.mrf.mxu0  ;;  %v1081_v7 = vpop.f32.mrf.mxu1 }
  0xf6   : > { %809 = vst.msk [vmem:[%s1274_s29 + $0x60] sm:$0xff] %vm300_vm1, %v777_v3  ;;  %v780_v8 = vmax.f32 %v748_v4, 0.0  ;;  %v746_v9 = vadd.f32 %v1267_v57, %v651_v5  ;;  %v672_v10 = vadd.f32 %v1081_v7, %v1047_v6 }
  0xf7   : > { %v451_v11 = vpop.f32.mrf.mxu0  ;;  %v663_v12 = vpop.f32.mrf.mxu1 }
  0xf8   : > { %812 = vst.msk [vmem:[%s1274_s29 + $0x78] sm:$0xff] %vm300_vm1, %v780_v8  ;;  %v778_v13 = vmax.f32 %v746_v9, 0.0  ;;  %v751_v14 = vadd.f32 %v1267_v57, %v672_v10  ;;  %v664_v15 = vadd.f32 %v663_v12, %v451_v11 }
  0xf9   : > { %v1048_v16 = vpop.f32.mrf.mxu0  ;;  %v1082_v17 = vpop.f32.mrf.mxu1 }
  0xfa   : > { %810 = vst.msk [vmem:[%s1274_s29 + $0x68] sm:$0xff] %vm300_vm1, %v778_v13  ;;  %v783_v18 = vmax.f32 %v751_v14, 0.0  ;;  %v749_v19 = vadd.f32 %v1267_v57, %v664_v15  ;;  %v675_v20 = vadd.f32 %v1082_v17, %v1048_v16 }
  0xfb   : > { %v454_v21 = vpop.f32.mrf.mxu0  ;;  %v666_v22 = vpop.f32.mrf.mxu1 }
  0xfc   : > { %815 = vst.msk [vmem:[%s1274_s29 + $0x90] sm:$0xff] %vm300_vm1, %v783_v18  ;;  %v781_v23 = vmax.f32 %v749_v19, 0.0  ;;  %v752_v24 = vadd.f32 %v1267_v57, %v675_v20  ;;  %v667_v25 = vadd.f32 %v666_v22, %v454_v21 }
  0xfd   : > { %v1051_v26 = vpop.f32.mrf.mxu0  ;;  %v1085_v27 = vpop.f32.mrf.mxu1 }
  0xfe   : > { %813 = vst.msk [vmem:[%s1274_s29 + $0x80] sm:$0xff] %vm300_vm1, %v781_v23  ;;  %v784_v28 = vmax.f32 %v752_v24, 0.0  ;;  %v750_v29 = vadd.f32 %v1267_v57, %v667_v25  ;;  %v688_v30 = vadd.f32 %v1085_v27, %v1051_v26 }
  0xff   : > { %v467_v31 = vpop.f32.mrf.mxu0  ;;  %v679_v32 = vpop.f32.mrf.mxu1 }
 0x100   : > { %816 = vst.msk [vmem:[%s1274_s29 + $0x98] sm:$0xff] %vm300_vm1, %v784_v28  ;;  %v782_v33 = vmax.f32 %v750_v29, 0.0  ;;  %v755_v34 = vadd.f32 %v1267_v57, %v688_v30  ;;  %v680_v35 = vadd.f32 %v679_v32, %v467_v31 }
 0x101   : > { %v1052_v36 = vpop.f32.mrf.mxu0  ;;  %v1086_v37 = vpop.f32.mrf.mxu1 }
 0x102   : > { %814 = vst.msk [vmem:[%s1274_s29 + $0x88] sm:$0xff] %vm300_vm1, %v782_v33  ;;  %v787_v38 = vmax.f32 %v755_v34, 0.0  ;;  %v753_v39 = vadd.f32 %v1267_v57, %v680_v35  ;;  %v691_v40 = vadd.f32 %v1086_v37, %v1052_v36 }
 0x103   : > { %v470_v41 = vpop.f32.mrf.mxu0  ;;  %v682_v42 = vpop.f32.mrf.mxu1 }
 0x104   : > { %819 = vst.msk [vmem:[%s1274_s29 + $0xb0] sm:$0xff] %vm300_vm1, %v787_v38  ;;  %v785_v43 = vmax.f32 %v753_v39, 0.0  ;;  %v756_v44 = vadd.f32 %v1267_v57, %v691_v40  ;;  %v683_v45 = vadd.f32 %v682_v42, %v470_v41 }
 0x105   : > { %v1055_v46 = vpop.f32.mrf.mxu0  ;;  %v1089_v47 = vpop.f32.mrf.mxu1 }
 0x106   : > { %817 = vst.msk [vmem:[%s1274_s29 + $0xa0] sm:$0xff] %vm300_vm1, %v785_v43  ;;  %v788_v48 = vmax.f32 %v756_v44, 0.0  ;;  %v754_v49 = vadd.f32 %v1267_v57, %v683_v45  ;;  %v704_v50 = vadd.f32 %v1089_v47, %v1055_v46 }
 0x107   : > { %v483_v51 = vpop.f32.mrf.mxu0  ;;  %v695_v52 = vpop.f32.mrf.mxu1 }
 0x108   : > { %820 = vst.msk [vmem:[%s1274_s29 + $0xb8] sm:$0xff] %vm300_vm1, %v788_v48  ;;  %v786_v53 = vmax.f32 %v754_v49, 0.0  ;;  %v759_v54 = vadd.f32 %v1267_v57, %v704_v50  ;;  %v696_v55 = vadd.f32 %v695_v52, %v483_v51 }
 0x109   : > { %v1056_v56 = vpop.f32.mrf.mxu0  ;;  %v1090_v58 = vpop.f32.mrf.mxu1 }
 0x10a   : > { %818 = vst.msk [vmem:[%s1274_s29 + $0xa8] sm:$0xff] %vm300_vm1, %v786_v53  ;;  %v791_v59 = vmax.f32 %v759_v54, 0.0  ;;  %v757_v60 = vadd.f32 %v1267_v57, %v696_v55  ;;  %v707_v61 = vadd.f32 %v1090_v58, %v1056_v56 }
 0x10b   : > { %v486_v62 = vpop.f32.mrf.mxu0  ;;  %v698_v63 = vpop.f32.mrf.mxu1 }
 0x10c   : > { %823 = vst.msk [vmem:[%s1274_s29 + $0xd0] sm:$0xff] %vm300_vm1, %v791_v59  ;;  %v789_v0 = vmax.f32 %v757_v60, 0.0  ;;  %v760_v1 = vadd.f32 %v1267_v57, %v707_v61  ;;  %v699_v2 = vadd.f32 %v698_v63, %v486_v62 }
 0x10d   : > { %v1059_v3 = vpop.f32.mrf.mxu0  ;;  %v1093_v4 = vpop.f32.mrf.mxu1 }
 0x10e   : > { %821 = vst.msk [vmem:[%s1274_s29 + $0xc0] sm:$0xff] %vm300_vm1, %v789_v0  ;;  %v792_v5 = vmax.f32 %v760_v1, 0.0  ;;  %v758_v6 = vadd.f32 %v1267_v57, %v699_v2  ;;  %v720_v7 = vadd.f32 %v1093_v4, %v1059_v3 }
 0x10f   : > { %v499_v8 = vpop.f32.mrf.mxu0  ;;  %v711_v9 = vpop.f32.mrf.mxu1 }
 0x110   : > { %824 = vst.msk [vmem:[%s1274_s29 + $0xd8] sm:$0xff] %vm300_vm1, %v792_v5  ;;  %v790_v10 = vmax.f32 %v758_v6, 0.0  ;;  %v763_v11 = vadd.f32 %v1267_v57, %v720_v7  ;;  %v712_v12 = vadd.f32 %v711_v9, %v499_v8 }
 0x111   : > { %v1060_v13 = vpop.f32.mrf.mxu0  ;;  %v1094_v14 = vpop.f32.mrf.mxu1 }
 0x112   : > { %822 = vst.msk [vmem:[%s1274_s29 + $0xc8] sm:$0xff] %vm300_vm1, %v790_v10  ;;  %v795_v15 = vmax.f32 %v763_v11, 0.0  ;;  %v761_v16 = vadd.f32 %v1267_v57, %v712_v12  ;;  %v723_v17 = vadd.f32 %v1094_v14, %v1060_v13 }
 0x113   : > { %v502_v18 = vpop.f32.mrf.mxu0  ;;  %v714_v19 = vpop.f32.mrf.mxu1 }
 0x114   : > { %827 = vst.msk [vmem:[%s1274_s29 + $0xf0] sm:$0xff] %vm300_vm1, %v795_v15  ;;  %v793_v20 = vmax.f32 %v761_v16, 0.0  ;;  %v764_v21 = vadd.f32 %v1267_v57, %v723_v17  ;;  %v715_v22 = vadd.f32 %v714_v19, %v502_v18 }
 0x116   : > { %825 = vst.msk [vmem:[%s1274_s29 + $0xe0] sm:$0xff] %vm300_vm1, %v793_v20  ;;  %v796_v23 = vmax.f32 %v764_v21, 0.0  ;;  %v762_v24 = vadd.f32 %v1267_v57, %v715_v22 }
 0x118   : > { %828 = vst.msk [vmem:[%s1274_s29 + $0xf8] sm:$0xff] %vm300_vm1, %v796_v23  ;;  %v794_v25 = vmax.f32 %v762_v24, 0.0 }
 0x11a   : > { %826 = vst.msk [vmem:[%s1274_s29 + $0xe8] sm:$0xff] %vm300_vm1, %v794_v25 }
 0x11b PF: > { %s13_s14 = sadd.s32 1, %s1144_s14   ;;  %s1384_s12 = smov %s1140_s13 }
 0x11c   : > { %p10_p5 = scmp.ge.s32.totalorder %s13_s14, 4   ;;  %s1385_s13 = smov %s1387_s15 }
 0x11e   :  { %12 = sbr.rel (!%p10_p5) target bundleno = 2 (0x2), region = 65 }

// kernel: _lambda_.8
= control target key start
LH: loop header
LB: loop body
LE: loop exit
PB: predicated region body
PF: predicated region fallthrough
CT: control target
= control target key end

     0   :  { %s1924_s12 = smov 0   ;;  %s1926_s13 = smov 0   ;;  %s2487_s0 = inlined_call_operand.vmem [shape: f32[2,17,17,4], index: 0, kind: input, shape index: {}]   ;;  %s2488_s1 = inlined_call_operand.vmem [shape: bf16[4,4,4], index: 1, kind: input, shape index: {}]   ;;  %s2489_s2 = inlined_call_operand.vmem [shape: f32[1,4], index: 2, kind: input, shape index: {}]   ;;  %s2490_s3 = inlined_call_operand.vmem [shape: f32[2,256,4], index: 3, kind: output, shape index: {}]  }
   0x1   :  { %s1928_s14 = smov 0  }
   0x2 LB: > { %s25_s15 = sadd.s32 1, %s1898_s13  ;;  %p1508_p0 = scmp.ge.s32.totalorder %s1902_s14, 1  ;;  %s1902_s14 = sphi %s1928_s14, %s13_s14   ;;  %s1898_s13 = sphi %s1926_s13, %s2516_s13   ;;  %s1894_s12 = sphi %s1924_s12, %s2515_s12  }
   0x3   : > { %p27_p1 = scmp.ge.s32.totalorder %s25_s15, 2  ;;  %p151_p2 = scmp.lt.s32.totalorder %s1902_s14, 3 }
   0x5   : > { %s2518_s15 = smov (%p27_p1, %s25_s15), 0  ;;  %p152_p3 = pnand %p1508_p0, %p151_p2 }
   0x7   : > { %155 = sbr.rel (%p152_p3) target bundleno = 351 (0x15f), region = 32 }
   0xc   : > { %v1512_v0 = vld [vmem:[%s2488_s1 + $0x2] sm:$0x3]  ;;  %vm346_vm0 = vcmask 1041408   ;;  %v246_v1 = vld [vmem:[%s2488_s1] sm:$0x3]  ;;  %p179_p4 = scmp.lt.s32.totalorder %s1894_s12, 1 }
   0xd   : > { %1851 = vmatprep.subr.msk.bf16.mxu0 %vm346_vm0, %v1512_v0  ;;  %v348_v2 = vsel %vm346_vm0, %v1512_v0, 0  ;;  %1852 = vmatprep.subr.msk.bf16.mxu1 %vm346_vm0, %v246_v1  ;;  %v560_v3 = vsel %vm346_vm0, %v246_v1, 0  ;;  %v1577_v4 = vld [vmem:[%s2488_s1 + $0x4] sm:$0x3]  ;;  %v1626_v5 = vld [vmem:[%s2488_s1 + $0x6] sm:$0x3] }
   0xe   : > { %1716 = vmatpush3.bf16.msra.mxu0 %v348_v2  ;;  %1750 = vmatpush3.bf16.msra.mxu1 %v560_v3  ;;  %s2520_s12 = smov (!%p179_p4, %s1894_s12), 1  ;;  %vm297_vm1 = vcmask 31744   ;;  %v825_v17 = vsel %vm346_vm0, %v1577_v4, 0  ;;  %v1119_v20 = vsel %vm346_vm0, %v1626_v5, 0 }
   0xf   : > { %1853 = vmatprep.subr.msk.bf16.mxu0 %vm346_vm0, %v1577_v4  ;;  %1854 = vmatprep.subr.msk.bf16.mxu1 %vm346_vm0, %v1626_v5  ;;  %s1855_s24 = smul.u32 408, %s2520_s12  ;;  %s1646_s30 = sshll.u32 %s2520_s12, 8 }
  0x10   : > { %s2327_s6 = scalar_lea.vmem %s2490_s3, %s1646_s30 }
  0x11   : > { %s1966_s27 = scalar_lea.vmem %s2487_s0, %s1855_s24 }
  0x12   : > { %v247_v6 = vld [vmem:[%s1966_s27 + $0x1] sm:$0xff]  ;;  %v248_v7 = vld [vmem:[%s1966_s27 + $0x9] sm:$0xff]  ;;  %v249_v11 = vld [vmem:[%s1966_s27 + $0x19] sm:$0xff] }
  0x13   : > { %v198_v8 = vld [vmem:[%s1966_s27] sm:$0xff]  ;;  %v279_v9 = vpack.c.bf16 %v248_v7, %v247_v6  ;;  %v199_v10 = vld [vmem:[%s1966_s27 + $0x8] sm:$0xff]  ;;  %v200_v15 = vld [vmem:[%s1966_s27 + $0x18] sm:$0xff] }
  0x14   : > { %v250_v12 = vld [vmem:[%s1966_s27 + $0x21] sm:$0xff]  ;;  %v230_v13 = vpack.c.bf16 %v199_v10, %v198_v8  ;;  %v251_v18 = vld [vmem:[%s1966_s27 + $0x31] sm:$0xff]  ;;  %v252_v21 = vld [vmem:[%s1966_s27 + $0x39] sm:$0xff] }
  0x15   : > { %v1974_v14 = vpack.c.bf16 %v250_v12, %v249_v11  ;;  %v201_v16 = vld [vmem:[%s1966_s27 + $0x20] sm:$0xff]  ;;  %1717 = vmatprep.mubr.msk.bf16.mxu0 %vm297_vm1, %v279_v9  ;;  %v202_v22 = vld [vmem:[%s1966_s27 + $0x30] sm:$0xff]  ;;  %v203_v23 = vld [vmem:[%s1966_s27 + $0x38] sm:$0xff]  ;;  %v1990_v24 = vpack.c.bf16 %v252_v21, %v251_v18 }
  0x16   : > { %v1981_v19 = vpack.c.bf16 %v201_v16, %v200_v15  ;;  %1751 = vmatprep.mubr.msk.bf16.mxu1 %vm297_vm1, %v230_v13  ;;  %v1992_v25 = vpack.c.bf16 %v203_v23, %v202_v22  ;;  %v253_v26 = vld [vmem:[%s1966_s27 + $0x49] sm:$0xff]  ;;  %v254_v27 = vld [vmem:[%s1966_s27 + $0x51] sm:$0xff]  ;;  %v255_v30 = vld [vmem:[%s1966_s27 + $0x61] sm:$0xff] }
  0x17   : > { %1718 = vmatmul.mubr.msk.bf16.vlgmr.msra.gmra.mxu0 %vm297_vm1, %v1974_v14  ;;  %v204_v28 = vld [vmem:[%s1966_s27 + $0x48] sm:$0xff]  ;;  %v205_v29 = vld [vmem:[%s1966_s27 + $0x50] sm:$0xff]  ;;  %v206_v32 = vld [vmem:[%s1966_s27 + $0x60] sm:$0xff]  ;;  %v2008_v34 = vpack.c.bf16 %v254_v27, %v253_v26 }
  0x18   : > { %1752 = vmatmul.mubr.msk.bf16.vlgmr.msra.gmra.mxu1 %vm297_vm1, %v1981_v19  ;;  %1784 = vmatpush3.bf16.msra.mxu0 %v825_v17  ;;  %v256_v31 = vld [vmem:[%s1966_s27 + $0x69] sm:$0xff]  ;;  %v2010_v35 = vpack.c.bf16 %v205_v29, %v204_v28  ;;  %v257_v38 = vld [vmem:[%s1966_s27 + $0x79] sm:$0xff]  ;;  %v258_v39 = vld [vmem:[%s1966_s27 + $0x81] sm:$0xff] }
  0x19   : > { %1818 = vmatpush3.bf16.msra.mxu1 %v1119_v20  ;;  %1721 = vmatprep.mubr.msk.bf16.mxu0 %vm297_vm1, %v1990_v24  ;;  %v207_v33 = vld [vmem:[%s1966_s27 + $0x68] sm:$0xff]  ;;  %v2012_v36 = vpack.c.bf16 %v256_v31, %v255_v30  ;;  %v208_v40 = vld [vmem:[%s1966_s27 + $0x78] sm:$0xff]  ;;  %v209_v41 = vld [vmem:[%s1966_s27 + $0x80] sm:$0xff]  ;;  %v2032_v46 = vpack.c.bf16 %v258_v39, %v257_v38 }
  0x1a   : > { %1755 = vmatprep.mubr.msk.bf16.mxu1 %vm297_vm1, %v1992_v25  ;;  %v2014_v37 = vpack.c.bf16 %v207_v33, %v206_v32  ;;  %v259_v42 = vld [vmem:[%s1966_s27 + $0x91] sm:$0xff]  ;;  %v260_v43 = vld [vmem:[%s1966_s27 + $0x99] sm:$0xff]  ;;  %v2034_v47 = vpack.c.bf16 %v209_v41, %v208_v40  ;;  %v261_v50 = vld [vmem:[%s1966_s27 + $0xa9] sm:$0xff] }
  0x1b   : > { %v210_v44 = vld [vmem:[%s1966_s27 + $0x90] sm:$0xff]  ;;  %v211_v45 = vld [vmem:[%s1966_s27 + $0x98] sm:$0xff]  ;;  %v2036_v48 = vpack.c.bf16 %v260_v43, %v259_v42  ;;  %v212_v52 = vld [vmem:[%s1966_s27 + $0xa8] sm:$0xff] }
  0x1c   : > { %v2038_v49 = vpack.c.bf16 %v211_v45, %v210_v44  ;;  %v262_v51 = vld [vmem:[%s1966_s27 + $0xb1] sm:$0xff]  ;;  %v263_v54 = vld [vmem:[%s1966_s27 + $0xc1] sm:$0xff]  ;;  %v264_v55 = vld [vmem:[%s1966_s27 + $0xc9] sm:$0xff] }
  0x1d   : > { %v213_v53 = vld [vmem:[%s1966_s27 + $0xb0] sm:$0xff]  ;;  %v214_v56 = vld [vmem:[%s1966_s27 + $0xc0] sm:$0xff]  ;;  %v215_v57 = vld [vmem:[%s1966_s27 + $0xc8] sm:$0xff]  ;;  %v2056_v58 = vpack.c.bf16 %v262_v51, %v261_v50  ;;  %v2060_v60 = vpack.c.bf16 %v264_v55, %v263_v54 }
  0x1e   : > { %v2058_v59 = vpack.c.bf16 %v213_v53, %v212_v52  ;;  %v2062_v61 = vpack.c.bf16 %v215_v57, %v214_v56  ;;  %v265_v62 = vld [vmem:[%s1966_s27 + $0xd9] sm:$0xff]  ;;  %v266_v63 = vld [vmem:[%s1966_s27 + $0xe1] sm:$0xff]  ;;  %v267_v2 = vld [vmem:[%s1966_s27 + $0xf1] sm:$0xff] }
  0x1f   : > { %1722 = vmatmul.mubr.msk.bf16.gmra.mxu0 %vm297_vm1, %v2008_v34  ;;  %v216_v0 = vld [vmem:[%s1966_s27 + $0xd8] sm:$0xff]  ;;  %v217_v1 = vld [vmem:[%s1966_s27 + $0xe0] sm:$0xff]  ;;  %v218_v4 = vld [vmem:[%s1966_s27 + $0xf0] sm:$0xff]  ;;  %v2080_v6 = vpack.c.bf16 %v266_v63, %v265_v62 }
  0x20   : > { %1756 = vmatmul.mubr.msk.bf16.gmra.mxu1 %vm297_vm1, %v2010_v35  ;;  %1725 = vmatprep.mubr.msk.bf16.mxu0 %vm297_vm1, %v2012_v36  ;;  %v268_v3 = vld [vmem:[%s1966_s27 + $0xf9] sm:$0xff]  ;;  %v2082_v7 = vpack.c.bf16 %v217_v1, %v216_v0  ;;  %v269_v10 = vld [vmem:[%s1966_s27 + $0x109] sm:$0xff]  ;;  %v270_v11 = vld [vmem:[%s1966_s27 + $0x111] sm:$0xff] }
  0x21   : > { %1759 = vmatprep.mubr.msk.bf16.mxu1 %vm297_vm1, %v2014_v37  ;;  %v219_v5 = vld [vmem:[%s1966_s27 + $0xf8] sm:$0xff]  ;;  %v2084_v8 = vpack.c.bf16 %v268_v3, %v267_v2  ;;  %v220_v12 = vld [vmem:[%s1966_s27 + $0x108] sm:$0xff]  ;;  %v221_v13 = vld [vmem:[%s1966_s27 + $0x110] sm:$0xff]  ;;  %v290_v20 = vpack.c.bf16 %v270_v11, %v269_v10 }
  0x22   : > { %v2086_v9 = vpack.c.bf16 %v219_v5, %v218_v4  ;;  %v271_v15 = vld [vmem:[%s1966_s27 + $0x121] sm:$0xff]  ;;  %v272_v16 = vld [vmem:[%s1966_s27 + $0x129] sm:$0xff]  ;;  %v241_v21 = vpack.c.bf16 %v221_v13, %v220_v12  ;;  %v273_v26 = vld [vmem:[%s1966_s27 + $0x139] sm:$0xff] }
  0x23   : > { %v222_v17 = vld [vmem:[%s1966_s27 + $0x120] sm:$0xff]  ;;  %v223_v18 = vld [vmem:[%s1966_s27 + $0x128] sm:$0xff]  ;;  %v291_v22 = vpack.c.bf16 %v272_v16, %v271_v15  ;;  %v224_v28 = vld [vmem:[%s1966_s27 + $0x138] sm:$0xff] }
  0x24   : > { %v242_v23 = vpack.c.bf16 %v223_v18, %v222_v17  ;;  %v274_v27 = vld [vmem:[%s1966_s27 + $0x141] sm:$0xff]  ;;  %v275_v30 = vld [vmem:[%s1966_s27 + $0x151] sm:$0xff]  ;;  %v276_v31 = vld [vmem:[%s1966_s27 + $0x159] sm:$0xff] }
  0x25   : > { %v225_v29 = vld [vmem:[%s1966_s27 + $0x140] sm:$0xff]  ;;  %v226_v32 = vld [vmem:[%s1966_s27 + $0x150] sm:$0xff]  ;;  %v227_v33 = vld [vmem:[%s1966_s27 + $0x158] sm:$0xff]  ;;  %v292_v38 = vpack.c.bf16 %v274_v27, %v273_v26  ;;  %v293_v40 = vpack.c.bf16 %v276_v31, %v275_v30 }
  0x26   : > { %v243_v39 = vpack.c.bf16 %v225_v29, %v224_v28  ;;  %v244_v41 = vpack.c.bf16 %v227_v33, %v226_v32  ;;  %v277_v42 = vld [vmem:[%s1966_s27 + $0x169] sm:$0xff]  ;;  %v278_v43 = vld [vmem:[%s1966_s27 + $0x171] sm:$0xff] }
  0x27   : > { %1726 = vmatmul.mubr.msk.bf16.gmra.mxu0 %vm297_vm1, %v2032_v46  ;;  %v228_v44 = vld [vmem:[%s1966_s27 + $0x168] sm:$0xff]  ;;  %v229_v45 = vld [vmem:[%s1966_s27 + $0x170] sm:$0xff]  ;;  %v294_v50 = vpack.c.bf16 %v278_v43, %v277_v42 }
  0x28   : > { %1760 = vmatmul.mubr.msk.bf16.gmra.mxu1 %vm297_vm1, %v2034_v47  ;;  %1729 = vmatprep.mubr.msk.bf16.mxu0 %vm297_vm1, %v2036_v48  ;;  %v245_v51 = vpack.c.bf16 %v229_v45, %v228_v44 }
  0x29   : > { %1763 = vmatprep.mubr.msk.bf16.mxu1 %vm297_vm1, %v2038_v49 }
  0x2f   : > { %1730 = vmatmul.mubr.msk.bf16.gmra.mxu0 %vm297_vm1, %v2056_v58 }
  0x30   : > { %1764 = vmatmul.mubr.msk.bf16.gmra.mxu1 %vm297_vm1, %v2058_v59  ;;  %1733 = vmatprep.mubr.msk.bf16.mxu0 %vm297_vm1, %v2060_v60 }
  0x31   : > { %1767 = vmatprep.mubr.msk.bf16.mxu1 %vm297_vm1, %v2062_v61 }
  0x37   : > { %1734 = vmatmul.mubr.msk.bf16.gmra.mxu0 %vm297_vm1, %v2080_v6 }
  0x38   : > { %1768 = vmatmul.mubr.msk.bf16.gmra.mxu1 %vm297_vm1, %v2082_v7  ;;  %1737 = vmatprep.mubr.msk.bf16.mxu0 %vm297_vm1, %v2084_v8 }
  0x39   : > { %1771 = vmatprep.mubr.msk.bf16.mxu1 %vm297_vm1, %v2086_v9 }
  0x3f   : > { %1738 = vmatmul.mubr.msk.bf16.gmra.mxu0 %vm297_vm1, %v290_v20 }
  0x40   : > { %1772 = vmatmul.mubr.msk.bf16.gmra.mxu1 %vm297_vm1, %v241_v21  ;;  %1741 = vmatprep.mubr.msk.bf16.mxu0 %vm297_vm1, %v291_v22 }
  0x41   : > { %1775 = vmatprep.mubr.msk.bf16.mxu1 %vm297_vm1, %v242_v23 }
  0x47   : > { %1742 = vmatmul.mubr.msk.bf16.gmra.mxu0 %vm297_vm1, %v292_v38 }
  0x48   : > { %1776 = vmatmul.mubr.msk.bf16.gmra.mxu1 %vm297_vm1, %v243_v39  ;;  %1745 = vmatprep.mubr.msk.bf16.mxu0 %vm297_vm1, %v293_v40 }
  0x49   : > { %1779 = vmatprep.mubr.msk.bf16.mxu1 %vm297_vm1, %v244_v41 }
  0x4f   : > { %1746 = vmatmul.mubr.msk.bf16.gmra.mxu0 %vm297_vm1, %v294_v50 }
  0x50   : > { %1780 = vmatmul.mubr.msk.bf16.gmra.mxu1 %vm297_vm1, %v245_v51  ;;  %1785 = vmatprep.mubr.msk.bf16.mxu0 %vm297_vm1, %v1981_v19  ;;  %v1576_v19 = vld [vmem:[%s1966_s27 + $0x188] sm:$0xff] }
  0x51   : > { %1819 = vmatprep.mubr.msk.bf16.mxu1 %vm297_vm1, %v1974_v14  ;;  %v1575_v14 = vld [vmem:[%s1966_s27 + $0x180] sm:$0xff] }
  0x57   : > { %1786 = vmatmul.mubr.msk.bf16.vlgmr.msra.gmra.mxu0 %vm297_vm1, %v1992_v25  ;;  %v1625_v25 = vld [vmem:[%s1966_s27 + $0x189] sm:$0xff] }
  0x58   : > { %1820 = vmatmul.mubr.msk.bf16.vlgmr.msra.gmra.mxu1 %vm297_vm1, %v1990_v24  ;;  %1789 = vmatprep.mubr.msk.bf16.mxu0 %vm297_vm1, %v2010_v35  ;;  %v1624_v24 = vld [vmem:[%s1966_s27 + $0x181] sm:$0xff] }
  0x59   : > { %1823 = vmatprep.mubr.msk.bf16.mxu1 %vm297_vm1, %v2008_v34  ;;  %v773_v34 = vpack.c.bf16 %v1576_v19, %v1575_v14  ;;  %v1067_v35 = vpack.c.bf16 %v1625_v25, %v1624_v24 }
  0x5f   : > { %1790 = vmatmul.mubr.msk.bf16.gmra.mxu0 %vm297_vm1, %v2014_v37 }
  0x60   : > { %1824 = vmatmul.mubr.msk.bf16.gmra.mxu1 %vm297_vm1, %v2012_v36  ;;  %1793 = vmatprep.mubr.msk.bf16.mxu0 %vm297_vm1, %v2034_v47 }
  0x61   : > { %1827 = vmatprep.mubr.msk.bf16.mxu1 %vm297_vm1, %v2032_v46 }
  0x67   : > { %1794 = vmatmul.mubr.msk.bf16.gmra.mxu0 %vm297_vm1, %v2038_v49 }
  0x68   : > { %1828 = vmatmul.mubr.msk.bf16.gmra.mxu1 %vm297_vm1, %v2036_v48  ;;  %1797 = vmatprep.mubr.msk.bf16.mxu0 %vm297_vm1, %v2058_v59 }
  0x69   : > { %1831 = vmatprep.mubr.msk.bf16.mxu1 %vm297_vm1, %v2056_v58 }
  0x6f   : > { %1798 = vmatmul.mubr.msk.bf16.gmra.mxu0 %vm297_vm1, %v2062_v61 }
  0x70   : > { %1832 = vmatmul.mubr.msk.bf16.gmra.mxu1 %vm297_vm1, %v2060_v60  ;;  %1801 = vmatprep.mubr.msk.bf16.mxu0 %vm297_vm1, %v2082_v7 }
  0x71   : > { %1835 = vmatprep.mubr.msk.bf16.mxu1 %vm297_vm1, %v2080_v6 }
  0x77   : > { %1802 = vmatmul.mubr.msk.bf16.gmra.mxu0 %vm297_vm1, %v2086_v9 }
  0x78   : > { %1836 = vmatmul.mubr.msk.bf16.gmra.mxu1 %vm297_vm1, %v2084_v8  ;;  %1805 = vmatprep.mubr.msk.bf16.mxu0 %vm297_vm1, %v241_v21 }
  0x79   : > { %1839 = vmatprep.mubr.msk.bf16.mxu1 %vm297_vm1, %v290_v20 }
  0x7f   : > { %1806 = vmatmul.mubr.msk.bf16.gmra.mxu0 %vm297_vm1, %v242_v23 }
  0x80   : > { %1840 = vmatmul.mubr.msk.bf16.gmra.mxu1 %vm297_vm1, %v291_v22  ;;  %1809 = vmatprep.mubr.msk.bf16.mxu0 %vm297_vm1, %v243_v39 }
  0x81   : > { %1843 = vmatprep.mubr.msk.bf16.mxu1 %vm297_vm1, %v292_v38 }
  0x87   : > { %1810 = vmatmul.mubr.msk.bf16.gmra.mxu0 %vm297_vm1, %v244_v41 }
  0x88   : > { %1844 = vmatmul.mubr.msk.bf16.gmra.mxu1 %vm297_vm1, %v293_v40  ;;  %1813 = vmatprep.mubr.msk.bf16.mxu0 %vm297_vm1, %v245_v51 }
  0x89   : > { %1847 = vmatprep.mubr.msk.bf16.mxu1 %vm297_vm1, %v294_v50 }
  0x8f   : > { %1814 = vmatmul.mubr.msk.bf16.gmra.mxu0 %vm297_vm1, %v773_v34 }
  0x90   : > { %1848 = vmatmul.mubr.msk.bf16.gmra.mxu1 %vm297_vm1, %v1067_v35 }
  0xd7   : > { %v2182_v36 = vpop.f32.mrf.mxu0 }
  0xd8   : > { %v1753_v37 = vpop.f32.mrf.mxu1 }
  0xd9   : > { %v2184_v46 = vpop.f32.mrf.mxu0  ;;  %v605_v35 = vadd.f32 %v1753_v37, %v2182_v36 }
  0xda   : > { %v2186_v47 = vpop.f32.mrf.mxu1 }
  0xdb   : > { %v2188_v48 = vpop.f32.mrf.mxu0 }
  0xdc   : > { %v2190_v49 = vpop.f32.mrf.mxu1 }
  0xdd   : > { %v2192_v52 = vpop.f32.mrf.mxu0 }
  0xde   : > { %v2194_v53 = vpop.f32.mrf.mxu1 }
  0xdf   : > { %v2196_v54 = vpop.f32.mrf.mxu0 }
  0xe0   : > { %v2198_v55 = vpop.f32.mrf.mxu1 }
  0xe1   : > { %v2200_v56 = vpop.f32.mrf.mxu0 }
  0xe2   : > { %v2202_v57 = vpop.f32.mrf.mxu1 }
  0xe3   : > { %v2204_v58 = vpop.f32.mrf.mxu0 }
  0xe4   : > { %v2206_v59 = vpop.f32.mrf.mxu1 }
  0xe5   : > { %v2208_v60 = vpop.f32.mrf.mxu0 }
  0xe6   : > { %v2210_v61 = vpop.f32.mrf.mxu1 }
  0xe7   : > { %v2212_v62 = vpop.f32.mrf.mxu0 }
  0xe8   : > { %v2214_v63 = vpop.f32.mrf.mxu1 }
  0xe9   : > { %v2216_v0 = vpop.f32.mrf.mxu0 }
  0xea   : > { %v2218_v1 = vpop.f32.mrf.mxu1 }
  0xeb   : > { %v2220_v2 = vpop.f32.mrf.mxu0 }
  0xec   : > { %v2222_v3 = vpop.f32.mrf.mxu1 }
  0xed   : > { %v2224_v4 = vpop.f32.mrf.mxu0 }
  0xee   : > { %v2226_v5 = vpop.f32.mrf.mxu1 }
  0xef   : > { %v2228_v6 = vpop.f32.mrf.mxu0 }
  0xf0   : > { %v2230_v7 = vpop.f32.mrf.mxu1 }
  0xf1   : > { %v2232_v8 = vpop.f32.mrf.mxu0 }
  0xf2   : > { %v2234_v9 = vpop.f32.mrf.mxu1 }
  0xf3   : > { %v2236_v10 = vpop.f32.mrf.mxu0 }
  0xf4   : > { %v2238_v11 = vpop.f32.mrf.mxu1 }
  0xf5   : > { %v2240_v12 = vpop.f32.mrf.mxu0 }
  0xf6   : > { %v2242_v13 = vpop.f32.mrf.mxu1 }
  0xf7   : > { %v2244_v15 = vpop.f32.mrf.mxu0 }
  0xf8   : > { %v2246_v16 = vpop.f32.mrf.mxu1 }
  0xf9   : > { %v2248_v17 = vpop.f32.mrf.mxu0 }
  0xfa   : > { %v2250_v18 = vpop.f32.mrf.mxu1 }
  0xfb   : > { %v2252_v20 = vpop.f32.mrf.mxu0 }
  0xfc   : > { %v2254_v21 = vpop.f32.mrf.mxu1 }
  0xfd   : > { %v2256_v22 = vpop.f32.mrf.mxu0 }
  0xfe   : > { %v2258_v23 = vpop.f32.mrf.mxu1 }
  0xff   : > { %v2260_v26 = vpop.f32.mrf.mxu0 }
 0x100   : > { %v2262_v27 = vpop.f32.mrf.mxu1 }
 0x101   : > { %v2264_v28 = vpop.f32.mrf.mxu0 }
 0x102   : > { %v2266_v29 = vpop.f32.mrf.mxu1 }
 0x103   : > { %v2268_v30 = vpop.f32.mrf.mxu0 }
 0x104   : > { %v2270_v31 = vpop.f32.mrf.mxu1 }
 0x105   : > { %v2272_v32 = vpop.f32.mrf.mxu0 }
 0x106   : > { %v2274_v33 = vpop.f32.mrf.mxu1 }
 0x107   : > { %v2276_v38 = vpop.f32.mrf.mxu0 }
 0x108   : > { %v2278_v39 = vpop.f32.mrf.mxu1 }
 0x109   : > { %v2280_v40 = vpop.f32.mrf.mxu0 }
 0x10a   : > { %v2282_v41 = vpop.f32.mrf.mxu1 }
 0x10b   : > { %v2284_v42 = vpop.f32.mrf.mxu0 }
 0x10c   : > { %2491 = vst [vmem:[#allocation2_spill] sm:$0xff] %v2284_v42  ;;  %v2286_v43 = vpop.f32.mrf.mxu1  ;;  %v621_v42 = vadd.f32 %v2198_v55, %v2196_v54 }
 0x10d   : > { %2492 = vst [vmem:[#allocation3_spill] sm:$0xff] %v2286_v43  ;;  %v2288_v44 = vpop.f32.mrf.mxu0 }
 0x10e   : > { %2493 = vst [vmem:[#allocation4_spill] sm:$0xff] %v2288_v44  ;;  %v2290_v45 = vpop.f32.mrf.mxu1 }
 0x10f   : > { %2494 = vst [vmem:[#allocation5_spill] sm:$0xff] %v2290_v45  ;;  %v2292_v50 = vpop.f32.mrf.mxu0 }
 0x110   : > { %2495 = vst [vmem:[#allocation6_spill] sm:$0xff] %v2292_v50  ;;  %v2294_v51 = vpop.f32.mrf.mxu1  ;;  %v597_v50 = vadd.f32 %v2186_v47, %v2184_v46 }
 0x111   : > { %2496 = vst [vmem:[#allocation7_spill] sm:$0xff] %v2294_v51  ;;  %v2296_v14 = vpop.f32.mrf.mxu0 }
 0x112   : > { %2497 = vst [vmem:[#allocation8_spill] sm:$0xff] %v2296_v14  ;;  %v2298_v19 = vpop.f32.mrf.mxu1  ;;  %v600_v14 = vadd.f32 %v2194_v53, %v2192_v52 }
 0x113   : > { %2498 = vst [vmem:[#allocation9_spill] sm:$0xff] %v2298_v19  ;;  %v2300_v24 = vpop.f32.mrf.mxu0  ;;  %v2314_v19 = vld [vmem:[%s2489_s2] ss:$0 sm:$0xff] }
 0x114   : > { %2499 = vst [vmem:[#allocation10_spill] sm:$0xff] %v2300_v24  ;;  %v2302_v25 = vpop.f32.mrf.mxu1 }
 0x115   : > { %2500 = vst [vmem:[#allocation11_spill] sm:$0xff] %v2302_v25  ;;  %v2304_v34 = vpop.f32.mrf.mxu0  ;;  %v608_v25 = vadd.f32 %v2190_v49, %v2188_v48 }
 0x116   : > { %2501 = vst [vmem:[#allocation12_spill] sm:$0xff] %v2304_v34  ;;  %v2307_v44 = vpop.f32.mrf.mxu1 }
 0x117   : > { %2502 = vst [vmem:[#allocation13_spill] sm:$0xff] %v2307_v44  ;;  %v1787_v45 = vpop.f32.mrf.mxu0 }
 0x118   : > { %v990_v43 = vadd.f32 %v1787_v45, %v605_v35  ;;  %v1821_v51 = vpop.f32.mrf.mxu1 }
 0x119   : > { %v861_v24 = vpop.f32.mrf.mxu0 }
 0x11a   : > { %v1284_v34 = vadd.f32 %v1821_v51, %v990_v43  ;;  %v988_v36 = vadd.f32 %v861_v24, %v597_v50  ;;  %v1155_v37 = vpop.f32.mrf.mxu1 }
 0x11b   : > { %v1788_v44 = vpop.f32.mrf.mxu0 }
 0x11c   : > { %v1323_v46 = vadd.f32 %v2314_v19, %v1284_v34  ;;  %v1282_v47 = vadd.f32 %v1155_v37, %v988_v36  ;;  %v991_v45 = vadd.f32 %v1788_v44, %v608_v25  ;;  %v1822_v35 = vpop.f32.mrf.mxu1  ;;  %v613_v44 = vadd.f32 %v2202_v57, %v2200_v56 }
 0x11d   : > { %v864_v48 = vpop.f32.mrf.mxu0  ;;  %v624_v36 = vadd.f32 %v2206_v59, %v2204_v58 }
 0x11e   : > { %v1355_v49 = vmax.f32 %v1323_v46, 0.0  ;;  %v1321_v43 = vadd.f32 %v2314_v19, %v1282_v47  ;;  %v1285_v52 = vadd.f32 %v1822_v35, %v991_v45  ;;  %v989_v53 = vadd.f32 %v864_v48, %v600_v14  ;;  %v1158_v50 = vpop.f32.mrf.mxu1 }
 0x11f   : > { %v1791_v51 = vpop.f32.mrf.mxu0  ;;  %v616_v45 = vadd.f32 %v2210_v61, %v2208_v60 }
 0x120   : > { %1387 = vst.msk [vmem:[%s2327_s6 + $0x10] sm:$0xff] %vm297_vm1, %v1355_v49  ;;  %v1353_v54 = vmax.f32 %v1321_v43, 0.0  ;;  %v1324_v55 = vadd.f32 %v2314_v19, %v1285_v52  ;;  %v1283_v24 = vadd.f32 %v1158_v50, %v989_v53  ;;  %v994_v25 = vadd.f32 %v1791_v51, %v621_v42  ;;  %v1825_v34 = vpop.f32.mrf.mxu1 }
 0x121   : > { %v877_v37 = vpop.f32.mrf.mxu0  ;;  %v637_v43 = vadd.f32 %v2214_v63, %v2212_v62  ;;  %v629_v51 = vadd.f32 %v2218_v1, %v2216_v0 }
 0x122   : > { %1385 = vst.msk [vmem:[%s2327_s6] sm:$0xff] %vm297_vm1, %v1353_v54  ;;  %v1356_v14 = vmax.f32 %v1324_v55, 0.0  ;;  %v1322_v56 = vadd.f32 %v2314_v19, %v1283_v24  ;;  %v1288_v57 = vadd.f32 %v1825_v34, %v994_v25  ;;  %v992_v46 = vadd.f32 %v877_v37, %v613_v44  ;;  %v1171_v47 = vpop.f32.mrf.mxu1 }
 0x123   : > { %v1792_v35 = vpop.f32.mrf.mxu0  ;;  %v640_v34 = vadd.f32 %v2222_v3, %v2220_v2 }
 0x124   : > { %1388 = vst.msk [vmem:[%s2327_s6 + $0x18] sm:$0xff] %vm297_vm1, %v1356_v14  ;;  %v1354_v42 = vmax.f32 %v1322_v56, 0.0  ;;  %v1327_v58 = vadd.f32 %v2314_v19, %v1288_v57  ;;  %v1286_v59 = vadd.f32 %v1171_v47, %v992_v46  ;;  %v995_v48 = vadd.f32 %v1792_v35, %v624_v36  ;;  %v1826_v49 = vpop.f32.mrf.mxu1 }
 0x125   : > { %v880_v52 = vpop.f32.mrf.mxu0  ;;  %v632_v57 = vadd.f32 %v2226_v5, %v2224_v4 }
 0x126   : > { %1386 = vst.msk [vmem:[%s2327_s6 + $0x8] sm:$0xff] %vm297_vm1, %v1354_v42  ;;  %v1359_v53 = vmax.f32 %v1327_v58, 0.0  ;;  %v1325_v60 = vadd.f32 %v2314_v19, %v1286_v59  ;;  %v1289_v61 = vadd.f32 %v1826_v49, %v995_v48  ;;  %v993_v50 = vadd.f32 %v880_v52, %v616_v45  ;;  %v1174_v44 = vpop.f32.mrf.mxu1 }
 0x127   : > { %v1795_v54 = vpop.f32.mrf.mxu0  ;;  %v653_v42 = vadd.f32 %v2230_v7, %v2228_v6 }
 0x128   : > { %1391 = vst.msk [vmem:[%s2327_s6 + $0x30] sm:$0xff] %vm297_vm1, %v1359_v53  ;;  %v1357_v55 = vmax.f32 %v1325_v60, 0.0  ;;  %v1328_v62 = vadd.f32 %v2314_v19, %v1289_v61  ;;  %v1287_v63 = vadd.f32 %v1174_v44, %v993_v50  ;;  %v998_v24 = vadd.f32 %v1795_v54, %v637_v43  ;;  %v1829_v25 = vpop.f32.mrf.mxu1 }
 0x129   : > { %v893_v36 = vpop.f32.mrf.mxu0  ;;  %v645_v43 = vadd.f32 %v2234_v9, %v2232_v8  ;;  %v656_v50 = vadd.f32 %v2238_v11, %v2236_v10 }
 0x12a   : > { %1389 = vst.msk [vmem:[%s2327_s6 + $0x20] sm:$0xff] %vm297_vm1, %v1357_v55  ;;  %v1360_v37 = vmax.f32 %v1328_v62, 0.0  ;;  %v1326_v0 = vadd.f32 %v2314_v19, %v1287_v63  ;;  %v1292_v1 = vadd.f32 %v1829_v25, %v998_v24  ;;  %v996_v14 = vadd.f32 %v893_v36, %v629_v51  ;;  %v1187_v56 = vpop.f32.mrf.mxu1 }
 0x12b   : > { %v1796_v46 = vpop.f32.mrf.mxu0  ;;  %v648_v62 = vadd.f32 %v2242_v13, %v2240_v12  ;;  %v669_v36 = vadd.f32 %v2246_v16, %v2244_v15 }
 0x12c   : > { %1392 = vst.msk [vmem:[%s2327_s6 + $0x38] sm:$0xff] %vm297_vm1, %v1360_v37  ;;  %v1358_v47 = vmax.f32 %v1326_v0, 0.0  ;;  %v1331_v2 = vadd.f32 %v2314_v19, %v1292_v1  ;;  %v1290_v3 = vadd.f32 %v1187_v56, %v996_v14  ;;  %v999_v45 = vadd.f32 %v1796_v46, %v640_v34  ;;  %v1830_v35 = vpop.f32.mrf.mxu1 }
 0x12d   : > { %v896_v58 = vpop.f32.mrf.mxu0  ;;  %v661_v56 = vadd.f32 %v2250_v18, %v2248_v17 }
 0x12e   : > { %1390 = vst.msk [vmem:[%s2327_s6 + $0x28] sm:$0xff] %vm297_vm1, %v1358_v47  ;;  %v1363_v59 = vmax.f32 %v1331_v2, 0.0  ;;  %v1329_v4 = vadd.f32 %v2314_v19, %v1290_v3  ;;  %v1293_v5 = vadd.f32 %v1830_v35, %v999_v45  ;;  %v997_v48 = vadd.f32 %v896_v58, %v632_v57  ;;  %v1190_v49 = vpop.f32.mrf.mxu1 }
 0x12f   : > { %v1799_v52 = vpop.f32.mrf.mxu0  ;;  %v672_v3 = vadd.f32 %v2254_v21, %v2252_v20 }
 0x130   : > { %1395 = vst.msk [vmem:[%s2327_s6 + $0x50] sm:$0xff] %vm297_vm1, %v1363_v59  ;;  %v1361_v53 = vmax.f32 %v1329_v4, 0.0  ;;  %v1332_v6 = vadd.f32 %v2314_v19, %v1293_v5  ;;  %v1291_v7 = vadd.f32 %v1190_v49, %v997_v48  ;;  %v1002_v60 = vadd.f32 %v1799_v52, %v653_v42  ;;  %v1833_v61 = vpop.f32.mrf.mxu1 }
 0x131   : > { %v909_v44 = vpop.f32.mrf.mxu0  ;;  %v664_v59 = vadd.f32 %v2258_v23, %v2256_v22 }
 0x132   : > { %1393 = vst.msk [vmem:[%s2327_s6 + $0x40] sm:$0xff] %vm297_vm1, %v1361_v53  ;;  %v1364_v51 = vmax.f32 %v1332_v6, 0.0  ;;  %v1330_v8 = vadd.f32 %v2314_v19, %v1291_v7  ;;  %v1296_v9 = vadd.f32 %v1833_v61, %v1002_v60  ;;  %v1000_v54 = vadd.f32 %v909_v44, %v645_v43  ;;  %v1203_v55 = vpop.f32.mrf.mxu1 }
 0x133   : > { %v1800_v63 = vpop.f32.mrf.mxu0  ;;  %v685_v43 = vadd.f32 %v2262_v27, %v2260_v26  ;;  %v677_v60 = vadd.f32 %v2266_v29, %v2264_v28 }
 0x134   : > { %1396 = vst.msk [vmem:[%s2327_s6 + $0x58] sm:$0xff] %vm297_vm1, %v1364_v51  ;;  %v1362_v24 = vmax.f32 %v1330_v8, 0.0  ;;  %v1335_v10 = vadd.f32 %v2314_v19, %v1296_v9  ;;  %v1294_v11 = vadd.f32 %v1203_v55, %v1000_v54  ;;  %v1003_v25 = vadd.f32 %v1800_v63, %v656_v50  ;;  %v1834_v34 = vpop.f32.mrf.mxu1 }
 0x135   : > { %v912_v37 = vpop.f32.mrf.mxu0  ;;  %v688_v8 = vadd.f32 %v2270_v31, %v2268_v30  ;;  %v680_v63 = vadd.f32 %v2274_v33, %v2272_v32 }
 0x136   : > { %1394 = vst.msk [vmem:[%s2327_s6 + $0x48] sm:$0xff] %vm297_vm1, %v1362_v24  ;;  %v1367_v0 = vmax.f32 %v1335_v10, 0.0  ;;  %v1333_v12 = vadd.f32 %v2314_v19, %v1294_v11  ;;  %v1297_v13 = vadd.f32 %v1834_v34, %v1003_v25  ;;  %v1001_v1 = vadd.f32 %v912_v37, %v648_v62  ;;  %v1206_v14 = vpop.f32.mrf.mxu1 }
 0x137   : > { %v1803_v57 = vpop.f32.mrf.mxu0  ;;  %v701_v34 = vadd.f32 %v2278_v39, %v2276_v38 }
 0x138   : > { %1399 = vst.msk [vmem:[%s2327_s6 + $0x70] sm:$0xff] %vm297_vm1, %v1367_v0  ;;  %v1365_v46 = vmax.f32 %v1333_v12, 0.0  ;;  %v1336_v15 = vadd.f32 %v2314_v19, %v1297_v13  ;;  %v1295_v16 = vadd.f32 %v1206_v14, %v1001_v1  ;;  %v1006_v47 = vadd.f32 %v1803_v57, %v669_v36  ;;  %v1837_v2 = vpop.f32.mrf.mxu1 }
 0x139   : > { %v925_v45 = vpop.f32.mrf.mxu0  ;;  %v693_v13 = vadd.f32 %v2282_v41, %v2280_v40 }
 0x13a   : > { %1397 = vst.msk [vmem:[%s2327_s6 + $0x60] sm:$0xff] %vm297_vm1, %v1365_v46  ;;  %v1368_v35 = vmax.f32 %v1336_v15, 0.0  ;;  %v1334_v17 = vadd.f32 %v2314_v19, %v1295_v16  ;;  %v1300_v18 = vadd.f32 %v1837_v2, %v1006_v47  ;;  %v1004_v42 = vadd.f32 %v925_v45, %v661_v56  ;;  %v1219_v58 = vpop.f32.mrf.mxu1  ;;  %v2503_v46 = vld [vmem:[#allocation2_spill] sm:$0xff]  ;;  %v2504_v15 = vld [vmem:[#allocation3_spill] sm:$0xff] }
 0x13b   : > { %v1804_v4 = vpop.f32.mrf.mxu0  ;;  %v704_v16 = vadd.f32 %v2504_v15, %v2503_v46 }
 0x13c   : > { %1400 = vst.msk [vmem:[%s2327_s6 + $0x78] sm:$0xff] %vm297_vm1, %v1368_v35  ;;  %v1366_v5 = vmax.f32 %v1334_v17, 0.0  ;;  %v1339_v20 = vadd.f32 %v2314_v19, %v1300_v18  ;;  %v1298_v21 = vadd.f32 %v1219_v58, %v1004_v42  ;;  %v1007_v48 = vadd.f32 %v1804_v4, %v672_v3  ;;  %v1838_v49 = vpop.f32.mrf.mxu1  ;;  %v2505_v35 = vld [vmem:[#allocation4_spill] sm:$0xff]  ;;  %v2506_v17 = vld [vmem:[#allocation5_spill] sm:$0xff] }
 0x13d   : > { %v928_v52 = vpop.f32.mrf.mxu0  ;;  %v696_v18 = vadd.f32 %v2506_v17, %v2505_v35 }
 0x13e   : > { %1398 = vst.msk [vmem:[%s2327_s6 + $0x68] sm:$0xff] %vm297_vm1, %v1366_v5  ;;  %v1371_v53 = vmax.f32 %v1339_v20, 0.0  ;;  %v1337_v22 = vadd.f32 %v2314_v19, %v1298_v21  ;;  %v1301_v23 = vadd.f32 %v1838_v49, %v1007_v48  ;;  %v1005_v6 = vadd.f32 %v928_v52, %v664_v59  ;;  %v1222_v7 = vpop.f32.mrf.mxu1  ;;  %v2507_v21 = vld [vmem:[#allocation6_spill] sm:$0xff]  ;;  %v2508_v48 = vld [vmem:[#allocation7_spill] sm:$0xff] }
 0x13f   : > { %v1807_v61 = vpop.f32.mrf.mxu0  ;;  %v717_v49 = vadd.f32 %v2508_v48, %v2507_v21 }
 0x140   : > { %1403 = vst.msk [vmem:[%s2327_s6 + $0x90] sm:$0xff] %vm297_vm1, %v1371_v53  ;;  %v1369_v50 = vmax.f32 %v1337_v22, 0.0  ;;  %v1340_v26 = vadd.f32 %v2314_v19, %v1301_v23  ;;  %v1299_v27 = vadd.f32 %v1222_v7, %v1005_v6  ;;  %v1010_v44 = vadd.f32 %v1807_v61, %v685_v43  ;;  %v1841_v51 = vpop.f32.mrf.mxu1  ;;  %v2509_v7 = vld [vmem:[#allocation8_spill] sm:$0xff] }
 0x141   : > { %v941_v9 = vpop.f32.mrf.mxu0 }
 0x142   : > { %1401 = vst.msk [vmem:[%s2327_s6 + $0x80] sm:$0xff] %vm297_vm1, %v1369_v50  ;;  %v1372_v54 = vmax.f32 %v1340_v26, 0.0  ;;  %v1338_v28 = vadd.f32 %v2314_v19, %v1299_v27  ;;  %v1304_v29 = vadd.f32 %v1841_v51, %v1010_v44  ;;  %v1008_v55 = vadd.f32 %v941_v9, %v677_v60  ;;  %v1235_v62 = vpop.f32.mrf.mxu1  ;;  %v2510_v60 = vld [vmem:[#allocation9_spill] sm:$0xff]  ;;  %v2511_v9 = vld [vmem:[#allocation10_spill] sm:$0xff] }
 0x143   : > { %v1808_v24 = vpop.f32.mrf.mxu0  ;;  %v709_v61 = vadd.f32 %v2510_v60, %v2509_v7 }
 0x144   : > { %1404 = vst.msk [vmem:[%s2327_s6 + $0x98] sm:$0xff] %vm297_vm1, %v1372_v54  ;;  %v1370_v10 = vmax.f32 %v1338_v28, 0.0  ;;  %v1343_v30 = vadd.f32 %v2314_v19, %v1304_v29  ;;  %v1302_v31 = vadd.f32 %v1235_v62, %v1008_v55  ;;  %v1011_v11 = vadd.f32 %v1808_v24, %v688_v8  ;;  %v1842_v25 = vpop.f32.mrf.mxu1  ;;  %v2512_v54 = vld [vmem:[#allocation11_spill] sm:$0xff] }
 0x145   : > { %v944_v36 = vpop.f32.mrf.mxu0  ;;  %v720_v28 = vadd.f32 %v2512_v54, %v2511_v9 }
 0x146   : > { %1402 = vst.msk [vmem:[%s2327_s6 + $0x88] sm:$0xff] %vm297_vm1, %v1370_v10  ;;  %v1375_v37 = vmax.f32 %v1343_v30, 0.0  ;;  %v1341_v32 = vadd.f32 %v2314_v19, %v1302_v31  ;;  %v1305_v33 = vadd.f32 %v1842_v25, %v1011_v11  ;;  %v1009_v0 = vadd.f32 %v944_v36, %v680_v63  ;;  %v1238_v12 = vpop.f32.mrf.mxu1  ;;  %v2513_v30 = vld [vmem:[#allocation12_spill] sm:$0xff]  ;;  %v2514_v31 = vld [vmem:[#allocation13_spill] sm:$0xff] }
 0x147   : > { %v1811_v1 = vpop.f32.mrf.mxu0  ;;  %v712_v11 = vadd.f32 %v2514_v31, %v2513_v30 }
 0x148   : > { %1407 = vst.msk [vmem:[%s2327_s6 + $0xb0] sm:$0xff] %vm297_vm1, %v1375_v37  ;;  %v1373_v14 = vmax.f32 %v1341_v32, 0.0  ;;  %v1344_v38 = vadd.f32 %v2314_v19, %v1305_v33  ;;  %v1303_v39 = vadd.f32 %v1238_v12, %v1009_v0  ;;  %v1014_v56 = vadd.f32 %v1811_v1, %v701_v34  ;;  %v1845_v57 = vpop.f32.mrf.mxu1 }
 0x149   : > { %v957_v47 = vpop.f32.mrf.mxu0 }
 0x14a   : > { %1405 = vst.msk [vmem:[%s2327_s6 + $0xa0] sm:$0xff] %vm297_vm1, %v1373_v14  ;;  %v1376_v2 = vmax.f32 %v1344_v38, 0.0  ;;  %v1342_v40 = vadd.f32 %v2314_v19, %v1303_v39  ;;  %v1308_v41 = vadd.f32 %v1845_v57, %v1014_v56  ;;  %v1012_v3 = vadd.f32 %v957_v47, %v693_v13  ;;  %v1251_v45 = vpop.f32.mrf.mxu1 }
 0x14b   : > { %v1812_v42 = vpop.f32.mrf.mxu0 }
 0x14c   : > { %1408 = vst.msk [vmem:[%s2327_s6 + $0xb8] sm:$0xff] %vm297_vm1, %v1376_v2  ;;  %v1374_v58 = vmax.f32 %v1342_v40, 0.0  ;;  %v1347_v59 = vadd.f32 %v2314_v19, %v1308_v41  ;;  %v1306_v4 = vadd.f32 %v1251_v45, %v1012_v3  ;;  %v1015_v5 = vadd.f32 %v1812_v42, %v704_v16  ;;  %v1846_v20 = vpop.f32.mrf.mxu1 }
 0x14d   : > { %v960_v43 = vpop.f32.mrf.mxu0 }
 0x14e   : > { %1406 = vst.msk [vmem:[%s2327_s6 + $0xa8] sm:$0xff] %vm297_vm1, %v1374_v58  ;;  %v1379_v52 = vmax.f32 %v1347_v59, 0.0  ;;  %v1345_v53 = vadd.f32 %v2314_v19, %v1306_v4  ;;  %v1309_v22 = vadd.f32 %v1846_v20, %v1015_v5  ;;  %v1013_v23 = vadd.f32 %v960_v43, %v696_v18  ;;  %v1254_v6 = vpop.f32.mrf.mxu1 }
 0x14f   : > { %v1815_v50 = vpop.f32.mrf.mxu0 }
 0x150   : > { %1411 = vst.msk [vmem:[%s2327_s6 + $0xd0] sm:$0xff] %vm297_vm1, %v1379_v52  ;;  %v1377_v26 = vmax.f32 %v1345_v53, 0.0  ;;  %v1348_v27 = vadd.f32 %v2314_v19, %v1309_v22  ;;  %v1307_v44 = vadd.f32 %v1254_v6, %v1013_v23  ;;  %v1018_v51 = vadd.f32 %v1815_v50, %v717_v49  ;;  %v1849_v8 = vpop.f32.mrf.mxu1 }
 0x151   : > { %v973_v29 = vpop.f32.mrf.mxu0 }
 0x152   : > { %1409 = vst.msk [vmem:[%s2327_s6 + $0xc0] sm:$0xff] %vm297_vm1, %v1377_v26  ;;  %v1380_v55 = vmax.f32 %v1348_v27, 0.0  ;;  %v1346_v62 = vadd.f32 %v2314_v19, %v1307_v44  ;;  %v1312_v63 = vadd.f32 %v1849_v8, %v1018_v51  ;;  %v1016_v24 = vadd.f32 %v973_v29, %v709_v61  ;;  %v1267_v10 = vpop.f32.mrf.mxu1 }
 0x153   : > { %v1816_v25 = vpop.f32.mrf.mxu0 }
 0x154   : > { %1412 = vst.msk [vmem:[%s2327_s6 + $0xd8] sm:$0xff] %vm297_vm1, %v1380_v55  ;;  %v1378_v34 = vmax.f32 %v1346_v62, 0.0  ;;  %v1351_v36 = vadd.f32 %v2314_v19, %v1312_v63  ;;  %v1310_v37 = vadd.f32 %v1267_v10, %v1016_v24  ;;  %v1019_v32 = vadd.f32 %v1816_v25, %v720_v28  ;;  %v1850_v33 = vpop.f32.mrf.mxu1 }
 0x155   : > { %v976_v0 = vpop.f32.mrf.mxu0 }
 0x156   : > { %1410 = vst.msk [vmem:[%s2327_s6 + $0xc8] sm:$0xff] %vm297_vm1, %v1378_v34  ;;  %v1383_v12 = vmax.f32 %v1351_v36, 0.0  ;;  %v1349_v13 = vadd.f32 %v2314_v19, %v1310_v37  ;;  %v1313_v1 = vadd.f32 %v1850_v33, %v1019_v32  ;;  %v1017_v14 = vadd.f32 %v976_v0, %v712_v11  ;;  %v1270_v38 = vpop.f32.mrf.mxu1 }
 0x158   : > { %1415 = vst.msk [vmem:[%s2327_s6 + $0xf0] sm:$0xff] %vm297_vm1, %v1383_v12  ;;  %v1381_v39 = vmax.f32 %v1349_v13, 0.0  ;;  %v1352_v56 = vadd.f32 %v2314_v19, %v1313_v1  ;;  %v1311_v57 = vadd.f32 %v1270_v38, %v1017_v14 }
 0x15a   : > { %1413 = vst.msk [vmem:[%s2327_s6 + $0xe0] sm:$0xff] %vm297_vm1, %v1381_v39  ;;  %v1384_v46 = vmax.f32 %v1352_v56, 0.0  ;;  %v1350_v15 = vadd.f32 %v2314_v19, %v1311_v57 }
 0x15c   : > { %1416 = vst.msk [vmem:[%s2327_s6 + $0xf8] sm:$0xff] %vm297_vm1, %v1384_v46  ;;  %v1382_v16 = vmax.f32 %v1350_v15, 0.0 }
 0x15e   : > { %1414 = vst.msk [vmem:[%s2327_s6 + $0xe8] sm:$0xff] %vm297_vm1, %v1382_v16 }
 0x15f PF: > { %s13_s14 = sadd.s32 1, %s1902_s14   ;;  %s2515_s12 = smov %s1898_s13 }
 0x160   : > { %p10_p5 = scmp.ge.s32.totalorder %s13_s14, 4   ;;  %s2516_s13 = smov %s2518_s15 }
 0x162   :  { %12 = sbr.rel (!%p10_p5) target bundleno = 2 (0x2), region = 67 }

// kernel: _lambda_.9
= control target key start
LH: loop header
LB: loop body
LE: loop exit
PB: predicated region body
PF: predicated region fallthrough
CT: control target
= control target key end

     0   :  { %s1127_s12 = smov 0   ;;  %s1129_s13 = smov 0   ;;  %s1371_s0 = inlined_call_operand.vmem [shape: f32[2,16,17,4], index: 0, kind: input, shape index: {}]   ;;  %s1372_s1 = inlined_call_operand.vmem [shape: bf16[2,4,4], index: 1, kind: input, shape index: {}]   ;;  %s1373_s2 = inlined_call_operand.vmem [shape: f32[1,4], index: 2, kind: input, shape index: {}]   ;;  %s1374_s3 = inlined_call_operand.vmem [shape: f32[2,256,4], index: 3, kind: output, shape index: {}]  }
   0x1   :  { %s1131_s14 = smov 0  }
   0x2 LB: > { %s25_s15 = sadd.s32 1, %s1101_s13  ;;  %p913_p0 = scmp.ge.s32.totalorder %s1105_s14, 1  ;;  %s1105_s14 = sphi %s1131_s14, %s13_s14   ;;  %s1101_s13 = sphi %s1129_s13, %s1376_s13   ;;  %s1097_s12 = sphi %s1127_s12, %s1375_s12  }
   0x3   : > { %p27_p1 = scmp.ge.s32.totalorder %s25_s15, 2  ;;  %p151_p2 = scmp.lt.s32.totalorder %s1105_s14, 3 }
   0x5   : > { %s1378_s15 = smov (%p27_p1, %s25_s15), 0  ;;  %p152_p3 = pnand %p913_p0, %p151_p2 }
   0x6   : > { %p179_p4 = scmp.lt.s32.totalorder (!%p152_p3), %s1097_s12, 1 }
   0x7   : > { %155 = sbr.rel (%p152_p3) target bundleno = 284 (0x11c), region = 32 }
   0xc   : > { %v917_v0 = vld [vmem:[%s1372_s1 + $0x2] sm:$0x3]  ;;  %vm346_vm0 = vcmask 1041408   ;;  %v246_v1 = vld [vmem:[%s1372_s1] sm:$0x3]  ;;  %s1380_s12 = smov (!%p179_p4, %s1097_s12), 1 }
   0xd   : > { %1056 = vmatprep.subr.msk.bf16.mxu0 %vm346_vm0, %v917_v0  ;;  %1057 = vmatprep.subr.msk.bf16.mxu1 %vm346_vm0, %v246_v1  ;;  %v348_v2 = vsel %vm346_vm0, %v917_v0, 0  ;;  %v560_v3 = vsel %vm346_vm0, %v246_v1, 0  ;;  %s1058_s20 = smul.u32 384, %s1380_s12  ;;  %vm297_vm1 = vcmask 31744   ;;  %s953_s26 = sshll.u32 %s1380_s12, 8 }
   0xe   : > { %989 = vmatpush3.bf16.msra.mxu0 %v348_v2  ;;  %1023 = vmatpush3.bf16.msra.mxu1 %v560_v3  ;;  %s1265_s29 = scalar_lea.vmem %s1374_s3, %s953_s26 }
   0xf   : > { %s1157_s23 = scalar_lea.vmem %s1371_s0, %s1058_s20 }
  0x10   : > { %v247_v4 = vld [vmem:[%s1157_s23 + $0x1] sm:$0xff]  ;;  %v248_v5 = vld [vmem:[%s1157_s23 + $0x9] sm:$0xff]  ;;  %v249_v9 = vld [vmem:[%s1157_s23 + $0x19] sm:$0xff] }
  0x11   : > { %v198_v6 = vld [vmem:[%s1157_s23] sm:$0xff]  ;;  %v279_v7 = vpack.c.bf16 %v248_v5, %v247_v4  ;;  %v199_v8 = vld [vmem:[%s1157_s23 + $0x8] sm:$0xff]  ;;  %v200_v13 = vld [vmem:[%s1157_s23 + $0x18] sm:$0xff] }
  0x12   : > { %v250_v10 = vld [vmem:[%s1157_s23 + $0x21] sm:$0xff]  ;;  %v230_v11 = vpack.c.bf16 %v199_v8, %v198_v6  ;;  %v251_v15 = vld [vmem:[%s1157_s23 + $0x31] sm:$0xff]  ;;  %v252_v17 = vld [vmem:[%s1157_s23 + $0x39] sm:$0xff] }
  0x13   : > { %v280_v12 = vpack.c.bf16 %v250_v10, %v249_v9  ;;  %v201_v14 = vld [vmem:[%s1157_s23 + $0x20] sm:$0xff]  ;;  %990 = vmatprep.mubr.msk.bf16.mxu0 %vm297_vm1, %v279_v7  ;;  %v202_v18 = vld [vmem:[%s1157_s23 + $0x30] sm:$0xff]  ;;  %v203_v19 = vld [vmem:[%s1157_s23 + $0x38] sm:$0xff]  ;;  %v281_v20 = vpack.c.bf16 %v252_v17, %v251_v15 }
  0x14   : > { %v231_v16 = vpack.c.bf16 %v201_v14, %v200_v13  ;;  %1024 = vmatprep.mubr.msk.bf16.mxu1 %vm297_vm1, %v230_v11  ;;  %v232_v21 = vpack.c.bf16 %v203_v19, %v202_v18  ;;  %v253_v22 = vld [vmem:[%s1157_s23 + $0x49] sm:$0xff]  ;;  %v254_v23 = vld [vmem:[%s1157_s23 + $0x51] sm:$0xff]  ;;  %v255_v26 = vld [vmem:[%s1157_s23 + $0x61] sm:$0xff] }
  0x15   : > { %991 = vmatmul.mubr.msk.bf16.vlgmr.msra.gmra.mxu0 %vm297_vm1, %v280_v12  ;;  %v204_v24 = vld [vmem:[%s1157_s23 + $0x48] sm:$0xff]  ;;  %v205_v25 = vld [vmem:[%s1157_s23 + $0x50] sm:$0xff]  ;;  %v206_v28 = vld [vmem:[%s1157_s23 + $0x60] sm:$0xff]  ;;  %v282_v30 = vpack.c.bf16 %v254_v23, %v253_v22 }
  0x16   : > { %1025 = vmatmul.mubr.msk.bf16.vlgmr.msra.gmra.mxu1 %vm297_vm1, %v231_v16  ;;  %994 = vmatprep.mubr.msk.bf16.mxu0 %vm297_vm1, %v281_v20  ;;  %v256_v27 = vld [vmem:[%s1157_s23 + $0x69] sm:$0xff]  ;;  %v233_v31 = vpack.c.bf16 %v205_v25, %v204_v24  ;;  %v257_v34 = vld [vmem:[%s1157_s23 + $0x79] sm:$0xff]  ;;  %v258_v35 = vld [vmem:[%s1157_s23 + $0x81] sm:$0xff] }
  0x17   : > { %1028 = vmatprep.mubr.msk.bf16.mxu1 %vm297_vm1, %v232_v21  ;;  %v207_v29 = vld [vmem:[%s1157_s23 + $0x68] sm:$0xff]  ;;  %v283_v32 = vpack.c.bf16 %v256_v27, %v255_v26  ;;  %v208_v36 = vld [vmem:[%s1157_s23 + $0x78] sm:$0xff]  ;;  %v209_v37 = vld [vmem:[%s1157_s23 + $0x80] sm:$0xff]  ;;  %v284_v42 = vpack.c.bf16 %v258_v35, %v257_v34 }
  0x18   : > { %v234_v33 = vpack.c.bf16 %v207_v29, %v206_v28  ;;  %v259_v38 = vld [vmem:[%s1157_s23 + $0x91] sm:$0xff]  ;;  %v260_v39 = vld [vmem:[%s1157_s23 + $0x99] sm:$0xff]  ;;  %v235_v43 = vpack.c.bf16 %v209_v37, %v208_v36  ;;  %v261_v46 = vld [vmem:[%s1157_s23 + $0xa9] sm:$0xff] }
  0x19   : > { %v210_v40 = vld [vmem:[%s1157_s23 + $0x90] sm:$0xff]  ;;  %v211_v41 = vld [vmem:[%s1157_s23 + $0x98] sm:$0xff]  ;;  %v285_v44 = vpack.c.bf16 %v260_v39, %v259_v38  ;;  %v212_v48 = vld [vmem:[%s1157_s23 + $0xa8] sm:$0xff] }
  0x1a   : > { %v236_v45 = vpack.c.bf16 %v211_v41, %v210_v40  ;;  %v262_v47 = vld [vmem:[%s1157_s23 + $0xb1] sm:$0xff]  ;;  %v263_v50 = vld [vmem:[%s1157_s23 + $0xc1] sm:$0xff]  ;;  %v264_v51 = vld [vmem:[%s1157_s23 + $0xc9] sm:$0xff] }
  0x1b   : > { %v213_v49 = vld [vmem:[%s1157_s23 + $0xb0] sm:$0xff]  ;;  %v214_v52 = vld [vmem:[%s1157_s23 + $0xc0] sm:$0xff]  ;;  %v215_v53 = vld [vmem:[%s1157_s23 + $0xc8] sm:$0xff]  ;;  %v286_v54 = vpack.c.bf16 %v262_v47, %v261_v46  ;;  %v287_v56 = vpack.c.bf16 %v264_v51, %v263_v50 }
  0x1c   : > { %v237_v55 = vpack.c.bf16 %v213_v49, %v212_v48  ;;  %v238_v57 = vpack.c.bf16 %v215_v53, %v214_v52  ;;  %v265_v58 = vld [vmem:[%s1157_s23 + $0xd9] sm:$0xff]  ;;  %v266_v59 = vld [vmem:[%s1157_s23 + $0xe1] sm:$0xff]  ;;  %v267_v62 = vld [vmem:[%s1157_s23 + $0xf1] sm:$0xff] }
  0x1d   : > { %995 = vmatmul.mubr.msk.bf16.gmra.mxu0 %vm297_vm1, %v282_v30  ;;  %v216_v60 = vld [vmem:[%s1157_s23 + $0xd8] sm:$0xff]  ;;  %v217_v61 = vld [vmem:[%s1157_s23 + $0xe0] sm:$0xff]  ;;  %v218_v0 = vld [vmem:[%s1157_s23 + $0xf0] sm:$0xff]  ;;  %v288_v2 = vpack.c.bf16 %v266_v59, %v265_v58 }
  0x1e   : > { %1029 = vmatmul.mubr.msk.bf16.gmra.mxu1 %vm297_vm1, %v233_v31  ;;  %998 = vmatprep.mubr.msk.bf16.mxu0 %vm297_vm1, %v283_v32  ;;  %v268_v63 = vld [vmem:[%s1157_s23 + $0xf9] sm:$0xff]  ;;  %v239_v3 = vpack.c.bf16 %v217_v61, %v216_v60  ;;  %v269_v6 = vld [vmem:[%s1157_s23 + $0x109] sm:$0xff]  ;;  %v270_v7 = vld [vmem:[%s1157_s23 + $0x111] sm:$0xff] }
  0x1f   : > { %1032 = vmatprep.mubr.msk.bf16.mxu1 %vm297_vm1, %v234_v33  ;;  %v219_v1 = vld [vmem:[%s1157_s23 + $0xf8] sm:$0xff]  ;;  %v289_v4 = vpack.c.bf16 %v268_v63, %v267_v62  ;;  %v220_v8 = vld [vmem:[%s1157_s23 + $0x108] sm:$0xff]  ;;  %v221_v9 = vld [vmem:[%s1157_s23 + $0x110] sm:$0xff]  ;;  %v290_v14 = vpack.c.bf16 %v270_v7, %v269_v6 }
  0x20   : > { %v240_v5 = vpack.c.bf16 %v219_v1, %v218_v0  ;;  %v271_v10 = vld [vmem:[%s1157_s23 + $0x121] sm:$0xff]  ;;  %v272_v11 = vld [vmem:[%s1157_s23 + $0x129] sm:$0xff]  ;;  %v241_v15 = vpack.c.bf16 %v221_v9, %v220_v8  ;;  %v273_v18 = vld [vmem:[%s1157_s23 + $0x139] sm:$0xff] }
  0x21   : > { %v222_v12 = vld [vmem:[%s1157_s23 + $0x120] sm:$0xff]  ;;  %v223_v13 = vld [vmem:[%s1157_s23 + $0x128] sm:$0xff]  ;;  %v291_v16 = vpack.c.bf16 %v272_v11, %v271_v10  ;;  %v224_v20 = vld [vmem:[%s1157_s23 + $0x138] sm:$0xff] }
  0x22   : > { %v242_v17 = vpack.c.bf16 %v223_v13, %v222_v12  ;;  %v274_v19 = vld [vmem:[%s1157_s23 + $0x141] sm:$0xff]  ;;  %v275_v22 = vld [vmem:[%s1157_s23 + $0x151] sm:$0xff]  ;;  %v276_v23 = vld [vmem:[%s1157_s23 + $0x159] sm:$0xff] }
  0x23   : > { %v225_v21 = vld [vmem:[%s1157_s23 + $0x140] sm:$0xff]  ;;  %v226_v24 = vld [vmem:[%s1157_s23 + $0x150] sm:$0xff]  ;;  %v227_v25 = vld [vmem:[%s1157_s23 + $0x158] sm:$0xff]  ;;  %v292_v26 = vpack.c.bf16 %v274_v19, %v273_v18  ;;  %v293_v28 = vpack.c.bf16 %v276_v23, %v275_v22 }
  0x24   : > { %v243_v27 = vpack.c.bf16 %v225_v21, %v224_v20  ;;  %v244_v29 = vpack.c.bf16 %v227_v25, %v226_v24  ;;  %v277_v30 = vld [vmem:[%s1157_s23 + $0x169] sm:$0xff]  ;;  %v278_v31 = vld [vmem:[%s1157_s23 + $0x171] sm:$0xff]  ;;  %v1258_v38 = vld [vmem:[%s1373_s2] ss:$0 sm:$0xff] }
  0x25   : > { %999 = vmatmul.mubr.msk.bf16.gmra.mxu0 %vm297_vm1, %v284_v42  ;;  %v228_v32 = vld [vmem:[%s1157_s23 + $0x168] sm:$0xff]  ;;  %v229_v33 = vld [vmem:[%s1157_s23 + $0x170] sm:$0xff]  ;;  %v294_v34 = vpack.c.bf16 %v278_v31, %v277_v30 }
  0x26   : > { %1033 = vmatmul.mubr.msk.bf16.gmra.mxu1 %vm297_vm1, %v235_v43  ;;  %1002 = vmatprep.mubr.msk.bf16.mxu0 %vm297_vm1, %v285_v44  ;;  %v245_v35 = vpack.c.bf16 %v229_v33, %v228_v32 }
  0x27   : > { %1036 = vmatprep.mubr.msk.bf16.mxu1 %vm297_vm1, %v236_v45 }
  0x2d   : > { %1003 = vmatmul.mubr.msk.bf16.gmra.mxu0 %vm297_vm1, %v286_v54 }
  0x2e   : > { %1037 = vmatmul.mubr.msk.bf16.gmra.mxu1 %vm297_vm1, %v237_v55  ;;  %1006 = vmatprep.mubr.msk.bf16.mxu0 %vm297_vm1, %v287_v56 }
  0x2f   : > { %1040 = vmatprep.mubr.msk.bf16.mxu1 %vm297_vm1, %v238_v57 }
  0x35   : > { %1007 = vmatmul.mubr.msk.bf16.gmra.mxu0 %vm297_vm1, %v288_v2 }
  0x36   : > { %1041 = vmatmul.mubr.msk.bf16.gmra.mxu1 %vm297_vm1, %v239_v3  ;;  %1010 = vmatprep.mubr.msk.bf16.mxu0 %vm297_vm1, %v289_v4 }
  0x37   : > { %1044 = vmatprep.mubr.msk.bf16.mxu1 %vm297_vm1, %v240_v5 }
  0x3d   : > { %1011 = vmatmul.mubr.msk.bf16.gmra.mxu0 %vm297_vm1, %v290_v14 }
  0x3e   : > { %1045 = vmatmul.mubr.msk.bf16.gmra.mxu1 %vm297_vm1, %v241_v15  ;;  %1014 = vmatprep.mubr.msk.bf16.mxu0 %vm297_vm1, %v291_v16 }
  0x3f   : > { %1048 = vmatprep.mubr.msk.bf16.mxu1 %vm297_vm1, %v242_v17 }
  0x45   : > { %1015 = vmatmul.mubr.msk.bf16.gmra.mxu0 %vm297_vm1, %v292_v26 }
  0x46   : > { %1049 = vmatmul.mubr.msk.bf16.gmra.mxu1 %vm297_vm1, %v243_v27  ;;  %1018 = vmatprep.mubr.msk.bf16.mxu0 %vm297_vm1, %v293_v28 }
  0x47   : > { %1052 = vmatprep.mubr.msk.bf16.mxu1 %vm297_vm1, %v244_v29 }
  0x4d   : > { %1019 = vmatmul.mubr.msk.bf16.gmra.mxu0 %vm297_vm1, %v294_v34 }
  0x4e   : > { %1053 = vmatmul.mubr.msk.bf16.gmra.mxu1 %vm297_vm1, %v245_v35 }
  0xd5   : > { %v992_v36 = vpop.f32.mrf.mxu0 }
  0xd6   : > { %v1026_v37 = vpop.f32.mrf.mxu1 }
  0xd7   : > { %v605_v39 = vadd.f32 %v1026_v37, %v992_v36  ;;  %v384_v40 = vpop.f32.mrf.mxu0 }
  0xd8   : > { %v596_v41 = vpop.f32.mrf.mxu1 }
  0xd9   : > { %v732_v42 = vadd.f32 %v1258_v38, %v605_v39  ;;  %v597_v43 = vadd.f32 %v596_v41, %v384_v40  ;;  %v993_v44 = vpop.f32.mrf.mxu0 }
  0xda   : > { %v1027_v45 = vpop.f32.mrf.mxu1 }
  0xdb   : > { %v764_v46 = vmax.f32 %v732_v42, 0.0  ;;  %v730_v47 = vadd.f32 %v1258_v38, %v597_v43  ;;  %v608_v48 = vadd.f32 %v1027_v45, %v993_v44  ;;  %v387_v49 = vpop.f32.mrf.mxu0 }
  0xdc   : > { %v599_v50 = vpop.f32.mrf.mxu1 }
  0xdd   : > { %796 = vst.msk [vmem:[%s1265_s29 + $0x10] sm:$0xff] %vm297_vm1, %v764_v46  ;;  %v762_v51 = vmax.f32 %v730_v47, 0.0  ;;  %v733_v52 = vadd.f32 %v1258_v38, %v608_v48  ;;  %v600_v53 = vadd.f32 %v599_v50, %v387_v49  ;;  %v996_v54 = vpop.f32.mrf.mxu0 }
  0xde   : > { %v1030_v55 = vpop.f32.mrf.mxu1 }
  0xdf   : > { %794 = vst.msk [vmem:[%s1265_s29] sm:$0xff] %vm297_vm1, %v762_v51  ;;  %v765_v56 = vmax.f32 %v733_v52, 0.0  ;;  %v731_v57 = vadd.f32 %v1258_v38, %v600_v53  ;;  %v621_v58 = vadd.f32 %v1030_v55, %v996_v54  ;;  %v400_v59 = vpop.f32.mrf.mxu0 }
  0xe0   : > { %v612_v60 = vpop.f32.mrf.mxu1 }
  0xe1   : > { %797 = vst.msk [vmem:[%s1265_s29 + $0x18] sm:$0xff] %vm297_vm1, %v765_v56  ;;  %v763_v61 = vmax.f32 %v731_v57, 0.0  ;;  %v736_v62 = vadd.f32 %v1258_v38, %v621_v58  ;;  %v613_v63 = vadd.f32 %v612_v60, %v400_v59  ;;  %v997_v0 = vpop.f32.mrf.mxu0 }
  0xe2   : > { %v1031_v1 = vpop.f32.mrf.mxu1 }
  0xe3   : > { %795 = vst.msk [vmem:[%s1265_s29 + $0x8] sm:$0xff] %vm297_vm1, %v763_v61  ;;  %v768_v2 = vmax.f32 %v736_v62, 0.0  ;;  %v734_v3 = vadd.f32 %v1258_v38, %v613_v63  ;;  %v624_v4 = vadd.f32 %v1031_v1, %v997_v0  ;;  %v403_v5 = vpop.f32.mrf.mxu0 }
  0xe4   : > { %v615_v6 = vpop.f32.mrf.mxu1 }
  0xe5   : > { %800 = vst.msk [vmem:[%s1265_s29 + $0x30] sm:$0xff] %vm297_vm1, %v768_v2  ;;  %v766_v7 = vmax.f32 %v734_v3, 0.0  ;;  %v737_v8 = vadd.f32 %v1258_v38, %v624_v4  ;;  %v616_v9 = vadd.f32 %v615_v6, %v403_v5  ;;  %v1000_v10 = vpop.f32.mrf.mxu0 }
  0xe6   : > { %v1034_v11 = vpop.f32.mrf.mxu1 }
  0xe7   : > { %798 = vst.msk [vmem:[%s1265_s29 + $0x20] sm:$0xff] %vm297_vm1, %v766_v7  ;;  %v769_v12 = vmax.f32 %v737_v8, 0.0  ;;  %v735_v13 = vadd.f32 %v1258_v38, %v616_v9  ;;  %v637_v14 = vadd.f32 %v1034_v11, %v1000_v10  ;;  %v416_v15 = vpop.f32.mrf.mxu0 }
  0xe8   : > { %v628_v16 = vpop.f32.mrf.mxu1 }
  0xe9   : > { %801 = vst.msk [vmem:[%s1265_s29 + $0x38] sm:$0xff] %vm297_vm1, %v769_v12  ;;  %v767_v17 = vmax.f32 %v735_v13, 0.0  ;;  %v740_v18 = vadd.f32 %v1258_v38, %v637_v14  ;;  %v629_v19 = vadd.f32 %v628_v16, %v416_v15  ;;  %v1001_v20 = vpop.f32.mrf.mxu0 }
  0xea   : > { %v1035_v21 = vpop.f32.mrf.mxu1 }
  0xeb   : > { %799 = vst.msk [vmem:[%s1265_s29 + $0x28] sm:$0xff] %vm297_vm1, %v767_v17  ;;  %v772_v22 = vmax.f32 %v740_v18, 0.0  ;;  %v738_v23 = vadd.f32 %v1258_v38, %v629_v19  ;;  %v640_v24 = vadd.f32 %v1035_v21, %v1001_v20  ;;  %v419_v25 = vpop.f32.mrf.mxu0 }
  0xec   : > { %v631_v26 = vpop.f32.mrf.mxu1 }
  0xed   : > { %804 = vst.msk [vmem:[%s1265_s29 + $0x50] sm:$0xff] %vm297_vm1, %v772_v22  ;;  %v770_v27 = vmax.f32 %v738_v23, 0.0  ;;  %v741_v28 = vadd.f32 %v1258_v38, %v640_v24  ;;  %v632_v29 = vadd.f32 %v631_v26, %v419_v25  ;;  %v1004_v30 = vpop.f32.mrf.mxu0 }
  0xee   : > { %v1038_v31 = vpop.f32.mrf.mxu1 }
  0xef   : > { %802 = vst.msk [vmem:[%s1265_s29 + $0x40] sm:$0xff] %vm297_vm1, %v770_v27  ;;  %v773_v32 = vmax.f32 %v741_v28, 0.0  ;;  %v739_v33 = vadd.f32 %v1258_v38, %v632_v29  ;;  %v653_v34 = vadd.f32 %v1038_v31, %v1004_v30  ;;  %v432_v35 = vpop.f32.mrf.mxu0 }
  0xf0   : > { %v644_v36 = vpop.f32.mrf.mxu1 }
  0xf1   : > { %805 = vst.msk [vmem:[%s1265_s29 + $0x58] sm:$0xff] %vm297_vm1, %v773_v32  ;;  %v771_v37 = vmax.f32 %v739_v33, 0.0  ;;  %v744_v39 = vadd.f32 %v1258_v38, %v653_v34  ;;  %v645_v40 = vadd.f32 %v644_v36, %v432_v35  ;;  %v1005_v41 = vpop.f32.mrf.mxu0 }
  0xf2   : > { %v1039_v42 = vpop.f32.mrf.mxu1 }
  0xf3   : > { %803 = vst.msk [vmem:[%s1265_s29 + $0x48] sm:$0xff] %vm297_vm1, %v771_v37  ;;  %v776_v43 = vmax.f32 %v744_v39, 0.0  ;;  %v742_v44 = vadd.f32 %v1258_v38, %v645_v40  ;;  %v656_v45 = vadd.f32 %v1039_v42, %v1005_v41  ;;  %v435_v46 = vpop.f32.mrf.mxu0 }
  0xf4   : > { %v647_v47 = vpop.f32.mrf.mxu1 }
  0xf5   : > { %808 = vst.msk [vmem:[%s1265_s29 + $0x70] sm:$0xff] %vm297_vm1, %v776_v43  ;;  %v774_v48 = vmax.f32 %v742_v44, 0.0  ;;  %v745_v49 = vadd.f32 %v1258_v38, %v656_v45  ;;  %v648_v50 = vadd.f32 %v647_v47, %v435_v46  ;;  %v1008_v51 = vpop.f32.mrf.mxu0 }
  0xf6   : > { %v1042_v52 = vpop.f32.mrf.mxu1 }
  0xf7   : > { %806 = vst.msk [vmem:[%s1265_s29 + $0x60] sm:$0xff] %vm297_vm1, %v774_v48  ;;  %v777_v53 = vmax.f32 %v745_v49, 0.0  ;;  %v743_v54 = vadd.f32 %v1258_v38, %v648_v50  ;;  %v669_v55 = vadd.f32 %v1042_v52, %v1008_v51  ;;  %v448_v56 = vpop.f32.mrf.mxu0 }
  0xf8   : > { %v660_v57 = vpop.f32.mrf.mxu1 }
  0xf9   : > { %809 = vst.msk [vmem:[%s1265_s29 + $0x78] sm:$0xff] %vm297_vm1, %v777_v53  ;;  %v775_v58 = vmax.f32 %v743_v54, 0.0  ;;  %v748_v59 = vadd.f32 %v1258_v38, %v669_v55  ;;  %v661_v60 = vadd.f32 %v660_v57, %v448_v56  ;;  %v1009_v61 = vpop.f32.mrf.mxu0 }
  0xfa   : > { %v1043_v62 = vpop.f32.mrf.mxu1 }
  0xfb   : > { %807 = vst.msk [vmem:[%s1265_s29 + $0x68] sm:$0xff] %vm297_vm1, %v775_v58  ;;  %v780_v63 = vmax.f32 %v748_v59, 0.0  ;;  %v746_v0 = vadd.f32 %v1258_v38, %v661_v60  ;;  %v672_v1 = vadd.f32 %v1043_v62, %v1009_v61  ;;  %v451_v2 = vpop.f32.mrf.mxu0 }
  0xfc   : > { %v663_v3 = vpop.f32.mrf.mxu1 }
  0xfd   : > { %812 = vst.msk [vmem:[%s1265_s29 + $0x90] sm:$0xff] %vm297_vm1, %v780_v63  ;;  %v778_v4 = vmax.f32 %v746_v0, 0.0  ;;  %v749_v5 = vadd.f32 %v1258_v38, %v672_v1  ;;  %v664_v6 = vadd.f32 %v663_v3, %v451_v2  ;;  %v1012_v7 = vpop.f32.mrf.mxu0 }
  0xfe   : > { %v1046_v8 = vpop.f32.mrf.mxu1 }
  0xff   : > { %810 = vst.msk [vmem:[%s1265_s29 + $0x80] sm:$0xff] %vm297_vm1, %v778_v4  ;;  %v781_v9 = vmax.f32 %v749_v5, 0.0  ;;  %v747_v10 = vadd.f32 %v1258_v38, %v664_v6  ;;  %v685_v11 = vadd.f32 %v1046_v8, %v1012_v7  ;;  %v464_v12 = vpop.f32.mrf.mxu0 }
 0x100   : > { %v676_v13 = vpop.f32.mrf.mxu1 }
 0x101   : > { %813 = vst.msk [vmem:[%s1265_s29 + $0x98] sm:$0xff] %vm297_vm1, %v781_v9  ;;  %v779_v14 = vmax.f32 %v747_v10, 0.0  ;;  %v752_v15 = vadd.f32 %v1258_v38, %v685_v11  ;;  %v677_v16 = vadd.f32 %v676_v13, %v464_v12  ;;  %v1013_v17 = vpop.f32.mrf.mxu0 }
 0x102   : > { %v1047_v18 = vpop.f32.mrf.mxu1 }
 0x103   : > { %811 = vst.msk [vmem:[%s1265_s29 + $0x88] sm:$0xff] %vm297_vm1, %v779_v14  ;;  %v784_v19 = vmax.f32 %v752_v15, 0.0  ;;  %v750_v20 = vadd.f32 %v1258_v38, %v677_v16  ;;  %v688_v21 = vadd.f32 %v1047_v18, %v1013_v17  ;;  %v467_v22 = vpop.f32.mrf.mxu0 }
 0x104   : > { %v679_v23 = vpop.f32.mrf.mxu1 }
 0x105   : > { %816 = vst.msk [vmem:[%s1265_s29 + $0xb0] sm:$0xff] %vm297_vm1, %v784_v19  ;;  %v782_v24 = vmax.f32 %v750_v20, 0.0  ;;  %v753_v25 = vadd.f32 %v1258_v38, %v688_v21  ;;  %v680_v26 = vadd.f32 %v679_v23, %v467_v22  ;;  %v1016_v27 = vpop.f32.mrf.mxu0 }
 0x106   : > { %v1050_v28 = vpop.f32.mrf.mxu1 }
 0x107   : > { %814 = vst.msk [vmem:[%s1265_s29 + $0xa0] sm:$0xff] %vm297_vm1, %v782_v24  ;;  %v785_v29 = vmax.f32 %v753_v25, 0.0  ;;  %v751_v30 = vadd.f32 %v1258_v38, %v680_v26  ;;  %v701_v31 = vadd.f32 %v1050_v28, %v1016_v27  ;;  %v480_v32 = vpop.f32.mrf.mxu0 }
 0x108   : > { %v692_v33 = vpop.f32.mrf.mxu1 }
 0x109   : > { %817 = vst.msk [vmem:[%s1265_s29 + $0xb8] sm:$0xff] %vm297_vm1, %v785_v29  ;;  %v783_v34 = vmax.f32 %v751_v30, 0.0  ;;  %v756_v35 = vadd.f32 %v1258_v38, %v701_v31  ;;  %v693_v36 = vadd.f32 %v692_v33, %v480_v32  ;;  %v1017_v37 = vpop.f32.mrf.mxu0 }
 0x10a   : > { %v1051_v39 = vpop.f32.mrf.mxu1 }
 0x10b   : > { %815 = vst.msk [vmem:[%s1265_s29 + $0xa8] sm:$0xff] %vm297_vm1, %v783_v34  ;;  %v788_v40 = vmax.f32 %v756_v35, 0.0  ;;  %v754_v41 = vadd.f32 %v1258_v38, %v693_v36  ;;  %v704_v42 = vadd.f32 %v1051_v39, %v1017_v37  ;;  %v483_v43 = vpop.f32.mrf.mxu0 }
 0x10c   : > { %v695_v44 = vpop.f32.mrf.mxu1 }
 0x10d   : > { %820 = vst.msk [vmem:[%s1265_s29 + $0xd0] sm:$0xff] %vm297_vm1, %v788_v40  ;;  %v786_v45 = vmax.f32 %v754_v41, 0.0  ;;  %v757_v46 = vadd.f32 %v1258_v38, %v704_v42  ;;  %v696_v47 = vadd.f32 %v695_v44, %v483_v43  ;;  %v1020_v48 = vpop.f32.mrf.mxu0 }
 0x10e   : > { %v1054_v49 = vpop.f32.mrf.mxu1 }
 0x10f   : > { %818 = vst.msk [vmem:[%s1265_s29 + $0xc0] sm:$0xff] %vm297_vm1, %v786_v45  ;;  %v789_v50 = vmax.f32 %v757_v46, 0.0  ;;  %v755_v51 = vadd.f32 %v1258_v38, %v696_v47  ;;  %v717_v52 = vadd.f32 %v1054_v49, %v1020_v48  ;;  %v496_v53 = vpop.f32.mrf.mxu0 }
 0x110   : > { %v708_v54 = vpop.f32.mrf.mxu1 }
 0x111   : > { %821 = vst.msk [vmem:[%s1265_s29 + $0xd8] sm:$0xff] %vm297_vm1, %v789_v50  ;;  %v787_v55 = vmax.f32 %v755_v51, 0.0  ;;  %v760_v56 = vadd.f32 %v1258_v38, %v717_v52  ;;  %v709_v57 = vadd.f32 %v708_v54, %v496_v53  ;;  %v1021_v58 = vpop.f32.mrf.mxu0 }
 0x112   : > { %v1055_v59 = vpop.f32.mrf.mxu1 }
 0x113   : > { %819 = vst.msk [vmem:[%s1265_s29 + $0xc8] sm:$0xff] %vm297_vm1, %v787_v55  ;;  %v792_v60 = vmax.f32 %v760_v56, 0.0  ;;  %v758_v61 = vadd.f32 %v1258_v38, %v709_v57  ;;  %v720_v62 = vadd.f32 %v1055_v59, %v1021_v58  ;;  %v499_v63 = vpop.f32.mrf.mxu0 }
 0x114   : > { %v711_v0 = vpop.f32.mrf.mxu1 }
 0x115   : > { %824 = vst.msk [vmem:[%s1265_s29 + $0xf0] sm:$0xff] %vm297_vm1, %v792_v60  ;;  %v790_v1 = vmax.f32 %v758_v61, 0.0  ;;  %v761_v2 = vadd.f32 %v1258_v38, %v720_v62  ;;  %v712_v3 = vadd.f32 %v711_v0, %v499_v63 }
 0x117   : > { %822 = vst.msk [vmem:[%s1265_s29 + $0xe0] sm:$0xff] %vm297_vm1, %v790_v1  ;;  %v793_v4 = vmax.f32 %v761_v2, 0.0  ;;  %v759_v5 = vadd.f32 %v1258_v38, %v712_v3 }
 0x119   : > { %825 = vst.msk [vmem:[%s1265_s29 + $0xf8] sm:$0xff] %vm297_vm1, %v793_v4  ;;  %v791_v6 = vmax.f32 %v759_v5, 0.0 }
 0x11b   : > { %823 = vst.msk [vmem:[%s1265_s29 + $0xe8] sm:$0xff] %vm297_vm1, %v791_v6 }
 0x11c PF: > { %s13_s14 = sadd.s32 1, %s1105_s14   ;;  %s1375_s12 = smov %s1101_s13 }
 0x11d   : > { %p10_p5 = scmp.ge.s32.totalorder %s13_s14, 4   ;;  %s1376_s13 = smov %s1378_s15 }
 0x11f   :  { %12 = sbr.rel (!%p10_p5) target bundleno = 2 (0x2), region = 64 }

// kernel: _lambda_.11
= control target key start
LH: loop header
LB: loop body
LE: loop exit
PB: predicated region body
PF: predicated region fallthrough
CT: control target
= control target key end

     0   :  { %s1493_s12 = smov 0   ;;  %s1495_s13 = smov 0   ;;  %s1870_s0 = inlined_call_operand.vmem [shape: f32[2,16,18,4], index: 0, kind: input, shape index: {}]   ;;  %s1871_s1 = inlined_call_operand.vmem [shape: bf16[3,4,4], index: 1, kind: input, shape index: {}]   ;;  %s1872_s2 = inlined_call_operand.vmem [shape: f32[1,4], index: 2, kind: input, shape index: {}]   ;;  %s1873_s3 = inlined_call_operand.vmem [shape: f32[2,256,4], index: 3, kind: output, shape index: {}]  }
   0x1   :  { %s1497_s14 = smov 0  }
   0x2 LB: > { %s25_s15 = sadd.s32 1, %s1467_s13  ;;  %p1207_p0 = scmp.ge.s32.totalorder %s1471_s14, 1  ;;  %s1471_s14 = sphi %s1497_s14, %s13_s14   ;;  %s1467_s13 = sphi %s1495_s13, %s1875_s13   ;;  %s1463_s12 = sphi %s1493_s12, %s1874_s12  }
   0x3   : > { %p27_p1 = scmp.ge.s32.totalorder %s25_s15, 2  ;;  %p151_p2 = scmp.lt.s32.totalorder %s1471_s14, 3 }
   0x5   : > { %s1877_s15 = smov (%p27_p1, %s25_s15), 0  ;;  %p152_p3 = pnand %p1207_p0, %p151_p2 }
   0x6   : > { %p179_p4 = scmp.lt.s32.totalorder (!%p152_p3), %s1463_s12, 1 }
   0x7   : > { %155 = sbr.rel (%p152_p3) target bundleno = 318 (0x13e), region = 32 }
   0xc   : > { %v1211_v0 = vld [vmem:[%s1871_s1 + $0x2] sm:$0x3]  ;;  %vm346_vm0 = vcmask 1041408   ;;  %v246_v2 = vld [vmem:[%s1871_s1] sm:$0x3]  ;;  %s1879_s12 = smov (!%p179_p4, %s1463_s12), 1 }
   0xd   : > { %1421 = vmatprep.subr.msk.bf16.mxu1 %vm346_vm0, %v1211_v0  ;;  %1420 = vmatprep.subr.msk.bf16.mxu0 %vm346_vm0, %v1211_v0  ;;  %v348_v1 = vsel %vm346_vm0, %v1211_v0, 0  ;;  %v1244_v3 = vld [vmem:[%s1871_s1 + $0x4] sm:$0x3]  ;;  %s1424_s22 = smul.u32 384, %s1879_s12  ;;  %vm297_vm1 = vcmask 31744   ;;  %v560_v18 = vsel %vm346_vm0, %v246_v2, 0 }
   0xe   : > { %1419 = vmatpush3.bf16.msra.mxu1 %v348_v1  ;;  %1317 = vmatpush3.bf16.msra.mxu0 %v348_v1  ;;  %v822_v15 = vsel %vm346_vm0, %v1244_v3, 0  ;;  %s1264_s28 = sshll.u32 %s1879_s12, 8 }
   0xf   : > { %1422 = vmatprep.subr.msk.bf16.mxu1 %vm346_vm0, %v246_v2  ;;  %1423 = vmatprep.subr.msk.bf16.mxu0 %vm346_vm0, %v1244_v3  ;;  %s1531_s25 = scalar_lea.vmem %s1870_s0, %s1424_s22  ;;  %s1739_s4 = scalar_lea.vmem %s1873_s3, %s1264_s28 }
  0x10   : > { %v247_v4 = vld [vmem:[%s1531_s25 + $0x1] sm:$0xff]  ;;  %v248_v5 = vld [vmem:[%s1531_s25 + $0x9] sm:$0xff]  ;;  %v249_v9 = vld [vmem:[%s1531_s25 + $0x19] sm:$0xff] }
  0x11   : > { %v263_v6 = vld [vmem:[%s1531_s25 + $0xc1] sm:$0xff]  ;;  %v279_v7 = vpack.c.bf16 %v248_v5, %v247_v4  ;;  %v264_v8 = vld [vmem:[%s1531_s25 + $0xc9] sm:$0xff]  ;;  %v265_v13 = vld [vmem:[%s1531_s25 + $0xd9] sm:$0xff] }
  0x12   : > { %v250_v10 = vld [vmem:[%s1531_s25 + $0x21] sm:$0xff]  ;;  %v287_v11 = vpack.c.bf16 %v264_v8, %v263_v6  ;;  %v251_v16 = vld [vmem:[%s1531_s25 + $0x31] sm:$0xff]  ;;  %v252_v19 = vld [vmem:[%s1531_s25 + $0x39] sm:$0xff] }
  0x13   : > { %v280_v12 = vpack.c.bf16 %v250_v10, %v249_v9  ;;  %v266_v14 = vld [vmem:[%s1531_s25 + $0xe1] sm:$0xff]  ;;  %1318 = vmatprep.mubr.msk.bf16.mxu0 %vm297_vm1, %v279_v7  ;;  %v267_v20 = vld [vmem:[%s1531_s25 + $0xf1] sm:$0xff]  ;;  %v268_v21 = vld [vmem:[%s1531_s25 + $0xf9] sm:$0xff]  ;;  %v281_v22 = vpack.c.bf16 %v252_v19, %v251_v16 }
  0x14   : > { %v288_v17 = vpack.c.bf16 %v266_v14, %v265_v13  ;;  %1334 = vmatprep.mubr.msk.bf16.mxu1 %vm297_vm1, %v287_v11  ;;  %v289_v23 = vpack.c.bf16 %v268_v21, %v267_v20  ;;  %v253_v24 = vld [vmem:[%s1531_s25 + $0x49] sm:$0xff]  ;;  %v254_v25 = vld [vmem:[%s1531_s25 + $0x51] sm:$0xff]  ;;  %v255_v28 = vld [vmem:[%s1531_s25 + $0x61] sm:$0xff] }
  0x15   : > { %1319 = vmatmul.mubr.msk.bf16.vlgmr.msra.gmra.mxu0 %vm297_vm1, %v280_v12  ;;  %v269_v26 = vld [vmem:[%s1531_s25 + $0x109] sm:$0xff]  ;;  %v270_v27 = vld [vmem:[%s1531_s25 + $0x111] sm:$0xff]  ;;  %v271_v30 = vld [vmem:[%s1531_s25 + $0x121] sm:$0xff]  ;;  %v282_v32 = vpack.c.bf16 %v254_v25, %v253_v24 }
  0x16   : > { %1335 = vmatmul.mubr.msk.bf16.vlgmr.msra.gmra.mxu1 %vm297_vm1, %v288_v17  ;;  %1385 = vmatpush3.bf16.msra.mxu0 %v822_v15  ;;  %v256_v29 = vld [vmem:[%s1531_s25 + $0x69] sm:$0xff]  ;;  %v290_v33 = vpack.c.bf16 %v270_v27, %v269_v26  ;;  %v257_v36 = vld [vmem:[%s1531_s25 + $0x79] sm:$0xff]  ;;  %v258_v37 = vld [vmem:[%s1531_s25 + $0x81] sm:$0xff] }
  0x17   : > { %1351 = vmatpush3.bf16.msra.mxu1 %v560_v18  ;;  %1322 = vmatprep.mubr.msk.bf16.mxu0 %vm297_vm1, %v281_v22  ;;  %v272_v31 = vld [vmem:[%s1531_s25 + $0x129] sm:$0xff]  ;;  %v283_v34 = vpack.c.bf16 %v256_v29, %v255_v28  ;;  %v273_v38 = vld [vmem:[%s1531_s25 + $0x139] sm:$0xff]  ;;  %v274_v39 = vld [vmem:[%s1531_s25 + $0x141] sm:$0xff]  ;;  %v284_v44 = vpack.c.bf16 %v258_v37, %v257_v36 }
  0x18   : > { %1338 = vmatprep.mubr.msk.bf16.mxu1 %vm297_vm1, %v289_v23  ;;  %v291_v35 = vpack.c.bf16 %v272_v31, %v271_v30  ;;  %v259_v40 = vld [vmem:[%s1531_s25 + $0x91] sm:$0xff]  ;;  %v260_v41 = vld [vmem:[%s1531_s25 + $0x99] sm:$0xff]  ;;  %v292_v45 = vpack.c.bf16 %v274_v39, %v273_v38  ;;  %v261_v48 = vld [vmem:[%s1531_s25 + $0xa9] sm:$0xff] }
  0x19   : > { %v275_v42 = vld [vmem:[%s1531_s25 + $0x151] sm:$0xff]  ;;  %v276_v43 = vld [vmem:[%s1531_s25 + $0x159] sm:$0xff]  ;;  %v285_v46 = vpack.c.bf16 %v260_v41, %v259_v40  ;;  %v277_v50 = vld [vmem:[%s1531_s25 + $0x169] sm:$0xff] }
  0x1a   : > { %v293_v47 = vpack.c.bf16 %v276_v43, %v275_v42  ;;  %v262_v49 = vld [vmem:[%s1531_s25 + $0xb1] sm:$0xff]  ;;  %v723_v52 = vld [vmem:[%s1531_s25 + $0x2] sm:$0xff]  ;;  %v725_v61 = vld [vmem:[%s1531_s25 + $0x1a] sm:$0xff] }
  0x1b   : > { %v278_v51 = vld [vmem:[%s1531_s25 + $0x171] sm:$0xff]  ;;  %v198_v54 = vld [vmem:[%s1531_s25] sm:$0xff]  ;;  %v199_v55 = vld [vmem:[%s1531_s25 + $0x8] sm:$0xff]  ;;  %v286_v56 = vpack.c.bf16 %v262_v49, %v261_v48 }
  0x1c   : > { %v724_v53 = vld [vmem:[%s1531_s25 + $0xa] sm:$0xff]  ;;  %v294_v57 = vpack.c.bf16 %v278_v51, %v277_v50  ;;  %v230_v59 = vpack.c.bf16 %v199_v55, %v198_v54  ;;  %v200_v60 = vld [vmem:[%s1531_s25 + $0x18] sm:$0xff]  ;;  %v726_v62 = vld [vmem:[%s1531_s25 + $0x22] sm:$0xff] }
  0x1d   : > { %1323 = vmatmul.mubr.msk.bf16.gmra.mxu0 %vm297_vm1, %v282_v32  ;;  %v755_v58 = vpack.c.bf16 %v724_v53, %v723_v52  ;;  %v201_v63 = vld [vmem:[%s1531_s25 + $0x20] sm:$0xff]  ;;  %v727_v0 = vld [vmem:[%s1531_s25 + $0x32] sm:$0xff]  ;;  %v756_v4 = vpack.c.bf16 %v726_v62, %v725_v61  ;;  %v204_v8 = vld [vmem:[%s1531_s25 + $0x48] sm:$0xff] }
  0x1e   : > { %1339 = vmatmul.mubr.msk.bf16.gmra.mxu1 %vm297_vm1, %v290_v33  ;;  %1326 = vmatprep.mubr.msk.bf16.mxu0 %vm297_vm1, %v283_v34  ;;  %v728_v1 = vld [vmem:[%s1531_s25 + $0x3a] sm:$0xff]  ;;  %v202_v2 = vld [vmem:[%s1531_s25 + $0x30] sm:$0xff]  ;;  %v231_v5 = vpack.c.bf16 %v201_v63, %v200_v60  ;;  %v731_v12 = vld [vmem:[%s1531_s25 + $0x62] sm:$0xff] }
  0x1f   : > { %1342 = vmatprep.mubr.msk.bf16.mxu1 %vm297_vm1, %v291_v35  ;;  %v203_v3 = vld [vmem:[%s1531_s25 + $0x38] sm:$0xff]  ;;  %v757_v6 = vpack.c.bf16 %v728_v1, %v727_v0  ;;  %v729_v9 = vld [vmem:[%s1531_s25 + $0x4a] sm:$0xff]  ;;  %v206_v14 = vld [vmem:[%s1531_s25 + $0x60] sm:$0xff] }
  0x20   : > { %v232_v7 = vpack.c.bf16 %v203_v3, %v202_v2  ;;  %v730_v10 = vld [vmem:[%s1531_s25 + $0x52] sm:$0xff]  ;;  %v732_v13 = vld [vmem:[%s1531_s25 + $0x6a] sm:$0xff]  ;;  %v733_v21 = vld [vmem:[%s1531_s25 + $0x7a] sm:$0xff] }
  0x21   : > { %v205_v11 = vld [vmem:[%s1531_s25 + $0x50] sm:$0xff]  ;;  %v207_v15 = vld [vmem:[%s1531_s25 + $0x68] sm:$0xff]  ;;  %v758_v16 = vpack.c.bf16 %v730_v10, %v729_v9  ;;  %v759_v18 = vpack.c.bf16 %v732_v13, %v731_v12  ;;  %v208_v20 = vld [vmem:[%s1531_s25 + $0x78] sm:$0xff] }
  0x22   : > { %v233_v17 = vpack.c.bf16 %v205_v11, %v204_v8  ;;  %v234_v19 = vpack.c.bf16 %v207_v15, %v206_v14  ;;  %v734_v22 = vld [vmem:[%s1531_s25 + $0x82] sm:$0xff]  ;;  %v735_v24 = vld [vmem:[%s1531_s25 + $0x92] sm:$0xff]  ;;  %v736_v25 = vld [vmem:[%s1531_s25 + $0x9a] sm:$0xff] }
  0x23   : > { %v209_v23 = vld [vmem:[%s1531_s25 + $0x80] sm:$0xff]  ;;  %v210_v26 = vld [vmem:[%s1531_s25 + $0x90] sm:$0xff]  ;;  %v211_v27 = vld [vmem:[%s1531_s25 + $0x98] sm:$0xff]  ;;  %v760_v28 = vpack.c.bf16 %v734_v22, %v733_v21  ;;  %v761_v30 = vpack.c.bf16 %v736_v25, %v735_v24 }
  0x24   : > { %v235_v29 = vpack.c.bf16 %v209_v23, %v208_v20  ;;  %v236_v31 = vpack.c.bf16 %v211_v27, %v210_v26  ;;  %v212_v32 = vld [vmem:[%s1531_s25 + $0xa8] sm:$0xff]  ;;  %v738_v34 = vld [vmem:[%s1531_s25 + $0xb2] sm:$0xff]  ;;  %v214_v38 = vld [vmem:[%s1531_s25 + $0xc0] sm:$0xff] }
  0x25   : > { %1327 = vmatmul.mubr.msk.bf16.gmra.mxu0 %vm297_vm1, %v284_v44  ;;  %v737_v33 = vld [vmem:[%s1531_s25 + $0xaa] sm:$0xff]  ;;  %v739_v36 = vld [vmem:[%s1531_s25 + $0xc2] sm:$0xff]  ;;  %v216_v44 = vld [vmem:[%s1531_s25 + $0xd8] sm:$0xff] }
  0x26   : > { %1343 = vmatmul.mubr.msk.bf16.gmra.mxu1 %vm297_vm1, %v292_v45  ;;  %1330 = vmatprep.mubr.msk.bf16.mxu0 %vm297_vm1, %v285_v46  ;;  %v213_v35 = vld [vmem:[%s1531_s25 + $0xb0] sm:$0xff]  ;;  %v215_v39 = vld [vmem:[%s1531_s25 + $0xc8] sm:$0xff]  ;;  %v762_v40 = vpack.c.bf16 %v738_v34, %v737_v33  ;;  %v741_v45 = vld [vmem:[%s1531_s25 + $0xda] sm:$0xff] }
  0x27   : > { %1346 = vmatprep.mubr.msk.bf16.mxu1 %vm297_vm1, %v293_v47  ;;  %v740_v37 = vld [vmem:[%s1531_s25 + $0xca] sm:$0xff]  ;;  %v237_v41 = vpack.c.bf16 %v213_v35, %v212_v32  ;;  %v238_v43 = vpack.c.bf16 %v215_v39, %v214_v38  ;;  %v742_v46 = vld [vmem:[%s1531_s25 + $0xe2] sm:$0xff]  ;;  %v743_v48 = vld [vmem:[%s1531_s25 + $0xf2] sm:$0xff] }
  0x28   : > { %v763_v42 = vpack.c.bf16 %v740_v37, %v739_v36  ;;  %v217_v47 = vld [vmem:[%s1531_s25 + $0xe0] sm:$0xff]  ;;  %v218_v50 = vld [vmem:[%s1531_s25 + $0xf0] sm:$0xff]  ;;  %v219_v51 = vld [vmem:[%s1531_s25 + $0xf8] sm:$0xff]  ;;  %v764_v52 = vpack.c.bf16 %v742_v46, %v741_v45 }
  0x29   : > { %v744_v49 = vld [vmem:[%s1531_s25 + $0xfa] sm:$0xff]  ;;  %v239_v53 = vpack.c.bf16 %v217_v47, %v216_v44  ;;  %v240_v55 = vpack.c.bf16 %v219_v51, %v218_v50  ;;  %v747_v60 = vld [vmem:[%s1531_s25 + $0x122] sm:$0xff]  ;;  %v748_v61 = vld [vmem:[%s1531_s25 + $0x12a] sm:$0xff] }
  0x2a   : > { %v765_v54 = vpack.c.bf16 %v744_v49, %v743_v48  ;;  %v222_v62 = vld [vmem:[%s1531_s25 + $0x120] sm:$0xff]  ;;  %v223_v63 = vld [vmem:[%s1531_s25 + $0x128] sm:$0xff]  ;;  %v767_v2 = vpack.c.bf16 %v748_v61, %v747_v60  ;;  %v751_v8 = vld [vmem:[%s1531_s25 + $0x152] sm:$0xff] }
  0x2b   : > { %v242_v3 = vpack.c.bf16 %v223_v63, %v222_v62  ;;  %v752_v9 = vld [vmem:[%s1531_s25 + $0x15a] sm:$0xff]  ;;  %v226_v10 = vld [vmem:[%s1531_s25 + $0x150] sm:$0xff] }
  0x2c   : > { %v227_v11 = vld [vmem:[%s1531_s25 + $0x158] sm:$0xff]  ;;  %v769_v14 = vpack.c.bf16 %v752_v9, %v751_v8 }
  0x2d   : > { %1331 = vmatmul.mubr.msk.bf16.gmra.mxu0 %vm297_vm1, %v286_v56  ;;  %v220_v56 = vld [vmem:[%s1531_s25 + $0x108] sm:$0xff]  ;;  %v244_v15 = vpack.c.bf16 %v227_v11, %v226_v10 }
  0x2e   : > { %1347 = vmatmul.mubr.msk.bf16.gmra.mxu1 %vm297_vm1, %v294_v57  ;;  %1386 = vmatprep.mubr.msk.bf16.mxu0 %vm297_vm1, %v755_v58  ;;  %v745_v57 = vld [vmem:[%s1531_s25 + $0x10a] sm:$0xff]  ;;  %v746_v58 = vld [vmem:[%s1531_s25 + $0x112] sm:$0xff] }
  0x2f   : > { %1352 = vmatprep.mubr.msk.bf16.mxu1 %vm297_vm1, %v230_v59  ;;  %v221_v59 = vld [vmem:[%s1531_s25 + $0x110] sm:$0xff]  ;;  %v766_v0 = vpack.c.bf16 %v746_v58, %v745_v57  ;;  %v1732_v58 = vld [vmem:[%s1872_s2] ss:$0 sm:$0xff] }
  0x30   : > { %v241_v1 = vpack.c.bf16 %v221_v59, %v220_v56 }
  0x35   : > { %1387 = vmatmul.mubr.msk.bf16.vlgmr.msra.gmra.mxu0 %vm297_vm1, %v756_v4  ;;  %v224_v4 = vld [vmem:[%s1531_s25 + $0x138] sm:$0xff] }
  0x36   : > { %1353 = vmatmul.mubr.msk.bf16.vlgmr.msra.gmra.mxu1 %vm297_vm1, %v231_v5  ;;  %1390 = vmatprep.mubr.msk.bf16.mxu0 %vm297_vm1, %v757_v6  ;;  %v749_v5 = vld [vmem:[%s1531_s25 + $0x13a] sm:$0xff]  ;;  %v750_v6 = vld [vmem:[%s1531_s25 + $0x142] sm:$0xff] }
  0x37   : > { %1356 = vmatprep.mubr.msk.bf16.mxu1 %vm297_vm1, %v232_v7  ;;  %v225_v7 = vld [vmem:[%s1531_s25 + $0x140] sm:$0xff]  ;;  %v768_v12 = vpack.c.bf16 %v750_v6, %v749_v5 }
  0x38   : > { %v243_v13 = vpack.c.bf16 %v225_v7, %v224_v4 }
  0x3d   : > { %1391 = vmatmul.mubr.msk.bf16.gmra.mxu0 %vm297_vm1, %v758_v16  ;;  %v753_v16 = vld [vmem:[%s1531_s25 + $0x16a] sm:$0xff] }
  0x3e   : > { %1357 = vmatmul.mubr.msk.bf16.gmra.mxu1 %vm297_vm1, %v233_v17  ;;  %1394 = vmatprep.mubr.msk.bf16.mxu0 %vm297_vm1, %v759_v18  ;;  %v754_v17 = vld [vmem:[%s1531_s25 + $0x172] sm:$0xff]  ;;  %v228_v18 = vld [vmem:[%s1531_s25 + $0x168] sm:$0xff] }
  0x3f   : > { %1360 = vmatprep.mubr.msk.bf16.mxu1 %vm297_vm1, %v234_v19  ;;  %v229_v19 = vld [vmem:[%s1531_s25 + $0x170] sm:$0xff]  ;;  %v770_v20 = vpack.c.bf16 %v754_v17, %v753_v16 }
  0x40   : > { %v245_v21 = vpack.c.bf16 %v229_v19, %v228_v18 }
  0x45   : > { %1395 = vmatmul.mubr.msk.bf16.gmra.mxu0 %vm297_vm1, %v760_v28 }
  0x46   : > { %1361 = vmatmul.mubr.msk.bf16.gmra.mxu1 %vm297_vm1, %v235_v29  ;;  %1398 = vmatprep.mubr.msk.bf16.mxu0 %vm297_vm1, %v761_v30 }
  0x47   : > { %1364 = vmatprep.mubr.msk.bf16.mxu1 %vm297_vm1, %v236_v31 }
  0x4d   : > { %1399 = vmatmul.mubr.msk.bf16.gmra.mxu0 %vm297_vm1, %v762_v40 }
  0x4e   : > { %1365 = vmatmul.mubr.msk.bf16.gmra.mxu1 %vm297_vm1, %v237_v41  ;;  %1402 = vmatprep.mubr.msk.bf16.mxu0 %vm297_vm1, %v763_v42 }
  0x4f   : > { %1368 = vmatprep.mubr.msk.bf16.mxu1 %vm297_vm1, %v238_v43 }
  0x55   : > { %1403 = vmatmul.mubr.msk.bf16.gmra.mxu0 %vm297_vm1, %v764_v52 }
  0x56   : > { %1369 = vmatmul.mubr.msk.bf16.gmra.mxu1 %vm297_vm1, %v239_v53  ;;  %1406 = vmatprep.mubr.msk.bf16.mxu0 %vm297_vm1, %v765_v54 }
  0x57   : > { %1372 = vmatprep.mubr.msk.bf16.mxu1 %vm297_vm1, %v240_v55 }
  0x5d   : > { %1407 = vmatmul.mubr.msk.bf16.gmra.mxu0 %vm297_vm1, %v766_v0 }
  0x5e   : > { %1373 = vmatmul.mubr.msk.bf16.gmra.mxu1 %vm297_vm1, %v241_v1  ;;  %1410 = vmatprep.mubr.msk.bf16.mxu0 %vm297_vm1, %v767_v2 }
  0x5f   : > { %1376 = vmatprep.mubr.msk.bf16.mxu1 %vm297_vm1, %v242_v3 }
  0x65   : > { %1411 = vmatmul.mubr.msk.bf16.gmra.mxu0 %vm297_vm1, %v768_v12 }
  0x66   : > { %1377 = vmatmul.mubr.msk.bf16.gmra.mxu1 %vm297_vm1, %v243_v13  ;;  %1414 = vmatprep.mubr.msk.bf16.mxu0 %vm297_vm1, %v769_v14 }
  0x67   : > { %1380 = vmatprep.mubr.msk.bf16.mxu1 %vm297_vm1, %v244_v15 }
  0x6d   : > { %1415 = vmatmul.mubr.msk.bf16.gmra.mxu0 %vm297_vm1, %v770_v20 }
  0x6e   : > { %1381 = vmatmul.mubr.msk.bf16.gmra.mxu1 %vm297_vm1, %v245_v21 }
  0xd5   : > { %v1320_v22 = vpop.f32.mrf.mxu0 }
  0xd6   : > { %v1679_v23 = vpop.f32.mrf.mxu1 }
  0xd7   : > { %v384_v24 = vpop.f32.mrf.mxu0 }
  0xd8   : > { %v1681_v25 = vpop.f32.mrf.mxu1 }
  0xd9   : > { %v1321_v26 = vpop.f32.mrf.mxu0 }
  0xda   : > { %v1683_v27 = vpop.f32.mrf.mxu1 }
  0xdb   : > { %v387_v28 = vpop.f32.mrf.mxu0 }
  0xdc   : > { %v1685_v29 = vpop.f32.mrf.mxu1 }
  0xdd   : > { %v1324_v30 = vpop.f32.mrf.mxu0 }
  0xde   : > { %v1687_v31 = vpop.f32.mrf.mxu1 }
  0xdf   : > { %v400_v32 = vpop.f32.mrf.mxu0 }
  0xe0   : > { %v1689_v33 = vpop.f32.mrf.mxu1 }
  0xe1   : > { %v1325_v34 = vpop.f32.mrf.mxu0 }
  0xe2   : > { %v1691_v35 = vpop.f32.mrf.mxu1 }
  0xe3   : > { %v1693_v36 = vpop.f32.mrf.mxu0 }
  0xe4   : > { %v1695_v37 = vpop.f32.mrf.mxu1 }
  0xe5   : > { %v1697_v38 = vpop.f32.mrf.mxu0 }
  0xe6   : > { %v1699_v39 = vpop.f32.mrf.mxu1 }
  0xe7   : > { %v1701_v40 = vpop.f32.mrf.mxu0 }
  0xe8   : > { %v1703_v41 = vpop.f32.mrf.mxu1 }
  0xe9   : > { %v1705_v42 = vpop.f32.mrf.mxu0 }
  0xea   : > { %v1707_v43 = vpop.f32.mrf.mxu1 }
  0xeb   : > { %v1709_v44 = vpop.f32.mrf.mxu0 }
  0xec   : > { %v1711_v45 = vpop.f32.mrf.mxu1 }
  0xed   : > { %v1713_v46 = vpop.f32.mrf.mxu0 }
  0xee   : > { %v1715_v47 = vpop.f32.mrf.mxu1 }
  0xef   : > { %v1717_v48 = vpop.f32.mrf.mxu0 }
  0xf0   : > { %v1719_v49 = vpop.f32.mrf.mxu1 }
  0xf1   : > { %v1721_v50 = vpop.f32.mrf.mxu0 }
  0xf2   : > { %v1723_v51 = vpop.f32.mrf.mxu1 }
  0xf3   : > { %v1725_v52 = vpop.f32.mrf.mxu0 }
  0xf4   : > { %v1727_v53 = vpop.f32.mrf.mxu1 }
  0xf5   : > { %v1388_v54 = vpop.f32.mrf.mxu0 }
  0xf6   : > { %v1354_v55 = vpop.f32.mrf.mxu1 }
  0xf7   : > { %v605_v56 = vadd.f32 %v1354_v55, %v1320_v22  ;;  %v858_v57 = vpop.f32.mrf.mxu0 }
  0xf8   : > { %v596_v59 = vpop.f32.mrf.mxu1 }
  0xf9   : > { %v987_v60 = vadd.f32 %v1388_v54, %v605_v56  ;;  %v597_v61 = vadd.f32 %v596_v59, %v384_v24  ;;  %v1389_v62 = vpop.f32.mrf.mxu0 }
  0xfa   : > { %v1355_v63 = vpop.f32.mrf.mxu1 }
  0xfb   : > { %v1026_v0 = vadd.f32 %v1732_v58, %v987_v60  ;;  %v985_v1 = vadd.f32 %v858_v57, %v597_v61  ;;  %v608_v2 = vadd.f32 %v1355_v63, %v1321_v26  ;;  %v861_v3 = vpop.f32.mrf.mxu0 }
  0xfc   : > { %v599_v4 = vpop.f32.mrf.mxu1 }
  0xfd   : > { %v1058_v5 = vmax.f32 %v1026_v0, 0.0  ;;  %v1024_v6 = vadd.f32 %v1732_v58, %v985_v1  ;;  %v988_v7 = vadd.f32 %v1389_v62, %v608_v2  ;;  %v600_v8 = vadd.f32 %v599_v4, %v387_v28  ;;  %v1392_v9 = vpop.f32.mrf.mxu0 }
  0xfe   : > { %v1358_v10 = vpop.f32.mrf.mxu1 }
  0xff   : > { %1090 = vst.msk [vmem:[%s1739_s4 + $0x10] sm:$0xff] %vm297_vm1, %v1058_v5  ;;  %v1056_v11 = vmax.f32 %v1024_v6, 0.0  ;;  %v1027_v12 = vadd.f32 %v1732_v58, %v988_v7  ;;  %v986_v13 = vadd.f32 %v861_v3, %v600_v8  ;;  %v621_v14 = vadd.f32 %v1358_v10, %v1324_v30  ;;  %v874_v15 = vpop.f32.mrf.mxu0 }
 0x100   : > { %v612_v16 = vpop.f32.mrf.mxu1 }
 0x101   : > { %1088 = vst.msk [vmem:[%s1739_s4] sm:$0xff] %vm297_vm1, %v1056_v11  ;;  %v1059_v17 = vmax.f32 %v1027_v12, 0.0  ;;  %v1025_v18 = vadd.f32 %v1732_v58, %v986_v13  ;;  %v991_v19 = vadd.f32 %v1392_v9, %v621_v14  ;;  %v613_v20 = vadd.f32 %v612_v16, %v400_v32  ;;  %v1393_v21 = vpop.f32.mrf.mxu0 }
 0x102   : > { %v1359_v22 = vpop.f32.mrf.mxu1 }
 0x103   : > { %1091 = vst.msk [vmem:[%s1739_s4 + $0x18] sm:$0xff] %vm297_vm1, %v1059_v17  ;;  %v1057_v24 = vmax.f32 %v1025_v18, 0.0  ;;  %v1030_v26 = vadd.f32 %v1732_v58, %v991_v19  ;;  %v989_v28 = vadd.f32 %v874_v15, %v613_v20  ;;  %v624_v30 = vadd.f32 %v1359_v22, %v1325_v34  ;;  %v877_v54 = vpop.f32.mrf.mxu0 }
 0x104   : > { %v615_v55 = vpop.f32.mrf.mxu1 }
 0x105   : > { %1089 = vst.msk [vmem:[%s1739_s4 + $0x8] sm:$0xff] %vm297_vm1, %v1057_v24  ;;  %v1062_v56 = vmax.f32 %v1030_v26, 0.0  ;;  %v1028_v57 = vadd.f32 %v1732_v58, %v989_v28  ;;  %v992_v59 = vadd.f32 %v1393_v21, %v624_v30  ;;  %v616_v32 = vadd.f32 %v615_v55, %v1693_v36  ;;  %v1396_v60 = vpop.f32.mrf.mxu0 }
 0x106   : > { %v1362_v61 = vpop.f32.mrf.mxu1 }
 0x107   : > { %1094 = vst.msk [vmem:[%s1739_s4 + $0x30] sm:$0xff] %vm297_vm1, %v1062_v56  ;;  %v1060_v62 = vmax.f32 %v1028_v57, 0.0  ;;  %v1031_v63 = vadd.f32 %v1732_v58, %v992_v59  ;;  %v990_v34 = vadd.f32 %v877_v54, %v616_v32  ;;  %v637_v0 = vadd.f32 %v1362_v61, %v1697_v38  ;;  %v890_v1 = vpop.f32.mrf.mxu0 }
 0x108   : > { %v628_v2 = vpop.f32.mrf.mxu1 }
 0x109   : > { %1092 = vst.msk [vmem:[%s1739_s4 + $0x20] sm:$0xff] %vm297_vm1, %v1060_v62  ;;  %v1063_v3 = vmax.f32 %v1031_v63, 0.0  ;;  %v1029_v4 = vadd.f32 %v1732_v58, %v990_v34  ;;  %v995_v36 = vadd.f32 %v1396_v60, %v637_v0  ;;  %v629_v5 = vadd.f32 %v628_v2, %v1701_v40  ;;  %v1397_v6 = vpop.f32.mrf.mxu0 }
 0x10a   : > { %v1363_v7 = vpop.f32.mrf.mxu1 }
 0x10b   : > { %1095 = vst.msk [vmem:[%s1739_s4 + $0x38] sm:$0xff] %vm297_vm1, %v1063_v3  ;;  %v1061_v8 = vmax.f32 %v1029_v4, 0.0  ;;  %v1034_v9 = vadd.f32 %v1732_v58, %v995_v36  ;;  %v993_v38 = vadd.f32 %v890_v1, %v629_v5  ;;  %v640_v10 = vadd.f32 %v1363_v7, %v1705_v42  ;;  %v893_v11 = vpop.f32.mrf.mxu0 }
 0x10c   : > { %v631_v12 = vpop.f32.mrf.mxu1 }
 0x10d   : > { %1093 = vst.msk [vmem:[%s1739_s4 + $0x28] sm:$0xff] %vm297_vm1, %v1061_v8  ;;  %v1066_v13 = vmax.f32 %v1034_v9, 0.0  ;;  %v1032_v14 = vadd.f32 %v1732_v58, %v993_v38  ;;  %v996_v40 = vadd.f32 %v1397_v6, %v640_v10  ;;  %v632_v15 = vadd.f32 %v631_v12, %v1709_v44  ;;  %v1400_v16 = vpop.f32.mrf.mxu0 }
 0x10e   : > { %v1366_v17 = vpop.f32.mrf.mxu1 }
 0x10f   : > { %1098 = vst.msk [vmem:[%s1739_s4 + $0x50] sm:$0xff] %vm297_vm1, %v1066_v13  ;;  %v1064_v18 = vmax.f32 %v1032_v14, 0.0  ;;  %v1035_v19 = vadd.f32 %v1732_v58, %v996_v40  ;;  %v994_v42 = vadd.f32 %v893_v11, %v632_v15  ;;  %v653_v20 = vadd.f32 %v1366_v17, %v1713_v46  ;;  %v906_v21 = vpop.f32.mrf.mxu0 }
 0x110   : > { %v644_v22 = vpop.f32.mrf.mxu1 }
 0x111   : > { %1096 = vst.msk [vmem:[%s1739_s4 + $0x40] sm:$0xff] %vm297_vm1, %v1064_v18  ;;  %v1067_v24 = vmax.f32 %v1035_v19, 0.0  ;;  %v1033_v26 = vadd.f32 %v1732_v58, %v994_v42  ;;  %v999_v44 = vadd.f32 %v1400_v16, %v653_v20  ;;  %v645_v28 = vadd.f32 %v644_v22, %v1717_v48  ;;  %v1401_v30 = vpop.f32.mrf.mxu0 }
 0x112   : > { %v1367_v54 = vpop.f32.mrf.mxu1 }
 0x113   : > { %1099 = vst.msk [vmem:[%s1739_s4 + $0x58] sm:$0xff] %vm297_vm1, %v1067_v24  ;;  %v1065_v55 = vmax.f32 %v1033_v26, 0.0  ;;  %v1038_v56 = vadd.f32 %v1732_v58, %v999_v44  ;;  %v997_v46 = vadd.f32 %v906_v21, %v645_v28  ;;  %v656_v57 = vadd.f32 %v1367_v54, %v1721_v50  ;;  %v909_v59 = vpop.f32.mrf.mxu0 }
 0x114   : > { %v647_v32 = vpop.f32.mrf.mxu1 }
 0x115   : > { %1097 = vst.msk [vmem:[%s1739_s4 + $0x48] sm:$0xff] %vm297_vm1, %v1065_v55  ;;  %v1070_v60 = vmax.f32 %v1038_v56, 0.0  ;;  %v1036_v61 = vadd.f32 %v1732_v58, %v997_v46  ;;  %v1000_v48 = vadd.f32 %v1401_v30, %v656_v57  ;;  %v648_v62 = vadd.f32 %v647_v32, %v1725_v52  ;;  %v1404_v63 = vpop.f32.mrf.mxu0 }
 0x116   : > { %v1370_v34 = vpop.f32.mrf.mxu1 }
 0x117   : > { %1102 = vst.msk [vmem:[%s1739_s4 + $0x70] sm:$0xff] %vm297_vm1, %v1070_v60  ;;  %v1068_v0 = vmax.f32 %v1036_v61, 0.0  ;;  %v1039_v1 = vadd.f32 %v1732_v58, %v1000_v48  ;;  %v998_v50 = vadd.f32 %v909_v59, %v648_v62  ;;  %v669_v2 = vadd.f32 %v1370_v34, %v1679_v23  ;;  %v922_v3 = vpop.f32.mrf.mxu0 }
 0x118   : > { %v660_v4 = vpop.f32.mrf.mxu1 }
 0x119   : > { %1100 = vst.msk [vmem:[%s1739_s4 + $0x60] sm:$0xff] %vm297_vm1, %v1068_v0  ;;  %v1071_v36 = vmax.f32 %v1039_v1, 0.0  ;;  %v1037_v5 = vadd.f32 %v1732_v58, %v998_v50  ;;  %v1003_v52 = vadd.f32 %v1404_v63, %v669_v2  ;;  %v661_v6 = vadd.f32 %v660_v4, %v1681_v25  ;;  %v1405_v7 = vpop.f32.mrf.mxu0 }
 0x11a   : > { %v1371_v8 = vpop.f32.mrf.mxu1 }
 0x11b   : > { %1103 = vst.msk [vmem:[%s1739_s4 + $0x78] sm:$0xff] %vm297_vm1, %v1071_v36  ;;  %v1069_v9 = vmax.f32 %v1037_v5, 0.0  ;;  %v1042_v38 = vadd.f32 %v1732_v58, %v1003_v52  ;;  %v1001_v23 = vadd.f32 %v922_v3, %v661_v6  ;;  %v672_v10 = vadd.f32 %v1371_v8, %v1683_v27  ;;  %v925_v11 = vpop.f32.mrf.mxu0 }
 0x11c   : > { %v663_v12 = vpop.f32.mrf.mxu1 }
 0x11d   : > { %1101 = vst.msk [vmem:[%s1739_s4 + $0x68] sm:$0xff] %vm297_vm1, %v1069_v9  ;;  %v1074_v13 = vmax.f32 %v1042_v38, 0.0  ;;  %v1040_v14 = vadd.f32 %v1732_v58, %v1001_v23  ;;  %v1004_v25 = vadd.f32 %v1405_v7, %v672_v10  ;;  %v664_v40 = vadd.f32 %v663_v12, %v1685_v29  ;;  %v1408_v15 = vpop.f32.mrf.mxu0 }
 0x11e   : > { %v1374_v16 = vpop.f32.mrf.mxu1 }
 0x11f   : > { %1106 = vst.msk [vmem:[%s1739_s4 + $0x90] sm:$0xff] %vm297_vm1, %v1074_v13  ;;  %v1072_v17 = vmax.f32 %v1040_v14, 0.0  ;;  %v1043_v18 = vadd.f32 %v1732_v58, %v1004_v25  ;;  %v1002_v27 = vadd.f32 %v925_v11, %v664_v40  ;;  %v685_v19 = vadd.f32 %v1374_v16, %v1687_v31  ;;  %v938_v42 = vpop.f32.mrf.mxu0 }
 0x120   : > { %v676_v20 = vpop.f32.mrf.mxu1 }
 0x121   : > { %1104 = vst.msk [vmem:[%s1739_s4 + $0x80] sm:$0xff] %vm297_vm1, %v1072_v17  ;;  %v1075_v21 = vmax.f32 %v1043_v18, 0.0  ;;  %v1041_v22 = vadd.f32 %v1732_v58, %v1002_v27  ;;  %v1007_v29 = vadd.f32 %v1408_v15, %v685_v19  ;;  %v677_v24 = vadd.f32 %v676_v20, %v1689_v33  ;;  %v1409_v26 = vpop.f32.mrf.mxu0 }
 0x122   : > { %v1375_v44 = vpop.f32.mrf.mxu1 }
 0x123   : > { %1107 = vst.msk [vmem:[%s1739_s4 + $0x98] sm:$0xff] %vm297_vm1, %v1075_v21  ;;  %v1073_v28 = vmax.f32 %v1041_v22, 0.0  ;;  %v1046_v30 = vadd.f32 %v1732_v58, %v1007_v29  ;;  %v1005_v31 = vadd.f32 %v938_v42, %v677_v24  ;;  %v688_v54 = vadd.f32 %v1375_v44, %v1691_v35  ;;  %v941_v55 = vpop.f32.mrf.mxu0 }
 0x124   : > { %v679_v56 = vpop.f32.mrf.mxu1 }
 0x125   : > { %1105 = vst.msk [vmem:[%s1739_s4 + $0x88] sm:$0xff] %vm297_vm1, %v1073_v28  ;;  %v1078_v46 = vmax.f32 %v1046_v30, 0.0  ;;  %v1044_v57 = vadd.f32 %v1732_v58, %v1005_v31  ;;  %v1008_v33 = vadd.f32 %v1409_v26, %v688_v54  ;;  %v680_v59 = vadd.f32 %v679_v56, %v1695_v37  ;;  %v1412_v32 = vpop.f32.mrf.mxu0 }
 0x126   : > { %v1378_v60 = vpop.f32.mrf.mxu1 }
 0x127   : > { %1110 = vst.msk [vmem:[%s1739_s4 + $0xb0] sm:$0xff] %vm297_vm1, %v1078_v46  ;;  %v1076_v61 = vmax.f32 %v1044_v57, 0.0  ;;  %v1047_v48 = vadd.f32 %v1732_v58, %v1008_v33  ;;  %v1006_v35 = vadd.f32 %v941_v55, %v680_v59  ;;  %v701_v62 = vadd.f32 %v1378_v60, %v1699_v39  ;;  %v954_v63 = vpop.f32.mrf.mxu0 }
 0x128   : > { %v692_v34 = vpop.f32.mrf.mxu1 }
 0x129   : > { %1108 = vst.msk [vmem:[%s1739_s4 + $0xa0] sm:$0xff] %vm297_vm1, %v1076_v61  ;;  %v1079_v0 = vmax.f32 %v1047_v48, 0.0  ;;  %v1045_v1 = vadd.f32 %v1732_v58, %v1006_v35  ;;  %v1011_v37 = vadd.f32 %v1412_v32, %v701_v62  ;;  %v693_v50 = vadd.f32 %v692_v34, %v1703_v41  ;;  %v1413_v2 = vpop.f32.mrf.mxu0 }
 0x12a   : > { %v1379_v3 = vpop.f32.mrf.mxu1 }
 0x12b   : > { %1111 = vst.msk [vmem:[%s1739_s4 + $0xb8] sm:$0xff] %vm297_vm1, %v1079_v0  ;;  %v1077_v4 = vmax.f32 %v1045_v1, 0.0  ;;  %v1050_v36 = vadd.f32 %v1732_v58, %v1011_v37  ;;  %v1009_v39 = vadd.f32 %v954_v63, %v693_v50  ;;  %v704_v5 = vadd.f32 %v1379_v3, %v1707_v43  ;;  %v957_v52 = vpop.f32.mrf.mxu0 }
 0x12c   : > { %v695_v6 = vpop.f32.mrf.mxu1 }
 0x12d   : > { %1109 = vst.msk [vmem:[%s1739_s4 + $0xa8] sm:$0xff] %vm297_vm1, %v1077_v4  ;;  %v1082_v7 = vmax.f32 %v1050_v36, 0.0  ;;  %v1048_v8 = vadd.f32 %v1732_v58, %v1009_v39  ;;  %v1012_v41 = vadd.f32 %v1413_v2, %v704_v5  ;;  %v696_v9 = vadd.f32 %v695_v6, %v1711_v45  ;;  %v1416_v38 = vpop.f32.mrf.mxu0 }
 0x12e   : > { %v1382_v23 = vpop.f32.mrf.mxu1 }
 0x12f   : > { %1114 = vst.msk [vmem:[%s1739_s4 + $0xd0] sm:$0xff] %vm297_vm1, %v1082_v7  ;;  %v1080_v10 = vmax.f32 %v1048_v8, 0.0  ;;  %v1051_v11 = vadd.f32 %v1732_v58, %v1012_v41  ;;  %v1010_v43 = vadd.f32 %v957_v52, %v696_v9  ;;  %v717_v12 = vadd.f32 %v1382_v23, %v1715_v47  ;;  %v970_v13 = vpop.f32.mrf.mxu0 }
 0x130   : > { %v708_v14 = vpop.f32.mrf.mxu1 }
 0x131   : > { %1112 = vst.msk [vmem:[%s1739_s4 + $0xc0] sm:$0xff] %vm297_vm1, %v1080_v10  ;;  %v1083_v25 = vmax.f32 %v1051_v11, 0.0  ;;  %v1049_v40 = vadd.f32 %v1732_v58, %v1010_v43  ;;  %v1015_v45 = vadd.f32 %v1416_v38, %v717_v12  ;;  %v709_v15 = vadd.f32 %v708_v14, %v1719_v49  ;;  %v1417_v17 = vpop.f32.mrf.mxu0 }
 0x132   : > { %v1383_v16 = vpop.f32.mrf.mxu1 }
 0x133   : > { %1115 = vst.msk [vmem:[%s1739_s4 + $0xd8] sm:$0xff] %vm297_vm1, %v1083_v25  ;;  %v1081_v18 = vmax.f32 %v1049_v40, 0.0  ;;  %v1054_v47 = vadd.f32 %v1732_v58, %v1015_v45  ;;  %v1013_v27 = vadd.f32 %v970_v13, %v709_v15  ;;  %v720_v19 = vadd.f32 %v1383_v16, %v1723_v51  ;;  %v973_v29 = vpop.f32.mrf.mxu0 }
 0x134   : > { %v711_v42 = vpop.f32.mrf.mxu1 }
 0x135   : > { %1113 = vst.msk [vmem:[%s1739_s4 + $0xc8] sm:$0xff] %vm297_vm1, %v1081_v18  ;;  %v1086_v20 = vmax.f32 %v1054_v47, 0.0  ;;  %v1052_v21 = vadd.f32 %v1732_v58, %v1013_v27  ;;  %v1016_v49 = vadd.f32 %v1417_v17, %v720_v19  ;;  %v712_v22 = vadd.f32 %v711_v42, %v1727_v53 }
 0x137   : > { %1118 = vst.msk [vmem:[%s1739_s4 + $0xf0] sm:$0xff] %vm297_vm1, %v1086_v20  ;;  %v1084_v24 = vmax.f32 %v1052_v21, 0.0  ;;  %v1055_v26 = vadd.f32 %v1732_v58, %v1016_v49  ;;  %v1014_v44 = vadd.f32 %v973_v29, %v712_v22 }
 0x139   : > { %1116 = vst.msk [vmem:[%s1739_s4 + $0xe0] sm:$0xff] %vm297_vm1, %v1084_v24  ;;  %v1087_v51 = vmax.f32 %v1055_v26, 0.0  ;;  %v1053_v28 = vadd.f32 %v1732_v58, %v1014_v44 }
 0x13b   : > { %1119 = vst.msk [vmem:[%s1739_s4 + $0xf8] sm:$0xff] %vm297_vm1, %v1087_v51  ;;  %v1085_v30 = vmax.f32 %v1053_v28, 0.0 }
 0x13d   : > { %1117 = vst.msk [vmem:[%s1739_s4 + $0xe8] sm:$0xff] %vm297_vm1, %v1085_v30 }
 0x13e PF: > { %s13_s14 = sadd.s32 1, %s1471_s14   ;;  %s1874_s12 = smov %s1467_s13 }
 0x13f   : > { %p10_p5 = scmp.ge.s32.totalorder %s13_s14, 4   ;;  %s1875_s13 = smov %s1877_s15 }
 0x141   :  { %12 = sbr.rel (!%p10_p5) target bundleno = 2 (0x2), region = 65 }

// kernel: _lambda_.12
= control target key start
LH: loop header
LB: loop body
LE: loop exit
PB: predicated region body
PF: predicated region fallthrough
CT: control target
= control target key end

     0   :  { %s1571_s12 = smov 0   ;;  %s1573_s13 = smov 0   ;;  %s1912_s0 = inlined_call_operand.vmem [shape: f32[2,18,16,4], index: 0, kind: input, shape index: {}]   ;;  %s1913_s1 = inlined_call_operand.vmem [shape: bf16[3,4,4], index: 1, kind: input, shape index: {}]   ;;  %s1914_s2 = inlined_call_operand.vmem [shape: f32[1,4], index: 2, kind: input, shape index: {}]   ;;  %s1915_s3 = inlined_call_operand.vmem [shape: f32[2,256,4], index: 3, kind: output, shape index: {}]  }
   0x1   :  { %s1575_s14 = smov 0  }
   0x2 LB: > { %s25_s15 = sadd.s32 1, %s1545_s13  ;;  %p1221_p0 = scmp.ge.s32.totalorder %s1549_s14, 1  ;;  %s1549_s14 = sphi %s1575_s14, %s13_s14   ;;  %s1545_s13 = sphi %s1573_s13, %s1917_s13   ;;  %s1541_s12 = sphi %s1571_s12, %s1916_s12  }
   0x3   : > { %p27_p1 = scmp.ge.s32.totalorder %s25_s15, 2  ;;  %p151_p2 = scmp.lt.s32.totalorder %s1549_s14, 3 }
   0x5   : > { %s1919_s15 = smov (%p27_p1, %s25_s15), 0  ;;  %p152_p3 = pnand %p1221_p0, %p151_p2 }
   0x6   : > { %p179_p4 = scmp.lt.s32.totalorder (!%p152_p3), %s1541_s12, 1 }
   0x7   : > { %155 = sbr.rel (%p152_p3) target bundleno = 317 (0x13d), region = 32 }
   0xc   : > { %v1257_v0 = vld [vmem:[%s1913_s1 + $0x2] sm:$0x3]  ;;  %vm349_vm0 = vcmask 1041408   ;;  %v246_v2 = vld [vmem:[%s1913_s1] sm:$0x3]  ;;  %s1921_s12 = smov (!%p179_p4, %s1541_s12), 1 }
   0xd   : > { %1499 = vmatprep.subr.msk.bf16.mxu1 %vm349_vm0, %v1257_v0  ;;  %1498 = vmatprep.subr.msk.bf16.mxu0 %vm349_vm0, %v1257_v0  ;;  %v351_v1 = vsel %vm349_vm0, %v1257_v0, 0  ;;  %v1322_v3 = vld [vmem:[%s1913_s1 + $0x4] sm:$0x3]  ;;  %s1502_s22 = smul.u32 288, %s1921_s12  ;;  %vm300_vm1 = vcmask 31744   ;;  %v563_v18 = vsel %vm349_vm0, %v246_v2, 0 }
   0xe   : > { %1497 = vmatpush3.bf16.msra.mxu1 %v351_v1  ;;  %1395 = vmatpush3.bf16.msra.mxu0 %v351_v1  ;;  %v828_v15 = vsel %vm349_vm0, %v1322_v3, 0  ;;  %s1342_s28 = sshll.u32 %s1921_s12, 8 }
   0xf   : > { %1500 = vmatprep.subr.msk.bf16.mxu1 %vm349_vm0, %v246_v2  ;;  %1501 = vmatprep.subr.msk.bf16.mxu0 %vm349_vm0, %v1322_v3  ;;  %s1609_s25 = scalar_lea.vmem %s1912_s0, %s1502_s22  ;;  %s1781_s4 = scalar_lea.vmem %s1915_s3, %s1342_s28 }
  0x10   : > { %v1225_v4 = vld [vmem:[%s1609_s25 + $0x10] sm:$0xff]  ;;  %v1226_v5 = vld [vmem:[%s1609_s25 + $0x18] sm:$0xff]  ;;  %v1227_v9 = vld [vmem:[%s1609_s25 + $0x20] sm:$0xff] }
  0x11   : > { %v1241_v6 = vld [vmem:[%s1609_s25 + $0x90] sm:$0xff]  ;;  %v1614_v7 = vpack.c.bf16 %v1226_v5, %v1225_v4  ;;  %v1242_v8 = vld [vmem:[%s1609_s25 + $0x98] sm:$0xff]  ;;  %v1228_v10 = vld [vmem:[%s1609_s25 + $0x28] sm:$0xff] }
  0x12   : > { %v1619_v11 = vpack.c.bf16 %v1242_v8, %v1241_v6  ;;  %v1621_v12 = vpack.c.bf16 %v1228_v10, %v1227_v9  ;;  %v1243_v13 = vld [vmem:[%s1609_s25 + $0xa0] sm:$0xff]  ;;  %v1244_v14 = vld [vmem:[%s1609_s25 + $0xa8] sm:$0xff]  ;;  %v1229_v16 = vld [vmem:[%s1609_s25 + $0x30] sm:$0xff] }
  0x13   : > { %1396 = vmatprep.mubr.msk.bf16.mxu0 %vm300_vm1, %v1614_v7  ;;  %v1629_v17 = vpack.c.bf16 %v1244_v14, %v1243_v13  ;;  %v1230_v19 = vld [vmem:[%s1609_s25 + $0x38] sm:$0xff]  ;;  %v1245_v20 = vld [vmem:[%s1609_s25 + $0xb0] sm:$0xff]  ;;  %v1231_v24 = vld [vmem:[%s1609_s25 + $0x40] sm:$0xff] }
  0x14   : > { %v1246_v21 = vld [vmem:[%s1609_s25 + $0xb8] sm:$0xff]  ;;  %1412 = vmatprep.mubr.msk.bf16.mxu1 %vm300_vm1, %v1619_v11  ;;  %1397 = vmatmul.mubr.msk.bf16.vlgmr.msra.gmra.mxu0 %vm300_vm1, %v1621_v12  ;;  %v284_v22 = vpack.c.bf16 %v1230_v19, %v1229_v16  ;;  %v1232_v25 = vld [vmem:[%s1609_s25 + $0x48] sm:$0xff]  ;;  %v1247_v26 = vld [vmem:[%s1609_s25 + $0xc0] sm:$0xff] }
  0x15   : > { %v1639_v23 = vpack.c.bf16 %v1246_v21, %v1245_v20  ;;  %1413 = vmatmul.mubr.msk.bf16.vlgmr.msra.gmra.mxu1 %vm300_vm1, %v1629_v17  ;;  %1463 = vmatpush3.bf16.msra.mxu0 %v828_v15  ;;  %v1248_v27 = vld [vmem:[%s1609_s25 + $0xc8] sm:$0xff]  ;;  %v1233_v28 = vld [vmem:[%s1609_s25 + $0x50] sm:$0xff]  ;;  %v1234_v29 = vld [vmem:[%s1609_s25 + $0x58] sm:$0xff]  ;;  %v285_v32 = vpack.c.bf16 %v1232_v25, %v1231_v24 }
  0x16   : > { %1429 = vmatpush3.bf16.msra.mxu1 %v563_v18  ;;  %1400 = vmatprep.mubr.msk.bf16.mxu0 %vm300_vm1, %v284_v22  ;;  %v1249_v30 = vld [vmem:[%s1609_s25 + $0xd0] sm:$0xff]  ;;  %v1250_v31 = vld [vmem:[%s1609_s25 + $0xd8] sm:$0xff]  ;;  %v293_v33 = vpack.c.bf16 %v1248_v27, %v1247_v26  ;;  %v286_v34 = vpack.c.bf16 %v1234_v29, %v1233_v28  ;;  %v1235_v36 = vld [vmem:[%s1609_s25 + $0x60] sm:$0xff] }
  0x17   : > { %1416 = vmatprep.mubr.msk.bf16.mxu1 %vm300_vm1, %v1639_v23  ;;  %v294_v35 = vpack.c.bf16 %v1250_v31, %v1249_v30  ;;  %v1236_v37 = vld [vmem:[%s1609_s25 + $0x68] sm:$0xff]  ;;  %v1251_v38 = vld [vmem:[%s1609_s25 + $0xe0] sm:$0xff]  ;;  %v1237_v40 = vld [vmem:[%s1609_s25 + $0x70] sm:$0xff] }
  0x18   : > { %v1252_v39 = vld [vmem:[%s1609_s25 + $0xe8] sm:$0xff]  ;;  %v1238_v41 = vld [vmem:[%s1609_s25 + $0x78] sm:$0xff]  ;;  %v1253_v42 = vld [vmem:[%s1609_s25 + $0xf0] sm:$0xff]  ;;  %v287_v44 = vpack.c.bf16 %v1236_v37, %v1235_v36 }
  0x19   : > { %v1254_v43 = vld [vmem:[%s1609_s25 + $0xf8] sm:$0xff]  ;;  %v295_v45 = vpack.c.bf16 %v1252_v39, %v1251_v38  ;;  %v288_v46 = vpack.c.bf16 %v1238_v41, %v1237_v40  ;;  %v1239_v48 = vld [vmem:[%s1609_s25 + $0x80] sm:$0xff]  ;;  %v1240_v49 = vld [vmem:[%s1609_s25 + $0x88] sm:$0xff] }
  0x1a   : > { %v296_v47 = vpack.c.bf16 %v1254_v43, %v1253_v42  ;;  %v1255_v50 = vld [vmem:[%s1609_s25 + $0x100] sm:$0xff]  ;;  %v1256_v51 = vld [vmem:[%s1609_s25 + $0x108] sm:$0xff]  ;;  %v289_v54 = vpack.c.bf16 %v1240_v49, %v1239_v48  ;;  %v1320_v57 = vld [vmem:[%s1609_s25 + $0x110] sm:$0xff] }
  0x1b   : > { %v198_v52 = vld [vmem:[%s1609_s25] sm:$0xff]  ;;  %v199_v53 = vld [vmem:[%s1609_s25 + $0x8] sm:$0xff]  ;;  %v297_v55 = vpack.c.bf16 %v1256_v51, %v1255_v50  ;;  %v1321_v58 = vld [vmem:[%s1609_s25 + $0x118] sm:$0xff] }
  0x1c   : > { %1401 = vmatmul.mubr.msk.bf16.gmra.mxu0 %vm300_vm1, %v285_v32  ;;  %v230_v56 = vpack.c.bf16 %v199_v53, %v198_v52  ;;  %v776_v59 = vpack.c.bf16 %v1321_v58, %v1320_v57 }
  0x1d   : > { %1417 = vmatmul.mubr.msk.bf16.gmra.mxu1 %vm300_vm1, %v293_v33  ;;  %1404 = vmatprep.mubr.msk.bf16.mxu0 %vm300_vm1, %v286_v34 }
  0x1e   : > { %1420 = vmatprep.mubr.msk.bf16.mxu1 %vm300_vm1, %v294_v35 }
  0x24   : > { %1405 = vmatmul.mubr.msk.bf16.gmra.mxu0 %vm300_vm1, %v287_v44 }
  0x25   : > { %1421 = vmatmul.mubr.msk.bf16.gmra.mxu1 %vm300_vm1, %v295_v45  ;;  %1408 = vmatprep.mubr.msk.bf16.mxu0 %vm300_vm1, %v288_v46 }
  0x26   : > { %1424 = vmatprep.mubr.msk.bf16.mxu1 %vm300_vm1, %v296_v47 }
  0x2c   : > { %1409 = vmatmul.mubr.msk.bf16.gmra.mxu0 %vm300_vm1, %v289_v54 }
  0x2d   : > { %1425 = vmatmul.mubr.msk.bf16.gmra.mxu1 %vm300_vm1, %v297_v55  ;;  %1464 = vmatprep.mubr.msk.bf16.mxu0 %vm300_vm1, %v1621_v12 }
  0x2e   : > { %1430 = vmatprep.mubr.msk.bf16.mxu1 %vm300_vm1, %v230_v56 }
  0x34   : > { %1465 = vmatmul.mubr.msk.bf16.vlgmr.msra.gmra.mxu0 %vm300_vm1, %v284_v22 }
  0x35   : > { %1431 = vmatmul.mubr.msk.bf16.vlgmr.msra.gmra.mxu1 %vm300_vm1, %v1614_v7  ;;  %1468 = vmatprep.mubr.msk.bf16.mxu0 %vm300_vm1, %v285_v32 }
  0x36   : > { %1434 = vmatprep.mubr.msk.bf16.mxu1 %vm300_vm1, %v1621_v12 }
  0x3c   : > { %1469 = vmatmul.mubr.msk.bf16.gmra.mxu0 %vm300_vm1, %v286_v34 }
  0x3d   : > { %1435 = vmatmul.mubr.msk.bf16.gmra.mxu1 %vm300_vm1, %v284_v22  ;;  %1472 = vmatprep.mubr.msk.bf16.mxu0 %vm300_vm1, %v287_v44 }
  0x3e   : > { %1438 = vmatprep.mubr.msk.bf16.mxu1 %vm300_vm1, %v285_v32  ;;  %v1774_v32 = vld [vmem:[%s1914_s2] ss:$0 sm:$0xff] }
  0x44   : > { %1473 = vmatmul.mubr.msk.bf16.gmra.mxu0 %vm300_vm1, %v288_v46 }
  0x45   : > { %1439 = vmatmul.mubr.msk.bf16.gmra.mxu1 %vm300_vm1, %v286_v34  ;;  %1476 = vmatprep.mubr.msk.bf16.mxu0 %vm300_vm1, %v289_v54 }
  0x46   : > { %1442 = vmatprep.mubr.msk.bf16.mxu1 %vm300_vm1, %v287_v44 }
  0x4c   : > { %1477 = vmatmul.mubr.msk.bf16.gmra.mxu0 %vm300_vm1, %v1619_v11 }
  0x4d   : > { %1443 = vmatmul.mubr.msk.bf16.gmra.mxu1 %vm300_vm1, %v288_v46  ;;  %1480 = vmatprep.mubr.msk.bf16.mxu0 %vm300_vm1, %v1629_v17 }
  0x4e   : > { %1446 = vmatprep.mubr.msk.bf16.mxu1 %vm300_vm1, %v289_v54 }
  0x54   : > { %1481 = vmatmul.mubr.msk.bf16.gmra.mxu0 %vm300_vm1, %v1639_v23 }
  0x55   : > { %1447 = vmatmul.mubr.msk.bf16.gmra.mxu1 %vm300_vm1, %v1619_v11  ;;  %1484 = vmatprep.mubr.msk.bf16.mxu0 %vm300_vm1, %v293_v33 }
  0x56   : > { %1450 = vmatprep.mubr.msk.bf16.mxu1 %vm300_vm1, %v1629_v17 }
  0x5c   : > { %1485 = vmatmul.mubr.msk.bf16.gmra.mxu0 %vm300_vm1, %v294_v35 }
  0x5d   : > { %1451 = vmatmul.mubr.msk.bf16.gmra.mxu1 %vm300_vm1, %v1639_v23  ;;  %1488 = vmatprep.mubr.msk.bf16.mxu0 %vm300_vm1, %v295_v45 }
  0x5e   : > { %1454 = vmatprep.mubr.msk.bf16.mxu1 %vm300_vm1, %v293_v33 }
  0x64   : > { %1489 = vmatmul.mubr.msk.bf16.gmra.mxu0 %vm300_vm1, %v296_v47 }
  0x65   : > { %1455 = vmatmul.mubr.msk.bf16.gmra.mxu1 %vm300_vm1, %v294_v35  ;;  %1492 = vmatprep.mubr.msk.bf16.mxu0 %vm300_vm1, %v297_v55 }
  0x66   : > { %1458 = vmatprep.mubr.msk.bf16.mxu1 %vm300_vm1, %v295_v45 }
  0x6c   : > { %1493 = vmatmul.mubr.msk.bf16.gmra.mxu0 %vm300_vm1, %v776_v59 }
  0x6d   : > { %1459 = vmatmul.mubr.msk.bf16.gmra.mxu1 %vm300_vm1, %v296_v47 }
  0xd4   : > { %v1398_v60 = vpop.f32.mrf.mxu0 }
  0xd5   : > { %v1721_v61 = vpop.f32.mrf.mxu1 }
  0xd6   : > { %v387_v62 = vpop.f32.mrf.mxu0 }
  0xd7   : > { %v1723_v63 = vpop.f32.mrf.mxu1 }
  0xd8   : > { %v1399_v0 = vpop.f32.mrf.mxu0 }
  0xd9   : > { %v1725_v1 = vpop.f32.mrf.mxu1 }
  0xda   : > { %v390_v2 = vpop.f32.mrf.mxu0 }
  0xdb   : > { %v1727_v3 = vpop.f32.mrf.mxu1 }
  0xdc   : > { %v1402_v4 = vpop.f32.mrf.mxu0 }
  0xdd   : > { %v1729_v5 = vpop.f32.mrf.mxu1 }
  0xde   : > { %v403_v6 = vpop.f32.mrf.mxu0 }
  0xdf   : > { %v1731_v7 = vpop.f32.mrf.mxu1 }
  0xe0   : > { %v1403_v8 = vpop.f32.mrf.mxu0 }
  0xe1   : > { %v1733_v9 = vpop.f32.mrf.mxu1 }
  0xe2   : > { %v1735_v10 = vpop.f32.mrf.mxu0 }
  0xe3   : > { %v1737_v11 = vpop.f32.mrf.mxu1 }
  0xe4   : > { %v1739_v12 = vpop.f32.mrf.mxu0 }
  0xe5   : > { %v1741_v13 = vpop.f32.mrf.mxu1 }
  0xe6   : > { %v1743_v14 = vpop.f32.mrf.mxu0 }
  0xe7   : > { %v1745_v15 = vpop.f32.mrf.mxu1 }
  0xe8   : > { %v1747_v16 = vpop.f32.mrf.mxu0 }
  0xe9   : > { %v1749_v17 = vpop.f32.mrf.mxu1 }
  0xea   : > { %v1751_v18 = vpop.f32.mrf.mxu0 }
  0xeb   : > { %v1753_v19 = vpop.f32.mrf.mxu1 }
  0xec   : > { %v1755_v20 = vpop.f32.mrf.mxu0 }
  0xed   : > { %v1757_v21 = vpop.f32.mrf.mxu1 }
  0xee   : > { %v1759_v22 = vpop.f32.mrf.mxu0 }
  0xef   : > { %v1761_v23 = vpop.f32.mrf.mxu1 }
  0xf0   : > { %v1763_v24 = vpop.f32.mrf.mxu0 }
  0xf1   : > { %v1765_v25 = vpop.f32.mrf.mxu1 }
  0xf2   : > { %v1767_v26 = vpop.f32.mrf.mxu0 }
  0xf3   : > { %v1769_v27 = vpop.f32.mrf.mxu1 }
  0xf4   : > { %v1466_v28 = vpop.f32.mrf.mxu0 }
  0xf5   : > { %v1432_v29 = vpop.f32.mrf.mxu1 }
  0xf6   : > { %v608_v30 = vadd.f32 %v1432_v29, %v1398_v60  ;;  %v864_v31 = vpop.f32.mrf.mxu0 }
  0xf7   : > { %v599_v33 = vpop.f32.mrf.mxu1 }
  0xf8   : > { %v993_v34 = vadd.f32 %v1466_v28, %v608_v30  ;;  %v600_v35 = vadd.f32 %v599_v33, %v387_v62  ;;  %v1467_v36 = vpop.f32.mrf.mxu0 }
  0xf9   : > { %v1433_v37 = vpop.f32.mrf.mxu1 }
  0xfa   : > { %v1032_v38 = vadd.f32 %v1774_v32, %v993_v34  ;;  %v991_v39 = vadd.f32 %v864_v31, %v600_v35  ;;  %v611_v40 = vadd.f32 %v1433_v37, %v1399_v0  ;;  %v867_v41 = vpop.f32.mrf.mxu0 }
  0xfb   : > { %v602_v42 = vpop.f32.mrf.mxu1 }
  0xfc   : > { %v1064_v43 = vmax.f32 %v1032_v38, 0.0  ;;  %v1030_v44 = vadd.f32 %v1774_v32, %v991_v39  ;;  %v994_v45 = vadd.f32 %v1467_v36, %v611_v40  ;;  %v603_v46 = vadd.f32 %v602_v42, %v390_v2  ;;  %v1470_v47 = vpop.f32.mrf.mxu0 }
  0xfd   : > { %v1436_v48 = vpop.f32.mrf.mxu1 }
  0xfe   : > { %1096 = vst.msk [vmem:[%s1781_s4 + $0x10] sm:$0xff] %vm300_vm1, %v1064_v43  ;;  %v1062_v49 = vmax.f32 %v1030_v44, 0.0  ;;  %v1033_v50 = vadd.f32 %v1774_v32, %v994_v45  ;;  %v992_v51 = vadd.f32 %v867_v41, %v603_v46  ;;  %v624_v52 = vadd.f32 %v1436_v48, %v1402_v4  ;;  %v880_v53 = vpop.f32.mrf.mxu0 }
  0xff   : > { %v615_v54 = vpop.f32.mrf.mxu1 }
 0x100   : > { %1094 = vst.msk [vmem:[%s1781_s4] sm:$0xff] %vm300_vm1, %v1062_v49  ;;  %v1065_v55 = vmax.f32 %v1033_v50, 0.0  ;;  %v1031_v56 = vadd.f32 %v1774_v32, %v992_v51  ;;  %v997_v57 = vadd.f32 %v1470_v47, %v624_v52  ;;  %v616_v58 = vadd.f32 %v615_v54, %v403_v6  ;;  %v1471_v59 = vpop.f32.mrf.mxu0 }
 0x101   : > { %v1437_v60 = vpop.f32.mrf.mxu1 }
 0x102   : > { %1097 = vst.msk [vmem:[%s1781_s4 + $0x18] sm:$0xff] %vm300_vm1, %v1065_v55  ;;  %v1063_v62 = vmax.f32 %v1031_v56, 0.0  ;;  %v1036_v0 = vadd.f32 %v1774_v32, %v997_v57  ;;  %v995_v2 = vadd.f32 %v880_v53, %v616_v58  ;;  %v627_v4 = vadd.f32 %v1437_v60, %v1403_v8  ;;  %v883_v28 = vpop.f32.mrf.mxu0 }
 0x103   : > { %v618_v29 = vpop.f32.mrf.mxu1 }
 0x104   : > { %1095 = vst.msk [vmem:[%s1781_s4 + $0x8] sm:$0xff] %vm300_vm1, %v1063_v62  ;;  %v1068_v30 = vmax.f32 %v1036_v0, 0.0  ;;  %v1034_v31 = vadd.f32 %v1774_v32, %v995_v2  ;;  %v998_v33 = vadd.f32 %v1471_v59, %v627_v4  ;;  %v619_v6 = vadd.f32 %v618_v29, %v1735_v10  ;;  %v1474_v34 = vpop.f32.mrf.mxu0 }
 0x105   : > { %v1440_v35 = vpop.f32.mrf.mxu1 }
 0x106   : > { %1100 = vst.msk [vmem:[%s1781_s4 + $0x30] sm:$0xff] %vm300_vm1, %v1068_v30  ;;  %v1066_v36 = vmax.f32 %v1034_v31, 0.0  ;;  %v1037_v37 = vadd.f32 %v1774_v32, %v998_v33  ;;  %v996_v8 = vadd.f32 %v883_v28, %v619_v6  ;;  %v640_v38 = vadd.f32 %v1440_v35, %v1739_v12  ;;  %v896_v39 = vpop.f32.mrf.mxu0 }
 0x107   : > { %v631_v40 = vpop.f32.mrf.mxu1 }
 0x108   : > { %1098 = vst.msk [vmem:[%s1781_s4 + $0x20] sm:$0xff] %vm300_vm1, %v1066_v36  ;;  %v1069_v41 = vmax.f32 %v1037_v37, 0.0  ;;  %v1035_v42 = vadd.f32 %v1774_v32, %v996_v8  ;;  %v1001_v10 = vadd.f32 %v1474_v34, %v640_v38  ;;  %v632_v43 = vadd.f32 %v631_v40, %v1743_v14  ;;  %v1475_v44 = vpop.f32.mrf.mxu0 }
 0x109   : > { %v1441_v45 = vpop.f32.mrf.mxu1 }
 0x10a   : > { %1101 = vst.msk [vmem:[%s1781_s4 + $0x38] sm:$0xff] %vm300_vm1, %v1069_v41  ;;  %v1067_v46 = vmax.f32 %v1035_v42, 0.0  ;;  %v1040_v47 = vadd.f32 %v1774_v32, %v1001_v10  ;;  %v999_v12 = vadd.f32 %v896_v39, %v632_v43  ;;  %v643_v48 = vadd.f32 %v1441_v45, %v1747_v16  ;;  %v899_v49 = vpop.f32.mrf.mxu0 }
 0x10b   : > { %v634_v50 = vpop.f32.mrf.mxu1 }
 0x10c   : > { %1099 = vst.msk [vmem:[%s1781_s4 + $0x28] sm:$0xff] %vm300_vm1, %v1067_v46  ;;  %v1072_v51 = vmax.f32 %v1040_v47, 0.0  ;;  %v1038_v52 = vadd.f32 %v1774_v32, %v999_v12  ;;  %v1002_v14 = vadd.f32 %v1475_v44, %v643_v48  ;;  %v635_v53 = vadd.f32 %v634_v50, %v1751_v18  ;;  %v1478_v54 = vpop.f32.mrf.mxu0 }
 0x10d   : > { %v1444_v55 = vpop.f32.mrf.mxu1 }
 0x10e   : > { %1104 = vst.msk [vmem:[%s1781_s4 + $0x50] sm:$0xff] %vm300_vm1, %v1072_v51  ;;  %v1070_v56 = vmax.f32 %v1038_v52, 0.0  ;;  %v1041_v57 = vadd.f32 %v1774_v32, %v1002_v14  ;;  %v1000_v16 = vadd.f32 %v899_v49, %v635_v53  ;;  %v656_v58 = vadd.f32 %v1444_v55, %v1755_v20  ;;  %v912_v59 = vpop.f32.mrf.mxu0 }
 0x10f   : > { %v647_v60 = vpop.f32.mrf.mxu1 }
 0x110   : > { %1102 = vst.msk [vmem:[%s1781_s4 + $0x40] sm:$0xff] %vm300_vm1, %v1070_v56  ;;  %v1073_v62 = vmax.f32 %v1041_v57, 0.0  ;;  %v1039_v0 = vadd.f32 %v1774_v32, %v1000_v16  ;;  %v1005_v18 = vadd.f32 %v1478_v54, %v656_v58  ;;  %v648_v2 = vadd.f32 %v647_v60, %v1759_v22  ;;  %v1479_v4 = vpop.f32.mrf.mxu0 }
 0x111   : > { %v1445_v28 = vpop.f32.mrf.mxu1 }
 0x112   : > { %1105 = vst.msk [vmem:[%s1781_s4 + $0x58] sm:$0xff] %vm300_vm1, %v1073_v62  ;;  %v1071_v29 = vmax.f32 %v1039_v0, 0.0  ;;  %v1044_v30 = vadd.f32 %v1774_v32, %v1005_v18  ;;  %v1003_v20 = vadd.f32 %v912_v59, %v648_v2  ;;  %v659_v31 = vadd.f32 %v1445_v28, %v1763_v24  ;;  %v915_v33 = vpop.f32.mrf.mxu0 }
 0x113   : > { %v650_v6 = vpop.f32.mrf.mxu1 }
 0x114   : > { %1103 = vst.msk [vmem:[%s1781_s4 + $0x48] sm:$0xff] %vm300_vm1, %v1071_v29  ;;  %v1076_v34 = vmax.f32 %v1044_v30, 0.0  ;;  %v1042_v35 = vadd.f32 %v1774_v32, %v1003_v20  ;;  %v1006_v22 = vadd.f32 %v1479_v4, %v659_v31  ;;  %v651_v36 = vadd.f32 %v650_v6, %v1767_v26  ;;  %v1482_v37 = vpop.f32.mrf.mxu0 }
 0x115   : > { %v1448_v8 = vpop.f32.mrf.mxu1 }
 0x116   : > { %1108 = vst.msk [vmem:[%s1781_s4 + $0x70] sm:$0xff] %vm300_vm1, %v1076_v34  ;;  %v1074_v38 = vmax.f32 %v1042_v35, 0.0  ;;  %v1045_v39 = vadd.f32 %v1774_v32, %v1006_v22  ;;  %v1004_v24 = vadd.f32 %v915_v33, %v651_v36  ;;  %v672_v40 = vadd.f32 %v1448_v8, %v1721_v61  ;;  %v928_v41 = vpop.f32.mrf.mxu0 }
 0x117   : > { %v663_v42 = vpop.f32.mrf.mxu1 }
 0x118   : > { %1106 = vst.msk [vmem:[%s1781_s4 + $0x60] sm:$0xff] %vm300_vm1, %v1074_v38  ;;  %v1077_v10 = vmax.f32 %v1045_v39, 0.0  ;;  %v1043_v43 = vadd.f32 %v1774_v32, %v1004_v24  ;;  %v1009_v26 = vadd.f32 %v1482_v37, %v672_v40  ;;  %v664_v44 = vadd.f32 %v663_v42, %v1723_v63  ;;  %v1483_v45 = vpop.f32.mrf.mxu0 }
 0x119   : > { %v1449_v46 = vpop.f32.mrf.mxu1 }
 0x11a   : > { %1109 = vst.msk [vmem:[%s1781_s4 + $0x78] sm:$0xff] %vm300_vm1, %v1077_v10  ;;  %v1075_v47 = vmax.f32 %v1043_v43, 0.0  ;;  %v1048_v12 = vadd.f32 %v1774_v32, %v1009_v26  ;;  %v1007_v61 = vadd.f32 %v928_v41, %v664_v44  ;;  %v675_v48 = vadd.f32 %v1449_v46, %v1725_v1  ;;  %v931_v49 = vpop.f32.mrf.mxu0 }
 0x11b   : > { %v666_v50 = vpop.f32.mrf.mxu1 }
 0x11c   : > { %1107 = vst.msk [vmem:[%s1781_s4 + $0x68] sm:$0xff] %vm300_vm1, %v1075_v47  ;;  %v1080_v51 = vmax.f32 %v1048_v12, 0.0  ;;  %v1046_v52 = vadd.f32 %v1774_v32, %v1007_v61  ;;  %v1010_v63 = vadd.f32 %v1483_v45, %v675_v48  ;;  %v667_v14 = vadd.f32 %v666_v50, %v1727_v3  ;;  %v1486_v53 = vpop.f32.mrf.mxu0 }
 0x11d   : > { %v1452_v54 = vpop.f32.mrf.mxu1 }
 0x11e   : > { %1112 = vst.msk [vmem:[%s1781_s4 + $0x90] sm:$0xff] %vm300_vm1, %v1080_v51  ;;  %v1078_v55 = vmax.f32 %v1046_v52, 0.0  ;;  %v1049_v56 = vadd.f32 %v1774_v32, %v1010_v63  ;;  %v1008_v1 = vadd.f32 %v931_v49, %v667_v14  ;;  %v688_v57 = vadd.f32 %v1452_v54, %v1729_v5  ;;  %v944_v16 = vpop.f32.mrf.mxu0 }
 0x11f   : > { %v679_v58 = vpop.f32.mrf.mxu1 }
 0x120   : > { %1110 = vst.msk [vmem:[%s1781_s4 + $0x80] sm:$0xff] %vm300_vm1, %v1078_v55  ;;  %v1081_v59 = vmax.f32 %v1049_v56, 0.0  ;;  %v1047_v60 = vadd.f32 %v1774_v32, %v1008_v1  ;;  %v1013_v3 = vadd.f32 %v1486_v53, %v688_v57  ;;  %v680_v62 = vadd.f32 %v679_v58, %v1731_v7  ;;  %v1487_v0 = vpop.f32.mrf.mxu0 }
 0x121   : > { %v1453_v18 = vpop.f32.mrf.mxu1 }
 0x122   : > { %1113 = vst.msk [vmem:[%s1781_s4 + $0x98] sm:$0xff] %vm300_vm1, %v1081_v59  ;;  %v1079_v2 = vmax.f32 %v1047_v60, 0.0  ;;  %v1052_v4 = vadd.f32 %v1774_v32, %v1013_v3  ;;  %v1011_v5 = vadd.f32 %v944_v16, %v680_v62  ;;  %v691_v28 = vadd.f32 %v1453_v18, %v1733_v9  ;;  %v947_v29 = vpop.f32.mrf.mxu0 }
 0x123   : > { %v682_v30 = vpop.f32.mrf.mxu1 }
 0x124   : > { %1111 = vst.msk [vmem:[%s1781_s4 + $0x88] sm:$0xff] %vm300_vm1, %v1079_v2  ;;  %v1084_v20 = vmax.f32 %v1052_v4, 0.0  ;;  %v1050_v31 = vadd.f32 %v1774_v32, %v1011_v5  ;;  %v1014_v7 = vadd.f32 %v1487_v0, %v691_v28  ;;  %v683_v33 = vadd.f32 %v682_v30, %v1737_v11  ;;  %v1490_v6 = vpop.f32.mrf.mxu0 }
 0x125   : > { %v1456_v34 = vpop.f32.mrf.mxu1 }
 0x126   : > { %1116 = vst.msk [vmem:[%s1781_s4 + $0xb0] sm:$0xff] %vm300_vm1, %v1084_v20  ;;  %v1082_v35 = vmax.f32 %v1050_v31, 0.0  ;;  %v1053_v22 = vadd.f32 %v1774_v32, %v1014_v7  ;;  %v1012_v9 = vadd.f32 %v947_v29, %v683_v33  ;;  %v704_v36 = vadd.f32 %v1456_v34, %v1741_v13  ;;  %v960_v37 = vpop.f32.mrf.mxu0 }
 0x127   : > { %v695_v8 = vpop.f32.mrf.mxu1 }
 0x128   : > { %1114 = vst.msk [vmem:[%s1781_s4 + $0xa0] sm:$0xff] %vm300_vm1, %v1082_v35  ;;  %v1085_v38 = vmax.f32 %v1053_v22, 0.0  ;;  %v1051_v39 = vadd.f32 %v1774_v32, %v1012_v9  ;;  %v1017_v11 = vadd.f32 %v1490_v6, %v704_v36  ;;  %v696_v24 = vadd.f32 %v695_v8, %v1745_v15  ;;  %v1491_v40 = vpop.f32.mrf.mxu0 }
 0x129   : > { %v1457_v41 = vpop.f32.mrf.mxu1 }
 0x12a   : > { %1117 = vst.msk [vmem:[%s1781_s4 + $0xb8] sm:$0xff] %vm300_vm1, %v1085_v38  ;;  %v1083_v42 = vmax.f32 %v1051_v39, 0.0  ;;  %v1056_v10 = vadd.f32 %v1774_v32, %v1017_v11  ;;  %v1015_v13 = vadd.f32 %v960_v37, %v696_v24  ;;  %v707_v43 = vadd.f32 %v1457_v41, %v1749_v17  ;;  %v963_v26 = vpop.f32.mrf.mxu0 }
 0x12b   : > { %v698_v44 = vpop.f32.mrf.mxu1 }
 0x12c   : > { %1115 = vst.msk [vmem:[%s1781_s4 + $0xa8] sm:$0xff] %vm300_vm1, %v1083_v42  ;;  %v1088_v45 = vmax.f32 %v1056_v10, 0.0  ;;  %v1054_v46 = vadd.f32 %v1774_v32, %v1015_v13  ;;  %v1018_v15 = vadd.f32 %v1491_v40, %v707_v43  ;;  %v699_v47 = vadd.f32 %v698_v44, %v1753_v19  ;;  %v1494_v12 = vpop.f32.mrf.mxu0 }
 0x12d   : > { %v1460_v61 = vpop.f32.mrf.mxu1 }
 0x12e   : > { %1120 = vst.msk [vmem:[%s1781_s4 + $0xd0] sm:$0xff] %vm300_vm1, %v1088_v45  ;;  %v1086_v48 = vmax.f32 %v1054_v46, 0.0  ;;  %v1057_v49 = vadd.f32 %v1774_v32, %v1018_v15  ;;  %v1016_v17 = vadd.f32 %v963_v26, %v699_v47  ;;  %v720_v50 = vadd.f32 %v1460_v61, %v1757_v21  ;;  %v976_v51 = vpop.f32.mrf.mxu0 }
 0x12f   : > { %v711_v52 = vpop.f32.mrf.mxu1 }
 0x130   : > { %1118 = vst.msk [vmem:[%s1781_s4 + $0xc0] sm:$0xff] %vm300_vm1, %v1086_v48  ;;  %v1089_v63 = vmax.f32 %v1057_v49, 0.0  ;;  %v1055_v14 = vadd.f32 %v1774_v32, %v1016_v17  ;;  %v1021_v19 = vadd.f32 %v1494_v12, %v720_v50  ;;  %v712_v53 = vadd.f32 %v711_v52, %v1761_v23  ;;  %v1495_v55 = vpop.f32.mrf.mxu0 }
 0x131   : > { %v1461_v54 = vpop.f32.mrf.mxu1 }
 0x132   : > { %1121 = vst.msk [vmem:[%s1781_s4 + $0xd8] sm:$0xff] %vm300_vm1, %v1089_v63  ;;  %v1087_v56 = vmax.f32 %v1055_v14, 0.0  ;;  %v1060_v21 = vadd.f32 %v1774_v32, %v1021_v19  ;;  %v1019_v1 = vadd.f32 %v976_v51, %v712_v53  ;;  %v723_v57 = vadd.f32 %v1461_v54, %v1765_v25  ;;  %v979_v3 = vpop.f32.mrf.mxu0 }
 0x133   : > { %v714_v16 = vpop.f32.mrf.mxu1 }
 0x134   : > { %1119 = vst.msk [vmem:[%s1781_s4 + $0xc8] sm:$0xff] %vm300_vm1, %v1087_v56  ;;  %v1092_v58 = vmax.f32 %v1060_v21, 0.0  ;;  %v1058_v59 = vadd.f32 %v1774_v32, %v1019_v1  ;;  %v1022_v23 = vadd.f32 %v1495_v55, %v723_v57  ;;  %v715_v60 = vadd.f32 %v714_v16, %v1769_v27 }
 0x136   : > { %1124 = vst.msk [vmem:[%s1781_s4 + $0xf0] sm:$0xff] %vm300_vm1, %v1092_v58  ;;  %v1090_v62 = vmax.f32 %v1058_v59, 0.0  ;;  %v1061_v0 = vadd.f32 %v1774_v32, %v1022_v23  ;;  %v1020_v18 = vadd.f32 %v979_v3, %v715_v60 }
 0x138   : > { %1122 = vst.msk [vmem:[%s1781_s4 + $0xe0] sm:$0xff] %vm300_vm1, %v1090_v62  ;;  %v1093_v25 = vmax.f32 %v1061_v0, 0.0  ;;  %v1059_v2 = vadd.f32 %v1774_v32, %v1020_v18 }
 0x13a   : > { %1125 = vst.msk [vmem:[%s1781_s4 + $0xf8] sm:$0xff] %vm300_vm1, %v1093_v25  ;;  %v1091_v4 = vmax.f32 %v1059_v2, 0.0 }
 0x13c   : > { %1123 = vst.msk [vmem:[%s1781_s4 + $0xe8] sm:$0xff] %vm300_vm1, %v1091_v4 }
 0x13d PF: > { %s13_s14 = sadd.s32 1, %s1549_s14   ;;  %s1916_s12 = smov %s1545_s13 }
 0x13e   : > { %p10_p5 = scmp.ge.s32.totalorder %s13_s14, 4   ;;  %s1917_s13 = smov %s1919_s15 }
 0x140   :  { %12 = sbr.rel (!%p10_p5) target bundleno = 2 (0x2), region = 67 }

</bundles_post_ra>
